<compile_context>
chip_gen: v7x
topology: tpu7x:2x2x1
jax: 0.10.0
libtpu: 0.0.40
codegen_flags: <defaults>
</compile_context>

<pallas_src>
import functools
import math

import jax
import jax.numpy as jnp
from jax import lax
from jax.experimental import pallas as pl
from jax.experimental.pallas import tpu as pltpu

# -----------------------------------------------------------------------------
# Model hyper-parameters (LayerNorm(512) in the reference fixes d_model = 512).
# -----------------------------------------------------------------------------
D_MODEL = 512
N_HEADS = 8
D_HEAD = D_MODEL // N_HEADS
D_FF = 1024
NUM_LAYERS = 2
LN_EPS = 1e-5
ATTN_SCALE = 1.0 / math.sqrt(D_HEAD)


# -----------------------------------------------------------------------------
# In-kernel helpers (pure value math, f32)
# -----------------------------------------------------------------------------
def _layernorm(x, g, b):
    """LayerNorm over the last axis.  x:(M,C) f32, g/b:(1,C) f32."""
    mean = jnp.mean(x, axis=-1, keepdims=True)
    xc = x - mean
    var = jnp.mean(xc * xc, axis=-1, keepdims=True)
    return xc * lax.rsqrt(var + LN_EPS) * g + b


# -----------------------------------------------------------------------------
# Fused encoder-layer kernel: one grid step = one stream (a or v)
# -----------------------------------------------------------------------------
def _encoder_layer_kernel(q_src_ref, kv_src_ref,
                          wq_ref, bq_ref, wkv_ref, bkv_ref,
                          wo_ref, bo_ref,
                          ln1_g_ref, ln1_b_ref,
                          w1_ref, b1_ref, w2_ref, b2_ref,
                          ln2_g_ref, ln2_b_ref,
                          out_ref,
                          attn_scratch,
                          *, batch, seq):
    xq = q_src_ref[0].astype(jnp.float32)     # (M, C) — queries come from this stream
    xkv = kv_src_ref[0].astype(jnp.float32)   # (M, C) — keys/values from the other stream
    xq_bf = xq.astype(jnp.bfloat16)
    xkv_bf = xkv.astype(jnp.bfloat16)

    # --- projections on the MXU (bf16 operands, f32 accumulation) ---
    q = jnp.dot(xq_bf, wq_ref[...], preferred_element_type=jnp.float32) + bq_ref[...]
    kv = jnp.dot(xkv_bf, wkv_ref[...], preferred_element_type=jnp.float32) + bkv_ref[...]
    k = kv[:, :D_MODEL]
    v = kv[:, D_MODEL:]

    # --- per-(batch, head) scaled dot-product attention, all in VMEM ---
    for bi in range(batch):
        r0 = bi * seq
        qb = q[r0:r0 + seq, :] * ATTN_SCALE     # (T, C)
        kb = k[r0:r0 + seq, :]
        vb = v[r0:r0 + seq, :]
        for h in range(N_HEADS):
            c0 = h * D_HEAD
            qh = qb[:, c0:c0 + D_HEAD]          # (T, Dh)
            kh = kb[:, c0:c0 + D_HEAD]
            vh = vb[:, c0:c0 + D_HEAD]
            # QK^T via dot_general contracting last dims (no explicit transpose).
            s = lax.dot_general(qh, kh, (((1,), (1,)), ((), ())),
                                preferred_element_type=jnp.float32)     # (T, T)
            m = jnp.max(s, axis=-1, keepdims=True)
            p = jnp.exp(s - m)
            p = p * pl.reciprocal(jnp.sum(p, axis=-1, keepdims=True), approx=True)
            oh = jnp.dot(p, vh, preferred_element_type=jnp.float32)     # (T, Dh)
            attn_scratch[pl.ds(r0, seq), pl.ds(c0, D_HEAD)] = oh

    # --- output projection + residual + LN1 (post-norm) ---
    attn = attn_scratch[...]                                            # (M, C) f32
    o = jnp.dot(attn.astype(jnp.bfloat16), wo_ref[...],
                preferred_element_type=jnp.float32) + bo_ref[...]
    x1 = _layernorm(o + xq, ln1_g_ref[...], ln1_b_ref[...])

    # --- FFN (ReLU) + residual + LN2 (post-norm) ---
    h1 = jnp.dot(x1.astype(jnp.bfloat16), w1_ref[...],
                 preferred_element_type=jnp.float32) + b1_ref[...]
    h1 = jnp.maximum(h1, 0.0)
    y = jnp.dot(h1.astype(jnp.bfloat16), w2_ref[...],
                preferred_element_type=jnp.float32) + b2_ref[...]
    x2 = _layernorm(y + x1, ln2_g_ref[...], ln2_b_ref[...])

    out_ref[0] = x2.astype(out_ref.dtype)


def encoder_layer_pair(src_a, src_v, p):
    """Runs the cross-applied encoder layer on both streams in ONE pallas_call.

    Grid step 0: layer(q=src_a, kv=src_v)   Grid step 1: layer(q=src_v, kv=src_a).
    The two steps are independent -> "parallel" (v7x shards them across its 2 TCs).
    """
    B, T, C = src_a.shape
    M = B * T
    src = jnp.stack([src_a.reshape(M, C), src_v.reshape(M, C)])     # (2, M, C)

    kernel = functools.partial(_encoder_layer_kernel, batch=B, seq=T)
    wspec = lambda: pl.BlockSpec(None, None)  # placeholder (unused), kept for clarity

    def full(shape):
        return pl.BlockSpec(shape, lambda s: (0,) * len(shape))

    out = pl.pallas_call(
        kernel,
        out_shape=jax.ShapeDtypeStruct((2, M, C), src_a.dtype),
        grid=(2,),
        in_specs=[
            pl.BlockSpec((1, M, C), lambda s: (s, 0, 0)),          # q source (own stream)
            pl.BlockSpec((1, M, C), lambda s: (1 - s, 0, 0)),      # kv source (other stream)
            full((C, C)), full((1, C)),                            # wq, bq
            full((C, 2 * C)), full((1, 2 * C)),                    # wkv, bkv (K|V fused)
            full((C, C)), full((1, C)),                            # wo, bo
            full((1, C)), full((1, C)),                            # ln1 gamma, beta
            full((C, D_FF)), full((1, D_FF)),                      # w1, b1
            full((D_FF, C)), full((1, C)),                         # w2, b2
            full((1, C)), full((1, C)),                            # ln2 gamma, beta
        ],
        out_specs=pl.BlockSpec((1, M, C), lambda s: (s, 0, 0)),
        scratch_shapes=[pltpu.VMEM((M, C), jnp.float32)],          # attention output slab
        compiler_params=pltpu.CompilerParams(
            dimension_semantics=("parallel",)),
    )(src, src,
      p["wq"], p["bq"], p["wkv"], p["bkv"],
      p["wo"], p["bo"],
      p["ln1_g"], p["ln1_b"],
      p["w1"], p["b1"], p["w2"], p["b2"],
      p["ln2_g"], p["ln2_b"])

    return out[0].reshape(B, T, C), out[1].reshape(B, T, C)


# -----------------------------------------------------------------------------
# Final pure LayerNorm (no residual, no zeros tensor) — both streams in one call
# -----------------------------------------------------------------------------
def _final_ln_kernel(x_ref, g_ref, b_ref, o_ref):
    x = x_ref[0].astype(jnp.float32)                               # (M, C)
    o_ref[0] = _layernorm(x, g_ref[0], b_ref[0]).astype(o_ref.dtype)


def final_layernorm_pair(out_a, out_v, norm_g, norm_b):
    """norm_g/norm_b: (2, 1, C) — row 0 = norm1 (audio), row 1 = norm2 (video)."""
    B, T, C = out_a.shape
    M = B * T
    x = jnp.stack([out_a.reshape(M, C), out_v.reshape(M, C)])      # (2, M, C)
    y = pl.pallas_call(
        _final_ln_kernel,
        out_shape=jax.ShapeDtypeStruct((2, M, C), out_a.dtype),
        grid=(2,),
        in_specs=[
            pl.BlockSpec((1, M, C), lambda s: (s, 0, 0)),
            pl.BlockSpec((1, 1, C), lambda s: (s, 0, 0)),
            pl.BlockSpec((1, 1, C), lambda s: (s, 0, 0)),
        ],
        out_specs=pl.BlockSpec((1, M, C), lambda s: (s, 0, 0)),
        compiler_params=pltpu.CompilerParams(
            dimension_semantics=("parallel",)),
    )(x, norm_g, norm_b)
    return y[0].reshape(B, T, C), y[1].reshape(B, T, C)


# -----------------------------------------------------------------------------
# Full Encoder forward
# -----------------------------------------------------------------------------
def encoder_forward(src_a, src_v, layer_params, norm_g, norm_b, use_norm=True):
    """Faithful to the reference loop: every layer re-reads the ORIGINAL src_a/src_v."""
    output_a, output_v = src_a, src_v
    for p in layer_params:
        output_a, output_v = encoder_layer_pair(src_a, src_v, p)
    if use_norm:
        output_a, output_v = final_layernorm_pair(output_a, output_v, norm_g, norm_b)
    return output_a, output_v


# -----------------------------------------------------------------------------
# Deterministic parameter init (all layers identical, mirroring deepcopy clones).
# Matmul weights are stored pre-transposed (in_dim, out_dim) and in bf16 for the MXU;
# biases / LN params stay f32 and are pre-shaped to (1, N) once (not per call).
# -----------------------------------------------------------------------------
def init_layer_params(key):
    ks = jax.random.split(key, 6)
    std = 0.02

    def w(k, shape):
        return (jax.random.normal(k, shape, jnp.float32) * std).astype(jnp.bfloat16)

    return {
        "wq": w(ks[0], (D_MODEL, D_MODEL)),
        "bq": jnp.zeros((1, D_MODEL), jnp.float32),
        "wkv": jnp.concatenate(
            [w(ks[1], (D_MODEL, D_MODEL)), w(ks[2], (D_MODEL, D_MODEL))], axis=1),
        "bkv": jnp.zeros((1, 2 * D_MODEL), jnp.float32),
        "wo": w(ks[3], (D_MODEL, D_MODEL)),
        "bo": jnp.zeros((1, D_MODEL), jnp.float32),
        "w1": w(ks[4], (D_MODEL, D_FF)),
        "b1": jnp.zeros((1, D_FF), jnp.float32),
        "w2": w(ks[5], (D_FF, D_MODEL)),
        "b2": jnp.zeros((1, D_MODEL), jnp.float32),
        "ln1_g": jnp.ones((1, D_MODEL), jnp.float32),
        "ln1_b": jnp.zeros((1, D_MODEL), jnp.float32),
        "ln2_g": jnp.ones((1, D_MODEL), jnp.float32),
        "ln2_b": jnp.zeros((1, D_MODEL), jnp.float32),
    }


if __name__ == "__main__":
    key = jax.random.PRNGKey(0)
    k_a, k_v, k_p = jax.random.split(key, 3)

    B, T, C = 2, 8, D_MODEL  # small batch/seq; C fixed at 512 by LayerNorm(512)
    src_a = jax.random.normal(k_a, (B, T, C), jnp.float32)
    src_v = jax.random.normal(k_v, (B, T, C), jnp.float32)

    # _get_clones uses deepcopy -> all layers share the same initial weights.
    shared = init_layer_params(k_p)
    layer_params = [shared for _ in range(NUM_LAYERS)]
    # Final norm1 / norm2 params stacked: row 0 -> norm1 (audio), row 1 -> norm2 (video).
    norm_g = jnp.ones((2, 1, C), jnp.float32)
    norm_b = jnp.zeros((2, 1, C), jnp.float32)

    fwd = jax.jit(functools.partial(encoder_forward, use_norm=True))
    out_a, out_v = fwd(src_a, src_v, layer_params, norm_g, norm_b)
    jax.block_until_ready((out_a, out_v))

    assert out_a.shape == (B, T, C) and out_v.shape == (B, T, C)
    assert bool(jnp.all(jnp.isfinite(out_a))) and bool(jnp.all(jnp.isfinite(out_v)))
    print("KERNEL_OK")
</pallas_src>

<mosaic_0001>
module attributes {stable_mosaic.version = 11 : i64} {
  func.func @_encoder_layer_kernel(%arg0: i32, %arg1: memref<1x16x512xf32, #tpu.memory_space<vmem>>, %arg2: memref<1x16x512xf32, #tpu.memory_space<vmem>>, %arg3: memref<512x512xbf16, #tpu.memory_space<vmem>>, %arg4: memref<1x512xf32, #tpu.memory_space<vmem>>, %arg5: memref<512x1024xbf16, #tpu.memory_space<vmem>>, %arg6: memref<1x1024xf32, #tpu.memory_space<vmem>>, %arg7: memref<512x512xbf16, #tpu.memory_space<vmem>>, %arg8: memref<1x512xf32, #tpu.memory_space<vmem>>, %arg9: memref<1x512xf32, #tpu.memory_space<vmem>>, %arg10: memref<1x512xf32, #tpu.memory_space<vmem>>, %arg11: memref<512x1024xbf16, #tpu.memory_space<vmem>>, %arg12: memref<1x1024xf32, #tpu.memory_space<vmem>>, %arg13: memref<1024x512xbf16, #tpu.memory_space<vmem>>, %arg14: memref<1x512xf32, #tpu.memory_space<vmem>>, %arg15: memref<1x512xf32, #tpu.memory_space<vmem>>, %arg16: memref<1x512xf32, #tpu.memory_space<vmem>>, %arg17: memref<1x16x512xf32, #tpu.memory_space<vmem>>, %arg18: memref<16x512xf32, #tpu.memory_space<vmem>>) attributes {dimension_semantics = [#tpu.dimension_semantics<parallel>], iteration_bounds = array<i64: 2>, scalar_prefetch = 0 : i64, scratch_operands = 1 : i64, tpu.core_type = #tpu.core_type<tc>, window_params = [{transform_indices = @transform_0, window_bounds = array<i64: 1, 16, 512>}, {transform_indices = @transform_1, window_bounds = array<i64: 1, 16, 512>}, {pipeline_mode = #tpu.pipeline_mode<synchronous>, transform_indices = @transform_2, window_bounds = array<i64: 512, 512>}, {pipeline_mode = #tpu.pipeline_mode<synchronous>, transform_indices = @transform_3, window_bounds = array<i64: 1, 512>}, {pipeline_mode = #tpu.pipeline_mode<synchronous>, transform_indices = @transform_4, window_bounds = array<i64: 512, 1024>}, {pipeline_mode = #tpu.pipeline_mode<synchronous>, transform_indices = @transform_5, window_bounds = array<i64: 1, 1024>}, {pipeline_mode = #tpu.pipeline_mode<synchronous>, transform_indices = @transform_6, window_bounds = array<i64: 512, 512>}, {pipeline_mode = #tpu.pipeline_mode<synchronous>, transform_indices = @transform_7, window_bounds = array<i64: 1, 512>}, {pipeline_mode = #tpu.pipeline_mode<synchronous>, transform_indices = @transform_8, window_bounds = array<i64: 1, 512>}, {pipeline_mode = #tpu.pipeline_mode<synchronous>, transform_indices = @transform_9, window_bounds = array<i64: 1, 512>}, {pipeline_mode = #tpu.pipeline_mode<synchronous>, transform_indices = @transform_10, window_bounds = array<i64: 512, 1024>}, {pipeline_mode = #tpu.pipeline_mode<synchronous>, transform_indices = @transform_11, window_bounds = array<i64: 1, 1024>}, {pipeline_mode = #tpu.pipeline_mode<synchronous>, transform_indices = @transform_12, window_bounds = array<i64: 1024, 512>}, {pipeline_mode = #tpu.pipeline_mode<synchronous>, transform_indices = @transform_13, window_bounds = array<i64: 1, 512>}, {pipeline_mode = #tpu.pipeline_mode<synchronous>, transform_indices = @transform_14, window_bounds = array<i64: 1, 512>}, {pipeline_mode = #tpu.pipeline_mode<synchronous>, transform_indices = @transform_15, window_bounds = array<i64: 1, 512>}, {transform_indices = @transform_16, window_bounds = array<i64: 1, 16, 512>}]} {
    %c0 = arith.constant 0 : index
    %c0_0 = arith.constant 0 : index
    %c0_1 = arith.constant 0 : index
    %0 = vector.load %arg1[%c0, %c0_0, %c0_1] : memref<1x16x512xf32, #tpu.memory_space<vmem>>, vector<1x16x512xf32>
    %1 = vector.shape_cast %0 : vector<1x16x512xf32> to vector<16x512xf32>
    %c0_2 = arith.constant 0 : index
    %c0_3 = arith.constant 0 : index
    %c0_4 = arith.constant 0 : index
    %2 = vector.load %arg2[%c0_2, %c0_3, %c0_4] : memref<1x16x512xf32, #tpu.memory_space<vmem>>, vector<1x16x512xf32>
    %3 = vector.shape_cast %2 : vector<1x16x512xf32> to vector<16x512xf32>
    %4 = arith.truncf %1 : vector<16x512xf32> to vector<16x512xbf16>
    %5 = arith.truncf %3 : vector<16x512xf32> to vector<16x512xbf16>
    %c0_5 = arith.constant 0 : index
    %c0_6 = arith.constant 0 : index
    %6 = vector.load %arg3[%c0_5, %c0_6] : memref<512x512xbf16, #tpu.memory_space<vmem>>, vector<512x512xbf16>
    %cst = arith.constant dense<0.000000e+00> : vector<16x512xf32>
    %7 = tpu.matmul %4, %6, %cst {dimension_numbers = #tpu.dot_dimension_numbers<[1], [0], [0], [1], [0, 0, 1, 1], [], []>} : vector<16x512xbf16>, vector<512x512xbf16>, vector<16x512xf32> -> vector<16x512xf32>
    %c0_7 = arith.constant 0 : index
    %c0_8 = arith.constant 0 : index
    %8 = vector.load %arg4[%c0_7, %c0_8] : memref<1x512xf32, #tpu.memory_space<vmem>>, vector<1x512xf32>
    %9 = vector.broadcast %8 : vector<1x512xf32> to vector<16x512xf32>
    %10 = arith.addf %7, %9 : vector<16x512xf32>
    %c0_9 = arith.constant 0 : index
    %c0_10 = arith.constant 0 : index
    %11 = vector.load %arg5[%c0_9, %c0_10] : memref<512x1024xbf16, #tpu.memory_space<vmem>>, vector<512x1024xbf16>
    %cst_11 = arith.constant dense<0.000000e+00> : vector<16x1024xf32>
    %12 = tpu.matmul %5, %11, %cst_11 {dimension_numbers = #tpu.dot_dimension_numbers<[1], [0], [0], [1], [0, 0, 1, 1], [], []>} : vector<16x512xbf16>, vector<512x1024xbf16>, vector<16x1024xf32> -> vector<16x1024xf32>
    %c0_12 = arith.constant 0 : index
    %c0_13 = arith.constant 0 : index
    %13 = vector.load %arg6[%c0_12, %c0_13] : memref<1x1024xf32, #tpu.memory_space<vmem>>, vector<1x1024xf32>
    %14 = vector.broadcast %13 : vector<1x1024xf32> to vector<16x1024xf32>
    %15 = arith.addf %12, %14 : vector<16x1024xf32>
    %16 = vector.extract_strided_slice %15 {offsets = [0, 0], sizes = [16, 512], strides = [1, 1]} : vector<16x1024xf32> to vector<16x512xf32>
    %17 = vector.extract_strided_slice %15 {offsets = [0, 512], sizes = [16, 512], strides = [1, 1]} : vector<16x1024xf32> to vector<16x512xf32>
    %18 = vector.extract_strided_slice %10 {offsets = [0, 0], sizes = [8, 512], strides = [1, 1]} : vector<16x512xf32> to vector<8x512xf32>
    %cst_14 = arith.constant 1.250000e-01 : f32
    %19 = vector.broadcast %cst_14 : f32 to vector<8x512xf32>
    %20 = arith.mulf %18, %19 : vector<8x512xf32>
    %21 = vector.extract_strided_slice %16 {offsets = [0, 0], sizes = [8, 512], strides = [1, 1]} : vector<16x512xf32> to vector<8x512xf32>
    %22 = vector.extract_strided_slice %17 {offsets = [0, 0], sizes = [8, 512], strides = [1, 1]} : vector<16x512xf32> to vector<8x512xf32>
    %23 = vector.extract_strided_slice %20 {offsets = [0, 0], sizes = [8, 64], strides = [1, 1]} : vector<8x512xf32> to vector<8x64xf32>
    %24 = vector.extract_strided_slice %21 {offsets = [0, 0], sizes = [8, 64], strides = [1, 1]} : vector<8x512xf32> to vector<8x64xf32>
    %25 = vector.extract_strided_slice %22 {offsets = [0, 0], sizes = [8, 64], strides = [1, 1]} : vector<8x512xf32> to vector<8x64xf32>
    %cst_15 = arith.constant dense<0.000000e+00> : vector<8x8xf32>
    %26 = tpu.matmul %23, %24, %cst_15 {dimension_numbers = #tpu.dot_dimension_numbers<[1], [1], [0], [0], [0, 0, 1, 0], [], []>} : vector<8x64xf32>, vector<8x64xf32>, vector<8x8xf32> -> vector<8x8xf32>
    %cst_16 = arith.constant dense<0xFF800000> : vector<8xf32>
    %27 = vector.multi_reduction <maximumf>, %26, %cst_16 [1] : vector<8x8xf32> to vector<8xf32>
    %28 = vector.shape_cast %27 : vector<8xf32> to vector<8x1xf32>
    %29 = vector.broadcast %28 : vector<8x1xf32> to vector<8x8xf32>
    %30 = arith.subf %26, %29 : vector<8x8xf32>
    %31 = math.exp %30 : vector<8x8xf32>
    %cst_17 = arith.constant dense<0.000000e+00> : vector<8xf32>
    %32 = vector.multi_reduction <add>, %31, %cst_17 [1] : vector<8x8xf32> to vector<8xf32>
    %33 = vector.shape_cast %32 : vector<8xf32> to vector<8x1xf32>
    %34 = tpu.reciprocal %33 {approx = true} : vector<8x1xf32> -> vector<8x1xf32>
    %35 = vector.broadcast %34 : vector<8x1xf32> to vector<8x8xf32>
    %36 = arith.mulf %31, %35 : vector<8x8xf32>
    %cst_18 = arith.constant dense<0.000000e+00> : vector<8x64xf32>
    %37 = tpu.matmul %36, %25, %cst_18 {dimension_numbers = #tpu.dot_dimension_numbers<[1], [0], [0], [1], [0, 0, 1, 1], [], []>} : vector<8x8xf32>, vector<8x64xf32>, vector<8x64xf32> -> vector<8x64xf32>
    %c0_19 = arith.constant 0 : index
    %c0_20 = arith.constant 0 : index
    %38 = vector.load %arg18[%c0_19, %c0_20] : memref<16x512xf32, #tpu.memory_space<vmem>>, vector<8x64xf32>
    tpu.vector_store %arg18[%c0_19, %c0_20], %37 {strides = array<i32>} : memref<16x512xf32, #tpu.memory_space<vmem>>, vector<8x64xf32>,
    %39 = vector.extract_strided_slice %20 {offsets = [0, 64], sizes = [8, 64], strides = [1, 1]} : vector<8x512xf32> to vector<8x64xf32>
    %40 = vector.extract_strided_slice %21 {offsets = [0, 64], sizes = [8, 64], strides = [1, 1]} : vector<8x512xf32> to vector<8x64xf32>
    %41 = vector.extract_strided_slice %22 {offsets = [0, 64], sizes = [8, 64], strides = [1, 1]} : vector<8x512xf32> to vector<8x64xf32>
    %cst_21 = arith.constant dense<0.000000e+00> : vector<8x8xf32>
    %42 = tpu.matmul %39, %40, %cst_21 {dimension_numbers = #tpu.dot_dimension_numbers<[1], [1], [0], [0], [0, 0, 1, 0], [], []>} : vector<8x64xf32>, vector<8x64xf32>, vector<8x8xf32> -> vector<8x8xf32>
    %cst_22 = arith.constant dense<0xFF800000> : vector<8xf32>
    %43 = vector.multi_reduction <maximumf>, %42, %cst_22 [1] : vector<8x8xf32> to vector<8xf32>
    %44 = vector.shape_cast %43 : vector<8xf32> to vector<8x1xf32>
    %45 = vector.broadcast %44 : vector<8x1xf32> to vector<8x8xf32>
    %46 = arith.subf %42, %45 : vector<8x8xf32>
    %47 = math.exp %46 : vector<8x8xf32>
    %cst_23 = arith.constant dense<0.000000e+00> : vector<8xf32>
    %48 = vector.multi_reduction <add>, %47, %cst_23 [1] : vector<8x8xf32> to vector<8xf32>
    %49 = vector.shape_cast %48 : vector<8xf32> to vector<8x1xf32>
    %50 = tpu.reciprocal %49 {approx = true} : vector<8x1xf32> -> vector<8x1xf32>
    %51 = vector.broadcast %50 : vector<8x1xf32> to vector<8x8xf32>
    %52 = arith.mulf %47, %51 : vector<8x8xf32>
    %cst_24 = arith.constant dense<0.000000e+00> : vector<8x64xf32>
    %53 = tpu.matmul %52, %41, %cst_24 {dimension_numbers = #tpu.dot_dimension_numbers<[1], [0], [0], [1], [0, 0, 1, 1], [], []>} : vector<8x8xf32>, vector<8x64xf32>, vector<8x64xf32> -> vector<8x64xf32>
    %c0_25 = arith.constant 0 : index
    %c64 = arith.constant 64 : index
    %54 = vector.load %arg18[%c0_25, %c64] : memref<16x512xf32, #tpu.memory_space<vmem>>, vector<8x64xf32>
    tpu.vector_store %arg18[%c0_25, %c64], %53 {strides = array<i32>} : memref<16x512xf32, #tpu.memory_space<vmem>>, vector<8x64xf32>,
    %55 = vector.extract_strided_slice %20 {offsets = [0, 128], sizes = [8, 64], strides = [1, 1]} : vector<8x512xf32> to vector<8x64xf32>
    %56 = vector.extract_strided_slice %21 {offsets = [0, 128], sizes = [8, 64], strides = [1, 1]} : vector<8x512xf32> to vector<8x64xf32>
    %57 = vector.extract_strided_slice %22 {offsets = [0, 128], sizes = [8, 64], strides = [1, 1]} : vector<8x512xf32> to vector<8x64xf32>
    %cst_26 = arith.constant dense<0.000000e+00> : vector<8x8xf32>
    %58 = tpu.matmul %55, %56, %cst_26 {dimension_numbers = #tpu.dot_dimension_numbers<[1], [1], [0], [0], [0, 0, 1, 0], [], []>} : vector<8x64xf32>, vector<8x64xf32>, vector<8x8xf32> -> vector<8x8xf32>
    %cst_27 = arith.constant dense<0xFF800000> : vector<8xf32>
    %59 = vector.multi_reduction <maximumf>, %58, %cst_27 [1] : vector<8x8xf32> to vector<8xf32>
    %60 = vector.shape_cast %59 : vector<8xf32> to vector<8x1xf32>
    %61 = vector.broadcast %60 : vector<8x1xf32> to vector<8x8xf32>
    %62 = arith.subf %58, %61 : vector<8x8xf32>
    %63 = math.exp %62 : vector<8x8xf32>
    %cst_28 = arith.constant dense<0.000000e+00> : vector<8xf32>
    %64 = vector.multi_reduction <add>, %63, %cst_28 [1] : vector<8x8xf32> to vector<8xf32>
    %65 = vector.shape_cast %64 : vector<8xf32> to vector<8x1xf32>
    %66 = tpu.reciprocal %65 {approx = true} : vector<8x1xf32> -> vector<8x1xf32>
    %67 = vector.broadcast %66 : vector<8x1xf32> to vector<8x8xf32>
    %68 = arith.mulf %63, %67 : vector<8x8xf32>
    %cst_29 = arith.constant dense<0.000000e+00> : vector<8x64xf32>
    %69 = tpu.matmul %68, %57, %cst_29 {dimension_numbers = #tpu.dot_dimension_numbers<[1], [0], [0], [1], [0, 0, 1, 1], [], []>} : vector<8x8xf32>, vector<8x64xf32>, vector<8x64xf32> -> vector<8x64xf32>
    %c0_30 = arith.constant 0 : index
    %c128 = arith.constant 128 : index
    %70 = vector.load %arg18[%c0_30, %c128] : memref<16x512xf32, #tpu.memory_space<vmem>>, vector<8x64xf32>
    tpu.vector_store %arg18[%c0_30, %c128], %69 {strides = array<i32>} : memref<16x512xf32, #tpu.memory_space<vmem>>, vector<8x64xf32>,
    %71 = vector.extract_strided_slice %20 {offsets = [0, 192], sizes = [8, 64], strides = [1, 1]} : vector<8x512xf32> to vector<8x64xf32>
    %72 = vector.extract_strided_slice %21 {offsets = [0, 192], sizes = [8, 64], strides = [1, 1]} : vector<8x512xf32> to vector<8x64xf32>
    %73 = vector.extract_strided_slice %22 {offsets = [0, 192], sizes = [8, 64], strides = [1, 1]} : vector<8x512xf32> to vector<8x64xf32>
    %cst_31 = arith.constant dense<0.000000e+00> : vector<8x8xf32>
    %74 = tpu.matmul %71, %72, %cst_31 {dimension_numbers = #tpu.dot_dimension_numbers<[1], [1], [0], [0], [0, 0, 1, 0], [], []>} : vector<8x64xf32>, vector<8x64xf32>, vector<8x8xf32> -> vector<8x8xf32>
    %cst_32 = arith.constant dense<0xFF800000> : vector<8xf32>
    %75 = vector.multi_reduction <maximumf>, %74, %cst_32 [1] : vector<8x8xf32> to vector<8xf32>
    %76 = vector.shape_cast %75 : vector<8xf32> to vector<8x1xf32>
    %77 = vector.broadcast %76 : vector<8x1xf32> to vector<8x8xf32>
    %78 = arith.subf %74, %77 : vector<8x8xf32>
    %79 = math.exp %78 : vector<8x8xf32>
    %cst_33 = arith.constant dense<0.000000e+00> : vector<8xf32>
    %80 = vector.multi_reduction <add>, %79, %cst_33 [1] : vector<8x8xf32> to vector<8xf32>
    %81 = vector.shape_cast %80 : vector<8xf32> to vector<8x1xf32>
    %82 = tpu.reciprocal %81 {approx = true} : vector<8x1xf32> -> vector<8x1xf32>
    %83 = vector.broadcast %82 : vector<8x1xf32> to vector<8x8xf32>
    %84 = arith.mulf %79, %83 : vector<8x8xf32>
    %cst_34 = arith.constant dense<0.000000e+00> : vector<8x64xf32>
    %85 = tpu.matmul %84, %73, %cst_34 {dimension_numbers = #tpu.dot_dimension_numbers<[1], [0], [0], [1], [0, 0, 1, 1], [], []>} : vector<8x8xf32>, vector<8x64xf32>, vector<8x64xf32> -> vector<8x64xf32>
    %c0_35 = arith.constant 0 : index
    %c192 = arith.constant 192 : index
    %86 = vector.load %arg18[%c0_35, %c192] : memref<16x512xf32, #tpu.memory_space<vmem>>, vector<8x64xf32>
    tpu.vector_store %arg18[%c0_35, %c192], %85 {strides = array<i32>} : memref<16x512xf32, #tpu.memory_space<vmem>>, vector<8x64xf32>,
    %87 = vector.extract_strided_slice %20 {offsets = [0, 256], sizes = [8, 64], strides = [1, 1]} : vector<8x512xf32> to vector<8x64xf32>
    %88 = vector.extract_strided_slice %21 {offsets = [0, 256], sizes = [8, 64], strides = [1, 1]} : vector<8x512xf32> to vector<8x64xf32>
    %89 = vector.extract_strided_slice %22 {offsets = [0, 256], sizes = [8, 64], strides = [1, 1]} : vector<8x512xf32> to vector<8x64xf32>
    %cst_36 = arith.constant dense<0.000000e+00> : vector<8x8xf32>
    %90 = tpu.matmul %87, %88, %cst_36 {dimension_numbers = #tpu.dot_dimension_numbers<[1], [1], [0], [0], [0, 0, 1, 0], [], []>} : vector<8x64xf32>, vector<8x64xf32>, vector<8x8xf32> -> vector<8x8xf32>
    %cst_37 = arith.constant dense<0xFF800000> : vector<8xf32>
    %91 = vector.multi_reduction <maximumf>, %90, %cst_37 [1] : vector<8x8xf32> to vector<8xf32>
    %92 = vector.shape_cast %91 : vector<8xf32> to vector<8x1xf32>
    %93 = vector.broadcast %92 : vector<8x1xf32> to vector<8x8xf32>
    %94 = arith.subf %90, %93 : vector<8x8xf32>
    %95 = math.exp %94 : vector<8x8xf32>
    %cst_38 = arith.constant dense<0.000000e+00> : vector<8xf32>
    %96 = vector.multi_reduction <add>, %95, %cst_38 [1] : vector<8x8xf32> to vector<8xf32>
    %97 = vector.shape_cast %96 : vector<8xf32> to vector<8x1xf32>
    %98 = tpu.reciprocal %97 {approx = true} : vector<8x1xf32> -> vector<8x1xf32>
    %99 = vector.broadcast %98 : vector<8x1xf32> to vector<8x8xf32>
    %100 = arith.mulf %95, %99 : vector<8x8xf32>
    %cst_39 = arith.constant dense<0.000000e+00> : vector<8x64xf32>
    %101 = tpu.matmul %100, %89, %cst_39 {dimension_numbers = #tpu.dot_dimension_numbers<[1], [0], [0], [1], [0, 0, 1, 1], [], []>} : vector<8x8xf32>, vector<8x64xf32>, vector<8x64xf32> -> vector<8x64xf32>
    %c0_40 = arith.constant 0 : index
    %c256 = arith.constant 256 : index
    %102 = vector.load %arg18[%c0_40, %c256] : memref<16x512xf32, #tpu.memory_space<vmem>>, vector<8x64xf32>
    tpu.vector_store %arg18[%c0_40, %c256], %101 {strides = array<i32>} : memref<16x512xf32, #tpu.memory_space<vmem>>, vector<8x64xf32>,
    %103 = vector.extract_strided_slice %20 {offsets = [0, 320], sizes = [8, 64], strides = [1, 1]} : vector<8x512xf32> to vector<8x64xf32>
    %104 = vector.extract_strided_slice %21 {offsets = [0, 320], sizes = [8, 64], strides = [1, 1]} : vector<8x512xf32> to vector<8x64xf32>
    %105 = vector.extract_strided_slice %22 {offsets = [0, 320], sizes = [8, 64], strides = [1, 1]} : vector<8x512xf32> to vector<8x64xf32>
    %cst_41 = arith.constant dense<0.000000e+00> : vector<8x8xf32>
    %106 = tpu.matmul %103, %104, %cst_41 {dimension_numbers = #tpu.dot_dimension_numbers<[1], [1], [0], [0], [0, 0, 1, 0], [], []>} : vector<8x64xf32>, vector<8x64xf32>, vector<8x8xf32> -> vector<8x8xf32>
    %cst_42 = arith.constant dense<0xFF800000> : vector<8xf32>
    %107 = vector.multi_reduction <maximumf>, %106, %cst_42 [1] : vector<8x8xf32> to vector<8xf32>
    %108 = vector.shape_cast %107 : vector<8xf32> to vector<8x1xf32>
    %109 = vector.broadcast %108 : vector<8x1xf32> to vector<8x8xf32>
    %110 = arith.subf %106, %109 : vector<8x8xf32>
    %111 = math.exp %110 : vector<8x8xf32>
    %cst_43 = arith.constant dense<0.000000e+00> : vector<8xf32>
    %112 = vector.multi_reduction <add>, %111, %cst_43 [1] : vector<8x8xf32> to vector<8xf32>
    %113 = vector.shape_cast %112 : vector<8xf32> to vector<8x1xf32>
    %114 = tpu.reciprocal %113 {approx = true} : vector<8x1xf32> -> vector<8x1xf32>
    %115 = vector.broadcast %114 : vector<8x1xf32> to vector<8x8xf32>
    %116 = arith.mulf %111, %115 : vector<8x8xf32>
    %cst_44 = arith.constant dense<0.000000e+00> : vector<8x64xf32>
    %117 = tpu.matmul %116, %105, %cst_44 {dimension_numbers = #tpu.dot_dimension_numbers<[1], [0], [0], [1], [0, 0, 1, 1], [], []>} : vector<8x8xf32>, vector<8x64xf32>, vector<8x64xf32> -> vector<8x64xf32>
    %c0_45 = arith.constant 0 : index
    %c320 = arith.constant 320 : index
    %118 = vector.load %arg18[%c0_45, %c320] : memref<16x512xf32, #tpu.memory_space<vmem>>, vector<8x64xf32>
    tpu.vector_store %arg18[%c0_45, %c320], %117 {strides = array<i32>} : memref<16x512xf32, #tpu.memory_space<vmem>>, vector<8x64xf32>,
    %119 = vector.extract_strided_slice %20 {offsets = [0, 384], sizes = [8, 64], strides = [1, 1]} : vector<8x512xf32> to vector<8x64xf32>
    %120 = vector.extract_strided_slice %21 {offsets = [0, 384], sizes = [8, 64], strides = [1, 1]} : vector<8x512xf32> to vector<8x64xf32>
    %121 = vector.extract_strided_slice %22 {offsets = [0, 384], sizes = [8, 64], strides = [1, 1]} : vector<8x512xf32> to vector<8x64xf32>
    %cst_46 = arith.constant dense<0.000000e+00> : vector<8x8xf32>
    %122 = tpu.matmul %119, %120, %cst_46 {dimension_numbers = #tpu.dot_dimension_numbers<[1], [1], [0], [0], [0, 0, 1, 0], [], []>} : vector<8x64xf32>, vector<8x64xf32>, vector<8x8xf32> -> vector<8x8xf32>
    %cst_47 = arith.constant dense<0xFF800000> : vector<8xf32>
    %123 = vector.multi_reduction <maximumf>, %122, %cst_47 [1] : vector<8x8xf32> to vector<8xf32>
    %124 = vector.shape_cast %123 : vector<8xf32> to vector<8x1xf32>
    %125 = vector.broadcast %124 : vector<8x1xf32> to vector<8x8xf32>
    %126 = arith.subf %122, %125 : vector<8x8xf32>
    %127 = math.exp %126 : vector<8x8xf32>
    %cst_48 = arith.constant dense<0.000000e+00> : vector<8xf32>
    %128 = vector.multi_reduction <add>, %127, %cst_48 [1] : vector<8x8xf32> to vector<8xf32>
    %129 = vector.shape_cast %128 : vector<8xf32> to vector<8x1xf32>
    %130 = tpu.reciprocal %129 {approx = true} : vector<8x1xf32> -> vector<8x1xf32>
    %131 = vector.broadcast %130 : vector<8x1xf32> to vector<8x8xf32>
    %132 = arith.mulf %127, %131 : vector<8x8xf32>
    %cst_49 = arith.constant dense<0.000000e+00> : vector<8x64xf32>
    %133 = tpu.matmul %132, %121, %cst_49 {dimension_numbers = #tpu.dot_dimension_numbers<[1], [0], [0], [1], [0, 0, 1, 1], [], []>} : vector<8x8xf32>, vector<8x64xf32>, vector<8x64xf32> -> vector<8x64xf32>
    %c0_50 = arith.constant 0 : index
    %c384 = arith.constant 384 : index
    %134 = vector.load %arg18[%c0_50, %c384] : memref<16x512xf32, #tpu.memory_space<vmem>>, vector<8x64xf32>
    tpu.vector_store %arg18[%c0_50, %c384], %133 {strides = array<i32>} : memref<16x512xf32, #tpu.memory_space<vmem>>, vector<8x64xf32>,
    %135 = vector.extract_strided_slice %20 {offsets = [0, 448], sizes = [8, 64], strides = [1, 1]} : vector<8x512xf32> to vector<8x64xf32>
    %136 = vector.extract_strided_slice %21 {offsets = [0, 448], sizes = [8, 64], strides = [1, 1]} : vector<8x512xf32> to vector<8x64xf32>
    %137 = vector.extract_strided_slice %22 {offsets = [0, 448], sizes = [8, 64], strides = [1, 1]} : vector<8x512xf32> to vector<8x64xf32>
    %cst_51 = arith.constant dense<0.000000e+00> : vector<8x8xf32>
    %138 = tpu.matmul %135, %136, %cst_51 {dimension_numbers = #tpu.dot_dimension_numbers<[1], [1], [0], [0], [0, 0, 1, 0], [], []>} : vector<8x64xf32>, vector<8x64xf32>, vector<8x8xf32> -> vector<8x8xf32>
    %cst_52 = arith.constant dense<0xFF800000> : vector<8xf32>
    %139 = vector.multi_reduction <maximumf>, %138, %cst_52 [1] : vector<8x8xf32> to vector<8xf32>
    %140 = vector.shape_cast %139 : vector<8xf32> to vector<8x1xf32>
    %141 = vector.broadcast %140 : vector<8x1xf32> to vector<8x8xf32>
    %142 = arith.subf %138, %141 : vector<8x8xf32>
    %143 = math.exp %142 : vector<8x8xf32>
    %cst_53 = arith.constant dense<0.000000e+00> : vector<8xf32>
    %144 = vector.multi_reduction <add>, %143, %cst_53 [1] : vector<8x8xf32> to vector<8xf32>
    %145 = vector.shape_cast %144 : vector<8xf32> to vector<8x1xf32>
    %146 = tpu.reciprocal %145 {approx = true} : vector<8x1xf32> -> vector<8x1xf32>
    %147 = vector.broadcast %146 : vector<8x1xf32> to vector<8x8xf32>
    %148 = arith.mulf %143, %147 : vector<8x8xf32>
    %cst_54 = arith.constant dense<0.000000e+00> : vector<8x64xf32>
    %149 = tpu.matmul %148, %137, %cst_54 {dimension_numbers = #tpu.dot_dimension_numbers<[1], [0], [0], [1], [0, 0, 1, 1], [], []>} : vector<8x8xf32>, vector<8x64xf32>, vector<8x64xf32> -> vector<8x64xf32>
    %c0_55 = arith.constant 0 : index
    %c448 = arith.constant 448 : index
    %150 = vector.load %arg18[%c0_55, %c448] : memref<16x512xf32, #tpu.memory_space<vmem>>, vector<8x64xf32>
    tpu.vector_store %arg18[%c0_55, %c448], %149 {strides = array<i32>} : memref<16x512xf32, #tpu.memory_space<vmem>>, vector<8x64xf32>,
    %151 = vector.extract_strided_slice %10 {offsets = [8, 0], sizes = [8, 512], strides = [1, 1]} : vector<16x512xf32> to vector<8x512xf32>
    %cst_56 = arith.constant 1.250000e-01 : f32
    %152 = vector.broadcast %cst_56 : f32 to vector<8x512xf32>
    %153 = arith.mulf %151, %152 : vector<8x512xf32>
    %154 = vector.extract_strided_slice %16 {offsets = [8, 0], sizes = [8, 512], strides = [1, 1]} : vector<16x512xf32> to vector<8x512xf32>
    %155 = vector.extract_strided_slice %17 {offsets = [8, 0], sizes = [8, 512], strides = [1, 1]} : vector<16x512xf32> to vector<8x512xf32>
    %156 = vector.extract_strided_slice %153 {offsets = [0, 0], sizes = [8, 64], strides = [1, 1]} : vector<8x512xf32> to vector<8x64xf32>
    %157 = vector.extract_strided_slice %154 {offsets = [0, 0], sizes = [8, 64], strides = [1, 1]} : vector<8x512xf32> to vector<8x64xf32>
    %158 = vector.extract_strided_slice %155 {offsets = [0, 0], sizes = [8, 64], strides = [1, 1]} : vector<8x512xf32> to vector<8x64xf32>
    %cst_57 = arith.constant dense<0.000000e+00> : vector<8x8xf32>
    %159 = tpu.matmul %156, %157, %cst_57 {dimension_numbers = #tpu.dot_dimension_numbers<[1], [1], [0], [0], [0, 0, 1, 0], [], []>} : vector<8x64xf32>, vector<8x64xf32>, vector<8x8xf32> -> vector<8x8xf32>
    %cst_58 = arith.constant dense<0xFF800000> : vector<8xf32>
    %160 = vector.multi_reduction <maximumf>, %159, %cst_58 [1] : vector<8x8xf32> to vector<8xf32>
    %161 = vector.shape_cast %160 : vector<8xf32> to vector<8x1xf32>
    %162 = vector.broadcast %161 : vector<8x1xf32> to vector<8x8xf32>
    %163 = arith.subf %159, %162 : vector<8x8xf32>
    %164 = math.exp %163 : vector<8x8xf32>
    %cst_59 = arith.constant dense<0.000000e+00> : vector<8xf32>
    %165 = vector.multi_reduction <add>, %164, %cst_59 [1] : vector<8x8xf32> to vector<8xf32>
    %166 = vector.shape_cast %165 : vector<8xf32> to vector<8x1xf32>
    %167 = tpu.reciprocal %166 {approx = true} : vector<8x1xf32> -> vector<8x1xf32>
    %168 = vector.broadcast %167 : vector<8x1xf32> to vector<8x8xf32>
    %169 = arith.mulf %164, %168 : vector<8x8xf32>
    %cst_60 = arith.constant dense<0.000000e+00> : vector<8x64xf32>
    %170 = tpu.matmul %169, %158, %cst_60 {dimension_numbers = #tpu.dot_dimension_numbers<[1], [0], [0], [1], [0, 0, 1, 1], [], []>} : vector<8x8xf32>, vector<8x64xf32>, vector<8x64xf32> -> vector<8x64xf32>
    %c8 = arith.constant 8 : index
    %c0_61 = arith.constant 0 : index
    %171 = vector.load %arg18[%c8, %c0_61] : memref<16x512xf32, #tpu.memory_space<vmem>>, vector<8x64xf32>
    tpu.vector_store %arg18[%c8, %c0_61], %170 {strides = array<i32>} : memref<16x512xf32, #tpu.memory_space<vmem>>, vector<8x64xf32>,
    %172 = vector.extract_strided_slice %153 {offsets = [0, 64], sizes = [8, 64], strides = [1, 1]} : vector<8x512xf32> to vector<8x64xf32>
    %173 = vector.extract_strided_slice %154 {offsets = [0, 64], sizes = [8, 64], strides = [1, 1]} : vector<8x512xf32> to vector<8x64xf32>
    %174 = vector.extract_strided_slice %155 {offsets = [0, 64], sizes = [8, 64], strides = [1, 1]} : vector<8x512xf32> to vector<8x64xf32>
    %cst_62 = arith.constant dense<0.000000e+00> : vector<8x8xf32>
    %175 = tpu.matmul %172, %173, %cst_62 {dimension_numbers = #tpu.dot_dimension_numbers<[1], [1], [0], [0], [0, 0, 1, 0], [], []>} : vector<8x64xf32>, vector<8x64xf32>, vector<8x8xf32> -> vector<8x8xf32>
    %cst_63 = arith.constant dense<0xFF800000> : vector<8xf32>
    %176 = vector.multi_reduction <maximumf>, %175, %cst_63 [1] : vector<8x8xf32> to vector<8xf32>
    %177 = vector.shape_cast %176 : vector<8xf32> to vector<8x1xf32>
    %178 = vector.broadcast %177 : vector<8x1xf32> to vector<8x8xf32>
    %179 = arith.subf %175, %178 : vector<8x8xf32>
    %180 = math.exp %179 : vector<8x8xf32>
    %cst_64 = arith.constant dense<0.000000e+00> : vector<8xf32>
    %181 = vector.multi_reduction <add>, %180, %cst_64 [1] : vector<8x8xf32> to vector<8xf32>
    %182 = vector.shape_cast %181 : vector<8xf32> to vector<8x1xf32>
    %183 = tpu.reciprocal %182 {approx = true} : vector<8x1xf32> -> vector<8x1xf32>
    %184 = vector.broadcast %183 : vector<8x1xf32> to vector<8x8xf32>
    %185 = arith.mulf %180, %184 : vector<8x8xf32>
    %cst_65 = arith.constant dense<0.000000e+00> : vector<8x64xf32>
    %186 = tpu.matmul %185, %174, %cst_65 {dimension_numbers = #tpu.dot_dimension_numbers<[1], [0], [0], [1], [0, 0, 1, 1], [], []>} : vector<8x8xf32>, vector<8x64xf32>, vector<8x64xf32> -> vector<8x64xf32>
    %c8_66 = arith.constant 8 : index
    %c64_67 = arith.constant 64 : index
    %187 = vector.load %arg18[%c8_66, %c64_67] : memref<16x512xf32, #tpu.memory_space<vmem>>, vector<8x64xf32>
    tpu.vector_store %arg18[%c8_66, %c64_67], %186 {strides = array<i32>} : memref<16x512xf32, #tpu.memory_space<vmem>>, vector<8x64xf32>,
    %188 = vector.extract_strided_slice %153 {offsets = [0, 128], sizes = [8, 64], strides = [1, 1]} : vector<8x512xf32> to vector<8x64xf32>
    %189 = vector.extract_strided_slice %154 {offsets = [0, 128], sizes = [8, 64], strides = [1, 1]} : vector<8x512xf32> to vector<8x64xf32>
    %190 = vector.extract_strided_slice %155 {offsets = [0, 128], sizes = [8, 64], strides = [1, 1]} : vector<8x512xf32> to vector<8x64xf32>
    %cst_68 = arith.constant dense<0.000000e+00> : vector<8x8xf32>
    %191 = tpu.matmul %188, %189, %cst_68 {dimension_numbers = #tpu.dot_dimension_numbers<[1], [1], [0], [0], [0, 0, 1, 0], [], []>} : vector<8x64xf32>, vector<8x64xf32>, vector<8x8xf32> -> vector<8x8xf32>
    %cst_69 = arith.constant dense<0xFF800000> : vector<8xf32>
    %192 = vector.multi_reduction <maximumf>, %191, %cst_69 [1] : vector<8x8xf32> to vector<8xf32>
    %193 = vector.shape_cast %192 : vector<8xf32> to vector<8x1xf32>
    %194 = vector.broadcast %193 : vector<8x1xf32> to vector<8x8xf32>
    %195 = arith.subf %191, %194 : vector<8x8xf32>
    %196 = math.exp %195 : vector<8x8xf32>
    %cst_70 = arith.constant dense<0.000000e+00> : vector<8xf32>
    %197 = vector.multi_reduction <add>, %196, %cst_70 [1] : vector<8x8xf32> to vector<8xf32>
    %198 = vector.shape_cast %197 : vector<8xf32> to vector<8x1xf32>
    %199 = tpu.reciprocal %198 {approx = true} : vector<8x1xf32> -> vector<8x1xf32>
    %200 = vector.broadcast %199 : vector<8x1xf32> to vector<8x8xf32>
    %201 = arith.mulf %196, %200 : vector<8x8xf32>
    %cst_71 = arith.constant dense<0.000000e+00> : vector<8x64xf32>
    %202 = tpu.matmul %201, %190, %cst_71 {dimension_numbers = #tpu.dot_dimension_numbers<[1], [0], [0], [1], [0, 0, 1, 1], [], []>} : vector<8x8xf32>, vector<8x64xf32>, vector<8x64xf32> -> vector<8x64xf32>
    %c8_72 = arith.constant 8 : index
    %c128_73 = arith.constant 128 : index
    %203 = vector.load %arg18[%c8_72, %c128_73] : memref<16x512xf32, #tpu.memory_space<vmem>>, vector<8x64xf32>
    tpu.vector_store %arg18[%c8_72, %c128_73], %202 {strides = array<i32>} : memref<16x512xf32, #tpu.memory_space<vmem>>, vector<8x64xf32>,
    %204 = vector.extract_strided_slice %153 {offsets = [0, 192], sizes = [8, 64], strides = [1, 1]} : vector<8x512xf32> to vector<8x64xf32>
    %205 = vector.extract_strided_slice %154 {offsets = [0, 192], sizes = [8, 64], strides = [1, 1]} : vector<8x512xf32> to vector<8x64xf32>
    %206 = vector.extract_strided_slice %155 {offsets = [0, 192], sizes = [8, 64], strides = [1, 1]} : vector<8x512xf32> to vector<8x64xf32>
    %cst_74 = arith.constant dense<0.000000e+00> : vector<8x8xf32>
    %207 = tpu.matmul %204, %205, %cst_74 {dimension_numbers = #tpu.dot_dimension_numbers<[1], [1], [0], [0], [0, 0, 1, 0], [], []>} : vector<8x64xf32>, vector<8x64xf32>, vector<8x8xf32> -> vector<8x8xf32>
    %cst_75 = arith.constant dense<0xFF800000> : vector<8xf32>
    %208 = vector.multi_reduction <maximumf>, %207, %cst_75 [1] : vector<8x8xf32> to vector<8xf32>
    %209 = vector.shape_cast %208 : vector<8xf32> to vector<8x1xf32>
    %210 = vector.broadcast %209 : vector<8x1xf32> to vector<8x8xf32>
    %211 = arith.subf %207, %210 : vector<8x8xf32>
    %212 = math.exp %211 : vector<8x8xf32>
    %cst_76 = arith.constant dense<0.000000e+00> : vector<8xf32>
    %213 = vector.multi_reduction <add>, %212, %cst_76 [1] : vector<8x8xf32> to vector<8xf32>
    %214 = vector.shape_cast %213 : vector<8xf32> to vector<8x1xf32>
    %215 = tpu.reciprocal %214 {approx = true} : vector<8x1xf32> -> vector<8x1xf32>
    %216 = vector.broadcast %215 : vector<8x1xf32> to vector<8x8xf32>
    %217 = arith.mulf %212, %216 : vector<8x8xf32>
    %cst_77 = arith.constant dense<0.000000e+00> : vector<8x64xf32>
    %218 = tpu.matmul %217, %206, %cst_77 {dimension_numbers = #tpu.dot_dimension_numbers<[1], [0], [0], [1], [0, 0, 1, 1], [], []>} : vector<8x8xf32>, vector<8x64xf32>, vector<8x64xf32> -> vector<8x64xf32>
    %c8_78 = arith.constant 8 : index
    %c192_79 = arith.constant 192 : index
    %219 = vector.load %arg18[%c8_78, %c192_79] : memref<16x512xf32, #tpu.memory_space<vmem>>, vector<8x64xf32>
    tpu.vector_store %arg18[%c8_78, %c192_79], %218 {strides = array<i32>} : memref<16x512xf32, #tpu.memory_space<vmem>>, vector<8x64xf32>,
    %220 = vector.extract_strided_slice %153 {offsets = [0, 256], sizes = [8, 64], strides = [1, 1]} : vector<8x512xf32> to vector<8x64xf32>
    %221 = vector.extract_strided_slice %154 {offsets = [0, 256], sizes = [8, 64], strides = [1, 1]} : vector<8x512xf32> to vector<8x64xf32>
    %222 = vector.extract_strided_slice %155 {offsets = [0, 256], sizes = [8, 64], strides = [1, 1]} : vector<8x512xf32> to vector<8x64xf32>
    %cst_80 = arith.constant dense<0.000000e+00> : vector<8x8xf32>
    %223 = tpu.matmul %220, %221, %cst_80 {dimension_numbers = #tpu.dot_dimension_numbers<[1], [1], [0], [0], [0, 0, 1, 0], [], []>} : vector<8x64xf32>, vector<8x64xf32>, vector<8x8xf32> -> vector<8x8xf32>
    %cst_81 = arith.constant dense<0xFF800000> : vector<8xf32>
    %224 = vector.multi_reduction <maximumf>, %223, %cst_81 [1] : vector<8x8xf32> to vector<8xf32>
    %225 = vector.shape_cast %224 : vector<8xf32> to vector<8x1xf32>
    %226 = vector.broadcast %225 : vector<8x1xf32> to vector<8x8xf32>
    %227 = arith.subf %223, %226 : vector<8x8xf32>
    %228 = math.exp %227 : vector<8x8xf32>
    %cst_82 = arith.constant dense<0.000000e+00> : vector<8xf32>
    %229 = vector.multi_reduction <add>, %228, %cst_82 [1] : vector<8x8xf32> to vector<8xf32>
    %230 = vector.shape_cast %229 : vector<8xf32> to vector<8x1xf32>
    %231 = tpu.reciprocal %230 {approx = true} : vector<8x1xf32> -> vector<8x1xf32>
    %232 = vector.broadcast %231 : vector<8x1xf32> to vector<8x8xf32>
    %233 = arith.mulf %228, %232 : vector<8x8xf32>
    %cst_83 = arith.constant dense<0.000000e+00> : vector<8x64xf32>
    %234 = tpu.matmul %233, %222, %cst_83 {dimension_numbers = #tpu.dot_dimension_numbers<[1], [0], [0], [1], [0, 0, 1, 1], [], []>} : vector<8x8xf32>, vector<8x64xf32>, vector<8x64xf32> -> vector<8x64xf32>
    %c8_84 = arith.constant 8 : index
    %c256_85 = arith.constant 256 : index
    %235 = vector.load %arg18[%c8_84, %c256_85] : memref<16x512xf32, #tpu.memory_space<vmem>>, vector<8x64xf32>
    tpu.vector_store %arg18[%c8_84, %c256_85], %234 {strides = array<i32>} : memref<16x512xf32, #tpu.memory_space<vmem>>, vector<8x64xf32>,
    %236 = vector.extract_strided_slice %153 {offsets = [0, 320], sizes = [8, 64], strides = [1, 1]} : vector<8x512xf32> to vector<8x64xf32>
    %237 = vector.extract_strided_slice %154 {offsets = [0, 320], sizes = [8, 64], strides = [1, 1]} : vector<8x512xf32> to vector<8x64xf32>
    %238 = vector.extract_strided_slice %155 {offsets = [0, 320], sizes = [8, 64], strides = [1, 1]} : vector<8x512xf32> to vector<8x64xf32>
    %cst_86 = arith.constant dense<0.000000e+00> : vector<8x8xf32>
    %239 = tpu.matmul %236, %237, %cst_86 {dimension_numbers = #tpu.dot_dimension_numbers<[1], [1], [0], [0], [0, 0, 1, 0], [], []>} : vector<8x64xf32>, vector<8x64xf32>, vector<8x8xf32> -> vector<8x8xf32>
    %cst_87 = arith.constant dense<0xFF800000> : vector<8xf32>
    %240 = vector.multi_reduction <maximumf>, %239, %cst_87 [1] : vector<8x8xf32> to vector<8xf32>
    %241 = vector.shape_cast %240 : vector<8xf32> to vector<8x1xf32>
    %242 = vector.broadcast %241 : vector<8x1xf32> to vector<8x8xf32>
    %243 = arith.subf %239, %242 : vector<8x8xf32>
    %244 = math.exp %243 : vector<8x8xf32>
    %cst_88 = arith.constant dense<0.000000e+00> : vector<8xf32>
    %245 = vector.multi_reduction <add>, %244, %cst_88 [1] : vector<8x8xf32> to vector<8xf32>
    %246 = vector.shape_cast %245 : vector<8xf32> to vector<8x1xf32>
    %247 = tpu.reciprocal %246 {approx = true} : vector<8x1xf32> -> vector<8x1xf32>
    %248 = vector.broadcast %247 : vector<8x1xf32> to vector<8x8xf32>
    %249 = arith.mulf %244, %248 : vector<8x8xf32>
    %cst_89 = arith.constant dense<0.000000e+00> : vector<8x64xf32>
    %250 = tpu.matmul %249, %238, %cst_89 {dimension_numbers = #tpu.dot_dimension_numbers<[1], [0], [0], [1], [0, 0, 1, 1], [], []>} : vector<8x8xf32>, vector<8x64xf32>, vector<8x64xf32> -> vector<8x64xf32>
    %c8_90 = arith.constant 8 : index
    %c320_91 = arith.constant 320 : index
    %251 = vector.load %arg18[%c8_90, %c320_91] : memref<16x512xf32, #tpu.memory_space<vmem>>, vector<8x64xf32>
    tpu.vector_store %arg18[%c8_90, %c320_91], %250 {strides = array<i32>} : memref<16x512xf32, #tpu.memory_space<vmem>>, vector<8x64xf32>,
    %252 = vector.extract_strided_slice %153 {offsets = [0, 384], sizes = [8, 64], strides = [1, 1]} : vector<8x512xf32> to vector<8x64xf32>
    %253 = vector.extract_strided_slice %154 {offsets = [0, 384], sizes = [8, 64], strides = [1, 1]} : vector<8x512xf32> to vector<8x64xf32>
    %254 = vector.extract_strided_slice %155 {offsets = [0, 384], sizes = [8, 64], strides = [1, 1]} : vector<8x512xf32> to vector<8x64xf32>
    %cst_92 = arith.constant dense<0.000000e+00> : vector<8x8xf32>
    %255 = tpu.matmul %252, %253, %cst_92 {dimension_numbers = #tpu.dot_dimension_numbers<[1], [1], [0], [0], [0, 0, 1, 0], [], []>} : vector<8x64xf32>, vector<8x64xf32>, vector<8x8xf32> -> vector<8x8xf32>
    %cst_93 = arith.constant dense<0xFF800000> : vector<8xf32>
    %256 = vector.multi_reduction <maximumf>, %255, %cst_93 [1] : vector<8x8xf32> to vector<8xf32>
    %257 = vector.shape_cast %256 : vector<8xf32> to vector<8x1xf32>
    %258 = vector.broadcast %257 : vector<8x1xf32> to vector<8x8xf32>
    %259 = arith.subf %255, %258 : vector<8x8xf32>
    %260 = math.exp %259 : vector<8x8xf32>
    %cst_94 = arith.constant dense<0.000000e+00> : vector<8xf32>
    %261 = vector.multi_reduction <add>, %260, %cst_94 [1] : vector<8x8xf32> to vector<8xf32>
    %262 = vector.shape_cast %261 : vector<8xf32> to vector<8x1xf32>
    %263 = tpu.reciprocal %262 {approx = true} : vector<8x1xf32> -> vector<8x1xf32>
    %264 = vector.broadcast %263 : vector<8x1xf32> to vector<8x8xf32>
    %265 = arith.mulf %260, %264 : vector<8x8xf32>
    %cst_95 = arith.constant dense<0.000000e+00> : vector<8x64xf32>
    %266 = tpu.matmul %265, %254, %cst_95 {dimension_numbers = #tpu.dot_dimension_numbers<[1], [0], [0], [1], [0, 0, 1, 1], [], []>} : vector<8x8xf32>, vector<8x64xf32>, vector<8x64xf32> -> vector<8x64xf32>
    %c8_96 = arith.constant 8 : index
    %c384_97 = arith.constant 384 : index
    %267 = vector.load %arg18[%c8_96, %c384_97] : memref<16x512xf32, #tpu.memory_space<vmem>>, vector<8x64xf32>
    tpu.vector_store %arg18[%c8_96, %c384_97], %266 {strides = array<i32>} : memref<16x512xf32, #tpu.memory_space<vmem>>, vector<8x64xf32>,
    %268 = vector.extract_strided_slice %153 {offsets = [0, 448], sizes = [8, 64], strides = [1, 1]} : vector<8x512xf32> to vector<8x64xf32>
    %269 = vector.extract_strided_slice %154 {offsets = [0, 448], sizes = [8, 64], strides = [1, 1]} : vector<8x512xf32> to vector<8x64xf32>
    %270 = vector.extract_strided_slice %155 {offsets = [0, 448], sizes = [8, 64], strides = [1, 1]} : vector<8x512xf32> to vector<8x64xf32>
    %cst_98 = arith.constant dense<0.000000e+00> : vector<8x8xf32>
    %271 = tpu.matmul %268, %269, %cst_98 {dimension_numbers = #tpu.dot_dimension_numbers<[1], [1], [0], [0], [0, 0, 1, 0], [], []>} : vector<8x64xf32>, vector<8x64xf32>, vector<8x8xf32> -> vector<8x8xf32>
    %cst_99 = arith.constant dense<0xFF800000> : vector<8xf32>
    %272 = vector.multi_reduction <maximumf>, %271, %cst_99 [1] : vector<8x8xf32> to vector<8xf32>
    %273 = vector.shape_cast %272 : vector<8xf32> to vector<8x1xf32>
    %274 = vector.broadcast %273 : vector<8x1xf32> to vector<8x8xf32>
    %275 = arith.subf %271, %274 : vector<8x8xf32>
    %276 = math.exp %275 : vector<8x8xf32>
    %cst_100 = arith.constant dense<0.000000e+00> : vector<8xf32>
    %277 = vector.multi_reduction <add>, %276, %cst_100 [1] : vector<8x8xf32> to vector<8xf32>
    %278 = vector.shape_cast %277 : vector<8xf32> to vector<8x1xf32>
    %279 = tpu.reciprocal %278 {approx = true} : vector<8x1xf32> -> vector<8x1xf32>
    %280 = vector.broadcast %279 : vector<8x1xf32> to vector<8x8xf32>
    %281 = arith.mulf %276, %280 : vector<8x8xf32>
    %cst_101 = arith.constant dense<0.000000e+00> : vector<8x64xf32>
    %282 = tpu.matmul %281, %270, %cst_101 {dimension_numbers = #tpu.dot_dimension_numbers<[1], [0], [0], [1], [0, 0, 1, 1], [], []>} : vector<8x8xf32>, vector<8x64xf32>, vector<8x64xf32> -> vector<8x64xf32>
    %c8_102 = arith.constant 8 : index
    %c448_103 = arith.constant 448 : index
    %283 = vector.load %arg18[%c8_102, %c448_103] : memref<16x512xf32, #tpu.memory_space<vmem>>, vector<8x64xf32>
    tpu.vector_store %arg18[%c8_102, %c448_103], %282 {strides = array<i32>} : memref<16x512xf32, #tpu.memory_space<vmem>>, vector<8x64xf32>,
    %c0_104 = arith.constant 0 : index
    %c0_105 = arith.constant 0 : index
    %284 = vector.load %arg18[%c0_104, %c0_105] : memref<16x512xf32, #tpu.memory_space<vmem>>, vector<16x512xf32>
    %285 = arith.truncf %284 : vector<16x512xf32> to vector<16x512xbf16>
    %c0_106 = arith.constant 0 : index
    %c0_107 = arith.constant 0 : index
    %286 = vector.load %arg7[%c0_106, %c0_107] : memref<512x512xbf16, #tpu.memory_space<vmem>>, vector<512x512xbf16>
    %cst_108 = arith.constant dense<0.000000e+00> : vector<16x512xf32>
    %287 = tpu.matmul %285, %286, %cst_108 {dimension_numbers = #tpu.dot_dimension_numbers<[1], [0], [0], [1], [0, 0, 1, 1], [], []>} : vector<16x512xbf16>, vector<512x512xbf16>, vector<16x512xf32> -> vector<16x512xf32>
    %c0_109 = arith.constant 0 : index
    %c0_110 = arith.constant 0 : index
    %288 = vector.load %arg8[%c0_109, %c0_110] : memref<1x512xf32, #tpu.memory_space<vmem>>, vector<1x512xf32>
    %289 = vector.broadcast %288 : vector<1x512xf32> to vector<16x512xf32>
    %290 = arith.addf %287, %289 : vector<16x512xf32>
    %291 = arith.addf %290, %1 : vector<16x512xf32>
    %c0_111 = arith.constant 0 : index
    %c0_112 = arith.constant 0 : index
    %292 = vector.load %arg9[%c0_111, %c0_112] : memref<1x512xf32, #tpu.memory_space<vmem>>, vector<1x512xf32>
    %c0_113 = arith.constant 0 : index
    %c0_114 = arith.constant 0 : index
    %293 = vector.load %arg10[%c0_113, %c0_114] : memref<1x512xf32, #tpu.memory_space<vmem>>, vector<1x512xf32>
    %cst_115 = arith.constant dense<0.000000e+00> : vector<16xf32>
    %294 = vector.multi_reduction <add>, %291, %cst_115 [1] : vector<16x512xf32> to vector<16xf32>
    %295 = vector.shape_cast %294 : vector<16xf32> to vector<16x1xf32>
    %cst_116 = arith.constant 5.120000e+02 : f32
    %296 = vector.broadcast %cst_116 : f32 to vector<16x1xf32>
    %297 = arith.divf %295, %296 : vector<16x1xf32>
    %298 = vector.broadcast %297 : vector<16x1xf32> to vector<16x512xf32>
    %299 = arith.subf %291, %298 : vector<16x512xf32>
    %300 = arith.mulf %299, %299 : vector<16x512xf32>
    %cst_117 = arith.constant dense<0.000000e+00> : vector<16xf32>
    %301 = vector.multi_reduction <add>, %300, %cst_117 [1] : vector<16x512xf32> to vector<16xf32>
    %302 = vector.shape_cast %301 : vector<16xf32> to vector<16x1xf32>
    %cst_118 = arith.constant 5.120000e+02 : f32
    %303 = vector.broadcast %cst_118 : f32 to vector<16x1xf32>
    %304 = arith.divf %302, %303 : vector<16x1xf32>
    %cst_119 = arith.constant 9.99999974E-6 : f32
    %305 = vector.broadcast %cst_119 : f32 to vector<16x1xf32>
    %306 = arith.addf %304, %305 : vector<16x1xf32>
    %307 = math.rsqrt %306 : vector<16x1xf32>
    %308 = vector.broadcast %307 : vector<16x1xf32> to vector<16x512xf32>
    %309 = arith.mulf %299, %308 : vector<16x512xf32>
    %310 = vector.broadcast %292 : vector<1x512xf32> to vector<16x512xf32>
    %311 = arith.mulf %309, %310 : vector<16x512xf32>
    %312 = vector.broadcast %293 : vector<1x512xf32> to vector<16x512xf32>
    %313 = arith.addf %311, %312 : vector<16x512xf32>
    %314 = arith.truncf %313 : vector<16x512xf32> to vector<16x512xbf16>
    %c0_120 = arith.constant 0 : index
    %c0_121 = arith.constant 0 : index
    %315 = vector.load %arg11[%c0_120, %c0_121] : memref<512x1024xbf16, #tpu.memory_space<vmem>>, vector<512x1024xbf16>
    %cst_122 = arith.constant dense<0.000000e+00> : vector<16x1024xf32>
    %316 = tpu.matmul %314, %315, %cst_122 {dimension_numbers = #tpu.dot_dimension_numbers<[1], [0], [0], [1], [0, 0, 1, 1], [], []>} : vector<16x512xbf16>, vector<512x1024xbf16>, vector<16x1024xf32> -> vector<16x1024xf32>
    %c0_123 = arith.constant 0 : index
    %c0_124 = arith.constant 0 : index
    %317 = vector.load %arg12[%c0_123, %c0_124] : memref<1x1024xf32, #tpu.memory_space<vmem>>, vector<1x1024xf32>
    %318 = vector.broadcast %317 : vector<1x1024xf32> to vector<16x1024xf32>
    %319 = arith.addf %316, %318 : vector<16x1024xf32>
    %cst_125 = arith.constant 0.000000e+00 : f32
    %320 = vector.broadcast %cst_125 : f32 to vector<16x1024xf32>
    %321 = arith.maximumf %319, %320 : vector<16x1024xf32>
    %322 = arith.truncf %321 : vector<16x1024xf32> to vector<16x1024xbf16>
    %c0_126 = arith.constant 0 : index
    %c0_127 = arith.constant 0 : index
    %323 = vector.load %arg13[%c0_126, %c0_127] : memref<1024x512xbf16, #tpu.memory_space<vmem>>, vector<1024x512xbf16>
    %cst_128 = arith.constant dense<0.000000e+00> : vector<16x512xf32>
    %324 = tpu.matmul %322, %323, %cst_128 {dimension_numbers = #tpu.dot_dimension_numbers<[1], [0], [0], [1], [0, 0, 1, 1], [], []>} : vector<16x1024xbf16>, vector<1024x512xbf16>, vector<16x512xf32> -> vector<16x512xf32>
    %c0_129 = arith.constant 0 : index
    %c0_130 = arith.constant 0 : index
    %325 = vector.load %arg14[%c0_129, %c0_130] : memref<1x512xf32, #tpu.memory_space<vmem>>, vector<1x512xf32>
    %326 = vector.broadcast %325 : vector<1x512xf32> to vector<16x512xf32>
    %327 = arith.addf %324, %326 : vector<16x512xf32>
    %328 = arith.addf %327, %313 : vector<16x512xf32>
    %c0_131 = arith.constant 0 : index
    %c0_132 = arith.constant 0 : index
    %329 = vector.load %arg15[%c0_131, %c0_132] : memref<1x512xf32, #tpu.memory_space<vmem>>, vector<1x512xf32>
    %c0_133 = arith.constant 0 : index
    %c0_134 = arith.constant 0 : index
    %330 = vector.load %arg16[%c0_133, %c0_134] : memref<1x512xf32, #tpu.memory_space<vmem>>, vector<1x512xf32>
    %cst_135 = arith.constant dense<0.000000e+00> : vector<16xf32>
    %331 = vector.multi_reduction <add>, %328, %cst_135 [1] : vector<16x512xf32> to vector<16xf32>
    %332 = vector.shape_cast %331 : vector<16xf32> to vector<16x1xf32>
    %cst_136 = arith.constant 5.120000e+02 : f32
    %333 = vector.broadcast %cst_136 : f32 to vector<16x1xf32>
    %334 = arith.divf %332, %333 : vector<16x1xf32>
    %335 = vector.broadcast %334 : vector<16x1xf32> to vector<16x512xf32>
    %336 = arith.subf %328, %335 : vector<16x512xf32>
    %337 = arith.mulf %336, %336 : vector<16x512xf32>
    %cst_137 = arith.constant dense<0.000000e+00> : vector<16xf32>
    %338 = vector.multi_reduction <add>, %337, %cst_137 [1] : vector<16x512xf32> to vector<16xf32>
    %339 = vector.shape_cast %338 : vector<16xf32> to vector<16x1xf32>
    %cst_138 = arith.constant 5.120000e+02 : f32
    %340 = vector.broadcast %cst_138 : f32 to vector<16x1xf32>
    %341 = arith.divf %339, %340 : vector<16x1xf32>
    %cst_139 = arith.constant 9.99999974E-6 : f32
    %342 = vector.broadcast %cst_139 : f32 to vector<16x1xf32>
    %343 = arith.addf %341, %342 : vector<16x1xf32>
    %344 = math.rsqrt %343 : vector<16x1xf32>
    %345 = vector.broadcast %344 : vector<16x1xf32> to vector<16x512xf32>
    %346 = arith.mulf %336, %345 : vector<16x512xf32>
    %347 = vector.broadcast %329 : vector<1x512xf32> to vector<16x512xf32>
    %348 = arith.mulf %346, %347 : vector<16x512xf32>
    %349 = vector.broadcast %330 : vector<1x512xf32> to vector<16x512xf32>
    %350 = arith.addf %348, %349 : vector<16x512xf32>
    %c0_140 = arith.constant 0 : index
    %c0_141 = arith.constant 0 : index
    %c0_142 = arith.constant 0 : index
    %351 = vector.load %arg17[%c0_140, %c0_141, %c0_142] : memref<1x16x512xf32, #tpu.memory_space<vmem>>, vector<1x16x512xf32>
    %352 = vector.shape_cast %351 : vector<1x16x512xf32> to vector<16x512xf32>
    %353 = vector.shape_cast %350 : vector<16x512xf32> to vector<1x16x512xf32>
    tpu.vector_store %arg17[%c0_140, %c0_141, %c0_142], %353 {strides = array<i32>} : memref<1x16x512xf32, #tpu.memory_space<vmem>>, vector<1x16x512xf32>,
    return
  }
  func.func @transform_0(%arg0: i32) -> (i32, i32, i32) {
    %c0_i32 = arith.constant 0 : i32
    %c0_i32_0 = arith.constant 0 : i32
    %c0_i32_1 = arith.constant 0 : i32
    return %arg0, %c0_i32, %c0_i32_0 : i32, i32, i32
  }
  func.func @transform_1(%arg0: i32) -> (i32, i32, i32) {
    %c1_i32 = arith.constant 1 : i32
    %0 = arith.subi %c1_i32, %arg0 : i32
    %c0_i32 = arith.constant 0 : i32
    %c0_i32_0 = arith.constant 0 : i32
    %c0_i32_1 = arith.constant 0 : i32
    return %0, %c0_i32, %c0_i32_0 : i32, i32, i32
  }
  func.func @transform_2(%arg0: i32) -> (i32, i32) {
    %c0_i32 = arith.constant 0 : i32
    %c0_i32_0 = arith.constant 0 : i32
    %c0_i32_1 = arith.constant 0 : i32
    return %c0_i32, %c0_i32_0 : i32, i32
  }
  func.func @transform_3(%arg0: i32) -> (i32, i32) {
    %c0_i32 = arith.constant 0 : i32
    %c0_i32_0 = arith.constant 0 : i32
    %c0_i32_1 = arith.constant 0 : i32
    return %c0_i32, %c0_i32_0 : i32, i32
  }
  func.func @transform_4(%arg0: i32) -> (i32, i32) {
    %c0_i32 = arith.constant 0 : i32
    %c0_i32_0 = arith.constant 0 : i32
    %c0_i32_1 = arith.constant 0 : i32
    return %c0_i32, %c0_i32_0 : i32, i32
  }
  func.func @transform_5(%arg0: i32) -> (i32, i32) {
    %c0_i32 = arith.constant 0 : i32
    %c0_i32_0 = arith.constant 0 : i32
    %c0_i32_1 = arith.constant 0 : i32
    return %c0_i32, %c0_i32_0 : i32, i32
  }
  func.func @transform_6(%arg0: i32) -> (i32, i32) {
    %c0_i32 = arith.constant 0 : i32
    %c0_i32_0 = arith.constant 0 : i32
    %c0_i32_1 = arith.constant 0 : i32
    return %c0_i32, %c0_i32_0 : i32, i32
  }
  func.func @transform_7(%arg0: i32) -> (i32, i32) {
    %c0_i32 = arith.constant 0 : i32
    %c0_i32_0 = arith.constant 0 : i32
    %c0_i32_1 = arith.constant 0 : i32
    return %c0_i32, %c0_i32_0 : i32, i32
  }
  func.func @transform_8(%arg0: i32) -> (i32, i32) {
    %c0_i32 = arith.constant 0 : i32
    %c0_i32_0 = arith.constant 0 : i32
    %c0_i32_1 = arith.constant 0 : i32
    return %c0_i32, %c0_i32_0 : i32, i32
  }
  func.func @transform_9(%arg0: i32) -> (i32, i32) {
    %c0_i32 = arith.constant 0 : i32
    %c0_i32_0 = arith.constant 0 : i32
    %c0_i32_1 = arith.constant 0 : i32
    return %c0_i32, %c0_i32_0 : i32, i32
  }
  func.func @transform_10(%arg0: i32) -> (i32, i32) {
    %c0_i32 = arith.constant 0 : i32
    %c0_i32_0 = arith.constant 0 : i32
    %c0_i32_1 = arith.constant 0 : i32
    return %c0_i32, %c0_i32_0 : i32, i32
  }
  func.func @transform_11(%arg0: i32) -> (i32, i32) {
    %c0_i32 = arith.constant 0 : i32
    %c0_i32_0 = arith.constant 0 : i32
    %c0_i32_1 = arith.constant 0 : i32
    return %c0_i32, %c0_i32_0 : i32, i32
  }
  func.func @transform_12(%arg0: i32) -> (i32, i32) {
    %c0_i32 = arith.constant 0 : i32
    %c0_i32_0 = arith.constant 0 : i32
    %c0_i32_1 = arith.constant 0 : i32
    return %c0_i32, %c0_i32_0 : i32, i32
  }
  func.func @transform_13(%arg0: i32) -> (i32, i32) {
    %c0_i32 = arith.constant 0 : i32
    %c0_i32_0 = arith.constant 0 : i32
    %c0_i32_1 = arith.constant 0 : i32
    return %c0_i32, %c0_i32_0 : i32, i32
  }
  func.func @transform_14(%arg0: i32) -> (i32, i32) {
    %c0_i32 = arith.constant 0 : i32
    %c0_i32_0 = arith.constant 0 : i32
    %c0_i32_1 = arith.constant 0 : i32
    return %c0_i32, %c0_i32_0 : i32, i32
  }
  func.func @transform_15(%arg0: i32) -> (i32, i32) {
    %c0_i32 = arith.constant 0 : i32
    %c0_i32_0 = arith.constant 0 : i32
    %c0_i32_1 = arith.constant 0 : i32
    return %c0_i32, %c0_i32_0 : i32, i32
  }
  func.func @transform_16(%arg0: i32) -> (i32, i32, i32) {
    %c0_i32 = arith.constant 0 : i32
    %c0_i32_0 = arith.constant 0 : i32
    %c0_i32_1 = arith.constant 0 : i32
    return %arg0, %c0_i32, %c0_i32_0 : i32, i32, i32
  }
}

module attributes {stable_mosaic.version = 11 : i64} {
  func.func @_final_ln_kernel(%arg0: i32, %arg1: memref<1x16x512xf32, #tpu.memory_space<vmem>>, %arg2: memref<1x1x512xf32, #tpu.memory_space<vmem>>, %arg3: memref<1x1x512xf32, #tpu.memory_space<vmem>>, %arg4: memref<1x16x512xf32, #tpu.memory_space<vmem>>) attributes {dimension_semantics = [#tpu.dimension_semantics<parallel>], iteration_bounds = array<i64: 2>, scalar_prefetch = 0 : i64, scratch_operands = 0 : i64, tpu.core_type = #tpu.core_type<tc>, window_params = [{transform_indices = @transform_0, window_bounds = array<i64: 1, 16, 512>}, {transform_indices = @transform_1, window_bounds = array<i64: 1, 1, 512>}, {transform_indices = @transform_2, window_bounds = array<i64: 1, 1, 512>}, {transform_indices = @transform_3, window_bounds = array<i64: 1, 16, 512>}]} {
    %c0 = arith.constant 0 : index
    %c0_0 = arith.constant 0 : index
    %c0_1 = arith.constant 0 : index
    %0 = vector.load %arg1[%c0, %c0_0, %c0_1] : memref<1x16x512xf32, #tpu.memory_space<vmem>>, vector<1x16x512xf32>
    %1 = vector.shape_cast %0 : vector<1x16x512xf32> to vector<16x512xf32>
    %c0_2 = arith.constant 0 : index
    %c0_3 = arith.constant 0 : index
    %c0_4 = arith.constant 0 : index
    %2 = vector.load %arg2[%c0_2, %c0_3, %c0_4] : memref<1x1x512xf32, #tpu.memory_space<vmem>>, vector<1x1x512xf32>
    %3 = vector.shape_cast %2 : vector<1x1x512xf32> to vector<1x512xf32>
    %c0_5 = arith.constant 0 : index
    %c0_6 = arith.constant 0 : index
    %c0_7 = arith.constant 0 : index
    %4 = vector.load %arg3[%c0_5, %c0_6, %c0_7] : memref<1x1x512xf32, #tpu.memory_space<vmem>>, vector<1x1x512xf32>
    %5 = vector.shape_cast %4 : vector<1x1x512xf32> to vector<1x512xf32>
    %cst = arith.constant dense<0.000000e+00> : vector<16xf32>
    %6 = vector.multi_reduction <add>, %1, %cst [1] : vector<16x512xf32> to vector<16xf32>
    %7 = vector.shape_cast %6 : vector<16xf32> to vector<16x1xf32>
    %cst_8 = arith.constant 5.120000e+02 : f32
    %8 = vector.broadcast %cst_8 : f32 to vector<16x1xf32>
    %9 = arith.divf %7, %8 : vector<16x1xf32>
    %10 = vector.broadcast %9 : vector<16x1xf32> to vector<16x512xf32>
    %11 = arith.subf %1, %10 : vector<16x512xf32>
    %12 = arith.mulf %11, %11 : vector<16x512xf32>
    %cst_9 = arith.constant dense<0.000000e+00> : vector<16xf32>
    %13 = vector.multi_reduction <add>, %12, %cst_9 [1] : vector<16x512xf32> to vector<16xf32>
    %14 = vector.shape_cast %13 : vector<16xf32> to vector<16x1xf32>
    %cst_10 = arith.constant 5.120000e+02 : f32
    %15 = vector.broadcast %cst_10 : f32 to vector<16x1xf32>
    %16 = arith.divf %14, %15 : vector<16x1xf32>
    %cst_11 = arith.constant 9.99999974E-6 : f32
    %17 = vector.broadcast %cst_11 : f32 to vector<16x1xf32>
    %18 = arith.addf %16, %17 : vector<16x1xf32>
    %19 = math.rsqrt %18 : vector<16x1xf32>
    %20 = vector.broadcast %19 : vector<16x1xf32> to vector<16x512xf32>
    %21 = arith.mulf %11, %20 : vector<16x512xf32>
    %22 = vector.broadcast %3 : vector<1x512xf32> to vector<16x512xf32>
    %23 = arith.mulf %21, %22 : vector<16x512xf32>
    %24 = vector.broadcast %5 : vector<1x512xf32> to vector<16x512xf32>
    %25 = arith.addf %23, %24 : vector<16x512xf32>
    %c0_12 = arith.constant 0 : index
    %c0_13 = arith.constant 0 : index
    %c0_14 = arith.constant 0 : index
    %26 = vector.load %arg4[%c0_12, %c0_13, %c0_14] : memref<1x16x512xf32, #tpu.memory_space<vmem>>, vector<1x16x512xf32>
    %27 = vector.shape_cast %26 : vector<1x16x512xf32> to vector<16x512xf32>
    %28 = vector.shape_cast %25 : vector<16x512xf32> to vector<1x16x512xf32>
    tpu.vector_store %arg4[%c0_12, %c0_13, %c0_14], %28 {strides = array<i32>} : memref<1x16x512xf32, #tpu.memory_space<vmem>>, vector<1x16x512xf32>,
    return
  }
  func.func @transform_0(%arg0: i32) -> (i32, i32, i32) {
    %c0_i32 = arith.constant 0 : i32
    %c0_i32_0 = arith.constant 0 : i32
    %c0_i32_1 = arith.constant 0 : i32
    return %arg0, %c0_i32, %c0_i32_0 : i32, i32, i32
  }
  func.func @transform_1(%arg0: i32) -> (i32, i32, i32) {
    %c0_i32 = arith.constant 0 : i32
    %c0_i32_0 = arith.constant 0 : i32
    %c0_i32_1 = arith.constant 0 : i32
    return %arg0, %c0_i32, %c0_i32_0 : i32, i32, i32
  }
  func.func @transform_2(%arg0: i32) -> (i32, i32, i32) {
    %c0_i32 = arith.constant 0 : i32
    %c0_i32_0 = arith.constant 0 : i32
    %c0_i32_1 = arith.constant 0 : i32
    return %arg0, %c0_i32, %c0_i32_0 : i32, i32, i32
  }
  func.func @transform_3(%arg0: i32) -> (i32, i32, i32) {
    %c0_i32 = arith.constant 0 : i32
    %c0_i32_0 = arith.constant 0 : i32
    %c0_i32_1 = arith.constant 0 : i32
    return %arg0, %c0_i32, %c0_i32_0 : i32, i32, i32
  }
}

</mosaic_0001>

<bundles_post_ra>
// kernel: encoder_forward.3
= control target key start
LH: loop header
LB: loop body
LE: loop exit
PB: predicated region body
PF: predicated region fallthrough
CT: control target
= control target key end

     0   :  { %s468_s12 = smov 0   ;;  %s499_s0 = inlined_call_operand.vmem [shape: f32[2,16,512], index: 0, kind: input, shape index: {}]   ;;  %s500_s1 = inlined_call_operand.vmem [shape: f32[2,1,512], index: 1, kind: input, shape index: {}]   ;;  %s501_s2 = inlined_call_operand.vmem [shape: f32[2,1,512], index: 2, kind: input, shape index: {}]   ;;  %s502_s3 = inlined_call_operand.vmem [shape: f32[2,16,512], index: 3, kind: output, shape index: {}]  }
   0x1 LB: > { %s413_s13 = sadd.s32 4294967295, %s446_s12   ;;  %p417_p0 = scmp.ge.s32.totalorder %s446_s12, 1  ;;  %s446_s12 = sphi %s468_s12, %s13_s12  }
   0x2   : > { %p155_p1 = scmp.lt.s32.totalorder %s446_s12, 3 }
   0x4   : > { %p156_p2 = pnand %p417_p0, %p155_p1 }
   0x5   : > { %p187_p3 = scmp.lt.s32.totalorder (!%p156_p2), %s413_s13, 1  ;;  %v269_v42 = vlaneseq (!%p156_p2) }
   0x6   : > { %159 = sbr.rel (%p156_p2) target bundleno = 347 (0x15b), region = 32 }
   0x7   : > { %v270_v46 = vshrl.u32 (!%p156_p2), %v269_v42, 7 }
   0x9   : > { %v271_v48 = vsub.s32 (!%p156_p2), 0, %v270_v46  ;;  %v275_v49 = vsub.s32 (!%p156_p2), 1, %v270_v46  ;;  %v279_v50 = vsub.s32 (!%p156_p2), 2, %v270_v46  ;;  %v283_v51 = vsub.s32 (!%p156_p2), 3, %v270_v46 }
   0xd   : > { %s504_s13 = smov (!%p187_p3, %s413_s13), 1 }
   0xe   : > { %s426_s14 = sshll.u32 %s504_s13, 6  ;;  %s420_s18 = sshll.u32 %s504_s13, 2 }
   0xf   : > { %s191_s17 = scalar_lea.vmem %s499_s0, %s426_s14  ;;  %s195_s21 = scalar_lea.vmem %s500_s1, %s420_s18 }
  0x10   : > { %v205_v0 = vld [vmem:[%s191_s17] sm:$0xff]  ;;  %v206_v1 = vld [vmem:[%s191_s17 + $0x8] sm:$0xff]  ;;  %v207_v2 = vld [vmem:[%s191_s17 + $0x10] sm:$0xff]  ;;  %s199_s24 = scalar_lea.vmem %s501_s2, %s420_s18  ;;  %s204_s27 = scalar_lea.vmem %s502_s3, %s426_s14 }
  0x11   : > { %v215_v3 = vadd.f32 %v206_v1, %v205_v0  ;;  %v208_v4 = vld [vmem:[%s191_s17 + $0x18] sm:$0xff]  ;;  %v209_v5 = vld [vmem:[%s191_s17 + $0x20] sm:$0xff]  ;;  %v210_v6 = vld [vmem:[%s191_s17 + $0x28] sm:$0xff] }
  0x12   : > { %v211_v8 = vld [vmem:[%s191_s17 + $0x30] sm:$0xff]  ;;  %v220_v9 = vadd.f32 %v210_v6, %v209_v5  ;;  %v212_v11 = vld [vmem:[%s191_s17 + $0x38] sm:$0xff]  ;;  %v213_v52 = vld [vmem:[%s195_s21] sm:$0xf] }
  0x13   : > { %v216_v7 = vadd.f32 %v215_v3, %v207_v2  ;;  %v214_v53 = vld [vmem:[%s199_s24] sm:$0xf]  ;;  %v272_v54 = vrot.slane %v213_v52, %v271_v48  ;;  %v276_v55 = vrot.slane %v213_v52, %v275_v49  ;;  %v280_v56 = vrot.slane %v213_v52, %v279_v50 }
  0x14   : > { %v221_v12 = vadd.f32 %v220_v9, %v211_v8  ;;  %v284_v57 = vrot.slane %v213_v52, %v283_v51  ;;  %v301_v59 = vrot.slane %v214_v53, %v271_v48  ;;  %v305_v60 = vrot.slane %v214_v53, %v275_v49 }
  0x15   : > { %v217_v10 = vadd.f32 %v216_v7, %v208_v4  ;;  %v309_v61 = vrot.slane %v214_v53, %v279_v50  ;;  %v313_v62 = vrot.slane %v214_v53, %v283_v51 }
  0x16   : > { %v222_v13 = vadd.f32 %v221_v12, %v212_v11 }
  0x17   : > { %218 = vadd.xlane.f32.xlu0 %v217_v10 }
  0x1b   : > { %223 = vadd.xlane.f32.xlu0 %v222_v13 }
  0xa4   : > { %v219_v14 = vpop.xlane.xlu0 %218 }
  0xa5   : > { %v226_v15 = vmul.f32 0.001953125, %v219_v14 }
  0xa7   : > { %v228_v16 = vsub.f32 %v205_v0, %v226_v15  ;;  %v229_v17 = vsub.f32 %v206_v1, %v226_v15  ;;  %v230_v18 = vsub.f32 %v207_v2, %v226_v15  ;;  %v231_v20 = vsub.f32 %v208_v4, %v226_v15 }
  0xa8   : > { %v224_v19 = vpop.xlane.xlu0 %223 }
  0xa9   : > { %v227_v21 = vmul.f32 0.001953125, %v224_v19  ;;  %v236_v22 = vmul.f32 %v228_v16, %v228_v16  ;;  %v237_v23 = vmul.f32 %v229_v17, %v229_v17  ;;  %v238_v24 = vmul.f32 %v230_v18, %v230_v18 }
  0xaa   : > { %v239_v29 = vmul.f32 %v231_v20, %v231_v20 }
  0xab   : > { %v232_v25 = vsub.f32 %v209_v5, %v227_v21  ;;  %v233_v26 = vsub.f32 %v210_v6, %v227_v21  ;;  %v244_v27 = vadd.f32 %v237_v23, %v236_v22  ;;  %v234_v28 = vsub.f32 %v211_v8, %v227_v21 }
  0xac   : > { %v235_v31 = vsub.f32 %v212_v11, %v227_v21 }
  0xad   : > { %v245_v30 = vadd.f32 %v244_v27, %v238_v24  ;;  %v240_v32 = vmul.f32 %v232_v25, %v232_v25  ;;  %v241_v33 = vmul.f32 %v233_v26, %v233_v26  ;;  %v242_v35 = vmul.f32 %v234_v28, %v234_v28 }
  0xae   : > { %v243_v37 = vmul.f32 %v235_v31, %v235_v31 }
  0xaf   : > { %v246_v34 = vadd.f32 %v245_v30, %v239_v29  ;;  %v249_v36 = vadd.f32 %v241_v33, %v240_v32 }
  0xb1   : > { %247 = vadd.xlane.f32.xlu1 %v246_v34  ;;  %v250_v38 = vadd.f32 %v249_v36, %v242_v35 }
  0xb3   : > { %v251_v39 = vadd.f32 %v250_v38, %v243_v37 }
  0xb5   : > { %252 = vadd.xlane.f32.xlu1 %v251_v39 }
 0x13e   : > { %v248_v40 = vpop.xlane.xlu1 %247 }
 0x13f   : > { %v254_v41 = vmul.f32 0.001953125, %v248_v40 }
 0x141   : > { %v256_v43 = vadd.f32 1e-05, %v254_v41 }
 0x142   : > { %v253_v44 = vpop.xlane.xlu1 %252 }
 0x143   : > { %436 = vrsqrt.f32 %v256_v43  ;;  %v255_v45 = vmul.f32 0.001953125, %v253_v44 }
 0x145   : > { %v257_v47 = vadd.f32 1e-05, %v255_v45 }
 0x147   : > { %438 = vrsqrt.f32 %v257_v47 }
 0x14d   : > { %v437_v58 = vpop.eup %436 }
 0x14e   : > { %v260_v63 = vmul.f32 %v437_v58, %v228_v16  ;;  %v261_v0 = vmul.f32 %v437_v58, %v229_v17  ;;  %v262_v1 = vmul.f32 %v437_v58, %v230_v18  ;;  %v263_v2 = vmul.f32 %v437_v58, %v231_v20 }
 0x150   : > { %v289_v3 = vmul.f32 %v272_v54, %v260_v63  ;;  %v290_v4 = vmul.f32 %v276_v55, %v261_v0  ;;  %v291_v5 = vmul.f32 %v280_v56, %v262_v1  ;;  %v292_v6 = vmul.f32 %v284_v57, %v263_v2 }
 0x151   : > { %v439_v7 = vpop.eup %438 }
 0x152   : > { %v318_v8 = vadd.f32 %v301_v59, %v289_v3  ;;  %v319_v9 = vadd.f32 %v305_v60, %v290_v4  ;;  %v320_v10 = vadd.f32 %v309_v61, %v291_v5  ;;  %v321_v11 = vadd.f32 %v313_v62, %v292_v6 }
 0x153   : > { %v264_v12 = vmul.f32 %v439_v7, %v232_v25  ;;  %v265_v13 = vmul.f32 %v439_v7, %v233_v26  ;;  %v266_v14 = vmul.f32 %v439_v7, %v234_v28  ;;  %v267_v15 = vmul.f32 %v439_v7, %v235_v31 }
 0x154   : > { %326 = vst [vmem:[%s204_s27] sm:$0xff] %v318_v8  ;;  %327 = vst [vmem:[%s204_s27 + $0x8] sm:$0xff] %v319_v9 }
 0x155   : > { %328 = vst [vmem:[%s204_s27 + $0x10] sm:$0xff] %v320_v10  ;;  %329 = vst [vmem:[%s204_s27 + $0x18] sm:$0xff] %v321_v11  ;;  %v293_v16 = vmul.f32 %v272_v54, %v264_v12  ;;  %v294_v17 = vmul.f32 %v276_v55, %v265_v13  ;;  %v295_v18 = vmul.f32 %v280_v56, %v266_v14 }
 0x156   : > { %v296_v19 = vmul.f32 %v284_v57, %v267_v15 }
 0x157   : > { %v322_v20 = vadd.f32 %v301_v59, %v293_v16  ;;  %v323_v21 = vadd.f32 %v305_v60, %v294_v17  ;;  %v324_v22 = vadd.f32 %v309_v61, %v295_v18 }
 0x158   : > { %v325_v23 = vadd.f32 %v313_v62, %v296_v19 }
 0x159   : > { %330 = vst [vmem:[%s204_s27 + $0x20] sm:$0xff] %v322_v20  ;;  %331 = vst [vmem:[%s204_s27 + $0x28] sm:$0xff] %v323_v21 }
 0x15a   : > { %332 = vst [vmem:[%s204_s27 + $0x30] sm:$0xff] %v324_v22  ;;  %333 = vst [vmem:[%s204_s27 + $0x38] sm:$0xff] %v325_v23 }
 0x15b PF: > { %s13_s12 = sadd.s32 1, %s446_s12  }
 0x15c   : > { %p10_p4 = scmp.ge.s32.totalorder %s13_s12, 4  }
 0x15e   :  { %12 = sbr.rel (!%p10_p4) target bundleno = 1 (0x1), region = 68 }

// kernel: encoder_forward.2
= control target key start
LH: loop header
LB: loop body
LE: loop exit
PB: predicated region body
PF: predicated region fallthrough
CT: control target
= control target key end

     0   :  { %s15043_s0 = inlined_call_operand.vmem [shape: f32[2,16,512], index: 0, kind: input, shape index: {}, may-alias: {0,1}]   ;;  %s15044_s1 = inlined_call_operand.vmem [shape: f32[2,16,512], index: 1, kind: input, shape index: {}, may-alias: {0,1}]   ;;  %s15045_s2 = inlined_call_operand.hbm [shape: bf16[512,512], index: 2, kind: input, shape index: {}]   ;;  %s15046_s3 = inlined_call_operand.vmem [shape: f32[1,512], index: 3, kind: input, shape index: {}]   ;;  %s15047_s4 = inlined_call_operand.hbm [shape: bf16[512,1024], index: 4, kind: input, shape index: {}]   ;;  %s15048_s5 = inlined_call_operand.vmem [shape: f32[1,1024], index: 5, kind: input, shape index: {}]   ;;  %s15049_s6 = inlined_call_operand.hbm [shape: bf16[512,512], index: 6, kind: input, shape index: {}]   ;;  %s15050_s7 = inlined_call_operand.vmem [shape: f32[1,512], index: 7, kind: input, shape index: {}]   ;;  %s15051_s8 = inlined_call_operand.vmem [shape: f32[1,512], index: 8, kind: input, shape index: {}]   ;;  %s15052_s9 = inlined_call_operand.vmem [shape: f32[1,512], index: 9, kind: input, shape index: {}]   ;;  %s15053_s10 = inlined_call_operand.hbm [shape: bf16[512,1024], index: 10, kind: input, shape index: {}]   ;;  %s15054_s11 = inlined_call_operand.vmem [shape: f32[1,1024], index: 11, kind: input, shape index: {}]   ;;  %s15055_s12 = inlined_call_operand.hbm [shape: bf16[1024,512], index: 12, kind: input, shape index: {}]   ;;  %s15056_s13 = inlined_call_operand.vmem [shape: f32[1,512], index: 13, kind: input, shape index: {}]   ;;  %s15057_s14 = inlined_call_operand.vmem [shape: f32[1,512], index: 14, kind: input, shape index: {}]   ;;  %s15058_s15 = inlined_call_operand.vmem [shape: f32[1,512], index: 15, kind: input, shape index: {}]   ;;  %s15059_s16 = inlined_call_operand.vmem [shape: f32[2,16,512], index: 16, kind: output, shape index: {}]  }
   0x1   :  { %15063 = sst [smem:[#allocation15_spill]] %s15043_s0 }
   0x2   :  { %15064 = sst [smem:[#allocation16_spill]] %s15057_s14 }
   0x3   :  { %15065 = sst [smem:[#allocation17_spill]] %s15058_s15 }
   0x4   :  { %15066 = sst [smem:[#allocation18_spill]] %s15059_s16 }
   0x5   :  { %21 = vsyncpa [#allocation4], 0 }
   0x6   :  { %22 = vsyncpa [#allocation6], 0 }
   0x7   :  { %23 = vsyncpa [#allocation9], 0  ;;  %s14010_s21 = smov 0  }
   0x8 LB: > { %15067 = sst [smem:[#allocation14_spill]] %s13911_s21  ;;  %s13913_s22 = smov [#allocation5]   ;;  %s13911_s21 = sphi %s14010_s21, %s29_s21  }
   0x9   : > { %s436_s23 = sshll.u32 %s13913_s22, 4  ;;  %s14016_s24 = sadd.s32 4294967295, %s13911_s21   ;;  %s14021_s23 = int_to_ptr.vmem [resolvable:$true] %s436_s23 }
   0xa   : > { %p11391_p0 = scmp.ge.s32.totalorder %s13911_s21, 1  ;;  %p408_p1 = scmp.lt.s32.totalorder %s13911_s21, 3 }
   0xb   : > { %p15061_p2 = scmp.eq.s32.totalorder %s14016_s24, 0  ;;  %s13914_s26 = smov [#allocation8]  }
   0xc   : > { %p14023_p3 = pnand %p11391_p0, %p408_p1  ;;  %s474_s27 = sshll.u32 %s13914_s26, 4  ;;  %s14029_s27 = int_to_ptr.vmem [resolvable:$true] %s474_s27 }
   0xd   : > { %s13915_s29 = smov [#allocation3]   ;;  %s13753_s18 = scalar_lea.hbm %s15047_s4, 32768 }
   0xe   : > { %s15068_s25 = scalar_select %p14023_p3, 1, 0 }
   0xf   : > { %p12859_p4 = pneg %p14023_p3  ;;  %s420_s30 = sshll.u32 %s13915_s29, 4  ;;  %s14037_s30 = int_to_ptr.vmem [resolvable:$true] %s420_s30 }
  0x10   : > { %p13754_p6 = scmp.ne.s32.totalorder %s15047_s4, %s13753_s18  ;;  %p13760_p10 = scmp.lt.u32.totalorder %s13753_s18, %s15047_s4 }
  0x11   : > { %p14033_p5 = pnand %p15061_p2, %p12859_p4 }
  0x13   : > { %p14047_p7 = pneg %p14033_p5 }
  0x15   : > { %p13756_p8 = pnand %p14047_p7, %p13754_p6 }
  0x17   : > { %p13757_p9 = pneg %p13756_p8 }
  0x19   : > { %p13762_p11 = pnand %p13760_p10, %p13757_p9 }
  0x1b   : > { %13765 = shalt.err (!%p13762_p11)
}
  0x1c   : > { %s13766_s0 = scalar_lea.vmem %s14021_s23, 32768  ;;  %p13774_p1 = scmp.lt.s32.totalorder %s14021_s23, %s14021_s23 }
  0x1d   : > { %p13767_p12 = scmp.ne.s32.totalorder %s14021_s23, %s13766_s0  ;;  %p13775_p4 = scmp.lt.s32.totalorder %s13766_s0, %s13766_s0 }
  0x1f   : > { %p13769_p13 = pnand %p13767_p12, %p14047_p7  ;;  %p13776_p6 = por %p13775_p4, %p13774_p1 }
  0x21   : > { %p13770_p0 = pneg %p13769_p13 }
  0x23   : > { %p13777_p8 = pnand %p13776_p6, %p13770_p0 }
  0x25   : > { %13780 = shalt.err (!%p13777_p8)
}
  0x26   : > { %s13916_s17 = smov 512   ;;  %s13917_s18 = smov 32  }
  0x27   : > { %12865 = dma.hbm_to_vmem [thread:$0]  (!%p14033_p5), %s15047_s4, 32768, %s14021_s23, [#allocation6], %s13916_s17, %s13916_s17, %s13917_s18  }
  0x28   : > { %s13781_s21 = scalar_lea.hbm %s15053_s10, 32768 }
  0x29   : > { %p13782_p9 = scmp.ne.s32.totalorder %s15053_s10, %s13781_s21  ;;  %p13788_p12 = scmp.lt.u32.totalorder %s13781_s21, %s15053_s10 }
  0x2b   : > { %p13784_p10 = pnand %p13782_p9, %p14047_p7 }
  0x2d   : > { %p13785_p11 = pneg %p13784_p10 }
  0x2f   : > { %p13790_p13 = pnand %p13788_p12, %p13785_p11 }
  0x31   : > { %13793 = shalt.err (!%p13790_p13)
}
  0x32   : > { %s13794_s23 = scalar_lea.vmem %s14029_s27, 32768  ;;  %p13802_p6 = scmp.lt.s32.totalorder %s14029_s27, %s14029_s27 }
  0x33   : > { %p13795_p0 = scmp.ne.s32.totalorder %s14029_s27, %s13794_s23  ;;  %p13803_p8 = scmp.lt.s32.totalorder %s13794_s23, %s13794_s23 }
  0x35   : > { %p13797_p1 = pnand %p13795_p0, %p14047_p7  ;;  %p13804_p9 = por %p13803_p8, %p13802_p6 }
  0x37   : > { %p13798_p4 = pneg %p13797_p1 }
  0x39   : > { %p13805_p10 = pnand %p13804_p9, %p13798_p4 }
  0x3b   : > { %13808 = shalt.err (!%p13805_p10)
}
  0x3c   : > { %12871 = dma.hbm_to_vmem [thread:$0]  (!%p14033_p5), %s15053_s10, 32768, %s14029_s27, [#allocation9], %s13916_s17, %s13916_s17, %s13917_s18  }
  0x3d   : > { %s13809_s19 = scalar_lea.hbm %s15045_s2, 16384 }
  0x3e   : > { %p13810_p11 = scmp.ne.s32.totalorder %s15045_s2, %s13809_s19  ;;  %p13816_p0 = scmp.lt.u32.totalorder %s13809_s19, %s15045_s2 }
  0x40   : > { %p13812_p12 = pnand %p13810_p11, %p14047_p7 }
  0x42   : > { %p13813_p13 = pneg %p13812_p12 }
  0x44   : > { %p13818_p1 = pnand %p13816_p0, %p13813_p13 }
  0x46   : > { %13821 = shalt.err (!%p13818_p1)
}
  0x47   : > { %s13822_s27 = scalar_lea.vmem %s14037_s30, 16384  ;;  %p13830_p9 = scmp.lt.s32.totalorder %s14037_s30, %s14037_s30 }
  0x48   : > { %p13823_p4 = scmp.ne.s32.totalorder %s14037_s30, %s13822_s27  ;;  %p13831_p10 = scmp.lt.s32.totalorder %s13822_s27, %s13822_s27 }
  0x4a   : > { %p13825_p6 = pnand %p13823_p4, %p14047_p7  ;;  %p13832_p11 = por %p13831_p10, %p13830_p9 }
  0x4c   : > { %p13826_p8 = pneg %p13825_p6 }
  0x4e   : > { %p13833_p12 = pnand %p13832_p11, %p13826_p8 }
  0x50   : > { %13836 = shalt.err (!%p13833_p12)
}
  0x51   : > { %s13918_s17 = smov 256   ;;  %s13919_s18 = smov 16  }
  0x52   : > { %12862 = dma.hbm_to_vmem [thread:$0]  (!%p14033_p5), %s15045_s2, 16384, %s14037_s30, [#allocation4], %s13918_s17, %s13918_s17, %s13919_s18  }
  0x53   : > { %s13920_s15 = smov [#allocation7]   ;;  %s13921_s21 = smov [#allocation10]  }
  0x54   : > { %s452_s16 = sshll.u32 %s13920_s15, 4  ;;  %s490_s19 = sshll.u32 %s13921_s21, 4  ;;  %s453_s16 = int_to_ptr.vmem [resolvable:$true] %s452_s16  ;;  %s14117_s19 = int_to_ptr.vmem [resolvable:$true] %s490_s19 }
  0x55   : > { %s13837_s29 = scalar_lea.hbm %s15049_s6, 16384 }
  0x56   : > { %p13838_p13 = scmp.ne.s32.totalorder %s15049_s6, %s13837_s29  ;;  %p13844_p4 = scmp.lt.u32.totalorder %s13837_s29, %s15049_s6 }
  0x58   : > { %p13840_p0 = pnand %p13838_p13, %p14047_p7 }
  0x5a   : > { %p13841_p1 = pneg %p13840_p0 }
  0x5c   : > { %p13846_p6 = pnand %p13844_p4, %p13841_p1 }
  0x5e   : > { %13849 = shalt.err (!%p13846_p6)
}
  0x5f   : > { %s13850_s14 = scalar_lea.vmem %s453_s16, 16384  ;;  %p13858_p11 = scmp.lt.s32.totalorder %s453_s16, %s453_s16 }
  0x60   : > { %p13851_p8 = scmp.ne.s32.totalorder %s453_s16, %s13850_s14  ;;  %p13859_p12 = scmp.lt.s32.totalorder %s13850_s14, %s13850_s14 }
  0x62   : > { %p13853_p9 = pnand %p13851_p8, %p14047_p7  ;;  %p13860_p2 = por %p13859_p12, %p13858_p11 }
  0x64   : > { %p13854_p10 = pneg %p13853_p9 }
  0x66   : > { %p13861_p3 = pnand %p13860_p2, %p13854_p10 }
  0x68   : > { %13864 = shalt.err (!%p13861_p3)
}
  0x69   : > { %12868 = dma.hbm_to_vmem [thread:$0]  (!%p14033_p5), %s15049_s6, 16384, %s453_s16, [#allocation6], %s13918_s17, %s13918_s17, %s13919_s18  }
  0x6a   : > { %s13865_s29 = scalar_lea.hbm %s15055_s12, 32768 }
  0x6b   : > { %p13866_p13 = scmp.ne.s32.totalorder %s15055_s12, %s13865_s29  ;;  %p13872_p0 = scmp.lt.u32.totalorder %s13865_s29, %s15055_s12 }
  0x6d   : > { %p13868_p2 = pnand %p13866_p13, %p14047_p7 }
  0x6f   : > { %p13869_p3 = pneg %p13868_p2 }
  0x71   : > { %p13874_p1 = pnand %p13872_p0, %p13869_p3 }
  0x73   : > { %13877 = shalt.err (!%p13874_p1)
}
  0x74   : > { %s13878_s16 = scalar_lea.vmem %s14117_s19, 32768  ;;  %p13886_p9 = scmp.lt.s32.totalorder %s14117_s19, %s14117_s19 }
  0x75   : > { %p13879_p4 = scmp.ne.s32.totalorder %s14117_s19, %s13878_s16  ;;  %p13887_p10 = scmp.lt.s32.totalorder %s13878_s16, %s13878_s16 }
  0x77   : > { %p13881_p6 = pnand %p13879_p4, %p14047_p7  ;;  %p13888_p11 = por %p13887_p10, %p13886_p9 }
  0x79   : > { %p13882_p8 = pneg %p13881_p6 }
  0x7b   : > { %p13889_p12 = pnand %p13888_p11, %p13882_p8 }
  0x7d   : > { %13892 = shalt.err (!%p13889_p12)
}
  0x7e   : > { %12874 = dma.hbm_to_vmem [thread:$0]  (!%p14033_p5), %s15055_s12, 32768, %s14117_s19, [#allocation9], %s13918_s17, %s13918_s17, %s13919_s18  }
  0x7f   : > { %p15071_p13 = scmp.ne.s32.totalorder %s15068_s25, 0 }
  0x80   : > { %p15072_p7 = scmp.eq.s32.totalorder (!%p15071_p13), %s14016_s24, 0 }
  0x81   : > { %533 = sbr.rel (%p15071_p13) target bundleno = 3321 (0xcf9), region = 84 }
  0x88   : > { %13898 = dma.done.wait (%p15072_p7), [#allocation4], 16384   ;;  %p15073_p2 = pmov %p15072_p7 }
  0x8a   : > { %13900 = vsyncadd (%p15073_p2), [#allocation4], 4294950912  ;;  %p15074_p3 = pmov %p15073_p2 }
  0x8b   : > { %p15075_p0 = pmov %p15073_p2 }
  0x8c   : > { %13902 = dma.done.wait (%p15074_p3), [#allocation6], 49152  }
  0x8d   : > { %13904 = vsyncadd (%p15075_p0), [#allocation6], 4294918144  ;;  %p15076_p1 = pmov %p15075_p0 }
  0x8e   : > { %p15077_p5 = pmov %p15075_p0 }
  0x8f   : > { %13906 = dma.done.wait (%p15076_p1), [#allocation9], 65536  }
  0x90   : > { %13908 = vsyncadd (%p15077_p5), [#allocation9], 4294901760  ;;  %v12905_v0 = vld [vmem:[#allocation3 + $0x4] ss:$16 sps:$4 sm:$0xff]   ;;  %v12907_v1 = vld [vmem:[#allocation3 + $0xc] ss:$16 sps:$4 sm:$0xff]  }
  0x91   : > { %1436 = vmatprep.subr.bf16.mxu0 %v12905_v0  ;;  %v12909_v2 = vld [vmem:[#allocation3] ss:$16 sps:$4 sm:$0xff]   ;;  %v12910_v3 = vld [vmem:[#allocation3 + $0x8] ss:$16 sps:$4 sm:$0xff]   ;;  %1522 = vmatprep.subr.bf16.mxu1 %v12907_v1  ;;  %v12911_v4 = vld [vmem:[#allocation3 + $0x24] ss:$16 sps:$4 sm:$0xff]  }
  0x92   : > { %1437 = vmatpush1.bf16.msra.mxu0 %v12909_v2  ;;  %1523 = vmatpush1.bf16.msra.mxu1 %v12910_v3  ;;  %v12913_v5 = vld [vmem:[#allocation3 + $0x2c] ss:$16 sps:$4 sm:$0xff]   ;;  %v12915_v6 = vld [vmem:[#allocation3 + $0x20] ss:$16 sps:$4 sm:$0xff]   ;;  %v12916_v7 = vld [vmem:[#allocation3 + $0x28] ss:$16 sps:$4 sm:$0xff]  }
  0x93   : > { %1438 = vmatprep.subr.bf16.mxu0 %v12911_v4  ;;  %1524 = vmatprep.subr.bf16.mxu1 %v12913_v5  ;;  %v12917_v8 = vld [vmem:[#allocation3 + $0x44] ss:$16 sps:$4 sm:$0xff]   ;;  %v12919_v9 = vld [vmem:[#allocation3 + $0x4c] ss:$16 sps:$4 sm:$0xff]   ;;  %v12921_v10 = vld [vmem:[#allocation3 + $0x40] ss:$16 sps:$4 sm:$0xff]  }
  0x94   : > { %v12922_v11 = vld [vmem:[#allocation3 + $0x48] ss:$16 sps:$4 sm:$0xff]   ;;  %v12923_v12 = vld [vmem:[#allocation3 + $0x64] ss:$16 sps:$4 sm:$0xff]   ;;  %v12925_v13 = vld [vmem:[#allocation3 + $0x6c] ss:$16 sps:$4 sm:$0xff]  }
  0x95   : > { %v12927_v14 = vld [vmem:[#allocation3 + $0x60] ss:$16 sps:$4 sm:$0xff]   ;;  %v12928_v15 = vld [vmem:[#allocation3 + $0x68] ss:$16 sps:$4 sm:$0xff]   ;;  %v12929_v16 = vld [vmem:[#allocation3 + $0x84] ss:$16 sps:$4 sm:$0xff]  }
  0x96   : > { %1439 = vmatpush1.bf16.msra.mxu0 %v12915_v6  ;;  %1525 = vmatpush1.bf16.msra.mxu1 %v12916_v7  ;;  %v12931_v17 = vld [vmem:[#allocation3 + $0x8c] ss:$16 sps:$4 sm:$0xff]   ;;  %v12933_v18 = vld [vmem:[#allocation3 + $0x80] ss:$16 sps:$4 sm:$0xff]   ;;  %v12934_v19 = vld [vmem:[#allocation3 + $0x88] ss:$16 sps:$4 sm:$0xff]  }
  0x97   : > { %1440 = vmatprep.subr.bf16.mxu0 %v12917_v8  ;;  %1526 = vmatprep.subr.bf16.mxu1 %v12919_v9  ;;  %v12935_v20 = vld [vmem:[#allocation3 + $0xa4] ss:$16 sps:$4 sm:$0xff]   ;;  %v12937_v21 = vld [vmem:[#allocation3 + $0xac] ss:$16 sps:$4 sm:$0xff]   ;;  %v12939_v22 = vld [vmem:[#allocation3 + $0xa0] ss:$16 sps:$4 sm:$0xff]  }
  0x98   : > { %v12940_v23 = vld [vmem:[#allocation3 + $0xa8] ss:$16 sps:$4 sm:$0xff]   ;;  %v12941_v24 = vld [vmem:[#allocation3 + $0xc4] ss:$16 sps:$4 sm:$0xff]   ;;  %v12943_v25 = vld [vmem:[#allocation3 + $0xcc] ss:$16 sps:$4 sm:$0xff]  }
  0x99   : > { %v12945_v26 = vld [vmem:[#allocation3 + $0xc0] ss:$16 sps:$4 sm:$0xff]   ;;  %v12946_v27 = vld [vmem:[#allocation3 + $0xc8] ss:$16 sps:$4 sm:$0xff]   ;;  %v12947_v28 = vld [vmem:[#allocation3 + $0xe4] ss:$16 sps:$4 sm:$0xff]  }
  0x9a   : > { %1441 = vmatpush1.bf16.msra.mxu0 %v12921_v10  ;;  %1527 = vmatpush1.bf16.msra.mxu1 %v12922_v11  ;;  %v12949_v29 = vld [vmem:[#allocation3 + $0xec] ss:$16 sps:$4 sm:$0xff]   ;;  %v12951_v30 = vld [vmem:[#allocation3 + $0xe0] ss:$16 sps:$4 sm:$0xff]   ;;  %v12952_v31 = vld [vmem:[#allocation3 + $0xe8] ss:$16 sps:$4 sm:$0xff]  }
  0x9b   : > { %1442 = vmatprep.subr.bf16.mxu0 %v12923_v12  ;;  %1528 = vmatprep.subr.bf16.mxu1 %v12925_v13  ;;  %v12953_v32 = vld [vmem:[#allocation3 + $0x104] ss:$16 sps:$4 sm:$0xff]   ;;  %p605_p4 = scmp.lt.s32.totalorder %s14016_s24, 1  ;;  %v12955_v33 = vld [vmem:[#allocation3 + $0x10c] ss:$16 sps:$4 sm:$0xff]   ;;  %s15078_s18 = sld [smem:[#allocation15_spill]] }
  0x9c   : > { %v12957_v34 = vld [vmem:[#allocation3 + $0x100] ss:$16 sps:$4 sm:$0xff]   ;;  %v12958_v35 = vld [vmem:[#allocation3 + $0x108] ss:$16 sps:$4 sm:$0xff]   ;;  %v12959_v36 = vld [vmem:[#allocation3 + $0x124] ss:$16 sps:$4 sm:$0xff]  }
  0x9d   : > { %s14182_s25 = scalar_select %p605_p4, %s14016_s24, 1  ;;  %v12961_v37 = vld [vmem:[#allocation3 + $0x12c] ss:$16 sps:$4 sm:$0xff]   ;;  %v12963_v38 = vld [vmem:[#allocation3 + $0x120] ss:$16 sps:$4 sm:$0xff]   ;;  %vm13923_vm0 = vmmov 0  }
  0x9e   : > { %1443 = vmatpush1.bf16.msra.mxu0 %v12927_v14  ;;  %1529 = vmatpush1.bf16.msra.mxu1 %v12928_v15  ;;  %v12964_v39 = vld [vmem:[#allocation3 + $0x128] ss:$16 sps:$4 sm:$0xff]   ;;  %v12965_v40 = vld [vmem:[#allocation3 + $0x144] ss:$16 sps:$4 sm:$0xff]   ;;  %v12967_v41 = vld [vmem:[#allocation3 + $0x14c] ss:$16 sps:$4 sm:$0xff]  }
  0x9f   : > { %1444 = vmatprep.subr.bf16.mxu0 %v12929_v16  ;;  %1530 = vmatprep.subr.bf16.mxu1 %v12931_v17  ;;  %s12484_s28 = sshll.u32 %s14182_s25, 6  ;;  %v12969_v42 = vld [vmem:[#allocation3 + $0x140] ss:$16 sps:$4 sm:$0xff]   ;;  %v12970_v43 = vld [vmem:[#allocation3 + $0x148] ss:$16 sps:$4 sm:$0xff]   ;;  %s610_s21 = ssub.s32 1, %s14016_s24 }
  0xa0   : > { %v12971_v44 = vld [vmem:[#allocation3 + $0x164] ss:$16 sps:$4 sm:$0xff]   ;;  %v12973_v45 = vld [vmem:[#allocation3 + $0x16c] ss:$16 sps:$4 sm:$0xff]   ;;  %v12975_v48 = vld [vmem:[#allocation3 + $0x160] ss:$16 sps:$4 sm:$0xff]  }
  0xa1   : > { %s14190_s19 = scalar_lea.vmem %s15078_s18, %s12484_s28  ;;  %v12976_v49 = vld [vmem:[#allocation3 + $0x168] ss:$16 sps:$4 sm:$0xff]   ;;  %v12977_v51 = vld [vmem:[#allocation3 + $0x184] ss:$16 sps:$4 sm:$0xff]   ;;  %v12979_v52 = vld [vmem:[#allocation3 + $0x18c] ss:$16 sps:$4 sm:$0xff]  }
  0xa2   : > { %1445 = vmatpush1.bf16.msra.mxu0 %v12933_v18  ;;  %1531 = vmatpush1.bf16.msra.mxu1 %v12934_v19  ;;  %v623_v46 = vld [vmem:[%s14190_s19 + $0x8] sm:$0xff]  ;;  %v12981_v53 = vld [vmem:[#allocation3 + $0x180] ss:$16 sps:$4 sm:$0xff]   ;;  %v12983_v55 = vld [vmem:[#allocation3 + $0x1a4] ss:$16 sps:$4 sm:$0xff]   ;;  %p611_p6 = scmp.lt.s32.totalorder %s610_s21, 1 }
  0xa3   : > { %1446 = vmatprep.subr.bf16.mxu0 %v12935_v20  ;;  %1532 = vmatprep.subr.bf16.mxu1 %v12937_v21  ;;  %v627_v47 = vld [vmem:[%s14190_s19 + $0x28] sm:$0xff]  ;;  %v12987_v57 = vld [vmem:[#allocation3 + $0x1a0] ss:$16 sps:$4 sm:$0xff]   ;;  %v12989_v59 = vld [vmem:[#allocation3 + $0x1c4] ss:$16 sps:$4 sm:$0xff]   ;;  %vm3534_vm1 = vcmask 523264  }
  0xa4   : > { %v639_v50 = vpack.c.bf16 %v627_v47, %v623_v46  ;;  %v12982_v54 = vld [vmem:[#allocation3 + $0x188] ss:$16 sps:$4 sm:$0xff]   ;;  %v12985_v56 = vld [vmem:[#allocation3 + $0x1ac] ss:$16 sps:$4 sm:$0xff]   ;;  %v12993_v61 = vld [vmem:[#allocation3 + $0x1c0] ss:$16 sps:$4 sm:$0xff]  }
  0xa5   : > { %v12988_v58 = vld [vmem:[#allocation3 + $0x1a8] ss:$16 sps:$4 sm:$0xff]   ;;  %v12991_v60 = vld [vmem:[#allocation3 + $0x1cc] ss:$16 sps:$4 sm:$0xff]   ;;  %v12995_v63 = vld [vmem:[#allocation3 + $0x1e4] ss:$16 sps:$4 sm:$0xff]  }
  0xa6   : > { %1447 = vmatpush1.bf16.msra.mxu0 %v12939_v22  ;;  %1533 = vmatpush1.bf16.msra.mxu1 %v12940_v23  ;;  %v12994_v62 = vld [vmem:[#allocation3 + $0x1c8] ss:$16 sps:$4 sm:$0xff]   ;;  %v12997_v0 = vld [vmem:[#allocation3 + $0x1ec] ss:$16 sps:$4 sm:$0xff]   ;;  %v12999_v1 = vld [vmem:[#allocation3 + $0x1e0] ss:$16 sps:$4 sm:$0xff]  }
  0xa7   : > { %1448 = vmatprep.subr.bf16.mxu0 %v12941_v24  ;;  %1534 = vmatprep.subr.bf16.mxu1 %v12943_v25  ;;  %v13000_v2 = vld [vmem:[#allocation3 + $0x1e8] ss:$16 sps:$4 sm:$0xff]   ;;  %v13003_v3 = vld [vmem:[#allocation3 + $0x204] ss:$16 sps:$4 sm:$0xff]   ;;  %v13006_v6 = vld [vmem:[#allocation3 + $0x20c] ss:$16 sps:$4 sm:$0xff]  }
  0xa8   : > { %1468 = vmatprep.mubr.bf16.mxu0 %v639_v50  ;;  %1554 = vmatprep.mubr.bf16.mxu1 %v639_v50  ;;  %v622_v4 = vld [vmem:[%s14190_s19] sm:$0xff]  ;;  %v13004_v8 = vld [vmem:[#allocation3 + $0x208] ss:$16 sps:$4 sm:$0xff]   ;;  %v13012_v11 = vld [vmem:[#allocation3 + $0x22c] ss:$16 sps:$4 sm:$0xff]   ;;  %s15084_s21 = smov (!%p611_p6, %s610_s21), 1 }
  0xa9   : > { %v626_v5 = vld [vmem:[%s14190_s19 + $0x20] sm:$0xff]  ;;  %v13010_v13 = vld [vmem:[#allocation3 + $0x228] ss:$16 sps:$4 sm:$0xff]   ;;  %v13018_v15 = vld [vmem:[#allocation3 + $0x24c] ss:$16 sps:$4 sm:$0xff]   ;;  %s12485_s24 = sshll.u32 %s15084_s21, 6 }
  0xaa   : > { %1449 = vmatpush1.bf16.msra.mxu0 %v12945_v26  ;;  %1535 = vmatpush1.bf16.msra.mxu1 %v12946_v27  ;;  %v13001_v7 = vld [vmem:[#allocation3 + $0x200] ss:$16 sps:$4 sm:$0xff]   ;;  %v638_v9 = vpack.c.bf16 %v626_v5, %v622_v4  ;;  %v13009_v10 = vld [vmem:[#allocation3 + $0x224] ss:$16 sps:$4 sm:$0xff]   ;;  %v13016_v17 = vld [vmem:[#allocation3 + $0x248] ss:$16 sps:$4 sm:$0xff]   ;;  %s14204_s29 = scalar_lea.vmem %s15044_s1, %s12485_s24 }
  0xab   : > { %1450 = vmatprep.subr.bf16.mxu0 %v12947_v28  ;;  %1536 = vmatprep.subr.bf16.mxu1 %v12949_v29  ;;  %v13007_v12 = vld [vmem:[#allocation3 + $0x220] ss:$16 sps:$4 sm:$0xff]   ;;  %v13015_v14 = vld [vmem:[#allocation3 + $0x244] ss:$16 sps:$4 sm:$0xff]   ;;  %v13024_v19 = vld [vmem:[#allocation3 + $0x26c] ss:$16 sps:$4 sm:$0xff]  }
  0xac   : > { %v13013_v16 = vld [vmem:[#allocation3 + $0x240] ss:$16 sps:$4 sm:$0xff]   ;;  %v13021_v18 = vld [vmem:[#allocation3 + $0x264] ss:$16 sps:$4 sm:$0xff]   ;;  %v13022_v21 = vld [vmem:[#allocation3 + $0x268] ss:$16 sps:$4 sm:$0xff]  }
  0xad   : > { %v13019_v20 = vld [vmem:[#allocation3 + $0x260] ss:$16 sps:$4 sm:$0xff]   ;;  %v13027_v22 = vld [vmem:[#allocation3 + $0x284] ss:$16 sps:$4 sm:$0xff]   ;;  %v13030_v23 = vld [vmem:[#allocation3 + $0x28c] ss:$16 sps:$4 sm:$0xff]  }
  0xae   : > { %1451 = vmatpush1.bf16.msra.mxu0 %v12951_v30  ;;  %1537 = vmatpush1.bf16.msra.mxu1 %v12952_v31  ;;  %v13025_v24 = vld [vmem:[#allocation3 + $0x280] ss:$16 sps:$4 sm:$0xff]   ;;  %v13028_v25 = vld [vmem:[#allocation3 + $0x288] ss:$16 sps:$4 sm:$0xff]   ;;  %v13033_v26 = vld [vmem:[#allocation3 + $0x2a4] ss:$16 sps:$4 sm:$0xff]  }
  0xaf   : > { %1452 = vmatprep.subr.bf16.mxu0 %v12953_v32  ;;  %1538 = vmatprep.subr.bf16.mxu1 %v12955_v33  ;;  %v13036_v27 = vld [vmem:[#allocation3 + $0x2ac] ss:$16 sps:$4 sm:$0xff]   ;;  %v13031_v28 = vld [vmem:[#allocation3 + $0x2a0] ss:$16 sps:$4 sm:$0xff]   ;;  %v13034_v29 = vld [vmem:[#allocation3 + $0x2a8] ss:$16 sps:$4 sm:$0xff]  }
  0xb0   : > { %v13039_v30 = vld [vmem:[#allocation3 + $0x2c4] ss:$16 sps:$4 sm:$0xff]   ;;  %v13042_v31 = vld [vmem:[#allocation3 + $0x2cc] ss:$16 sps:$4 sm:$0xff]   ;;  %v13055_v47 = vld [vmem:[#allocation3 + $0x320] ss:$16 sps:$4 sm:$0xff]  }
  0xb1   : > { %v625_v32 = vld [vmem:[%s14190_s19 + $0x18] sm:$0xff]  ;;  %v13093_v5 = vld [vmem:[#allocation3 + $0x3e4] ss:$16 sps:$4 sm:$0xff]   ;;  %s13924_s16 = smov 64   ;;  %vm3611_vm2 = vcmask 64512   ;;  %vm3867_vm3 = vcmask 1048064  }
  0xb2   : > { %1453 = vmatpush1.bf16.msra.mxu0 %v12957_v34  ;;  %1539 = vmatpush1.bf16.msra.mxu1 %v12958_v35  ;;  %v629_v33 = vld [vmem:[%s14190_s19 + $0x38] sm:$0xff]  ;;  %v13037_v34 = vld [vmem:[#allocation3 + $0x2c0] ss:$16 sps:$4 sm:$0xff]   ;;  %s15079_s27 = sld [smem:[#allocation16_spill]]  ;;  %s15081_s22 = sld [smem:[#allocation18_spill]] }
  0xb3   : > { %1454 = vmatprep.subr.bf16.mxu0 %v12959_v36  ;;  %1540 = vmatprep.subr.bf16.mxu1 %v12961_v37  ;;  %v13040_v35 = vld [vmem:[#allocation3 + $0x2c8] ss:$16 sps:$4 sm:$0xff]   ;;  %v641_v36 = vpack.c.bf16 %v629_v33, %v625_v32  ;;  %v13045_v37 = vld [vmem:[#allocation3 + $0x2e4] ss:$16 sps:$4 sm:$0xff]   ;;  %v13060_v46 = vld [vmem:[#allocation3 + $0x32c] ss:$16 sps:$4 sm:$0xff]  }
  0xb4   : > { %v13066_v50 = vld [vmem:[#allocation3 + $0x34c] ss:$16 sps:$4 sm:$0xff]   ;;  %v13088_v4 = vld [vmem:[#allocation3 + $0x3c8] ss:$16 sps:$4 sm:$0xff]  }
  0xb6   : > { %1455 = vmatpush1.bf16.msra.mxu0 %v12963_v38  ;;  %1541 = vmatpush1.bf16.msra.mxu1 %v12964_v39  ;;  %v13048_v38 = vld [vmem:[#allocation3 + $0x2ec] ss:$16 sps:$4 sm:$0xff]   ;;  %v13043_v39 = vld [vmem:[#allocation3 + $0x2e0] ss:$16 sps:$4 sm:$0xff]  }
  0xb7   : > { %1456 = vmatprep.subr.bf16.mxu0 %v12965_v40  ;;  %1542 = vmatprep.subr.bf16.mxu1 %v12967_v41  ;;  %v13046_v40 = vld [vmem:[#allocation3 + $0x2e8] ss:$16 sps:$4 sm:$0xff]   ;;  %v13051_v41 = vld [vmem:[#allocation3 + $0x304] ss:$16 sps:$4 sm:$0xff]  }
  0xb8   : > { %s621_s17 = scalar_lea.vmem %s15081_s22, %s12484_s28 }
  0xba   : > { %1457 = vmatpush1.bf16.msra.mxu0 %v12969_v42  ;;  %1543 = vmatpush1.bf16.msra.mxu1 %v12970_v43  ;;  %v13054_v42 = vld [vmem:[#allocation3 + $0x30c] ss:$16 sps:$4 sm:$0xff]   ;;  %v13049_v43 = vld [vmem:[#allocation3 + $0x300] ss:$16 sps:$4 sm:$0xff]  }
  0xbb   : > { %1458 = vmatprep.subr.bf16.mxu0 %v12971_v44  ;;  %1544 = vmatprep.subr.bf16.mxu1 %v12973_v45  ;;  %v13052_v44 = vld [vmem:[#allocation3 + $0x308] ss:$16 sps:$4 sm:$0xff]   ;;  %v13057_v45 = vld [vmem:[#allocation3 + $0x324] ss:$16 sps:$4 sm:$0xff]  }
  0xbe   : > { %1459 = vmatpush1.bf16.msra.mxu0 %v12975_v48  ;;  %1545 = vmatpush1.bf16.msra.mxu1 %v12976_v49  ;;  %v13058_v48 = vld [vmem:[#allocation3 + $0x328] ss:$16 sps:$4 sm:$0xff]   ;;  %v13063_v49 = vld [vmem:[#allocation3 + $0x344] ss:$16 sps:$4 sm:$0xff]  }
  0xbf   : > { %1460 = vmatprep.subr.bf16.mxu0 %v12977_v51  ;;  %1546 = vmatprep.subr.bf16.mxu1 %v12979_v52  ;;  %v13061_v51 = vld [vmem:[#allocation3 + $0x340] ss:$16 sps:$4 sm:$0xff]   ;;  %v13064_v52 = vld [vmem:[#allocation3 + $0x348] ss:$16 sps:$4 sm:$0xff]  }
  0xc2   : > { %1461 = vmatpush1.bf16.msra.mxu0 %v12981_v53  ;;  %1547 = vmatpush1.bf16.msra.mxu1 %v12982_v54  ;;  %v13069_v53 = vld [vmem:[#allocation3 + $0x364] ss:$16 sps:$4 sm:$0xff]   ;;  %v13072_v54 = vld [vmem:[#allocation3 + $0x36c] ss:$16 sps:$4 sm:$0xff]  }
  0xc3   : > { %1462 = vmatprep.subr.bf16.mxu0 %v12983_v55  ;;  %1548 = vmatprep.subr.bf16.mxu1 %v12985_v56  ;;  %v13067_v55 = vld [vmem:[#allocation3 + $0x360] ss:$16 sps:$4 sm:$0xff]   ;;  %v13070_v56 = vld [vmem:[#allocation3 + $0x368] ss:$16 sps:$4 sm:$0xff]  }
  0xc6   : > { %1463 = vmatpush1.bf16.msra.mxu0 %v12987_v57  ;;  %1549 = vmatpush1.bf16.msra.mxu1 %v12988_v58  ;;  %v13075_v57 = vld [vmem:[#allocation3 + $0x384] ss:$16 sps:$4 sm:$0xff]   ;;  %v13078_v58 = vld [vmem:[#allocation3 + $0x38c] ss:$16 sps:$4 sm:$0xff]  }
  0xc7   : > { %1464 = vmatprep.subr.bf16.mxu0 %v12989_v59  ;;  %1550 = vmatprep.subr.bf16.mxu1 %v12991_v60  ;;  %v13073_v59 = vld [vmem:[#allocation3 + $0x380] ss:$16 sps:$4 sm:$0xff]   ;;  %v13076_v60 = vld [vmem:[#allocation3 + $0x388] ss:$16 sps:$4 sm:$0xff]  }
  0xca   : > { %1465 = vmatpush1.bf16.msra.mxu0 %v12993_v61  ;;  %1551 = vmatpush1.bf16.msra.mxu1 %v12994_v62  ;;  %v13081_v61 = vld [vmem:[#allocation3 + $0x3a4] ss:$16 sps:$4 sm:$0xff]   ;;  %v13084_v62 = vld [vmem:[#allocation3 + $0x3ac] ss:$16 sps:$4 sm:$0xff]  }
  0xcb   : > { %1466 = vmatprep.subr.bf16.mxu0 %v12995_v63  ;;  %1552 = vmatprep.subr.bf16.mxu1 %v12997_v0  ;;  %v13079_v63 = vld [vmem:[#allocation3 + $0x3a0] ss:$16 sps:$4 sm:$0xff]   ;;  %v13082_v0 = vld [vmem:[#allocation3 + $0x3a8] ss:$16 sps:$4 sm:$0xff]  }
  0xce   : > { %1467 = vmatpush1.bf16.msra.mxu0 %v12999_v1  ;;  %1553 = vmatpush1.bf16.msra.mxu1 %v13000_v2  ;;  %v13087_v1 = vld [vmem:[#allocation3 + $0x3c4] ss:$16 sps:$4 sm:$0xff]   ;;  %v13090_v2 = vld [vmem:[#allocation3 + $0x3cc] ss:$16 sps:$4 sm:$0xff]  }
  0xcf   : > { %1479 = vmatprep.subr.bf16.mxu0 %v13003_v3  ;;  %1565 = vmatprep.subr.bf16.mxu1 %v13006_v6  ;;  %v13085_v3 = vld [vmem:[#allocation3 + $0x3c0] ss:$16 sps:$4 sm:$0xff]   ;;  %v13096_v6 = vld [vmem:[#allocation3 + $0x3ec] ss:$16 sps:$4 sm:$0xff]  }
  0xd1   : > { %1469 = vmatmul.mubr.bf16.vlgmr.msra.gmra.mrb[0].mxu0 %v638_v9  ;;  %1555 = vmatmul.mubr.bf16.vlgmr.msra.gmra.mrb[0].mxu1 %v638_v9  ;;  %v1609_v9 = vld [vmem:[#allocation5 + $0x8] sm:$0xff] }
  0xd2   : > { %1480 = vmatpush1.bf16.msra.mxu0 %v13001_v7  ;;  %1566 = vmatpush1.bf16.msra.mxu1 %v13004_v8  ;;  %v1608_v7 = vld [vmem:[#allocation5] sm:$0xff] }
  0xd3   : > { %1481 = vmatprep.subr.bf16.mxu0 %v13009_v10  ;;  %1567 = vmatprep.subr.bf16.mxu1 %v13012_v11  ;;  %v1612_v8 = vld [vmem:[#allocation5 + $0x20] sm:$0xff]  ;;  %v1613_v10 = vld [vmem:[#allocation5 + $0x28] sm:$0xff] }
  0xd4   : > { %1511 = vmatprep.mubr.bf16.mxu0 %v641_v36  ;;  %1597 = vmatprep.mubr.bf16.mxu1 %v641_v36  ;;  %v13091_v11 = vld [vmem:[#allocation3 + $0x3e0] ss:$16 sps:$4 sm:$0xff]  }
  0xd6   : > { %1482 = vmatpush1.bf16.msra.mxu0 %v13007_v12  ;;  %1568 = vmatpush1.bf16.msra.mxu1 %v13010_v13  ;;  %v13094_v12 = vld [vmem:[#allocation3 + $0x3e8] ss:$16 sps:$4 sm:$0xff]   ;;  %v624_v13 = vld [vmem:[%s14190_s19 + $0x10] sm:$0xff] }
  0xd7   : > { %1483 = vmatprep.subr.bf16.mxu0 %v13015_v14  ;;  %1569 = vmatprep.subr.bf16.mxu1 %v13018_v15  ;;  %v628_v14 = vld [vmem:[%s14190_s19 + $0x30] sm:$0xff]  ;;  %v11539_v15 = vcombine.high %v1608_v7, %v1612_v8 }
  0xda   : > { %1484 = vmatpush1.bf16.msra.mxu0 %v13013_v16  ;;  %1570 = vmatpush1.bf16.msra.mxu1 %v13016_v17  ;;  %v11541_v16 = vcombine.high %v1609_v9, %v1613_v10  ;;  %v1616_v17 = vld [vmem:[#allocation5 + $0x40] sm:$0xff] }
  0xdb   : > { %1485 = vmatprep.subr.bf16.mxu0 %v13021_v18  ;;  %1571 = vmatprep.subr.bf16.mxu1 %v13024_v19  ;;  %v1620_v18 = vld [vmem:[#allocation5 + $0x60] sm:$0xff]  ;;  %v1617_v19 = vld [vmem:[#allocation5 + $0x48] sm:$0xff] }
  0xdc   : > { %v11546_v33 = vcombine.low %v1616_v17, %v1620_v18 }
  0xde   : > { %1486 = vmatpush1.bf16.msra.mxu0 %v13019_v20  ;;  %1572 = vmatpush1.bf16.msra.mxu1 %v13022_v21  ;;  %v1621_v20 = vld [vmem:[#allocation5 + $0x68] sm:$0xff]  ;;  %v640_v21 = vpack.c.bf16 %v628_v14, %v624_v13 }
  0xdf   : > { %1487 = vmatprep.subr.bf16.mxu0 %v13027_v22  ;;  %1573 = vmatprep.subr.bf16.mxu1 %v13030_v23  ;;  %v631_v22 = vld [vmem:[%s14204_s29 + $0x8] sm:$0xff] }
  0xe0   : > { %v635_v23 = vld [vmem:[%s14204_s29 + $0x28] sm:$0xff] }
  0xe1   : > { %v14208_v32 = vpack.c.bf16 %v635_v23, %v631_v22  ;;  %v1673_v13 = vld [vmem:[#allocation5 + $0x208] sm:$0xff] }
  0xe2   : > { %1488 = vmatpush1.bf16.msra.mxu0 %v13025_v24  ;;  %1574 = vmatpush1.bf16.msra.mxu1 %v13028_v25  ;;  %v11538_v24 = vcombine.low %v1608_v7, %v1612_v8  ;;  %v11540_v25 = vcombine.low %v1609_v9, %v1613_v10  ;;  %v1677_v14 = vld [vmem:[#allocation5 + $0x228] sm:$0xff] }
  0xe3   : > { %1489 = vmatprep.subr.bf16.mxu0 %v13033_v26  ;;  %1575 = vmatprep.subr.bf16.mxu1 %v13036_v27  ;;  %v11547_v26 = vcombine.high %v1616_v17, %v1620_v18  ;;  %v11549_v27 = vcombine.high %v1617_v19, %v1621_v20  ;;  %v1685_v22 = vld [vmem:[#allocation5 + $0x268] sm:$0xff] }
  0xe6   : > { %1490 = vmatpush1.bf16.msra.mxu0 %v13031_v28  ;;  %1576 = vmatpush1.bf16.msra.mxu1 %v13034_v29  ;;  %v1624_v28 = vld [vmem:[#allocation5 + $0x80] sm:$0xff] }
  0xe7   : > { %1491 = vmatprep.subr.bf16.mxu0 %v13039_v30  ;;  %1577 = vmatprep.subr.bf16.mxu1 %v13042_v31  ;;  %v1628_v29 = vld [vmem:[#allocation5 + $0xa0] sm:$0xff]  ;;  %v1625_v30 = vld [vmem:[#allocation5 + $0x88] sm:$0xff] }
  0xe8   : > { %v1629_v31 = vld [vmem:[#allocation5 + $0xa8] sm:$0xff] }
  0xe9   : > { %v11557_v36 = vcombine.high %v1625_v30, %v1629_v31 }
  0xea   : > { %1492 = vmatpush1.bf16.msra.mxu0 %v13037_v34  ;;  %1578 = vmatpush1.bf16.msra.mxu1 %v13040_v35  ;;  %v11548_v34 = vcombine.low %v1617_v19, %v1621_v20  ;;  %v11555_v35 = vcombine.high %v1624_v28, %v1628_v29  ;;  %v1680_v19 = vld [vmem:[#allocation5 + $0x240] sm:$0xff] }
  0xeb   : > { %1493 = vmatprep.subr.bf16.mxu0 %v13045_v37  ;;  %1579 = vmatprep.subr.bf16.mxu1 %v13048_v38  ;;  %v1632_v37 = vld [vmem:[#allocation5 + $0xc0] sm:$0xff] }
  0xec   : > { %v1636_v38 = vld [vmem:[#allocation5 + $0xe0] sm:$0xff] }
  0xed   : > { %v1684_v20 = vld [vmem:[#allocation5 + $0x260] sm:$0xff] }
  0xee   : > { %1494 = vmatpush1.bf16.msra.mxu0 %v13043_v39  ;;  %1580 = vmatpush1.bf16.msra.mxu1 %v13046_v40  ;;  %v1633_v39 = vld [vmem:[#allocation5 + $0xc8] sm:$0xff] }
  0xef   : > { %1495 = vmatprep.subr.bf16.mxu0 %v13051_v41  ;;  %1581 = vmatprep.subr.bf16.mxu1 %v13054_v42  ;;  %v1637_v40 = vld [vmem:[#allocation5 + $0xe8] sm:$0xff]  ;;  %v11554_v41 = vcombine.low %v1624_v28, %v1628_v29  ;;  %v11556_v42 = vcombine.low %v1625_v30, %v1629_v31  ;;  %v1692_v28 = vld [vmem:[#allocation5 + $0x2a0] sm:$0xff]  ;;  %v11611_v31 = vcombine.high %v1680_v19, %v1684_v20 }
  0xf0   : > { %v1689_v29 = vld [vmem:[#allocation5 + $0x288] sm:$0xff] }
  0xf1   : > { %v1693_v30 = vld [vmem:[#allocation5 + $0x2a8] sm:$0xff] }
  0xf2   : > { %1496 = vmatpush1.bf16.msra.mxu0 %v13049_v43  ;;  %1582 = vmatpush1.bf16.msra.mxu1 %v13052_v44  ;;  %v1640_v43 = vld [vmem:[#allocation5 + $0x100] sm:$0xff] }
  0xf3   : > { %1497 = vmatprep.subr.bf16.mxu0 %v13057_v45  ;;  %1583 = vmatprep.subr.bf16.mxu1 %v13060_v46  ;;  %v1644_v44 = vld [vmem:[#allocation5 + $0x120] sm:$0xff]  ;;  %v1641_v45 = vld [vmem:[#allocation5 + $0x108] sm:$0xff] }
  0xf4   : > { %v1645_v46 = vld [vmem:[#allocation5 + $0x128] sm:$0xff] }
  0xf6   : > { %1498 = vmatpush1.bf16.msra.mxu0 %v13055_v47  ;;  %1584 = vmatpush1.bf16.msra.mxu1 %v13058_v48  ;;  %v11563_v47 = vcombine.high %v1632_v37, %v1636_v38  ;;  %v11565_v48 = vcombine.high %v1633_v39, %v1637_v40 }
  0xf7   : > { %1499 = vmatprep.subr.bf16.mxu0 %v13063_v49  ;;  %1585 = vmatprep.subr.bf16.mxu1 %v13066_v50  ;;  %v11562_v49 = vcombine.low %v1632_v37, %v1636_v38  ;;  %v11564_v50 = vcombine.low %v1633_v39, %v1637_v40  ;;  %v1700_v37 = vld [vmem:[#allocation5 + $0x2e0] sm:$0xff]  ;;  %v1697_v38 = vld [vmem:[#allocation5 + $0x2c8] sm:$0xff] }
  0xf8   : > { %v1701_v39 = vld [vmem:[#allocation5 + $0x2e8] sm:$0xff] }
  0xfa   : > { %1500 = vmatpush1.bf16.msra.mxu0 %v13061_v51  ;;  %1586 = vmatpush1.bf16.msra.mxu1 %v13064_v52  ;;  %v1648_v51 = vld [vmem:[#allocation5 + $0x140] sm:$0xff] }
  0xfb   : > { %1501 = vmatprep.subr.bf16.mxu0 %v13069_v53  ;;  %1587 = vmatprep.subr.bf16.mxu1 %v13072_v54  ;;  %v1652_v52 = vld [vmem:[#allocation5 + $0x160] sm:$0xff]  ;;  %v1649_v53 = vld [vmem:[#allocation5 + $0x148] sm:$0xff] }
  0xfc   : > { %v1653_v54 = vld [vmem:[#allocation5 + $0x168] sm:$0xff] }
  0xfe   : > { %1502 = vmatpush1.bf16.msra.mxu0 %v13067_v55  ;;  %1588 = vmatpush1.bf16.msra.mxu1 %v13070_v56  ;;  %v11571_v55 = vcombine.high %v1640_v43, %v1644_v44  ;;  %v11573_v56 = vcombine.high %v1641_v45, %v1645_v46 }
  0xff   : > { %1503 = vmatprep.subr.bf16.mxu0 %v13075_v57  ;;  %1589 = vmatprep.subr.bf16.mxu1 %v13078_v58  ;;  %v11570_v57 = vcombine.low %v1640_v43, %v1644_v44  ;;  %v11572_v58 = vcombine.low %v1641_v45, %v1645_v46  ;;  %v11620_v43 = vcombine.low %v1689_v29, %v1693_v30  ;;  %v1704_v44 = vld [vmem:[#allocation5 + $0x300] sm:$0xff]  ;;  %v1705_v46 = vld [vmem:[#allocation5 + $0x308] sm:$0xff] }
 0x100   : > { %v1708_v45 = vld [vmem:[#allocation5 + $0x320] sm:$0xff] }
 0x102   : > { %1504 = vmatpush1.bf16.msra.mxu0 %v13073_v59  ;;  %1590 = vmatpush1.bf16.msra.mxu1 %v13076_v60  ;;  %v1656_v59 = vld [vmem:[#allocation5 + $0x180] sm:$0xff] }
 0x103   : > { %1505 = vmatprep.subr.bf16.mxu0 %v13081_v61  ;;  %1591 = vmatprep.subr.bf16.mxu1 %v13084_v62  ;;  %v1660_v60 = vld [vmem:[#allocation5 + $0x1a0] sm:$0xff]  ;;  %v1657_v61 = vld [vmem:[#allocation5 + $0x188] sm:$0xff] }
 0x104   : > { %v1661_v62 = vld [vmem:[#allocation5 + $0x1a8] sm:$0xff]  ;;  %v11587_v7 = vcombine.high %v1656_v59, %v1660_v60  ;;  %v11586_v9 = vcombine.low %v1656_v59, %v1660_v60  ;;  %v1720_v60 = vld [vmem:[#allocation5 + $0x380] sm:$0xff] }
 0x105   : > { %v11589_v8 = vcombine.high %v1657_v61, %v1661_v62  ;;  %v11588_v10 = vcombine.low %v1657_v61, %v1661_v62  ;;  %v1724_v61 = vld [vmem:[#allocation5 + $0x3a0] sm:$0xff]  ;;  %v1721_v62 = vld [vmem:[#allocation5 + $0x388] sm:$0xff] }
 0x106   : > { %1506 = vmatpush1.bf16.msra.mxu0 %v13079_v63  ;;  %1592 = vmatpush1.bf16.msra.mxu1 %v13082_v0  ;;  %v11579_v63 = vcombine.high %v1648_v51, %v1652_v52  ;;  %v11581_v0 = vcombine.high %v1649_v53, %v1653_v54 }
 0x107   : > { %1507 = vmatprep.subr.bf16.mxu0 %v13087_v1  ;;  %1593 = vmatprep.subr.bf16.mxu1 %v13090_v2  ;;  %v11578_v1 = vcombine.low %v1648_v51, %v1652_v52  ;;  %v11580_v2 = vcombine.low %v1649_v53, %v1653_v54  ;;  %v11628_v51 = vcombine.low %v1697_v38, %v1701_v39  ;;  %v1712_v52 = vld [vmem:[#allocation5 + $0x340] sm:$0xff]  ;;  %v1713_v54 = vld [vmem:[#allocation5 + $0x348] sm:$0xff] }
 0x108   : > { %v1716_v53 = vld [vmem:[#allocation5 + $0x360] sm:$0xff] }
 0x10a   : > { %1508 = vmatpush1.bf16.msra.mxu0 %v13085_v3  ;;  %1594 = vmatpush1.bf16.msra.mxu1 %v13088_v4  ;;  %v1664_v3 = vld [vmem:[#allocation5 + $0x1c0] sm:$0xff] }
 0x10b   : > { %1509 = vmatprep.subr.bf16.mxu0 %v13093_v5  ;;  %1595 = vmatprep.subr.bf16.mxu1 %v13096_v6  ;;  %v1668_v4 = vld [vmem:[#allocation5 + $0x1e0] sm:$0xff]  ;;  %v1665_v5 = vld [vmem:[#allocation5 + $0x1c8] sm:$0xff] }
 0x10c   : > { %v1669_v6 = vld [vmem:[#allocation5 + $0x1e8] sm:$0xff]  ;;  %v11594_v17 = vcombine.low %v1664_v3, %v1668_v4 }
 0x10d   : > { %v11596_v18 = vcombine.low %v1665_v5, %v1669_v6 }
 0x10e   : > { %1510 = vmatpush1.bf16.msra.mxu0 %v13091_v11  ;;  %1596 = vmatpush1.bf16.msra.mxu1 %v13094_v12  ;;  %v1672_v11 = vld [vmem:[#allocation5 + $0x200] sm:$0xff] }
 0x10f   : > { %3186 = vmatprep.subr.bf16.mxu0 %v11539_v15  ;;  %3272 = vmatprep.subr.bf16.mxu1 %v11541_v16  ;;  %v1676_v12 = vld [vmem:[#allocation5 + $0x220] sm:$0xff]  ;;  %v11595_v15 = vcombine.high %v1664_v3, %v1668_v4  ;;  %v11597_v16 = vcombine.high %v1665_v5, %v1669_v6  ;;  %v1729_v6 = vld [vmem:[#allocation5 + $0x3c8] sm:$0xff] }
 0x110   : > { %v11603_v23 = vcombine.high %v1672_v11, %v1676_v12  ;;  %v1728_v4 = vld [vmem:[#allocation5 + $0x3c0] sm:$0xff] }
 0x111   : > { %1512 = vmatmul.mubr.bf16.vlgmr.msra.gmra.mrb[0].mxu0 %v640_v21  ;;  %1598 = vmatmul.mubr.bf16.vlgmr.msra.gmra.mrb[0].mxu1 %v640_v21  ;;  %v1681_v21 = vld [vmem:[#allocation5 + $0x248] sm:$0xff]  ;;  %v1732_v5 = vld [vmem:[#allocation5 + $0x3e0] sm:$0xff] }
 0x112   : > { %3187 = vmatpush1.bf16.msra.mxu0 %v11538_v24  ;;  %3273 = vmatpush1.bf16.msra.mxu1 %v11540_v25  ;;  %v11605_v24 = vcombine.high %v1673_v13, %v1677_v14  ;;  %v11602_v25 = vcombine.low %v1672_v11, %v1676_v12  ;;  %v1736_v12 = vld [vmem:[#allocation5 + $0x400] sm:$0xff] }
 0x113   : > { %3188 = vmatprep.subr.bf16.mxu0 %v11547_v26  ;;  %3274 = vmatprep.subr.bf16.mxu1 %v11549_v27  ;;  %v11604_v26 = vcombine.low %v1673_v13, %v1677_v14  ;;  %v1688_v27 = vld [vmem:[#allocation5 + $0x280] sm:$0xff]  ;;  %v1737_v14 = vld [vmem:[#allocation5 + $0x408] sm:$0xff] }
 0x114   : > { %3218 = vmatprep.mubr.bf16.mxu0 %v14208_v32  ;;  %3304 = vmatprep.mubr.bf16.mxu1 %v14208_v32  ;;  %v11619_v40 = vcombine.high %v1688_v27, %v1692_v28  ;;  %v1740_v13 = vld [vmem:[#allocation5 + $0x420] sm:$0xff] }
 0x116   : > { %3189 = vmatpush1.bf16.msra.mxu0 %v11546_v33  ;;  %3275 = vmatpush1.bf16.msra.mxu1 %v11548_v34  ;;  %v11613_v33 = vcombine.high %v1681_v21, %v1685_v22  ;;  %v11610_v34 = vcombine.low %v1680_v19, %v1684_v20  ;;  %v634_v19 = vld [vmem:[%s14204_s29 + $0x20] sm:$0xff]  ;;  %v11658_v20 = vcombine.low %v1728_v4, %v1732_v5 }
 0x117   : > { %3190 = vmatprep.subr.bf16.mxu0 %v11555_v35  ;;  %3276 = vmatprep.subr.bf16.mxu1 %v11557_v36  ;;  %v11612_v35 = vcombine.low %v1681_v21, %v1685_v22  ;;  %v1696_v36 = vld [vmem:[#allocation5 + $0x2c0] sm:$0xff] }
 0x118   : > { %v1744_v22 = vld [vmem:[#allocation5 + $0x440] sm:$0xff] }
 0x11a   : > { %3191 = vmatpush1.bf16.msra.mxu0 %v11554_v41  ;;  %3277 = vmatpush1.bf16.msra.mxu1 %v11556_v42  ;;  %v11621_v41 = vcombine.high %v1689_v29, %v1693_v30  ;;  %v11618_v42 = vcombine.low %v1688_v27, %v1692_v28  ;;  %v633_v28 = vld [vmem:[%s14204_s29 + $0x18] sm:$0xff] }
 0x11b   : > { %3192 = vmatprep.subr.bf16.mxu0 %v11563_v47  ;;  %3278 = vmatprep.subr.bf16.mxu1 %v11565_v48  ;;  %v1709_v47 = vld [vmem:[#allocation5 + $0x328] sm:$0xff]  ;;  %v11627_v48 = vcombine.high %v1696_v36, %v1700_v37  ;;  %v637_v29 = vld [vmem:[%s14204_s29 + $0x38] sm:$0xff] }
 0x11c   : > { %v11636_v59 = vcombine.low %v1705_v46, %v1709_v47 }
 0x11e   : > { %3193 = vmatpush1.bf16.msra.mxu0 %v11562_v49  ;;  %3279 = vmatpush1.bf16.msra.mxu1 %v11564_v50  ;;  %v11629_v49 = vcombine.high %v1697_v38, %v1701_v39  ;;  %v11626_v50 = vcombine.low %v1696_v36, %v1700_v37  ;;  %v1753_v36 = vld [vmem:[#allocation5 + $0x488] sm:$0xff] }
 0x11f   : > { %3194 = vmatprep.subr.bf16.mxu0 %v11571_v55  ;;  %3280 = vmatprep.subr.bf16.mxu1 %v11573_v56  ;;  %v1717_v55 = vld [vmem:[#allocation5 + $0x368] sm:$0xff]  ;;  %v11635_v56 = vcombine.high %v1704_v44, %v1708_v45 }
 0x120   : > { %v11644_v3 = vcombine.low %v1713_v54, %v1717_v55  ;;  %v1757_v37 = vld [vmem:[#allocation5 + $0x4a8] sm:$0xff] }
 0x122   : > { %3195 = vmatpush1.bf16.msra.mxu0 %v11570_v57  ;;  %3281 = vmatpush1.bf16.msra.mxu1 %v11572_v58  ;;  %v11637_v57 = vcombine.high %v1705_v46, %v1709_v47  ;;  %v11634_v58 = vcombine.low %v1704_v44, %v1708_v45  ;;  %v1764_v44 = vld [vmem:[#allocation5 + $0x4e0] sm:$0xff]  ;;  %v1761_v45 = vld [vmem:[#allocation5 + $0x4c8] sm:$0xff] }
 0x123   : > { %3196 = vmatprep.subr.bf16.mxu0 %v11579_v63  ;;  %3282 = vmatprep.subr.bf16.mxu1 %v11581_v0  ;;  %v1725_v63 = vld [vmem:[#allocation5 + $0x3a8] sm:$0xff]  ;;  %v11643_v0 = vcombine.high %v1712_v52, %v1716_v53 }
 0x124   : > { %v11652_v11 = vcombine.low %v1721_v62, %v1725_v63  ;;  %v1765_v46 = vld [vmem:[#allocation5 + $0x4e8] sm:$0xff] }
 0x126   : > { %3197 = vmatpush1.bf16.msra.mxu0 %v11578_v1  ;;  %3283 = vmatpush1.bf16.msra.mxu1 %v11580_v2  ;;  %v11645_v1 = vcombine.high %v1713_v54, %v1717_v55  ;;  %v11642_v2 = vcombine.low %v1712_v52, %v1716_v53  ;;  %v1772_v52 = vld [vmem:[#allocation5 + $0x520] sm:$0xff]  ;;  %v1769_v53 = vld [vmem:[#allocation5 + $0x508] sm:$0xff] }
 0x127   : > { %3198 = vmatprep.subr.bf16.mxu0 %v11587_v7  ;;  %3284 = vmatprep.subr.bf16.mxu1 %v11589_v8  ;;  %v1733_v7 = vld [vmem:[#allocation5 + $0x3e8] sm:$0xff]  ;;  %v11651_v8 = vcombine.high %v1720_v60, %v1724_v61 }
 0x128   : > { %v11660_v21 = vcombine.low %v1729_v6, %v1733_v7  ;;  %v1773_v54 = vld [vmem:[#allocation5 + $0x528] sm:$0xff] }
 0x12a   : > { %3199 = vmatpush1.bf16.msra.mxu0 %v11586_v9  ;;  %3285 = vmatpush1.bf16.msra.mxu1 %v11588_v10  ;;  %v11653_v9 = vcombine.high %v1721_v62, %v1725_v63  ;;  %v11650_v10 = vcombine.low %v1720_v60, %v1724_v61  ;;  %v1780_v60 = vld [vmem:[#allocation5 + $0x560] sm:$0xff]  ;;  %v1777_v61 = vld [vmem:[#allocation5 + $0x548] sm:$0xff] }
 0x12b   : > { %3200 = vmatprep.subr.bf16.mxu0 %v11595_v15  ;;  %3286 = vmatprep.subr.bf16.mxu1 %v11597_v16  ;;  %v1741_v15 = vld [vmem:[#allocation5 + $0x428] sm:$0xff]  ;;  %v11659_v16 = vcombine.high %v1728_v4, %v1732_v5  ;;  %v1788_v4 = vld [vmem:[#allocation5 + $0x5a0] sm:$0xff] }
 0x12c   : > { %v11669_v27 = vcombine.high %v1737_v14, %v1741_v15  ;;  %v1781_v62 = vld [vmem:[#allocation5 + $0x568] sm:$0xff] }
 0x12d   : > { %v1785_v5 = vld [vmem:[#allocation5 + $0x588] sm:$0xff] }
 0x12e   : > { %3201 = vmatpush1.bf16.msra.mxu0 %v11594_v17  ;;  %3287 = vmatpush1.bf16.msra.mxu1 %v11596_v18  ;;  %v11661_v17 = vcombine.high %v1729_v6, %v1733_v7  ;;  %v630_v18 = vld [vmem:[%s14204_s29] sm:$0xff]  ;;  %v1789_v6 = vld [vmem:[#allocation5 + $0x5a8] sm:$0xff] }
 0x12f   : > { %3202 = vmatprep.subr.bf16.mxu0 %v11603_v23  ;;  %3288 = vmatprep.subr.bf16.mxu1 %v11605_v24  ;;  %v1748_v23 = vld [vmem:[#allocation5 + $0x460] sm:$0xff]  ;;  %v1745_v24 = vld [vmem:[#allocation5 + $0x448] sm:$0xff]  ;;  %v14216_v30 = vpack.c.bf16 %v634_v19, %v630_v18  ;;  %v11716_v18 = vcombine.low %v1785_v5, %v1789_v6 }
 0x130   : > { %v11675_v38 = vcombine.high %v1744_v22, %v1748_v23  ;;  %v1800_v19 = vld [vmem:[#allocation5 + $0x600] sm:$0xff] }
 0x132   : > { %3203 = vmatpush1.bf16.msra.mxu0 %v11602_v25  ;;  %3289 = vmatpush1.bf16.msra.mxu1 %v11604_v26  ;;  %v1749_v25 = vld [vmem:[#allocation5 + $0x468] sm:$0xff]  ;;  %v11667_v26 = vcombine.high %v1736_v12, %v1740_v13 }
 0x133   : > { %3204 = vmatprep.subr.bf16.mxu0 %v11611_v31  ;;  %3290 = vmatprep.subr.bf16.mxu1 %v11613_v33  ;;  %v11666_v31 = vcombine.low %v1736_v12, %v1740_v13  ;;  %v11668_v33 = vcombine.low %v1737_v14, %v1741_v15  ;;  %v11677_v39 = vcombine.high %v1745_v24, %v1749_v25  ;;  %v1796_v12 = vld [vmem:[#allocation5 + $0x5e0] sm:$0xff]  ;;  %v1793_v13 = vld [vmem:[#allocation5 + $0x5c8] sm:$0xff] }
 0x134   : > { %v1797_v14 = vld [vmem:[#allocation5 + $0x5e8] sm:$0xff] }
 0x136   : > { %3205 = vmatpush1.bf16.msra.mxu0 %v11610_v34  ;;  %3291 = vmatpush1.bf16.msra.mxu1 %v11612_v35  ;;  %v1752_v34 = vld [vmem:[#allocation5 + $0x480] sm:$0xff] }
 0x137   : > { %3206 = vmatprep.subr.bf16.mxu0 %v11619_v40  ;;  %3292 = vmatprep.subr.bf16.mxu1 %v11621_v41  ;;  %v1756_v35 = vld [vmem:[#allocation5 + $0x4a0] sm:$0xff]  ;;  %v14218_v40 = vpack.c.bf16 %v637_v29, %v633_v28  ;;  %v11674_v41 = vcombine.low %v1744_v22, %v1748_v23  ;;  %v11725_v22 = vcombine.high %v1793_v13, %v1797_v14  ;;  %v1801_v23 = vld [vmem:[#allocation5 + $0x608] sm:$0xff] }
 0x138   : > { %v11683_v47 = vcombine.high %v1752_v34, %v1756_v35  ;;  %v1808_v29 = vld [vmem:[#allocation5 + $0x640] sm:$0xff] }
 0x13a   : > { %3207 = vmatpush1.bf16.msra.mxu0 %v11618_v42  ;;  %3293 = vmatpush1.bf16.msra.mxu1 %v11620_v43  ;;  %v11676_v42 = vcombine.low %v1745_v24, %v1749_v25  ;;  %v1760_v43 = vld [vmem:[#allocation5 + $0x4c0] sm:$0xff]  ;;  %v1805_v24 = vld [vmem:[#allocation5 + $0x628] sm:$0xff] }
 0x13b   : > { %3208 = vmatprep.subr.bf16.mxu0 %v11627_v48  ;;  %3294 = vmatprep.subr.bf16.mxu1 %v11629_v49  ;;  %v11685_v48 = vcombine.high %v1753_v36, %v1757_v37  ;;  %v11682_v49 = vcombine.low %v1752_v34, %v1756_v35  ;;  %v11691_v55 = vcombine.high %v1760_v43, %v1764_v44  ;;  %v1813_v34 = vld [vmem:[#allocation5 + $0x668] sm:$0xff] }
 0x13c   : > { %v11733_v28 = vcombine.high %v1801_v23, %v1805_v24 }
 0x13e   : > { %3209 = vmatpush1.bf16.msra.mxu0 %v11626_v50  ;;  %3295 = vmatpush1.bf16.msra.mxu1 %v11628_v51  ;;  %v11684_v50 = vcombine.low %v1753_v36, %v1757_v37  ;;  %v1768_v51 = vld [vmem:[#allocation5 + $0x500] sm:$0xff]  ;;  %v11732_v36 = vcombine.low %v1801_v23, %v1805_v24  ;;  %v1614_v23 = vld [vmem:[#allocation5 + $0x30] sm:$0xff] }
 0x13f   : > { %3210 = vmatprep.subr.bf16.mxu0 %v11635_v56  ;;  %3296 = vmatprep.subr.bf16.mxu1 %v11637_v57  ;;  %v11693_v56 = vcombine.high %v1761_v45, %v1765_v46  ;;  %v11690_v57 = vcombine.low %v1760_v43, %v1764_v44  ;;  %v11699_v63 = vcombine.high %v1768_v51, %v1772_v52  ;;  %v1821_v43 = vld [vmem:[#allocation5 + $0x6a8] sm:$0xff] }
 0x142   : > { %3211 = vmatpush1.bf16.msra.mxu0 %v11634_v58  ;;  %3297 = vmatpush1.bf16.msra.mxu1 %v11636_v59  ;;  %v11692_v58 = vcombine.low %v1761_v45, %v1765_v46  ;;  %v1776_v59 = vld [vmem:[#allocation5 + $0x540] sm:$0xff] }
 0x143   : > { %3212 = vmatprep.subr.bf16.mxu0 %v11643_v0  ;;  %3298 = vmatprep.subr.bf16.mxu1 %v11645_v1  ;;  %v11701_v0 = vcombine.high %v1769_v53, %v1773_v54  ;;  %v11698_v1 = vcombine.low %v1768_v51, %v1772_v52  ;;  %v11707_v7 = vcombine.high %v1776_v59, %v1780_v60  ;;  %v1829_v51 = vld [vmem:[#allocation5 + $0x6e8] sm:$0xff] }
 0x146   : > { %3213 = vmatpush1.bf16.msra.mxu0 %v11642_v2  ;;  %3299 = vmatpush1.bf16.msra.mxu1 %v11644_v3  ;;  %v11700_v2 = vcombine.low %v1769_v53, %v1773_v54  ;;  %v1784_v3 = vld [vmem:[#allocation5 + $0x580] sm:$0xff] }
 0x147   : > { %3214 = vmatprep.subr.bf16.mxu0 %v11651_v8  ;;  %3300 = vmatprep.subr.bf16.mxu1 %v11653_v9  ;;  %v11709_v8 = vcombine.high %v1777_v61, %v1781_v62  ;;  %v11706_v9 = vcombine.low %v1776_v59, %v1780_v60  ;;  %v11715_v15 = vcombine.high %v1784_v3, %v1788_v4  ;;  %v1832_v54 = vld [vmem:[#allocation5 + $0x700] sm:$0xff] }
 0x14a   : > { %3215 = vmatpush1.bf16.msra.mxu0 %v11650_v10  ;;  %3301 = vmatpush1.bf16.msra.mxu1 %v11652_v11  ;;  %v11708_v10 = vcombine.low %v1777_v61, %v1781_v62  ;;  %v1792_v11 = vld [vmem:[#allocation5 + $0x5c0] sm:$0xff] }
 0x14b   : > { %3216 = vmatprep.subr.bf16.mxu0 %v11659_v16  ;;  %3302 = vmatprep.subr.bf16.mxu1 %v11661_v17  ;;  %v11717_v16 = vcombine.high %v1785_v5, %v1789_v6  ;;  %v11714_v17 = vcombine.low %v1784_v3, %v1788_v4  ;;  %v11722_v25 = vcombine.low %v1792_v11, %v1796_v12  ;;  %v1840_v62 = vld [vmem:[#allocation5 + $0x740] sm:$0xff] }
 0x14c   : > { %v1848_v6 = vld [vmem:[#allocation5 + $0x780] sm:$0xff] }
 0x14e   : > { %3217 = vmatpush1.bf16.msra.mxu0 %v11658_v20  ;;  %3303 = vmatpush1.bf16.msra.mxu1 %v11660_v21  ;;  %v1804_v20 = vld [vmem:[#allocation5 + $0x620] sm:$0xff]  ;;  %v11723_v21 = vcombine.high %v1792_v11, %v1796_v12 }
 0x14f   : > { %3229 = vmatprep.subr.bf16.mxu0 %v11667_v26  ;;  %3315 = vmatprep.subr.bf16.mxu1 %v11669_v27  ;;  %v11724_v26 = vcombine.low %v1793_v13, %v1797_v14  ;;  %v11731_v27 = vcombine.high %v1800_v19, %v1804_v20  ;;  %v11730_v35 = vcombine.low %v1800_v19, %v1804_v20  ;;  %v1856_v14 = vld [vmem:[#allocation5 + $0x7c0] sm:$0xff] }
 0x151   : > { %3219 = vmatmul.mubr.bf16.vlgmr.msra.gmra.mrb[4].mxu0 %v14216_v30  ;;  %3305 = vmatmul.mubr.bf16.vlgmr.msra.gmra.mrb[4].mxu1 %v14216_v30 }
 0x152   : > { %3230 = vmatpush1.bf16.msra.mxu0 %v11666_v31  ;;  %3316 = vmatpush1.bf16.msra.mxu1 %v11668_v33  ;;  %v1812_v31 = vld [vmem:[#allocation5 + $0x660] sm:$0xff]  ;;  %v1809_v33 = vld [vmem:[#allocation5 + $0x648] sm:$0xff] }
 0x153   : > { %3231 = vmatprep.subr.bf16.mxu0 %v11675_v38  ;;  %3317 = vmatprep.subr.bf16.mxu1 %v11677_v39  ;;  %v11739_v37 = vcombine.high %v1808_v29, %v1812_v31  ;;  %v11741_v38 = vcombine.high %v1809_v33, %v1813_v34  ;;  %v1816_v39 = vld [vmem:[#allocation5 + $0x680] sm:$0xff]  ;;  %v11738_v44 = vcombine.low %v1808_v29, %v1812_v31  ;;  %v1618_v31 = vld [vmem:[#allocation5 + $0x50] sm:$0xff] }
 0x154   : > { %3261 = vmatprep.mubr.bf16.mxu0 %v14218_v40  ;;  %3347 = vmatprep.mubr.bf16.mxu1 %v14218_v40  ;;  %v11740_v45 = vcombine.low %v1809_v33, %v1813_v34  ;;  %v1622_v33 = vld [vmem:[#allocation5 + $0x70] sm:$0xff] }
 0x156   : > { %3232 = vmatpush1.bf16.msra.mxu0 %v11674_v41  ;;  %3318 = vmatpush1.bf16.msra.mxu1 %v11676_v42  ;;  %v1820_v41 = vld [vmem:[#allocation5 + $0x6a0] sm:$0xff]  ;;  %v1817_v42 = vld [vmem:[#allocation5 + $0x688] sm:$0xff] }
 0x157   : > { %3233 = vmatprep.subr.bf16.mxu0 %v11683_v47  ;;  %3319 = vmatprep.subr.bf16.mxu1 %v11685_v48  ;;  %v11747_v46 = vcombine.high %v1816_v39, %v1820_v41  ;;  %v11749_v47 = vcombine.high %v1817_v42, %v1821_v43  ;;  %v1824_v48 = vld [vmem:[#allocation5 + $0x6c0] sm:$0xff]  ;;  %v11746_v52 = vcombine.low %v1816_v39, %v1820_v41 }
 0x158   : > { %v11748_v53 = vcombine.low %v1817_v42, %v1821_v43  ;;  %v11551_v39 = vcombine.high %v1618_v31, %v1622_v33  ;;  %v11550_v41 = vcombine.low %v1618_v31, %v1622_v33  ;;  %v1634_v42 = vld [vmem:[#allocation5 + $0xd0] sm:$0xff] }
 0x159   : > { %v1638_v43 = vld [vmem:[#allocation5 + $0xf0] sm:$0xff] }
 0x15a   : > { %3234 = vmatpush1.bf16.msra.mxu0 %v11682_v49  ;;  %3320 = vmatpush1.bf16.msra.mxu1 %v11684_v50  ;;  %v1828_v49 = vld [vmem:[#allocation5 + $0x6e0] sm:$0xff]  ;;  %v1825_v50 = vld [vmem:[#allocation5 + $0x6c8] sm:$0xff]  ;;  %v1738_v31 = vld [vmem:[#allocation5 + $0x410] sm:$0xff] }
 0x15b   : > { %3235 = vmatprep.subr.bf16.mxu0 %v11691_v55  ;;  %3321 = vmatprep.subr.bf16.mxu1 %v11693_v56  ;;  %v1836_v55 = vld [vmem:[#allocation5 + $0x720] sm:$0xff]  ;;  %v1833_v56 = vld [vmem:[#allocation5 + $0x708] sm:$0xff]  ;;  %v11757_v59 = vcombine.high %v1825_v50, %v1829_v51  ;;  %v11754_v60 = vcombine.low %v1824_v48, %v1828_v49  ;;  %v11756_v61 = vcombine.low %v1825_v50, %v1829_v51  ;;  %v1650_v50 = vld [vmem:[#allocation5 + $0x150] sm:$0xff] }
 0x15c   : > { %v11762_v4 = vcombine.low %v1832_v54, %v1836_v55  ;;  %v1654_v51 = vld [vmem:[#allocation5 + $0x170] sm:$0xff] }
 0x15d   : > { %v1742_v33 = vld [vmem:[#allocation5 + $0x430] sm:$0xff] }
 0x15e   : > { %3236 = vmatpush1.bf16.msra.mxu0 %v11690_v57  ;;  %3322 = vmatpush1.bf16.msra.mxu1 %v11692_v58  ;;  %v1837_v57 = vld [vmem:[#allocation5 + $0x728] sm:$0xff]  ;;  %v11755_v58 = vcombine.high %v1824_v48, %v1828_v49  ;;  %v11567_v48 = vcombine.high %v1634_v42, %v1638_v43  ;;  %v11566_v49 = vcombine.low %v1634_v42, %v1638_v43  ;;  %v1754_v42 = vld [vmem:[#allocation5 + $0x490] sm:$0xff] }
 0x15f   : > { %3237 = vmatprep.subr.bf16.mxu0 %v11699_v63  ;;  %3323 = vmatprep.subr.bf16.mxu1 %v11701_v0  ;;  %v1844_v63 = vld [vmem:[#allocation5 + $0x760] sm:$0xff]  ;;  %v1841_v0 = vld [vmem:[#allocation5 + $0x748] sm:$0xff]  ;;  %v11765_v3 = vcombine.high %v1833_v56, %v1837_v57  ;;  %v11764_v5 = vcombine.low %v1833_v56, %v1837_v57  ;;  %v11583_v56 = vcombine.high %v1650_v50, %v1654_v51  ;;  %v1666_v57 = vld [vmem:[#allocation5 + $0x1d0] sm:$0xff] }
 0x160   : > { %v11770_v12 = vcombine.low %v1840_v62, %v1844_v63  ;;  %v1758_v43 = vld [vmem:[#allocation5 + $0x4b0] sm:$0xff] }
 0x162   : > { %3238 = vmatpush1.bf16.msra.mxu0 %v11698_v1  ;;  %3324 = vmatpush1.bf16.msra.mxu1 %v11700_v2  ;;  %v1845_v1 = vld [vmem:[#allocation5 + $0x768] sm:$0xff]  ;;  %v11763_v2 = vcombine.high %v1832_v54, %v1836_v55  ;;  %v1658_v54 = vld [vmem:[#allocation5 + $0x190] sm:$0xff] }
 0x163   : > { %3239 = vmatprep.subr.bf16.mxu0 %v11707_v7  ;;  %3325 = vmatprep.subr.bf16.mxu1 %v11709_v8  ;;  %v1852_v7 = vld [vmem:[#allocation5 + $0x7a0] sm:$0xff]  ;;  %v1849_v8 = vld [vmem:[#allocation5 + $0x788] sm:$0xff]  ;;  %v11773_v11 = vcombine.high %v1841_v0, %v1845_v1  ;;  %v11772_v13 = vcombine.low %v1841_v0, %v1845_v1  ;;  %v1662_v55 = vld [vmem:[#allocation5 + $0x1b0] sm:$0xff] }
 0x164   : > { %v11778_v20 = vcombine.low %v1848_v6, %v1852_v7 }
 0x166   : > { %3240 = vmatpush1.bf16.msra.mxu0 %v11706_v9  ;;  %3326 = vmatpush1.bf16.msra.mxu1 %v11708_v10  ;;  %v1853_v9 = vld [vmem:[#allocation5 + $0x7a8] sm:$0xff]  ;;  %v11771_v10 = vcombine.high %v1840_v62, %v1844_v63  ;;  %v1678_v62 = vld [vmem:[#allocation5 + $0x230] sm:$0xff] }
 0x167   : > { %3241 = vmatprep.subr.bf16.mxu0 %v11715_v15  ;;  %3327 = vmatprep.subr.bf16.mxu1 %v11717_v16  ;;  %v1860_v15 = vld [vmem:[#allocation5 + $0x7e0] sm:$0xff]  ;;  %v1857_v16 = vld [vmem:[#allocation5 + $0x7c8] sm:$0xff]  ;;  %v11781_v19 = vcombine.high %v1849_v8, %v1853_v9 }
 0x168   : > { %v11787_v24 = vcombine.high %v1856_v14, %v1860_v15 }
 0x16a   : > { %3242 = vmatpush1.bf16.msra.mxu0 %v11714_v17  ;;  %3328 = vmatpush1.bf16.msra.mxu1 %v11716_v18  ;;  %v1861_v17 = vld [vmem:[#allocation5 + $0x7e8] sm:$0xff]  ;;  %v11779_v18 = vcombine.high %v1848_v6, %v1852_v7  ;;  %v1690_v6 = vld [vmem:[#allocation5 + $0x290] sm:$0xff] }
 0x16b   : > { %3243 = vmatprep.subr.bf16.mxu0 %v11723_v21  ;;  %3329 = vmatprep.subr.bf16.mxu1 %v11725_v22  ;;  %v11780_v21 = vcombine.low %v1849_v8, %v1853_v9  ;;  %v1610_v22 = vld [vmem:[#allocation5 + $0x10] sm:$0xff]  ;;  %v11788_v29 = vcombine.low %v1857_v16, %v1861_v17 }
 0x16c   : > { %v11543_v34 = vcombine.high %v1610_v22, %v1614_v23  ;;  %v1694_v7 = vld [vmem:[#allocation5 + $0x2b0] sm:$0xff] }
 0x16d   : > { %v11623_v9 = vcombine.high %v1690_v6, %v1694_v7 }
 0x16e   : > { %3244 = vmatpush1.bf16.msra.mxu0 %v11722_v25  ;;  %3330 = vmatpush1.bf16.msra.mxu1 %v11724_v26  ;;  %v11789_v25 = vcombine.high %v1857_v16, %v1861_v17  ;;  %v632_v26 = vld [vmem:[%s14204_s29 + $0x10] sm:$0xff] }
 0x16f   : > { %3245 = vmatprep.subr.bf16.mxu0 %v11731_v27  ;;  %3331 = vmatprep.subr.bf16.mxu1 %v11733_v28  ;;  %v636_v27 = vld [vmem:[%s14204_s29 + $0x30] sm:$0xff]  ;;  %v11786_v28 = vcombine.low %v1856_v14, %v1860_v15 }
 0x170   : > { %v1706_v14 = vld [vmem:[#allocation5 + $0x310] sm:$0xff] }
 0x171   : > { %v1710_v15 = vld [vmem:[#allocation5 + $0x330] sm:$0xff] }
 0x172   : > { %3246 = vmatpush1.bf16.msra.mxu0 %v11730_v35  ;;  %3332 = vmatpush1.bf16.msra.mxu1 %v11732_v36  ;;  %v14226_v35 = vpack.c.bf16 %v636_v27, %v632_v26  ;;  %v11542_v36 = vcombine.low %v1610_v22, %v1614_v23  ;;  %v11639_v17 = vcombine.high %v1706_v14, %v1710_v15  ;;  %v1722_v22 = vld [vmem:[#allocation5 + $0x390] sm:$0xff] }
 0x173   : > { %3247 = vmatprep.subr.bf16.mxu0 %v11739_v37  ;;  %3333 = vmatprep.subr.bf16.mxu1 %v11741_v38  ;;  %v1626_v37 = vld [vmem:[#allocation5 + $0x90] sm:$0xff] }
 0x174   : > { %v1630_v38 = vld [vmem:[#allocation5 + $0xb0] sm:$0xff] }
 0x175   : > { %v1726_v23 = vld [vmem:[#allocation5 + $0x3b0] sm:$0xff] }
 0x176   : > { %3248 = vmatpush1.bf16.msra.mxu0 %v11738_v44  ;;  %3334 = vmatpush1.bf16.msra.mxu1 %v11740_v45  ;;  %v11559_v44 = vcombine.high %v1626_v37, %v1630_v38  ;;  %v11558_v45 = vcombine.low %v1626_v37, %v1630_v38  ;;  %v1730_v26 = vld [vmem:[#allocation5 + $0x3d0] sm:$0xff] }
 0x177   : > { %3249 = vmatprep.subr.bf16.mxu0 %v11747_v46  ;;  %3335 = vmatprep.subr.bf16.mxu1 %v11749_v47  ;;  %v1642_v46 = vld [vmem:[#allocation5 + $0x110] sm:$0xff] }
 0x178   : > { %v1646_v47 = vld [vmem:[#allocation5 + $0x130] sm:$0xff] }
 0x179   : > { %v1734_v27 = vld [vmem:[#allocation5 + $0x3f0] sm:$0xff] }
 0x17a   : > { %3250 = vmatpush1.bf16.msra.mxu0 %v11746_v52  ;;  %3336 = vmatpush1.bf16.msra.mxu1 %v11748_v53  ;;  %v11575_v52 = vcombine.high %v1642_v46, %v1646_v47  ;;  %v11574_v53 = vcombine.low %v1642_v46, %v1646_v47  ;;  %v1746_v37 = vld [vmem:[#allocation5 + $0x450] sm:$0xff] }
 0x17b   : > { %3251 = vmatprep.subr.bf16.mxu0 %v11755_v58  ;;  %3337 = vmatprep.subr.bf16.mxu1 %v11757_v59  ;;  %v1670_v58 = vld [vmem:[#allocation5 + $0x1f0] sm:$0xff]  ;;  %v11591_v59 = vcombine.high %v1658_v54, %v1662_v55 }
 0x17c   : > { %v11599_v63 = vcombine.high %v1666_v57, %v1670_v58  ;;  %v11598_v0 = vcombine.low %v1666_v57, %v1670_v58  ;;  %v1750_v38 = vld [vmem:[#allocation5 + $0x470] sm:$0xff] }
 0x17d   : > { %v1762_v46 = vld [vmem:[#allocation5 + $0x4d0] sm:$0xff] }
 0x17e   : > { %3252 = vmatpush1.bf16.msra.mxu0 %v11754_v60  ;;  %3338 = vmatpush1.bf16.msra.mxu1 %v11756_v61  ;;  %v11590_v60 = vcombine.low %v1658_v54, %v1662_v55  ;;  %v1674_v61 = vld [vmem:[#allocation5 + $0x210] sm:$0xff] }
 0x17f   : > { %3253 = vmatprep.subr.bf16.mxu0 %v11763_v2  ;;  %3339 = vmatprep.subr.bf16.mxu1 %v11765_v3  ;;  %v11607_v1 = vcombine.high %v1674_v61, %v1678_v62  ;;  %v1682_v2 = vld [vmem:[#allocation5 + $0x250] sm:$0xff] }
 0x180   : > { %v1686_v3 = vld [vmem:[#allocation5 + $0x270] sm:$0xff] }
 0x181   : > { %v11614_v8 = vcombine.low %v1682_v2, %v1686_v3  ;;  %v1766_v47 = vld [vmem:[#allocation5 + $0x4f0] sm:$0xff] }
 0x182   : > { %3254 = vmatpush1.bf16.msra.mxu0 %v11762_v4  ;;  %3340 = vmatpush1.bf16.msra.mxu1 %v11764_v5  ;;  %v11606_v4 = vcombine.low %v1674_v61, %v1678_v62  ;;  %v11615_v5 = vcombine.high %v1682_v2, %v1686_v3  ;;  %v1778_v54 = vld [vmem:[#allocation5 + $0x550] sm:$0xff] }
 0x183   : > { %3255 = vmatprep.subr.bf16.mxu0 %v11771_v10  ;;  %3341 = vmatprep.subr.bf16.mxu1 %v11773_v11  ;;  %v1698_v10 = vld [vmem:[#allocation5 + $0x2d0] sm:$0xff] }
 0x184   : > { %v1702_v11 = vld [vmem:[#allocation5 + $0x2f0] sm:$0xff] }
 0x185   : > { %v11630_v16 = vcombine.low %v1698_v10, %v1702_v11  ;;  %v1782_v55 = vld [vmem:[#allocation5 + $0x570] sm:$0xff] }
 0x186   : > { %3256 = vmatpush1.bf16.msra.mxu0 %v11770_v12  ;;  %3342 = vmatpush1.bf16.msra.mxu1 %v11772_v13  ;;  %v11622_v12 = vcombine.low %v1690_v6, %v1694_v7  ;;  %v11631_v13 = vcombine.high %v1698_v10, %v1702_v11  ;;  %v1786_v57 = vld [vmem:[#allocation5 + $0x590] sm:$0xff] }
 0x187   : > { %3257 = vmatprep.subr.bf16.mxu0 %v11779_v18  ;;  %3343 = vmatprep.subr.bf16.mxu1 %v11781_v19  ;;  %v1714_v18 = vld [vmem:[#allocation5 + $0x350] sm:$0xff] }
 0x188   : > { %v1718_v19 = vld [vmem:[#allocation5 + $0x370] sm:$0xff] }
 0x189   : > { %v1790_v58 = vld [vmem:[#allocation5 + $0x5b0] sm:$0xff] }
 0x18a   : > { %3258 = vmatpush1.bf16.msra.mxu0 %v11778_v20  ;;  %3344 = vmatpush1.bf16.msra.mxu1 %v11780_v21  ;;  %v11638_v20 = vcombine.low %v1706_v14, %v1710_v15  ;;  %v11647_v21 = vcombine.high %v1714_v18, %v1718_v19  ;;  %v1806_v10 = vld [vmem:[#allocation5 + $0x630] sm:$0xff] }
 0x18b   : > { %3259 = vmatprep.subr.bf16.mxu0 %v11787_v24  ;;  %3345 = vmatprep.subr.bf16.mxu1 %v11789_v25  ;;  %v11646_v24 = vcombine.low %v1714_v18, %v1718_v19  ;;  %v11655_v25 = vcombine.high %v1722_v22, %v1726_v23  ;;  %v1814_v14 = vld [vmem:[#allocation5 + $0x670] sm:$0xff] }
 0x18c   : > { %v1822_v18 = vld [vmem:[#allocation5 + $0x6b0] sm:$0xff] }
 0x18e   : > { %3260 = vmatpush1.bf16.msra.mxu0 %v11786_v28  ;;  %3346 = vmatpush1.bf16.msra.mxu1 %v11788_v29  ;;  %v11654_v28 = vcombine.low %v1722_v22, %v1726_v23  ;;  %v11663_v29 = vcombine.high %v1730_v26, %v1734_v27  ;;  %v1830_v22 = vld [vmem:[#allocation5 + $0x6f0] sm:$0xff] }
 0x18f   : > { %3358 = vmatprep.subr.bf16.mxu0 %v11543_v34  ;;  %v11662_v34 = vcombine.low %v1730_v26, %v1734_v27  ;;  %v1838_v26 = vld [vmem:[#allocation5 + $0x730] sm:$0xff] }
 0x191   : > { %3262 = vmatmul.mubr.bf16.vlgmr.msra.gmra.mrb[4].mxu0 %v14226_v35  ;;  %3348 = vmatmul.mubr.bf16.vlgmr.msra.gmra.mrb[4].mxu1 %v14226_v35 }
 0x192   : > { %3359 = vmatpush1.bf16.msra.mxu0 %v11542_v36  ;;  %3390 = vmatprep.mubr.bf16.mxu0 %v14208_v32  ;;  %v11671_v36 = vcombine.high %v1738_v31, %v1742_v33 }
 0x193   : > { %3360 = vmatprep.subr.bf16.mxu0 %v11551_v39  ;;  %3476 = vmatprep.mubr.bf16.mxu1 %v14208_v32  ;;  %v11582_v32 = vcombine.low %v1650_v50, %v1654_v51  ;;  %v11670_v39 = vcombine.low %v1738_v31, %v1742_v33  ;;  %v1770_v50 = vld [vmem:[#allocation5 + $0x510] sm:$0xff] }
 0x194   : > { %v1774_v51 = vld [vmem:[#allocation5 + $0x530] sm:$0xff] }
 0x195   : > { %v1846_v31 = vld [vmem:[#allocation5 + $0x770] sm:$0xff] }
 0x196   : > { %3361 = vmatpush1.bf16.msra.mxu0 %v11550_v41  ;;  %v11679_v41 = vcombine.high %v1746_v37, %v1750_v38 }
 0x197   : > { %3362 = vmatprep.subr.bf16.mxu0 %v11559_v44  ;;  %v11678_v44 = vcombine.low %v1746_v37, %v1750_v38 }
 0x19a   : > { %3363 = vmatpush1.bf16.msra.mxu0 %v11558_v45  ;;  %v11687_v45 = vcombine.high %v1754_v42, %v1758_v43 }
 0x19b   : > { %3364 = vmatprep.subr.bf16.mxu0 %v11567_v48  ;;  %v11686_v48 = vcombine.low %v1754_v42, %v1758_v43 }
 0x19e   : > { %3365 = vmatpush1.bf16.msra.mxu0 %v11566_v49  ;;  %v11695_v49 = vcombine.high %v1762_v46, %v1766_v47 }
 0x19f   : > { %3366 = vmatprep.subr.bf16.mxu0 %v11575_v52  ;;  %v11694_v52 = vcombine.low %v1762_v46, %v1766_v47  ;;  %v1858_v47 = vld [vmem:[#allocation5 + $0x7d0] sm:$0xff] }
 0x1a2   : > { %3367 = vmatpush1.bf16.msra.mxu0 %v11574_v53  ;;  %v11703_v53 = vcombine.high %v1770_v50, %v1774_v51 }
 0x1a3   : > { %3368 = vmatprep.subr.bf16.mxu0 %v11583_v56  ;;  %v11702_v56 = vcombine.low %v1770_v50, %v1774_v51  ;;  %v1627_v51 = vld [vmem:[#allocation5 + $0x98] sm:$0xff] }
 0x1a6   : > { %3369 = vmatpush1.bf16.msra.mxu0 %v11582_v32  ;;  %v11711_v32 = vcombine.high %v1778_v54, %v1782_v55 }
 0x1a7   : > { %3370 = vmatprep.subr.bf16.mxu0 %v11591_v59  ;;  %v11710_v59 = vcombine.low %v1778_v54, %v1782_v55  ;;  %v1639_v55 = vld [vmem:[#allocation5 + $0xf8] sm:$0xff] }
 0x1aa   : > { %3371 = vmatpush1.bf16.msra.mxu0 %v11590_v60  ;;  %v11719_v60 = vcombine.high %v1786_v57, %v1790_v58 }
 0x1ab   : > { %3372 = vmatprep.subr.bf16.mxu0 %v11599_v63  ;;  %v1794_v63 = vld [vmem:[#allocation5 + $0x5d0] sm:$0xff] }
 0x1ae   : > { %3373 = vmatpush1.bf16.msra.mxu0 %v11598_v0  ;;  %v1798_v0 = vld [vmem:[#allocation5 + $0x5f0] sm:$0xff] }
 0x1af   : > { %3374 = vmatprep.subr.bf16.mxu0 %v11607_v1  ;;  %v11726_v11 = vcombine.low %v1794_v63, %v1798_v0 }
 0x1b2   : > { %3375 = vmatpush1.bf16.msra.mxu0 %v11606_v4 }
 0x1b3   : > { %3376 = vmatprep.subr.bf16.mxu0 %v11615_v5  ;;  %v11718_v5 = vcombine.low %v1786_v57, %v1790_v58 }
 0x1b6   : > { %3377 = vmatpush1.bf16.msra.mxu0 %v11614_v8  ;;  %v11727_v8 = vcombine.high %v1794_v63, %v1798_v0 }
 0x1b7   : > { %3378 = vmatprep.subr.bf16.mxu0 %v11623_v9  ;;  %v1802_v9 = vld [vmem:[#allocation5 + $0x610] sm:$0xff] }
 0x1b8   : > { %v11734_v15 = vcombine.low %v1802_v9, %v1806_v10 }
 0x1ba   : > { %3379 = vmatpush1.bf16.msra.mxu0 %v11622_v12  ;;  %v11735_v12 = vcombine.high %v1802_v9, %v1806_v10  ;;  %v1655_v9 = vld [vmem:[#allocation5 + $0x178] sm:$0xff] }
 0x1bb   : > { %3380 = vmatprep.subr.bf16.mxu0 %v11631_v13  ;;  %v1810_v13 = vld [vmem:[#allocation5 + $0x650] sm:$0xff] }
 0x1bc   : > { %v11742_v19 = vcombine.low %v1810_v13, %v1814_v14 }
 0x1be   : > { %3381 = vmatpush1.bf16.msra.mxu0 %v11630_v16  ;;  %v11743_v16 = vcombine.high %v1810_v13, %v1814_v14  ;;  %v1659_v13 = vld [vmem:[#allocation5 + $0x198] sm:$0xff] }
 0x1bf   : > { %3382 = vmatprep.subr.bf16.mxu0 %v11639_v17  ;;  %v1818_v17 = vld [vmem:[#allocation5 + $0x690] sm:$0xff]  ;;  %v1663_v14 = vld [vmem:[#allocation5 + $0x1b8] sm:$0xff] }
 0x1c0   : > { %v11750_v23 = vcombine.low %v1818_v17, %v1822_v18 }
 0x1c2   : > { %3383 = vmatpush1.bf16.msra.mxu0 %v11638_v20  ;;  %v11751_v20 = vcombine.high %v1818_v17, %v1822_v18  ;;  %v1667_v17 = vld [vmem:[#allocation5 + $0x1d8] sm:$0xff] }
 0x1c3   : > { %3384 = vmatprep.subr.bf16.mxu0 %v11647_v21  ;;  %v1826_v21 = vld [vmem:[#allocation5 + $0x6d0] sm:$0xff]  ;;  %v1671_v18 = vld [vmem:[#allocation5 + $0x1f8] sm:$0xff] }
 0x1c4   : > { %v11758_v27 = vcombine.low %v1826_v21, %v1830_v22 }
 0x1c6   : > { %3385 = vmatpush1.bf16.msra.mxu0 %v11646_v24  ;;  %v11759_v24 = vcombine.high %v1826_v21, %v1830_v22  ;;  %v1675_v21 = vld [vmem:[#allocation5 + $0x218] sm:$0xff] }
 0x1c7   : > { %3386 = vmatprep.subr.bf16.mxu0 %v11655_v25  ;;  %v1834_v25 = vld [vmem:[#allocation5 + $0x710] sm:$0xff]  ;;  %v1679_v22 = vld [vmem:[#allocation5 + $0x238] sm:$0xff] }
 0x1c8   : > { %v11766_v33 = vcombine.low %v1834_v25, %v1838_v26 }
 0x1ca   : > { %3387 = vmatpush1.bf16.msra.mxu0 %v11654_v28  ;;  %v11767_v28 = vcombine.high %v1834_v25, %v1838_v26  ;;  %v1683_v25 = vld [vmem:[#allocation5 + $0x258] sm:$0xff] }
 0x1cb   : > { %3388 = vmatprep.subr.bf16.mxu0 %v11663_v29  ;;  %v1842_v29 = vld [vmem:[#allocation5 + $0x750] sm:$0xff]  ;;  %v1687_v26 = vld [vmem:[#allocation5 + $0x278] sm:$0xff] }
 0x1cc   : > { %v11775_v37 = vcombine.high %v1842_v29, %v1846_v31  ;;  %v11774_v43 = vcombine.low %v1842_v29, %v1846_v31  ;;  %v1691_v29 = vld [vmem:[#allocation5 + $0x298] sm:$0xff] }
 0x1cd   : > { %v1695_v31 = vld [vmem:[#allocation5 + $0x2b8] sm:$0xff] }
 0x1ce   : > { %3389 = vmatpush1.bf16.msra.mxu0 %v11662_v34  ;;  %v1611_v34 = vld [vmem:[#allocation5 + $0x18] sm:$0xff] }
 0x1cf   : > { %3401 = vmatprep.subr.bf16.mxu0 %v11671_v36  ;;  %v1615_v36 = vld [vmem:[#allocation5 + $0x38] sm:$0xff] }
 0x1d0   : > { %v11545_v38 = vcombine.high %v1611_v34, %v1615_v36  ;;  %v11544_v42 = vcombine.low %v1611_v34, %v1615_v36  ;;  %v11625_v34 = vcombine.high %v1691_v29, %v1695_v31  ;;  %v1699_v36 = vld [vmem:[#allocation5 + $0x2d8] sm:$0xff] }
 0x1d1   : > { %3391 = vmatmul.mubr.bf16.vlgmr.msra.gmra.mrb[8].mxu0 %v14216_v30 }
 0x1d2   : > { %3402 = vmatpush1.bf16.msra.mxu0 %v11670_v39  ;;  %3433 = vmatprep.mubr.bf16.mxu0 %v14218_v40  ;;  %v1850_v39 = vld [vmem:[#allocation5 + $0x790] sm:$0xff] }
 0x1d3   : > { %3403 = vmatprep.subr.bf16.mxu0 %v11679_v41  ;;  %v1854_v41 = vld [vmem:[#allocation5 + $0x7b0] sm:$0xff]  ;;  %3444 = vmatprep.subr.bf16.mxu1 %v11545_v38  ;;  %v11624_v38 = vcombine.low %v1691_v29, %v1695_v31  ;;  %v1795_v31 = vld [vmem:[#allocation5 + $0x5d8] sm:$0xff] }
 0x1d4   : > { %3445 = vmatpush1.bf16.msra.mxu1 %v11544_v42  ;;  %v11783_v46 = vcombine.high %v1850_v39, %v1854_v41  ;;  %v1711_v42 = vld [vmem:[#allocation5 + $0x338] sm:$0xff] }
 0x1d6   : > { %3404 = vmatpush1.bf16.msra.mxu0 %v11678_v44  ;;  %v1619_v44 = vld [vmem:[#allocation5 + $0x58] sm:$0xff] }
 0x1d7   : > { %3405 = vmatprep.subr.bf16.mxu0 %v11687_v45  ;;  %v1623_v45 = vld [vmem:[#allocation5 + $0x78] sm:$0xff] }
 0x1d8   : > { %v11552_v50 = vcombine.low %v1619_v44, %v1623_v45 }
 0x1da   : > { %3406 = vmatpush1.bf16.msra.mxu0 %v11686_v48  ;;  %v1862_v48 = vld [vmem:[#allocation5 + $0x7f0] sm:$0xff] }
 0x1db   : > { %3407 = vmatprep.subr.bf16.mxu0 %v11695_v49  ;;  %v11553_v49 = vcombine.high %v1619_v44, %v1623_v45  ;;  %v11791_v57 = vcombine.high %v1858_v47, %v1862_v48  ;;  %v11790_v63 = vcombine.low %v1858_v47, %v1862_v48  ;;  %v1715_v45 = vld [vmem:[#allocation5 + $0x358] sm:$0xff] }
 0x1dd   : > { %3446 = vmatprep.subr.bf16.mxu1 %v11553_v49  ;;  %v1723_v49 = vld [vmem:[#allocation5 + $0x398] sm:$0xff] }
 0x1de   : > { %3408 = vmatpush1.bf16.msra.mxu0 %v11694_v52  ;;  %v1631_v52 = vld [vmem:[#allocation5 + $0xb8] sm:$0xff]  ;;  %3447 = vmatpush1.bf16.msra.mxu1 %v11552_v50 }
 0x1df   : > { %3409 = vmatprep.subr.bf16.mxu0 %v11703_v53  ;;  %v1635_v53 = vld [vmem:[#allocation5 + $0xd8] sm:$0xff]  ;;  %v11561_v54 = vcombine.high %v1627_v51, %v1631_v52 }
 0x1e0   : > { %v11569_v58 = vcombine.high %v1635_v53, %v1639_v55  ;;  %v11568_v0 = vcombine.low %v1635_v53, %v1639_v55  ;;  %v1727_v50 = vld [vmem:[#allocation5 + $0x3b8] sm:$0xff] }
 0x1e1   : > { %3448 = vmatprep.subr.bf16.mxu1 %v11561_v54  ;;  %v1731_v53 = vld [vmem:[#allocation5 + $0x3d8] sm:$0xff]  ;;  %v11656_v55 = vcombine.low %v1723_v49, %v1727_v50 }
 0x1e2   : > { %3410 = vmatpush1.bf16.msra.mxu0 %v11702_v56  ;;  %v11782_v56 = vcombine.low %v1850_v39, %v1854_v41  ;;  %v1707_v41 = vld [vmem:[#allocation5 + $0x318] sm:$0xff] }
 0x1e3   : > { %3411 = vmatprep.subr.bf16.mxu0 %v11711_v32  ;;  %v11560_v32 = vcombine.low %v1627_v51, %v1631_v52  ;;  %v11641_v44 = vcombine.high %v1707_v41, %v1711_v42  ;;  %v11640_v47 = vcombine.low %v1707_v41, %v1711_v42  ;;  %v11657_v52 = vcombine.high %v1723_v49, %v1727_v50  ;;  %v1735_v54 = vld [vmem:[#allocation5 + $0x3f8] sm:$0xff]  ;;  %v14270_v41 = vld [vmem:[%s15048_s5] sm:$0xff] }
 0x1e4   : > { %v14234_v61 = vpop.f32.mrb[0].mxu0  ;;  %v14236_v62 = vpop.f32.mrb[0].mxu1  ;;  %v1803_v42 = vld [vmem:[#allocation5 + $0x618] sm:$0xff] }
 0x1e5   : > { %v14238_v1 = vpop.f32.mrb[1].mxu0  ;;  %v14240_v2 = vpop.f32.mrb[1].mxu1  ;;  %3449 = vmatpush1.bf16.msra.mxu1 %v11560_v32  ;;  %v1739_v32 = vld [vmem:[#allocation5 + $0x418] sm:$0xff] }
 0x1e6   : > { %v14242_v3 = vpop.f32.mrb[2].mxu0  ;;  %v14244_v4 = vpop.f32.mrb[2].mxu1  ;;  %3412 = vmatpush1.bf16.msra.mxu0 %v11710_v59  ;;  %v1643_v59 = vld [vmem:[#allocation5 + $0x118] sm:$0xff]  ;;  %3450 = vmatprep.subr.bf16.mxu1 %v11569_v58  ;;  %v11664_v58 = vcombine.low %v1731_v53, %v1735_v54 }
 0x1e7   : > { %v14246_v6 = vpop.f32.mrb[3].mxu0  ;;  %v14248_v7 = vpop.f32.mrb[3].mxu1  ;;  %3413 = vmatprep.subr.bf16.mxu0 %v11719_v60  ;;  %v1647_v60 = vld [vmem:[#allocation5 + $0x138] sm:$0xff] }
 0x1e8   : > { %v11576_v10 = vcombine.low %v1643_v59, %v1647_v60 }
 0x1e9   : > { %3451 = vmatpush1.bf16.msra.mxu1 %v11568_v0 }
 0x1ea   : > { %3414 = vmatpush1.bf16.msra.mxu0 %v11718_v5  ;;  %v11577_v5 = vcombine.high %v1643_v59, %v1647_v60  ;;  %v1747_v60 = vld [vmem:[#allocation5 + $0x458] sm:$0xff] }
 0x1eb   : > { %3415 = vmatprep.subr.bf16.mxu0 %v11727_v8  ;;  %v1651_v8 = vld [vmem:[#allocation5 + $0x158] sm:$0xff] }
 0x1ec   : > { %3452 = vmatprep.subr.bf16.mxu1 %v11577_v5 }
 0x1ed   : > { %3453 = vmatpush1.bf16.msra.mxu1 %v11576_v10 }
 0x1ee   : > { %3416 = vmatpush1.bf16.msra.mxu0 %v11726_v11  ;;  %v13922_v11 = vmov 0.0  }
 0x1ef   : > { %3417 = vmatprep.subr.bf16.mxu0 %v11735_v12  ;;  %v11585_v12 = vcombine.high %v1651_v8, %v1655_v9 }
 0x1f1   : > { %3454 = vmatprep.subr.bf16.mxu1 %v11585_v12 }
 0x1f2   : > { %3418 = vmatpush1.bf16.msra.mxu0 %v11734_v15  ;;  %v11584_v15 = vcombine.low %v1651_v8, %v1655_v9  ;;  %v1755_v8 = vld [vmem:[#allocation5 + $0x498] sm:$0xff] }
 0x1f3   : > { %3419 = vmatprep.subr.bf16.mxu0 %v11743_v16  ;;  %v11593_v16 = vcombine.high %v1659_v13, %v1663_v14  ;;  %v1759_v9 = vld [vmem:[#allocation5 + $0x4b8] sm:$0xff] }
 0x1f4   : > { %3455 = vmatpush1.bf16.msra.mxu1 %v11584_v15  ;;  %v11689_v12 = vcombine.high %v1755_v8, %v1759_v9  ;;  %v11688_v15 = vcombine.low %v1755_v8, %v1759_v9 }
 0x1f5   : > { %3456 = vmatprep.subr.bf16.mxu1 %v11593_v16 }
 0x1f6   : > { %3420 = vmatpush1.bf16.msra.mxu0 %v11742_v19  ;;  %v11592_v19 = vcombine.low %v1659_v13, %v1663_v14  ;;  %v1763_v13 = vld [vmem:[#allocation5 + $0x4d8] sm:$0xff] }
 0x1f7   : > { %3421 = vmatprep.subr.bf16.mxu0 %v11751_v20  ;;  %v11601_v20 = vcombine.high %v1667_v17, %v1671_v18  ;;  %v1767_v14 = vld [vmem:[#allocation5 + $0x4f8] sm:$0xff] }
 0x1f8   : > { %3457 = vmatpush1.bf16.msra.mxu1 %v11592_v19  ;;  %v11697_v16 = vcombine.high %v1763_v13, %v1767_v14  ;;  %v11696_v19 = vcombine.low %v1763_v13, %v1767_v14 }
 0x1f9   : > { %3458 = vmatprep.subr.bf16.mxu1 %v11601_v20 }
 0x1fa   : > { %3422 = vmatpush1.bf16.msra.mxu0 %v11750_v23  ;;  %v11600_v23 = vcombine.low %v1667_v17, %v1671_v18  ;;  %v1771_v17 = vld [vmem:[#allocation5 + $0x518] sm:$0xff] }
 0x1fb   : > { %3423 = vmatprep.subr.bf16.mxu0 %v11759_v24  ;;  %v11609_v24 = vcombine.high %v1675_v21, %v1679_v22  ;;  %v1775_v18 = vld [vmem:[#allocation5 + $0x538] sm:$0xff] }
 0x1fc   : > { %3459 = vmatpush1.bf16.msra.mxu1 %v11600_v23  ;;  %v11705_v20 = vcombine.high %v1771_v17, %v1775_v18  ;;  %v1787_v23 = vld [vmem:[#allocation5 + $0x598] sm:$0xff] }
 0x1fd   : > { %3460 = vmatprep.subr.bf16.mxu1 %v11609_v24  ;;  %v1791_v24 = vld [vmem:[#allocation5 + $0x5b8] sm:$0xff] }
 0x1fe   : > { %3424 = vmatpush1.bf16.msra.mxu0 %v11758_v27  ;;  %v11608_v27 = vcombine.low %v1675_v21, %v1679_v22  ;;  %v1779_v21 = vld [vmem:[#allocation5 + $0x558] sm:$0xff]  ;;  %v11704_v22 = vcombine.low %v1771_v17, %v1775_v18 }
 0x1ff   : > { %3425 = vmatprep.subr.bf16.mxu0 %v11767_v28  ;;  %v11617_v28 = vcombine.high %v1683_v25, %v1687_v26 }
 0x200   : > { %3461 = vmatpush1.bf16.msra.mxu1 %v11608_v27  ;;  %v776_v27 = vlaneseq }
 0x201   : > { %3462 = vmatprep.subr.bf16.mxu1 %v11617_v28  ;;  %v11720_v28 = vcombine.low %v1787_v23, %v1791_v24 }
 0x202   : > { %3426 = vmatpush1.bf16.msra.mxu0 %v11766_v33  ;;  %v11616_v33 = vcombine.low %v1683_v25, %v1687_v26  ;;  %v11721_v26 = vcombine.high %v1787_v23, %v1791_v24  ;;  %v14256_v29 = vshrl.u32 %v776_v27, 7 }
 0x203   : > { %3427 = vmatprep.subr.bf16.mxu0 %v11775_v37  ;;  %v1703_v37 = vld [vmem:[#allocation5 + $0x2f8] sm:$0xff] }
 0x204   : > { %3463 = vmatpush1.bf16.msra.mxu1 %v11616_v33  ;;  %v11633_v39 = vcombine.high %v1699_v36, %v1703_v37  ;;  %v1799_v33 = vld [vmem:[#allocation5 + $0x5f8] sm:$0xff] }
 0x205   : > { %3464 = vmatprep.subr.bf16.mxu1 %v11625_v34  ;;  %v11728_v34 = vcombine.low %v1795_v31, %v1799_v33 }
 0x206   : > { %3428 = vmatpush1.bf16.msra.mxu0 %v11774_v43  ;;  %v11632_v43 = vcombine.low %v1699_v36, %v1703_v37  ;;  %v11729_v36 = vcombine.high %v1795_v31, %v1799_v33  ;;  %v14259_v37 = vsub.s32 0, %v14256_v29 }
 0x207   : > { %3429 = vmatprep.subr.bf16.mxu0 %v11783_v46  ;;  %v1719_v46 = vld [vmem:[#allocation5 + $0x378] sm:$0xff] }
 0x208   : > { %3465 = vmatpush1.bf16.msra.mxu1 %v11624_v38  ;;  %v11649_v48 = vcombine.high %v1715_v45, %v1719_v46  ;;  %v11648_v51 = vcombine.low %v1715_v45, %v1719_v46  ;;  %v774_v38 = vld [vmem:[%s15046_s3] sm:$0xf] }
 0x209   : > { %3466 = vmatprep.subr.bf16.mxu1 %v11633_v39  ;;  %v14265_v39 = vsub.s32 1, %v14256_v29 }
 0x20a   : > { %3430 = vmatpush1.bf16.msra.mxu0 %v11782_v56  ;;  %v11665_v56 = vcombine.high %v1731_v53, %v1735_v54 }
 0x20b   : > { %3431 = vmatprep.subr.bf16.mxu0 %v11791_v57  ;;  %v1743_v57 = vld [vmem:[#allocation5 + $0x438] sm:$0xff]  ;;  %v14283_v49 = vrot.slane %v774_v38, %v14265_v39  ;;  %v14287_v50 = vrot.slane %v14270_v41, %v14265_v39 }
 0x20c   : > { %3467 = vmatpush1.bf16.msra.mxu1 %v11632_v43  ;;  %v11673_v59 = vcombine.high %v1739_v32, %v1743_v57  ;;  %v11672_v0 = vcombine.low %v1739_v32, %v1743_v57  ;;  %v1807_v43 = vld [vmem:[#allocation5 + $0x638] sm:$0xff] }
 0x20d   : > { %3468 = vmatprep.subr.bf16.mxu1 %v11641_v44  ;;  %v14273_v44 = vrot.slane %v774_v38, %v14259_v37  ;;  %v11736_v45 = vcombine.low %v1803_v42, %v1807_v43  ;;  %v11737_v46 = vcombine.high %v1803_v42, %v1807_v43 }
 0x20e   : > { %3432 = vmatpush1.bf16.msra.mxu0 %v11790_v63  ;;  %v1751_v63 = vld [vmem:[#allocation5 + $0x478] sm:$0xff] }
 0x20f   : > { %12551 = vmatprep.subr.mxu0 %v13922_v11  ;;  %v11681_v5 = vcombine.high %v1747_v60, %v1751_v63  ;;  %v11680_v10 = vcombine.low %v1747_v60, %v1751_v63  ;;  %v12711_v53 = vadd.f32 %v14234_v61, %v14273_v44  ;;  %v12712_v63 = vadd.f32 %v14238_v1, %v14283_v49  ;;  %v1823_v1 = vld [vmem:[#allocation5 + $0x6b8] sm:$0xff] }
 0x210   : > { %3469 = vmatpush1.bf16.msra.mxu1 %v11640_v47  ;;  %v14277_v47 = vrot.slane %v14270_v41, %v14259_v37 }
 0x211   : > { %3434 = vmatmul.mubr.bf16.vlgmr.msra.gmra.mrb[8].mxu0 %v14226_v35  ;;  %3470 = vmatprep.subr.bf16.mxu1 %v11649_v48  ;;  %v14280_v48 = vsub.s32 2, %v14256_v29  ;;  %v3530_v13 = vmul.f32 0.125, %v12711_v53  ;;  %v14316_v18 = vmul.f32 0.125, %v12712_v63 }
 0x212   : > { %12553 = vmatprep.mubr.msk.f32.mxu0 %vm13923_vm0, %v13922_v11 }
 0x213   : > { %v14293_v60 = vrot.slane %v774_v38, %v14280_v48  ;;  %v1877_v14 = vrot.slane %v14270_v41, %v14280_v48 }
 0x214   : > { %3471 = vmatpush1.bf16.msra.mxu1 %v11648_v51  ;;  %v1811_v51 = vld [vmem:[#allocation5 + $0x658] sm:$0xff] }
 0x215   : > { %3472 = vmatprep.subr.bf16.mxu1 %v11657_v52  ;;  %v1815_v52 = vld [vmem:[#allocation5 + $0x678] sm:$0xff]  ;;  %v12715_v17 = vadd.f32 %v14236_v62, %v14293_v60  ;;  %v12717_v53 = vadd.f32 %v14244_v4, %v14293_v60  ;;  %v1884_v60 = vsub.s32 4, %v14256_v29 }
 0x217   : > { %v14329_v23 = vmul.f32 0.125, %v12715_v17 }
 0x218   : > { %3473 = vmatpush1.bf16.msra.mxu1 %v11656_v55 }
 0x219   : > { %3474 = vmatprep.subr.bf16.mxu1 %v11665_v56  ;;  %v11745_v56 = vcombine.high %v1811_v51, %v1815_v52 }
 0x21c   : > { %3475 = vmatpush1.bf16.msra.mxu1 %v11664_v58 }
 0x21d   : > { %3487 = vmatprep.subr.bf16.mxu1 %v11673_v59  ;;  %v11744_v59 = vcombine.low %v1811_v51, %v1815_v52 }
 0x21f   : > { %3477 = vmatmul.mubr.bf16.vlgmr.msra.gmra.mrb[8].mxu1 %v14216_v30  ;;  %v1783_v30 = vld [vmem:[#allocation5 + $0x578] sm:$0xff] }
 0x220   : > { %3488 = vmatpush1.bf16.msra.mxu1 %v11672_v0  ;;  %3519 = vmatprep.mubr.bf16.mxu1 %v14218_v40  ;;  %v11713_v40 = vcombine.high %v1779_v21, %v1783_v30  ;;  %v11712_v25 = vcombine.low %v1779_v21, %v1783_v30  ;;  %v14298_v0 = vsub.s32 3, %v14256_v29  ;;  %v1831_v21 = vld [vmem:[#allocation5 + $0x6f8] sm:$0xff] }
 0x221   : > { %3489 = vmatprep.subr.bf16.mxu1 %v11681_v5 }
 0x222   : > { %v1881_v62 = vrot.slane %v14270_v41, %v14298_v0 }
 0x224   : > { %3490 = vmatpush1.bf16.msra.mxu1 %v11680_v10 }
 0x225   : > { %3491 = vmatprep.subr.bf16.mxu1 %v11689_v12  ;;  %v1819_v12 = vld [vmem:[#allocation5 + $0x698] sm:$0xff] }
 0x228   : > { %3492 = vmatpush1.bf16.msra.mxu1 %v11688_v15  ;;  %v11752_v15 = vcombine.low %v1819_v12, %v1823_v1 }
 0x229   : > { %3493 = vmatprep.subr.bf16.mxu1 %v11697_v16  ;;  %v11753_v16 = vcombine.high %v1819_v12, %v1823_v1 }
 0x22c   : > { %3494 = vmatpush1.bf16.msra.mxu1 %v11696_v19  ;;  %v791_v19 = vrot.slane %v774_v38, %v14298_v0 }
 0x22d   : > { %3495 = vmatprep.subr.bf16.mxu1 %v11705_v20  ;;  %v1827_v20 = vld [vmem:[#allocation5 + $0x6d8] sm:$0xff] }
 0x22e   : > { %v11761_v30 = vcombine.high %v1827_v20, %v1831_v21  ;;  %v12716_v24 = vadd.f32 %v14240_v2, %v791_v19  ;;  %v1843_v2 = vld [vmem:[#allocation5 + $0x758] sm:$0xff]  ;;  %v12718_v4 = vadd.f32 %v14248_v7, %v791_v19 }
 0x230   : > { %3496 = vmatpush1.bf16.msra.mxu1 %v11704_v22  ;;  %v14338_v33 = vmul.f32 0.125, %v12716_v24 }
 0x231   : > { %3497 = vmatprep.subr.bf16.mxu1 %v11713_v40  ;;  %v11760_v40 = vcombine.low %v1827_v20, %v1831_v21 }
 0x234   : > { %3498 = vmatpush1.bf16.msra.mxu1 %v11712_v25  ;;  %v1835_v25 = vld [vmem:[#allocation5 + $0x718] sm:$0xff] }
 0x235   : > { %3499 = vmatprep.subr.bf16.mxu1 %v11721_v26  ;;  %v1839_v26 = vld [vmem:[#allocation5 + $0x738] sm:$0xff] }
 0x236   : > { %v11769_v27 = vcombine.high %v1835_v25, %v1839_v26  ;;  %v11768_v31 = vcombine.low %v1835_v25, %v1839_v26 }
 0x238   : > { %3500 = vmatpush1.bf16.msra.mxu1 %v11720_v28 }
 0x239   : > { %3501 = vmatprep.subr.bf16.mxu1 %v11729_v36  ;;  %v1847_v36 = vld [vmem:[#allocation5 + $0x778] sm:$0xff] }
 0x23a   : > { %v11777_v38 = vcombine.high %v1843_v2, %v1847_v36  ;;  %v11776_v43 = vcombine.low %v1843_v2, %v1847_v36 }
 0x23c   : > { %3502 = vmatpush1.bf16.msra.mxu1 %v11728_v34  ;;  %v12713_v34 = vadd.f32 %v14242_v3, %v14273_v44  ;;  %v12714_v3 = vadd.f32 %v14246_v6, %v14283_v49  ;;  %v1851_v44 = vld [vmem:[#allocation5 + $0x798] sm:$0xff] }
 0x23d   : > { %3503 = vmatprep.subr.bf16.mxu1 %v11737_v46  ;;  %v1855_v46 = vld [vmem:[#allocation5 + $0x7b8] sm:$0xff] }
 0x23e   : > { %v11785_v51 = vcombine.high %v1851_v44, %v1855_v46  ;;  %v11784_v52 = vcombine.low %v1851_v44, %v1855_v46  ;;  %v1859_v6 = vld [vmem:[#allocation5 + $0x7d8] sm:$0xff] }
 0x23f   : > { %v1863_v49 = vld [vmem:[#allocation5 + $0x7f8] sm:$0xff] }
 0x240   : > { %3504 = vmatpush1.bf16.msra.mxu1 %v11736_v45  ;;  %v14349_v45 = vmul.f32 0.125, %v12713_v34 }
 0x241   : > { %3505 = vmatprep.subr.bf16.mxu1 %v11745_v56  ;;  %v11792_v56 = vcombine.low %v1859_v6, %v1863_v49 }
 0x244   : > { %3506 = vmatpush1.bf16.msra.mxu1 %v11744_v59 }
 0x245   : > { %3507 = vmatprep.subr.bf16.mxu1 %v11753_v16 }
 0x248   : > { %3508 = vmatpush1.bf16.msra.mxu1 %v11752_v15 }
 0x249   : > { %3509 = vmatprep.subr.bf16.mxu1 %v11761_v30 }
 0x24c   : > { %3510 = vmatpush1.bf16.msra.mxu1 %v11760_v40 }
 0x24d   : > { %3511 = vmatprep.subr.bf16.mxu1 %v11769_v27 }
 0x250   : > { %3512 = vmatpush1.bf16.msra.mxu1 %v11768_v31  ;;  %v1896_v31 = vsub.s32 7, %v14256_v29 }
 0x251   : > { %3513 = vmatprep.subr.bf16.mxu1 %v11777_v38 }
 0x252   : > { %v14514_v2 = vrot.slane %v14270_v41, %v1896_v31 }
 0x254   : > { %3514 = vmatpush1.bf16.msra.mxu1 %v11776_v43 }
 0x255   : > { %3515 = vmatprep.subr.bf16.mxu1 %v11785_v51 }
 0x258   : > { %3516 = vmatpush1.bf16.msra.mxu1 %v11784_v52 }
 0x264   : > { %v3263_v54 = vpop.f32.mrb[4].mxu0  ;;  %v3349_v55 = vpop.f32.mrb[4].mxu1 }
 0x265   : > { %v12719_v32 = vadd.f32 %v3263_v54, %v14277_v47  ;;  %v3265_v57 = vpop.f32.mrb[5].mxu0  ;;  %v3351_v58 = vpop.f32.mrb[5].mxu1  ;;  %v14325_v22 = vadd.f32 %v3349_v55, %v1877_v14  ;;  %v14362_v54 = vmul.f32 0.125, %v12714_v3  ;;  %v11793_v55 = vcombine.high %v1859_v6, %v1863_v49 }
 0x266   : > { %v14301_v61 = vadd.f32 %v3265_v57, %v14287_v50  ;;  %v3267_v5 = vpop.f32.mrb[6].mxu0  ;;  %v14303_v8 = vpop.f32.mrb[6].mxu1  ;;  %v14336_v28 = vadd.f32 %v3351_v58, %v1881_v62  ;;  %v14381_v58 = vmul.f32 0.125, %v12718_v4 }
 0x267   : > { %v3269_v9 = vpop.f32.mrb[7].mxu0  ;;  %v14305_v10 = vpop.f32.mrb[7].mxu1  ;;  %3699 = vrot.lane.b32.xlu0 %v12719_v32, %s13924_s16  ;;  %12552 = vmatpush3.xpose.msk.msra.mxu0 %vm3534_vm1, %v12719_v32  ;;  %v14347_v42 = vadd.f32 %v3267_v5, %v14277_v47  ;;  %v14371_v32 = vmul.f32 0.125, %v12717_v53  ;;  %v1885_v5 = vrot.slane %v14270_v41, %v1884_v60 }
 0x268   : > { %4032 = vrot.lane.b32.xlu1 %v14301_v61, %s13924_s16  ;;  %12561 = vmatprep.subr.mxu0 %v13922_v11  ;;  %v14358_v47 = vadd.f32 %v3269_v9, %v14287_v50  ;;  %v14369_v50 = vadd.f32 %v14303_v8, %v1877_v14  ;;  %v14379_v57 = vadd.f32 %v14305_v10, %v1881_v62 }
 0x269   : > { %3517 = vmatprep.subr.bf16.mxu1 %v11793_v55 }
 0x26a   : > { %12554 = vmatmul.mubr.msk.f32.vlgmr.msra.gmra.mrb[12].mxu0 %vm3534_vm1, %v3530_v13  ;;  %3518 = vmatpush1.bf16.msra.mxu1 %v11792_v56 }
 0x26b   : > { %3697 = vrot.lane.b32.xlu0 %v3530_v13, %s13924_s16  ;;  %12563 = vmatprep.mubr.msk.f32.mxu0 %vm13923_vm0, %v13922_v11 }
 0x26c   : > { %4030 = vrot.lane.b32.xlu1 %v14316_v18, %s13924_s16  ;;  %12556 = vmatprep.subr.mxu1 %v13922_v11 }
 0x26d   : > { %3520 = vmatmul.mubr.bf16.vlgmr.msra.gmra.mrb[8].mxu1 %v14226_v35  ;;  %v1888_v35 = vsub.s32 5, %v14256_v29 }
 0x26e   : > { %12558 = vmatprep.mubr.msk.f32.mxu1 %vm13923_vm0, %v13922_v11 }
 0x26f   : > { %4364 = vrot.lane.b32.xlu0 %v14325_v22, %s13924_s16  ;;  %v14413_v8 = vrot.slane %v14270_v41, %v1888_v35 }
 0x270   : > { %4362 = vrot.lane.b32.xlu1 %v14329_v23, %s13924_s16 }
 0x273   : > { %4696 = vrot.lane.b32.xlu0 %v14336_v28, %s13924_s16 }
 0x274   : > { %4694 = vrot.lane.b32.xlu1 %v14338_v33, %s13924_s16 }
 0x277   : > { %5032 = vrot.lane.b32.xlu0 %v14347_v42, %s13924_s16 }
 0x278   : > { %5030 = vrot.lane.b32.xlu1 %v14349_v45, %s13924_s16 }
 0x27b   : > { %5364 = vrot.lane.b32.xlu0 %v14358_v47, %s13924_s16 }
 0x27c   : > { %5362 = vrot.lane.b32.xlu1 %v14362_v54, %s13924_s16 }
 0x27f   : > { %5696 = vrot.lane.b32.xlu0 %v14369_v50, %s13924_s16 }
 0x280   : > { %5694 = vrot.lane.b32.xlu1 %v14371_v32, %s13924_s16 }
 0x283   : > { %6028 = vrot.lane.b32.xlu0 %v14379_v57, %s13924_s16 }
 0x284   : > { %6026 = vrot.lane.b32.xlu1 %v14381_v58, %s13924_s16 }
 0x2d9   : > { %v3700_v7 = vpop.permute.xlu0 %3699 }
 0x2da   : > { %12562 = vmatpush3.xpose.msk.msra.mxu0 %vm3534_vm1, %v3700_v7  ;;  %v4033_v63 = vpop.permute.xlu1 %4032 }
 0x2db   : > { %12571 = vmatprep.subr.mxu0 %v13922_v11 }
 0x2dd   : > { %v3698_v59 = vpop.permute.xlu0 %3697 }
 0x2de   : > { %12564 = vmatmul.mubr.msk.f32.vlgmr.msra.gmra.mrb[14].mxu0 %vm3534_vm1, %v3698_v59  ;;  %v4031_v9 = vpop.permute.xlu1 %4030 }
 0x2df   : > { %12572 = vmatpush3.xpose.msk.msra.mxu0 %vm3534_vm1, %v14301_v61  ;;  %12573 = vmatprep.mubr.msk.f32.mxu0 %vm13923_vm0, %v13922_v11 }
 0x2e0   : > { %12581 = vmatprep.subr.mxu0 %v13922_v11 }
 0x2e1   : > { %v4365_v16 = vpop.permute.xlu0 %4364 }
 0x2e2   : > { %12574 = vmatmul.mubr.msk.f32.vlgmr.msra.gmra.mrb[16].mxu0 %vm3534_vm1, %v14316_v18  ;;  %v4363_v17 = vpop.permute.xlu1 %4362 }
 0x2e3   : > { %12582 = vmatpush3.xpose.msk.msra.mxu0 %vm3534_vm1, %v4033_v63  ;;  %12583 = vmatprep.mubr.msk.f32.mxu0 %vm13923_vm0, %v13922_v11 }
 0x2e4   : > { %12591 = vmatprep.subr.mxu0 %v13922_v11  ;;  %v3435_v61 = vpop.f32.mrb[8].mxu0 }
 0x2e5   : > { %v14415_v10 = vadd.f32 %v3435_v61, %v1885_v5  ;;  %v14417_v12 = vpop.f32.mrb[9].mxu0  ;;  %v4697_v18 = vpop.permute.xlu0 %4696 }
 0x2e6   : > { %12584 = vmatmul.mubr.msk.f32.vlgmr.msra.gmra.mrb[18].mxu0 %vm3534_vm1, %v4031_v9  ;;  %v3439_v1 = vpop.f32.mrb[10].mxu0  ;;  %v4695_v19 = vpop.permute.xlu1 %4694 }
 0x2e7   : > { %12592 = vmatpush3.xpose.msk.msra.mxu0 %vm3534_vm1, %v14325_v22  ;;  %12593 = vmatprep.mubr.msk.f32.mxu0 %vm13923_vm0, %v13922_v11  ;;  %v14424_v13 = vadd.f32 %v3439_v1, %v1885_v5  ;;  %v3441_v14 = vpop.f32.mrb[11].mxu0 }
 0x2e8   : > { %12601 = vmatprep.subr.mxu0 %v13922_v11  ;;  %v14428_v15 = vadd.f32 %v3441_v14, %v14413_v8  ;;  %12557 = vmatpush3.msra.mxu1 %v14415_v10 }
 0x2e9   : > { %12566 = vmatprep.subr.mxu1 %v13922_v11  ;;  %v5033_v20 = vpop.permute.xlu0 %5032 }
 0x2ea   : > { %12594 = vmatmul.mubr.msk.f32.vlgmr.msra.gmra.mrb[20].mxu0 %vm3534_vm1, %v14329_v23  ;;  %v5031_v21 = vpop.permute.xlu1 %5030 }
 0x2eb   : > { %12602 = vmatpush3.xpose.msk.msra.mxu0 %vm3534_vm1, %v4365_v16  ;;  %12603 = vmatprep.mubr.msk.f32.mxu0 %vm13923_vm0, %v13922_v11 }
 0x2ec   : > { %12611 = vmatprep.subr.mxu0 %v13922_v11 }
 0x2ed   : > { %v5365_v30 = vpop.permute.xlu0 %5364 }
 0x2ee   : > { %12604 = vmatmul.mubr.msk.f32.vlgmr.msra.gmra.mrb[22].mxu0 %vm3534_vm1, %v4363_v17  ;;  %v5363_v22 = vpop.permute.xlu1 %5362 }
 0x2ef   : > { %12612 = vmatpush3.xpose.msk.msra.mxu0 %vm3534_vm1, %v14336_v28  ;;  %12613 = vmatprep.mubr.msk.f32.mxu0 %vm13923_vm0, %v13922_v11  ;;  %v1892_v28 = vsub.s32 6, %v14256_v29 }
 0x2f0   : > { %12621 = vmatprep.subr.mxu0 %v13922_v11 }
 0x2f1   : > { %v5697_v62 = vpop.permute.xlu0 %5696 }
 0x2f2   : > { %12614 = vmatmul.mubr.msk.f32.vlgmr.msra.gmra.mrb[24].mxu0 %vm3534_vm1, %v14338_v33  ;;  %v5695_v40 = vpop.permute.xlu1 %5694  ;;  %v14507_v33 = vrot.slane %v14270_v41, %v1892_v28 }
 0x2f3   : > { %12622 = vmatpush3.xpose.msk.msra.mxu0 %vm3534_vm1, %v4697_v18  ;;  %12623 = vmatprep.mubr.msk.f32.mxu0 %vm13923_vm0, %v13922_v11 }
 0x2f4   : > { %12631 = vmatprep.subr.mxu0 %v13922_v11 }
 0x2f5   : > { %v6029_v23 = vpop.permute.xlu0 %6028 }
 0x2f6   : > { %12624 = vmatmul.mubr.msk.f32.vlgmr.msra.gmra.mrb[26].mxu0 %vm3534_vm1, %v4695_v19  ;;  %v6027_v24 = vpop.permute.xlu1 %6026 }
 0x2f7   : > { %12632 = vmatpush3.xpose.msk.msra.mxu0 %vm3534_vm1, %v14347_v42  ;;  %12633 = vmatprep.mubr.msk.f32.mxu0 %vm13923_vm0, %v13922_v11 }
 0x2f8   : > { %12641 = vmatprep.subr.mxu0 %v13922_v11 }
 0x2fa   : > { %12634 = vmatmul.mubr.msk.f32.vlgmr.msra.gmra.mrb[28].mxu0 %vm3534_vm1, %v14349_v45 }
 0x2fb   : > { %12642 = vmatpush3.xpose.msk.msra.mxu0 %vm3534_vm1, %v5033_v20  ;;  %12643 = vmatprep.mubr.msk.f32.mxu0 %vm13923_vm0, %v13922_v11 }
 0x2fc   : > { %12651 = vmatprep.subr.mxu0 %v13922_v11 }
 0x2fe   : > { %12644 = vmatmul.mubr.msk.f32.vlgmr.msra.gmra.mrb[30].mxu0 %vm3534_vm1, %v5031_v21 }
 0x2ff   : > { %12652 = vmatpush3.xpose.msk.msra.mxu0 %vm3534_vm1, %v14358_v47  ;;  %12653 = vmatprep.mubr.msk.f32.mxu0 %vm13923_vm0, %v13922_v11 }
 0x300   : > { %12661 = vmatprep.subr.mxu0 %v13922_v11 }
 0x302   : > { %12654 = vmatmul.mubr.msk.f32.vlgmr.msra.gmra.mrb[32].mxu0 %vm3534_vm1, %v14362_v54 }
 0x303   : > { %12662 = vmatpush3.xpose.msk.msra.mxu0 %vm3534_vm1, %v5365_v30  ;;  %12663 = vmatprep.mubr.msk.f32.mxu0 %vm13923_vm0, %v13922_v11 }
 0x304   : > { %12671 = vmatprep.subr.mxu0 %v13922_v11 }
 0x306   : > { %12664 = vmatmul.mubr.msk.f32.vlgmr.msra.gmra.mrb[34].mxu0 %vm3534_vm1, %v5363_v22 }
 0x307   : > { %12672 = vmatpush3.xpose.msk.msra.mxu0 %vm3534_vm1, %v14369_v50  ;;  %12673 = vmatprep.mubr.msk.f32.mxu0 %vm13923_vm0, %v13922_v11 }
 0x308   : > { %12681 = vmatprep.subr.mxu0 %v13922_v11 }
 0x30a   : > { %12674 = vmatmul.mubr.msk.f32.vlgmr.msra.gmra.mrb[36].mxu0 %vm3534_vm1, %v14371_v32 }
 0x30b   : > { %12682 = vmatpush3.xpose.msk.msra.mxu0 %vm3534_vm1, %v5697_v62  ;;  %12683 = vmatprep.mubr.msk.f32.mxu0 %vm13923_vm0, %v13922_v11 }
 0x30c   : > { %12691 = vmatprep.subr.mxu0 %v13922_v11 }
 0x30e   : > { %12684 = vmatmul.mubr.msk.f32.vlgmr.msra.gmra.mrb[38].mxu0 %vm3534_vm1, %v5695_v40 }
 0x30f   : > { %12692 = vmatpush3.xpose.msk.msra.mxu0 %vm3534_vm1, %v14379_v57  ;;  %12693 = vmatprep.mubr.msk.f32.mxu0 %vm13923_vm0, %v13922_v11 }
 0x310   : > { %12701 = vmatprep.subr.mxu0 %v13922_v11 }
 0x312   : > { %12694 = vmatmul.mubr.msk.f32.vlgmr.msra.gmra.mrb[40].mxu0 %vm3534_vm1, %v14381_v58 }
 0x313   : > { %12702 = vmatpush3.xpose.msk.msra.mxu0 %vm3534_vm1, %v6029_v23  ;;  %12703 = vmatprep.mubr.msk.f32.mxu0 %vm13923_vm0, %v13922_v11 }
 0x316   : > { %12704 = vmatmul.mubr.msk.f32.vlgmr.msra.gmra.mrb[42].mxu0 %vm3534_vm1, %v6027_v24 }
 0x33d   : > { %v14498_v25 = vpop.f32.mrb[12].mxu0 }
 0x33e   : > { %v12555_v26 = vpop.f32.mrb[13].mxu0  ;;  %v3612_v27 = vsel %vm3611_vm2, %v14498_v25, -inf }
 0x33f   : > { %3613 = vmax.xlane.f32.xlu0 %v3612_v27 }
 0x340   : > { %v14509_v34 = vpop.f32.mrb[8].mxu1 }
 0x341   : > { %v14516_v36 = vpop.f32.mrb[9].mxu1 }
 0x342   : > { %v3525_v38 = vpop.f32.mrb[10].mxu1 }
 0x343   : > { %v14519_v42 = vadd.f32 %v3525_v38, %v14507_v33  ;;  %v3527_v43 = vpop.f32.mrb[11].mxu1  ;;  %v14578_v38 = vadd.f32 %v14417_v12, %v14413_v8  ;;  %v14591_v8 = vadd.f32 %v14509_v34, %v14507_v33 }
 0x344   : > { %v14522_v45 = vadd.f32 %v3527_v43, %v14514_v2 }
 0x3b1   : > { %v14524_v3 = vpop.f32.mrb[14].mxu0 }
 0x3b2   : > { %v12565_v44 = vpop.f32.mrb[15].mxu0  ;;  %v3775_v46 = vsel %vm3611_vm2, %v14524_v3, -inf }
 0x3b3   : > { %3776 = vmax.xlane.f32.xlu1 %v3775_v46 }
 0x3b5   : > { %v14528_v51 = vpop.f32.mrb[16].mxu0 }
 0x3b6   : > { %v12575_v41 = vpop.f32.mrb[17].mxu0  ;;  %v3945_v47 = vsel %vm3611_vm2, %v14528_v51, -inf }
 0x3b7   : > { %3946 = vmax.xlane.f32.xlu0 %v3945_v47 }
 0x3b9   : > { %v14532_v52 = vpop.f32.mrb[18].mxu0 }
 0x3ba   : > { %v12585_v53 = vpop.f32.mrb[19].mxu0  ;;  %v4108_v54 = vsel %vm3611_vm2, %v14532_v52, -inf }
 0x3bb   : > { %4109 = vmax.xlane.f32.xlu0 %v4108_v54 }
 0x3bd   : > { %v14536_v6 = vpop.f32.mrb[20].mxu0 }
 0x3be   : > { %v12595_v49 = vpop.f32.mrb[21].mxu0  ;;  %v4277_v55 = vsel %vm3611_vm2, %v14536_v6, -inf }
 0x3bf   : > { %4278 = vmax.xlane.f32.xlu1 %v4277_v55 }
 0x3c1   : > { %v14540_v50 = vpop.f32.mrb[22].mxu0 }
 0x3c2   : > { %v12605_v56 = vpop.f32.mrb[23].mxu0  ;;  %v4440_v32 = vsel %vm3611_vm2, %v14540_v50, -inf }
 0x3c3   : > { %4441 = vmax.xlane.f32.xlu0 %v4440_v32 }
 0x3c5   : > { %v14544_v4 = vpop.f32.mrb[24].mxu0 }
 0x3c6   : > { %v12615_v57 = vpop.f32.mrb[25].mxu0  ;;  %v4609_v58 = vsel %vm3611_vm2, %v14544_v4, -inf }
 0x3c7   : > { %4610 = vmax.xlane.f32.xlu1 %v4609_v58 }
 0x3c9   : > { %v14548_v7 = vpop.f32.mrb[26].mxu0 }
 0x3ca   : > { %v12625_v59 = vpop.f32.mrb[27].mxu0  ;;  %v4772_v63 = vsel %vm3611_vm2, %v14548_v7, -inf }
 0x3cb   : > { %4773 = vmax.xlane.f32.xlu0 %v4772_v63 }
 0x3cc   : > { %v3614_v43 = vpop.xlane.xlu0 %3613 }
 0x3cd   : > { %v14552_v5 = vpop.f32.mrb[28].mxu0  ;;  %v3615_v44 = vsub.f32 %v14498_v25, %v3614_v43 }
 0x3ce   : > { %v12635_v61 = vpop.f32.mrb[29].mxu0  ;;  %v4945_v9 = vsel %vm3611_vm2, %v14552_v5, -inf }
 0x3cf   : > { %4946 = vmax.xlane.f32.xlu1 %v4945_v9 }
 0x3d1   : > { %v14556_v1 = vpop.f32.mrb[30].mxu0 }
 0x3d2   : > { %v12645_v14 = vpop.f32.mrb[31].mxu0  ;;  %v5108_v16 = vsel %vm3611_vm2, %v14556_v1, -inf }
 0x3d3   : > { %5109 = vmax.xlane.f32.xlu0 %v5108_v16 }
 0x3d5   : > { %v14560_v17 = vpop.f32.mrb[32].mxu0 }
 0x3d6   : > { %v12655_v18 = vpop.f32.mrb[33].mxu0  ;;  %v5277_v46 = vsel %vm3611_vm2, %v14560_v17, -inf }
 0x3d9   : > { %v14562_v19 = vpop.f32.mrb[34].mxu0 }
 0x3da   : > { %v12665_v20 = vpop.f32.mrb[35].mxu0  ;;  %v5440_v21 = vsel %vm3611_vm2, %v14562_v19, -inf }
 0x3db   : > { %5441 = vmax.xlane.f32.xlu0 %v5440_v21 }
 0x3dd   : > { %v14566_v30 = vpop.f32.mrb[36].mxu0 }
 0x3de   : > { %v12675_v22 = vpop.f32.mrb[37].mxu0  ;;  %v5609_v12 = vsel %vm3611_vm2, %v14566_v30, -inf }
 0x3e0   : > { %3787 = vrot.lane.b32.xlu1 %v14415_v10, %s13924_s16  ;;  %v3616_v10 = vmul.f32 1.442695, %v3615_v44 }
 0x3e1   : > { %v14570_v62 = vpop.f32.mrb[38].mxu0 }
 0x3e2   : > { %v12685_v40 = vpop.f32.mrb[39].mxu0  ;;  %13673 = vpow2.f32 %v3616_v10  ;;  %v5772_v53 = vsel %vm3611_vm2, %v14570_v62, -inf }
 0x3e5   : > { %v14572_v23 = vpop.f32.mrb[40].mxu0 }
 0x3e6   : > { %v12695_v24 = vpop.f32.mrb[41].mxu0  ;;  %v5941_v33 = vsel %vm3611_vm2, %v14572_v23, -inf }
 0x3e9   : > { %v14574_v26 = vpop.f32.mrb[42].mxu0 }
 0x3ea   : > { %v12705_v27 = vpop.f32.mrb[43].mxu0  ;;  %v6104_v57 = vsel %vm3611_vm2, %v14574_v26, -inf }
 0x3ec   : > { %v14585_v41 = vpop.eup %13673 }
 0x3ed   : > { %v3618_v47 = vsel %vm3611_vm2, %v14585_v41, 0.0 }
 0x3f1   : > { %4120 = vrot.lane.b32.xlu0 %v14578_v38, %s13924_s16 }
 0x404   : > { %5278 = vmax.xlane.f32.xlu1 %v5277_v46 }
 0x408   : > { %3619 = vadd.xlane.f32.xlu1 %v3618_v47 }
 0x419   : > { %4452 = vrot.lane.b32.xlu1 %v14591_v8, %s13924_s16 }
 0x43d   : > { %5610 = vmax.xlane.f32.xlu1 %v5609_v12 }
 0x440   : > { %v3777_v25 = vpop.xlane.xlu1 %3776 }
 0x441   : > { %v3778_v54 = vsub.f32 %v14524_v3, %v3777_v25  ;;  %5773 = vmax.xlane.f32.xlu1 %v5772_v53 }
 0x443   : > { %v3779_v49 = vmul.f32 1.442695, %v3778_v54 }
 0x444   : > { %v3947_v55 = vpop.xlane.xlu0 %3946 }
 0x445   : > { %13675 = vpow2.f32 %v3779_v49  ;;  %v3948_v34 = vsub.f32 %v14528_v51, %v3947_v55  ;;  %5942 = vmax.xlane.f32.xlu1 %v5941_v33 }
 0x447   : > { %v3949_v56 = vmul.f32 1.442695, %v3948_v34 }
 0x448   : > { %v4110_v32 = vpop.xlane.xlu0 %4109 }
 0x449   : > { %13677 = vpow2.f32 %v3949_v56  ;;  %v4111_v58 = vsub.f32 %v14532_v52, %v4110_v32  ;;  %6105 = vmax.xlane.f32.xlu1 %v6104_v57 }
 0x44b   : > { %v4112_v3 = vmul.f32 1.442695, %v4111_v58 }
 0x44c   : > { %v4279_v59 = vpop.xlane.xlu1 %4278 }
 0x44d   : > { %13679 = vpow2.f32 %v4112_v3  ;;  %v4280_v63 = vsub.f32 %v14536_v6, %v4279_v59 }
 0x44f   : > { %v14607_v61 = vpop.eup %13675  ;;  %v4281_v9 = vmul.f32 1.442695, %v4280_v63  ;;  %v14655_v63 = vadd.f32 %v14516_v36, %v14514_v2 }
 0x450   : > { %v4442_v14 = vpop.xlane.xlu0 %4441  ;;  %v3781_v51 = vsel %vm3611_vm2, %v14607_v61, 0.0 }
 0x451   : > { %13681 = vpow2.f32 %v4281_v9  ;;  %v4443_v16 = vsub.f32 %v14540_v50, %v4442_v14  ;;  %3782 = vadd.xlane.f32.xlu0 %v3781_v51 }
 0x453   : > { %v14612_v18 = vpop.eup %13677  ;;  %v4444_v52 = vmul.f32 1.442695, %v4443_v16 }
 0x454   : > { %v4611_v20 = vpop.xlane.xlu1 %4610  ;;  %v3951_v21 = vsel %vm3611_vm2, %v14612_v18, 0.0 }
 0x455   : > { %13683 = vpow2.f32 %v4444_v52  ;;  %v4612_v6 = vsub.f32 %v14544_v4, %v4611_v20  ;;  %3952 = vadd.xlane.f32.xlu0 %v3951_v21 }
 0x457   : > { %v14617_v22 = vpop.eup %13679  ;;  %v4613_v40 = vmul.f32 1.442695, %v4612_v6 }
 0x458   : > { %v4774_v24 = vpop.xlane.xlu0 %4773  ;;  %v4114_v27 = vsel %vm3611_vm2, %v14617_v22, 0.0 }
 0x459   : > { %13685 = vpow2.f32 %v4613_v40  ;;  %v4775_v50 = vsub.f32 %v14548_v7, %v4774_v24  ;;  %4115 = vadd.xlane.f32.xlu0 %v4114_v27 }
 0x45b   : > { %v14622_v43 = vpop.eup %13681  ;;  %v4776_v44 = vmul.f32 1.442695, %v4775_v50 }
 0x45c   : > { %v4947_v10 = vpop.xlane.xlu1 %4946  ;;  %v4283_v46 = vsel %vm3611_vm2, %v14622_v43, 0.0 }
 0x45d   : > { %13687 = vpow2.f32 %v4776_v44  ;;  %v4948_v4 = vsub.f32 %v14552_v5, %v4947_v10  ;;  %4284 = vadd.xlane.f32.xlu0 %v4283_v46 }
 0x45f   : > { %v14627_v47 = vpop.eup %13683  ;;  %v4949_v12 = vmul.f32 1.442695, %v4948_v4 }
 0x460   : > { %v5110_v25 = vpop.xlane.xlu0 %5109  ;;  %v4446_v53 = vsel %vm3611_vm2, %v14627_v47, 0.0  ;;  %v3788_v9 = vpop.permute.xlu1 %3787 }
 0x461   : > { %13689 = vpow2.f32 %v4949_v12  ;;  %v5111_v7 = vsub.f32 %v14556_v1, %v5110_v25  ;;  %4447 = vadd.xlane.f32.xlu0 %v4446_v53 }
 0x463   : > { %v14632_v54 = vpop.eup %13685  ;;  %v5112_v49 = vmul.f32 1.442695, %v5111_v7 }
 0x464   : > { %v4615_v55 = vsel %vm3611_vm2, %v14632_v54, 0.0 }
 0x465   : > { %13691 = vpow2.f32 %v5112_v49  ;;  %4616 = vadd.xlane.f32.xlu1 %v4615_v55 }
 0x467   : > { %v14636_v5 = vpop.eup %13687 }
 0x468   : > { %v5442_v33 = vpop.xlane.xlu0 %5441  ;;  %v4778_v34 = vsel %vm3611_vm2, %v14636_v5, 0.0 }
 0x469   : > { %v5443_v56 = vsub.f32 %v14562_v19, %v5442_v33  ;;  %4779 = vadd.xlane.f32.xlu0 %v4778_v34 }
 0x46b   : > { %v14641_v32 = vpop.eup %13689  ;;  %v5444_v1 = vmul.f32 1.442695, %v5443_v56 }
 0x46c   : > { %v4951_v57 = vsel %vm3611_vm2, %v14641_v32, 0.0  ;;  %v4121_v7 = vpop.permute.xlu0 %4120 }
 0x46d   : > { %13693 = vpow2.f32 %v5444_v1  ;;  %4952 = vadd.xlane.f32.xlu0 %v4951_v57 }
 0x46f   : > { %v14645_v58 = vpop.eup %13691 }
 0x470   : > { %v5114_v3 = vsel %vm3611_vm2, %v14645_v58, 0.0 }
 0x471   : > { %5115 = vadd.xlane.f32.xlu0 %v5114_v3 }
 0x477   : > { %v14649_v59 = vpop.eup %13693 }
 0x478   : > { %v5446_v19 = vsel %vm3611_vm2, %v14649_v59, 0.0 }
 0x479   : > { %5447 = vadd.xlane.f32.xlu0 %v5446_v19 }
 0x48f   : > { %4784 = vrot.lane.b32.xlu0 %v14655_v63, %s13924_s16 }
 0x491   : > { %v5279_v14 = vpop.xlane.xlu1 %5278 }
 0x492   : > { %v5280_v51 = vsub.f32 %v14560_v17, %v5279_v14 }
 0x494   : > { %v5281_v16 = vmul.f32 1.442695, %v5280_v51 }
 0x495   : > { %v3620_v52 = vpop.xlane.xlu1 %3619 }
 0x496   : > { %13695 = vpow2.f32 %v5281_v16 }
 0x497   : > { %13697 = vrcp.f32 %v3620_v52 }
 0x499   : > { %v14673_v36 = vpop.permute.xlu1 %4452 }
 0x4a0   : > { %v14660_v20 = vpop.eup %13695 }
 0x4a1   : > { %v13698_v21 = vpop.eup %13697  ;;  %v5283_v6 = vsel %vm3611_vm2, %v14660_v20, 0.0 }
 0x4a2   : > { %v3622_v2 = vmul.f32 %v13698_v21, %v14585_v41  ;;  %5284 = vadd.xlane.f32.xlu1 %v5283_v6 }
 0x4a4   : > { %12559 = vmatmul.mubr.msk.f32.vlgmr.msra.gmra.mrb[12].mxu1 %vm3611_vm2, %v3622_v2 }
 0x4a5   : > { %12567 = vmatpush3.msra.mxu1 %v3788_v9  ;;  %12568 = vmatprep.mubr.msk.f32.mxu1 %vm13923_vm0, %v13922_v11 }
 0x4a6   : > { %12576 = vmatprep.subr.mxu1 %v13922_v11 }
 0x4b3   : > { %5120 = vrot.lane.b32.xlu1 %v14424_v13, %s13924_s16 }
 0x4b7   : > { %5452 = vrot.lane.b32.xlu1 %v14428_v15, %s13924_s16 }
 0x4ca   : > { %v5611_v17 = vpop.xlane.xlu1 %5610 }
 0x4cb   : > { %v5612_v41 = vsub.f32 %v14566_v30, %v5611_v17 }
 0x4cd   : > { %v5613_v40 = vmul.f32 1.442695, %v5612_v41 }
 0x4ce   : > { %v5774_v24 = vpop.xlane.xlu1 %5773 }
 0x4cf   : > { %13699 = vpow2.f32 %v5613_v40  ;;  %v5775_v27 = vsub.f32 %v14570_v62, %v5774_v24 }
 0x4d1   : > { %v5776_v50 = vmul.f32 1.442695, %v5775_v27 }
 0x4d2   : > { %v5943_v44 = vpop.xlane.xlu1 %5942 }
 0x4d3   : > { %13701 = vpow2.f32 %v5776_v50  ;;  %v5944_v10 = vsub.f32 %v14572_v23, %v5943_v44 }
 0x4d5   : > { %v5945_v46 = vmul.f32 1.442695, %v5944_v10 }
 0x4d6   : > { %v6106_v4 = vpop.xlane.xlu1 %6105 }
 0x4d7   : > { %13703 = vpow2.f32 %v5945_v46  ;;  %v6107_v12 = vsub.f32 %v14574_v26, %v6106_v4 }
 0x4d9   : > { %v14679_v25 = vpop.eup %13699  ;;  %v6108_v53 = vmul.f32 1.442695, %v6107_v12 }
 0x4da   : > { %v5615_v30 = vsel %vm3611_vm2, %v14679_v25, 0.0 }
 0x4db   : > { %13705 = vpow2.f32 %v6108_v53  ;;  %5616 = vadd.xlane.f32.xlu1 %v5615_v30 }
 0x4dd   : > { %v14683_v62 = vpop.eup %13701 }
 0x4de   : > { %v3783_v49 = vpop.xlane.xlu0 %3782  ;;  %v5778_v23 = vsel %vm3611_vm2, %v14683_v62, 0.0 }
 0x4df   : > { %13707 = vrcp.f32 %v3783_v49  ;;  %5779 = vadd.xlane.f32.xlu0 %v5778_v23 }
 0x4e1   : > { %v14687_v55 = vpop.eup %13703 }
 0x4e2   : > { %v3953_v26 = vpop.xlane.xlu0 %3952  ;;  %v5947_v33 = vsel %vm3611_vm2, %v14687_v55, 0.0 }
 0x4e3   : > { %13709 = vrcp.f32 %v3953_v26  ;;  %5948 = vadd.xlane.f32.xlu1 %v5947_v33 }
 0x4e5   : > { %v14691_v34 = vpop.eup %13705 }
 0x4e6   : > { %v4116_v56 = vpop.xlane.xlu0 %4115  ;;  %v6110_v1 = vsel %vm3611_vm2, %v14691_v34, 0.0 }
 0x4e7   : > { %13711 = vrcp.f32 %v4116_v56  ;;  %6111 = vadd.xlane.f32.xlu0 %v6110_v1 }
 0x4e9   : > { %v13708_v57 = vpop.eup %13707 }
 0x4ea   : > { %v3785_v3 = vmul.f32 %v13708_v57, %v14607_v61  ;;  %v4285_v19 = vpop.xlane.xlu0 %4284 }
 0x4eb   : > { %13713 = vrcp.f32 %v4285_v19 }
 0x4ec   : > { %12569 = vmatmul.mubr.msk.f32.vlgmr.msra.gmra.mrb[14].mxu1 %vm3611_vm2, %v3785_v3 }
 0x4ed   : > { %v13710_v9 = vpop.eup %13709  ;;  %12577 = vmatpush3.msra.mxu1 %v14578_v38  ;;  %12578 = vmatprep.mubr.msk.f32.mxu1 %vm13923_vm0, %v13922_v11 }
 0x4ee   : > { %v3955_v14 = vmul.f32 %v13710_v9, %v14612_v18  ;;  %v4448_v51 = vpop.xlane.xlu0 %4447  ;;  %12586 = vmatprep.subr.mxu1 %v13922_v11 }
 0x4ef   : > { %13715 = vrcp.f32 %v4448_v51 }
 0x4f0   : > { %12579 = vmatmul.mubr.msk.f32.vlgmr.msra.gmra.mrb[16].mxu1 %vm3611_vm2, %v3955_v14 }
 0x4f1   : > { %v13712_v16 = vpop.eup %13711  ;;  %12587 = vmatpush3.msra.mxu1 %v4121_v7  ;;  %12588 = vmatprep.mubr.msk.f32.mxu1 %vm13923_vm0, %v13922_v11 }
 0x4f2   : > { %v4118_v61 = vmul.f32 %v13712_v16, %v14617_v22  ;;  %v4617_v52 = vpop.xlane.xlu1 %4616  ;;  %12596 = vmatprep.subr.mxu1 %v13922_v11  ;;  %v13097_v16 = vld [vmem:[#allocation7] ss:$16 sps:$4 sm:$0xff]  }
 0x4f3   : > { %13717 = vrcp.f32 %v4617_v52  ;;  %v13102_v52 = vld [vmem:[#allocation7 + $0xc] ss:$16 sps:$4 sm:$0xff]  }
 0x4f4   : > { %12589 = vmatmul.mubr.msk.f32.vlgmr.msra.gmra.mrb[18].mxu1 %vm3611_vm2, %v4118_v61  ;;  %5784 = vrot.lane.b32.xlu1 %v14519_v42, %s13924_s16  ;;  %v13099_v61 = vld [vmem:[#allocation7 + $0x4] ss:$16 sps:$4 sm:$0xff]  }
 0x4f5   : > { %v13714_v38 = vpop.eup %13713  ;;  %12597 = vmatpush3.msra.mxu1 %v14591_v8  ;;  %12598 = vmatprep.mubr.msk.f32.mxu1 %vm13923_vm0, %v13922_v11 }
 0x4f6   : > { %v4287_v18 = vmul.f32 %v13714_v38, %v14622_v43  ;;  %v4780_v21 = vpop.xlane.xlu0 %4779  ;;  %12606 = vmatprep.subr.mxu1 %v13922_v11  ;;  %6999 = vmatprep.subr.bf16.mxu0 %v13099_v61  ;;  %v13100_v38 = vld [vmem:[#allocation7 + $0x8] ss:$16 sps:$4 sm:$0xff]  }
 0x4f7   : > { %13719 = vrcp.f32 %v4780_v21  ;;  %7000 = vmatpush1.bf16.msra.mxu0 %v13097_v16  ;;  %v13103_v21 = vld [vmem:[#allocation7 + $0x20] ss:$16 sps:$4 sm:$0xff]   ;;  %v13172_v16 = vld [vmem:[#allocation7 + $0x188] ss:$16 sps:$4 sm:$0xff]  }
 0x4f8   : > { %12599 = vmatmul.mubr.msk.f32.vlgmr.msra.gmra.mrb[20].mxu1 %vm3611_vm2, %v4287_v18  ;;  %v13105_v18 = vld [vmem:[#allocation7 + $0x24] ss:$16 sps:$4 sm:$0xff]  }
 0x4f9   : > { %v13716_v22 = vpop.eup %13715  ;;  %12607 = vmatpush3.msra.mxu1 %v14673_v36  ;;  %12608 = vmatprep.mubr.msk.f32.mxu1 %vm13923_vm0, %v13922_v11 }
 0x4fa   : > { %v4450_v6 = vmul.f32 %v13716_v22, %v14627_v47  ;;  %12616 = vmatprep.subr.mxu1 %v13922_v11  ;;  %v4953_v8 = vpop.xlane.xlu0 %4952  ;;  %v13108_v22 = vld [vmem:[#allocation7 + $0x2c] ss:$16 sps:$4 sm:$0xff]   ;;  %7001 = vmatprep.subr.bf16.mxu0 %v13105_v18 }
 0x4fb   : > { %13721 = vrcp.f32 %v4953_v8  ;;  %v13111_v8 = vld [vmem:[#allocation7 + $0x44] ss:$16 sps:$4 sm:$0xff]   ;;  %7002 = vmatpush1.bf16.msra.mxu0 %v13103_v21  ;;  %v13178_v21 = vld [vmem:[#allocation7 + $0x1a8] ss:$16 sps:$4 sm:$0xff]  }
 0x4fc   : > { %12609 = vmatmul.mubr.msk.f32.vlgmr.msra.gmra.mrb[22].mxu1 %vm3611_vm2, %v4450_v6  ;;  %v13106_v6 = vld [vmem:[#allocation7 + $0x28] ss:$16 sps:$4 sm:$0xff]   ;;  %7003 = vmatprep.subr.bf16.mxu0 %v13111_v8  ;;  %v13183_v8 = vld [vmem:[#allocation7 + $0x1c4] ss:$16 sps:$4 sm:$0xff]  }
 0x4fd   : > { %v13718_v2 = vpop.eup %13717  ;;  %12617 = vmatpush3.msra.mxu1 %v14655_v63  ;;  %6116 = vrot.lane.b32.xlu0 %v14522_v45, %s13924_s16 }
 0x4fe   : > { %v4619_v43 = vmul.f32 %v13718_v2, %v14632_v54  ;;  %12618 = vmatprep.mubr.msk.f32.mxu1 %vm13923_vm0, %v13922_v11  ;;  %12626 = vmatprep.subr.mxu1 %v13922_v11  ;;  %v5116_v47 = vpop.xlane.xlu0 %5115  ;;  %v13114_v2 = vld [vmem:[#allocation7 + $0x4c] ss:$16 sps:$4 sm:$0xff]  }
 0x4ff   : > { %13723 = vrcp.f32 %v5116_v47  ;;  %v13112_v47 = vld [vmem:[#allocation7 + $0x48] ss:$16 sps:$4 sm:$0xff]  }
 0x500   : > { %12619 = vmatmul.mubr.msk.f32.vlgmr.msra.gmra.mrb[24].mxu1 %vm3611_vm2, %v4619_v43  ;;  %v13109_v43 = vld [vmem:[#allocation7 + $0x40] ss:$16 sps:$4 sm:$0xff]  }
 0x501   : > { %12628 = vmatprep.mubr.msk.f32.mxu1 %vm13923_vm0, %v13922_v11  ;;  %v13720_v17 = vpop.eup %13719  ;;  %7004 = vmatpush1.bf16.msra.mxu0 %v13109_v43  ;;  %v13186_v43 = vld [vmem:[#allocation7 + $0x1cc] ss:$16 sps:$4 sm:$0xff]  }
 0x502   : > { %v4782_v63 = vmul.f32 %v13720_v17, %v14636_v5  ;;  %v13120_v17 = vld [vmem:[#allocation7 + $0x6c] ss:$16 sps:$4 sm:$0xff]  }
 0x505   : > { %v13722_v40 = vpop.eup %13721 }
 0x506   : > { %v5448_v36 = vpop.xlane.xlu0 %5447  ;;  %v4955_v54 = vmul.f32 %v13722_v40, %v14641_v32  ;;  %v13115_v40 = vld [vmem:[#allocation7 + $0x60] ss:$16 sps:$4 sm:$0xff]  }
 0x509   : > { %v13724_v24 = vpop.eup %13723 }
 0x50a   : > { %v4785_v41 = vpop.permute.xlu0 %4784  ;;  %v5118_v27 = vmul.f32 %v13724_v24, %v14645_v58  ;;  %v13126_v24 = vld [vmem:[#allocation7 + $0x8c] ss:$16 sps:$4 sm:$0xff]  }
 0x50b   : > { %12627 = vmatpush3.msra.mxu1 %v4785_v41 }
 0x50c   : > { %12629 = vmatmul.mubr.msk.f32.vlgmr.msra.gmra.mrb[26].mxu1 %vm3611_vm2, %v4782_v63  ;;  %12636 = vmatprep.subr.mxu1 %v13922_v11 }
 0x50d   : > { %12637 = vmatpush3.msra.mxu1 %v14424_v13  ;;  %12638 = vmatprep.mubr.msk.f32.mxu1 %vm13923_vm0, %v13922_v11 }
 0x50e   : > { %12646 = vmatprep.subr.mxu1 %v13922_v11 }
 0x510   : > { %12639 = vmatmul.mubr.msk.f32.vlgmr.msra.gmra.mrb[28].mxu1 %vm3611_vm2, %v4955_v54  ;;  %v13118_v54 = vld [vmem:[#allocation7 + $0x68] ss:$16 sps:$4 sm:$0xff]  }
 0x511   : > { %12648 = vmatprep.mubr.msk.f32.mxu1 %vm13923_vm0, %v13922_v11 }
 0x52f   : > { %v5285_v5 = vpop.xlane.xlu1 %5284 }
 0x530   : > { %13725 = vrcp.f32 %v5285_v5  ;;  %v13123_v5 = vld [vmem:[#allocation7 + $0x84] ss:$16 sps:$4 sm:$0xff]  }
 0x531   : > { %13727 = vrcp.f32 %v5448_v36  ;;  %v13117_v36 = vld [vmem:[#allocation7 + $0x64] ss:$16 sps:$4 sm:$0xff]  }
 0x532   : > { %7005 = vmatprep.subr.bf16.mxu0 %v13117_v36 }
 0x533   : > { %v5121_v13 = vpop.permute.xlu1 %5120  ;;  %7006 = vmatpush1.bf16.msra.mxu0 %v13115_v40  ;;  %v13192_v40 = vld [vmem:[#allocation7 + $0x1ec] ss:$16 sps:$4 sm:$0xff]  }
 0x534   : > { %12647 = vmatpush3.msra.mxu1 %v5121_v13  ;;  %7007 = vmatprep.subr.bf16.mxu0 %v13123_v5 }
 0x535   : > { %12649 = vmatmul.mubr.msk.f32.vlgmr.msra.gmra.mrb[30].mxu1 %vm3611_vm2, %v5118_v27  ;;  %12656 = vmatprep.subr.mxu1 %v13922_v11 }
 0x536   : > { %12657 = vmatpush3.msra.mxu1 %v14428_v15  ;;  %12658 = vmatprep.mubr.msk.f32.mxu1 %vm13923_vm0, %v13922_v11 }
 0x537   : > { %12666 = vmatprep.subr.mxu1 %v13922_v11  ;;  %v5453_v10 = vpop.permute.xlu1 %5452 }
 0x53a   : > { %v13726_v32 = vpop.eup %13725 }
 0x53b   : > { %v5287_v50 = vmul.f32 %v13726_v32, %v14660_v20  ;;  %v13728_v44 = vpop.eup %13727  ;;  %v13121_v32 = vld [vmem:[#allocation7 + $0x80] ss:$16 sps:$4 sm:$0xff]  }
 0x53c   : > { %v5450_v58 = vmul.f32 %v13728_v44, %v14649_v59  ;;  %v13129_v44 = vld [vmem:[#allocation7 + $0xa4] ss:$16 sps:$4 sm:$0xff]   ;;  %7008 = vmatpush1.bf16.msra.mxu0 %v13121_v32 }
 0x53d   : > { %12659 = vmatmul.mubr.msk.f32.vlgmr.msra.gmra.mrb[32].mxu1 %vm3611_vm2, %v5287_v50  ;;  %v13124_v50 = vld [vmem:[#allocation7 + $0x88] ss:$16 sps:$4 sm:$0xff]   ;;  %7009 = vmatprep.subr.bf16.mxu0 %v13129_v44 }
 0x53e   : > { %12667 = vmatpush3.msra.mxu1 %v5453_v10  ;;  %12668 = vmatprep.mubr.msk.f32.mxu1 %vm13923_vm0, %v13922_v11  ;;  %v13132_v10 = vld [vmem:[#allocation7 + $0xac] ss:$16 sps:$4 sm:$0xff]  }
 0x53f   : > { %12676 = vmatprep.subr.mxu1 %v13922_v11 }
 0x541   : > { %12669 = vmatmul.mubr.msk.f32.vlgmr.msra.gmra.mrb[34].mxu1 %vm3611_vm2, %v5450_v58  ;;  %v13127_v58 = vld [vmem:[#allocation7 + $0xa0] ss:$16 sps:$4 sm:$0xff]  }
 0x542   : > { %12677 = vmatpush3.msra.mxu1 %v14519_v42  ;;  %12678 = vmatprep.mubr.msk.f32.mxu1 %vm13923_vm0, %v13922_v11 }
 0x543   : > { %12686 = vmatprep.subr.mxu1 %v13922_v11  ;;  %7010 = vmatpush1.bf16.msra.mxu0 %v13127_v58 }
 0x568   : > { %v5617_v15 = vpop.xlane.xlu1 %5616 }
 0x569   : > { %13729 = vrcp.f32 %v5617_v15  ;;  %v13130_v15 = vld [vmem:[#allocation7 + $0xa8] ss:$16 sps:$4 sm:$0xff]  }
 0x56c   : > { %v5780_v20 = vpop.xlane.xlu0 %5779 }
 0x56d   : > { %13731 = vrcp.f32 %v5780_v20  ;;  %v13135_v20 = vld [vmem:[#allocation7 + $0xc4] ss:$16 sps:$4 sm:$0xff]  }
 0x56e   : > { %7011 = vmatprep.subr.bf16.mxu0 %v13135_v20 }
 0x570   : > { %v5949_v46 = vpop.xlane.xlu1 %5948 }
 0x571   : > { %13733 = vrcp.f32 %v5949_v46  ;;  %v13138_v46 = vld [vmem:[#allocation7 + $0xcc] ss:$16 sps:$4 sm:$0xff]  }
 0x573   : > { %v13730_v4 = vpop.eup %13729 }
 0x574   : > { %v5619_v59 = vmul.f32 %v13730_v4, %v14679_v25  ;;  %v6112_v12 = vpop.xlane.xlu0 %6111  ;;  %v5785_v53 = vpop.permute.xlu1 %5784  ;;  %v13133_v4 = vld [vmem:[#allocation7 + $0xc0] ss:$16 sps:$4 sm:$0xff]  }
 0x575   : > { %13735 = vrcp.f32 %v6112_v12  ;;  %v13141_v12 = vld [vmem:[#allocation7 + $0xe4] ss:$16 sps:$4 sm:$0xff]   ;;  %7012 = vmatpush1.bf16.msra.mxu0 %v13133_v4 }
 0x576   : > { %12679 = vmatmul.mubr.msk.f32.vlgmr.msra.gmra.mrb[36].mxu1 %vm3611_vm2, %v5619_v59  ;;  %v13136_v59 = vld [vmem:[#allocation7 + $0xc8] ss:$16 sps:$4 sm:$0xff]   ;;  %7013 = vmatprep.subr.bf16.mxu0 %v13141_v12 }
 0x577   : > { %v13732_v42 = vpop.eup %13731  ;;  %v3692_v7 = vpop.f32.mrb[12].mxu1  ;;  %12687 = vmatpush3.msra.mxu1 %v5785_v53  ;;  %12688 = vmatprep.mubr.msk.f32.mxu1 %vm13923_vm0, %v13922_v11  ;;  %v13144_v53 = vld [vmem:[#allocation7 + $0xec] ss:$16 sps:$4 sm:$0xff]  }
 0x578   : > { %v5782_v30 = vmul.f32 %v13732_v42, %v14683_v62  ;;  %3696 = vst.msk [vmem:[#allocation2] sm:$0xff] %vm3534_vm1, %v3692_v7  ;;  %v12560_v49 = vpop.f32.mrb[13].mxu1  ;;  %12696 = vmatprep.subr.mxu1 %v13922_v11  ;;  %v6117_v26 = vpop.permute.xlu0 %6116  ;;  %v13139_v42 = vld [vmem:[#allocation7 + $0xe0] ss:$16 sps:$4 sm:$0xff]   ;;  %v13142_v7 = vld [vmem:[#allocation7 + $0xe8] ss:$16 sps:$4 sm:$0xff]  }
 0x579   : > { %v13150_v49 = vld [vmem:[#allocation7 + $0x10c] ss:$16 sps:$4 sm:$0xff]   ;;  %7014 = vmatpush1.bf16.msra.mxu0 %v13139_v42 }
 0x57a   : > { %12689 = vmatmul.mubr.msk.f32.vlgmr.msra.gmra.mrb[38].mxu1 %vm3611_vm2, %v5782_v30  ;;  %v13147_v30 = vld [vmem:[#allocation7 + $0x104] ss:$16 sps:$4 sm:$0xff]  }
 0x57b   : > { %v13734_v25 = vpop.eup %13733  ;;  %12697 = vmatpush3.msra.mxu1 %v14522_v45  ;;  %12698 = vmatprep.mubr.msk.f32.mxu1 %vm13923_vm0, %v13922_v11 }
 0x57c   : > { %v5951_v23 = vmul.f32 %v13734_v25, %v14687_v55  ;;  %12706 = vmatprep.subr.mxu1 %v13922_v11  ;;  %v13145_v25 = vld [vmem:[#allocation7 + $0x100] ss:$16 sps:$4 sm:$0xff]   ;;  %7015 = vmatprep.subr.bf16.mxu0 %v13147_v30 }
 0x57d   : > { %7016 = vmatpush1.bf16.msra.mxu0 %v13145_v25  ;;  %v13193_v25 = vld [vmem:[#allocation7 + $0x200] ss:$16 sps:$4 sm:$0xff]  }
 0x57e   : > { %12699 = vmatmul.mubr.msk.f32.vlgmr.msra.gmra.mrb[40].mxu1 %vm3611_vm2, %v5951_v23  ;;  %v13148_v23 = vld [vmem:[#allocation7 + $0x108] ss:$16 sps:$4 sm:$0xff]  }
 0x57f   : > { %v13736_v62 = vpop.eup %13735  ;;  %12707 = vmatpush3.msra.mxu1 %v6117_v26  ;;  %12708 = vmatprep.mubr.msk.f32.mxu1 %vm13923_vm0, %v13922_v11  ;;  %v13153_v26 = vld [vmem:[#allocation7 + $0x124] ss:$16 sps:$4 sm:$0xff]  }
 0x580   : > { %v6114_v33 = vmul.f32 %v13736_v62, %v14691_v34  ;;  %7085 = vmatprep.subr.bf16.mxu1 %v13102_v52  ;;  %v13156_v62 = vld [vmem:[#allocation7 + $0x12c] ss:$16 sps:$4 sm:$0xff]   ;;  %7017 = vmatprep.subr.bf16.mxu0 %v13153_v26  ;;  %v13175_v52 = vld [vmem:[#allocation7 + $0x1a0] ss:$16 sps:$4 sm:$0xff]  }
 0x582   : > { %12709 = vmatmul.mubr.msk.f32.vlgmr.msra.gmra.mrb[42].mxu1 %vm3611_vm2, %v6114_v33  ;;  %v13151_v33 = vld [vmem:[#allocation7 + $0x120] ss:$16 sps:$4 sm:$0xff]  }
 0x583   : > { %7086 = vmatpush1.bf16.msra.mxu1 %v13100_v38  ;;  %7018 = vmatpush1.bf16.msra.mxu0 %v13151_v33  ;;  %v13177_v38 = vld [vmem:[#allocation7 + $0x1a4] ss:$16 sps:$4 sm:$0xff]  }
 0x584   : > { %7087 = vmatprep.subr.bf16.mxu1 %v13108_v22  ;;  %v13180_v22 = vld [vmem:[#allocation7 + $0x1ac] ss:$16 sps:$4 sm:$0xff]  }
 0x587   : > { %7088 = vmatpush1.bf16.msra.mxu1 %v13106_v6  ;;  %v13181_v6 = vld [vmem:[#allocation7 + $0x1c0] ss:$16 sps:$4 sm:$0xff]  }
 0x588   : > { %7089 = vmatprep.subr.bf16.mxu1 %v13114_v2  ;;  %v13184_v2 = vld [vmem:[#allocation7 + $0x1c8] ss:$16 sps:$4 sm:$0xff]  }
 0x58b   : > { %7090 = vmatpush1.bf16.msra.mxu1 %v13112_v47  ;;  %v13189_v47 = vld [vmem:[#allocation7 + $0x1e4] ss:$16 sps:$4 sm:$0xff]  }
 0x58c   : > { %7091 = vmatprep.subr.bf16.mxu1 %v13120_v17  ;;  %v13187_v17 = vld [vmem:[#allocation7 + $0x1e0] ss:$16 sps:$4 sm:$0xff]  }
 0x58f   : > { %7092 = vmatpush1.bf16.msra.mxu1 %v13118_v54 }
 0x590   : > { %7093 = vmatprep.subr.bf16.mxu1 %v13126_v24  ;;  %v13195_v24 = vld [vmem:[#allocation7 + $0x204] ss:$16 sps:$4 sm:$0xff]  }
 0x593   : > { %7094 = vmatpush1.bf16.msra.mxu1 %v13124_v50 }
 0x594   : > { %7095 = vmatprep.subr.bf16.mxu1 %v13132_v10 }
 0x597   : > { %7096 = vmatpush1.bf16.msra.mxu1 %v13130_v15 }
 0x598   : > { %7097 = vmatprep.subr.bf16.mxu1 %v13138_v46 }
 0x59b   : > { %7098 = vmatpush1.bf16.msra.mxu1 %v13136_v59 }
 0x59c   : > { %7099 = vmatprep.subr.bf16.mxu1 %v13144_v53 }
 0x59f   : > { %7100 = vmatpush1.bf16.msra.mxu1 %v13142_v7 }
 0x5a0   : > { %7101 = vmatprep.subr.bf16.mxu1 %v13150_v49 }
 0x5a3   : > { %7102 = vmatpush1.bf16.msra.mxu1 %v13148_v23 }
 0x5a4   : > { %7103 = vmatprep.subr.bf16.mxu1 %v13156_v62  ;;  %v13196_v62 = vld [vmem:[#allocation7 + $0x208] ss:$16 sps:$4 sm:$0xff]  }
 0x5bf   : > { %v3859_v45 = vpop.f32.mrb[14].mxu1 }
 0x5c0   : > { %v12570_v56 = vpop.f32.mrb[15].mxu1  ;;  %3864 = vrot.lane.b32.xlu0 %v3859_v45, %s13924_s16  ;;  %v13154_v45 = vld [vmem:[#allocation7 + $0x128] ss:$16 sps:$4 sm:$0xff]  }
 0x5c1   : > { %v13159_v56 = vld [vmem:[#allocation7 + $0x144] ss:$16 sps:$4 sm:$0xff]   ;;  %7104 = vmatpush1.bf16.msra.mxu1 %v13154_v45 }
 0x5c2   : > { %7019 = vmatprep.subr.bf16.mxu0 %v13159_v56  ;;  %v13201_v45 = vld [vmem:[#allocation7 + $0x224] ss:$16 sps:$4 sm:$0xff]   ;;  %v13204_v56 = vld [vmem:[#allocation7 + $0x22c] ss:$16 sps:$4 sm:$0xff]  }
 0x5c3   : > { %v4025_v1 = vpop.f32.mrb[16].mxu1 }
 0x5c4   : > { %4029 = vst.msk [vmem:[#allocation2 + $0x8] sm:$0xff] %vm3534_vm1, %v4025_v1  ;;  %v12580_v55 = vpop.f32.mrb[17].mxu1  ;;  %v13162_v1 = vld [vmem:[#allocation7 + $0x14c] ss:$16 sps:$4 sm:$0xff]  }
 0x5c5   : > { %v13157_v55 = vld [vmem:[#allocation7 + $0x140] ss:$16 sps:$4 sm:$0xff]   ;;  %7105 = vmatprep.subr.bf16.mxu1 %v13162_v1 }
 0x5c6   : > { %7020 = vmatpush1.bf16.msra.mxu0 %v13157_v55  ;;  %v13199_v1 = vld [vmem:[#allocation7 + $0x220] ss:$16 sps:$4 sm:$0xff]   ;;  %v13202_v55 = vld [vmem:[#allocation7 + $0x228] ss:$16 sps:$4 sm:$0xff]  }
 0x5c7   : > { %v4192_v57 = vpop.f32.mrb[18].mxu1 }
 0x5c8   : > { %v12590_v3 = vpop.f32.mrb[19].mxu1  ;;  %4197 = vrot.lane.b32.xlu1 %v4192_v57, %s13924_s16  ;;  %v13160_v57 = vld [vmem:[#allocation7 + $0x148] ss:$16 sps:$4 sm:$0xff]  }
 0x5c9   : > { %v13165_v3 = vld [vmem:[#allocation7 + $0x164] ss:$16 sps:$4 sm:$0xff]   ;;  %7106 = vmatpush1.bf16.msra.mxu1 %v13160_v57 }
 0x5ca   : > { %7021 = vmatprep.subr.bf16.mxu0 %v13165_v3  ;;  %v13207_v57 = vld [vmem:[#allocation7 + $0x244] ss:$16 sps:$4 sm:$0xff]   ;;  %v13210_v3 = vld [vmem:[#allocation7 + $0x24c] ss:$16 sps:$4 sm:$0xff]  }
 0x5cb   : > { %v4357_v19 = vpop.f32.mrb[20].mxu1 }
 0x5cc   : > { %4361 = vst.msk [vmem:[#allocation2 + $0x10] sm:$0xff] %vm3534_vm1, %v4357_v19  ;;  %v12600_v11 = vpop.f32.mrb[21].mxu1  ;;  %v13168_v19 = vld [vmem:[#allocation7 + $0x16c] ss:$16 sps:$4 sm:$0xff]  }
 0x5cd   : > { %v13163_v11 = vld [vmem:[#allocation7 + $0x160] ss:$16 sps:$4 sm:$0xff]   ;;  %7107 = vmatprep.subr.bf16.mxu1 %v13168_v19 }
 0x5ce   : > { %7022 = vmatpush1.bf16.msra.mxu0 %v13163_v11  ;;  %v13205_v19 = vld [vmem:[#allocation7 + $0x240] ss:$16 sps:$4 sm:$0xff]   ;;  %v13208_v11 = vld [vmem:[#allocation7 + $0x248] ss:$16 sps:$4 sm:$0xff]  }
 0x5cf   : > { %v4524_v9 = vpop.f32.mrb[22].mxu1 }
 0x5d0   : > { %v12610_v34 = vpop.f32.mrb[23].mxu1 }
 0x5d1   : > { %v13171_v34 = vld [vmem:[#allocation7 + $0x184] ss:$16 sps:$4 sm:$0xff]  }
 0x5d2   : > { %7023 = vmatprep.subr.bf16.mxu0 %v13171_v34  ;;  %v13216_v34 = vld [vmem:[#allocation7 + $0x26c] ss:$16 sps:$4 sm:$0xff]  }
 0x5d3   : > { %v4689_v14 = vpop.f32.mrb[24].mxu1 }
 0x5d4   : > { %4693 = vst.msk [vmem:[#allocation2 + $0x18] sm:$0xff] %vm3534_vm1, %v4689_v14  ;;  %v12620_v51 = vpop.f32.mrb[25].mxu1  ;;  %v13174_v14 = vld [vmem:[#allocation7 + $0x18c] ss:$16 sps:$4 sm:$0xff]  }
 0x5d5   : > { %v13169_v51 = vld [vmem:[#allocation7 + $0x180] ss:$16 sps:$4 sm:$0xff]  }
 0x5d6   : > { %7024 = vmatpush1.bf16.msra.mxu0 %v13169_v51  ;;  %v13214_v51 = vld [vmem:[#allocation7 + $0x268] ss:$16 sps:$4 sm:$0xff]  }
 0x5d7   : > { %7025 = vmatprep.subr.bf16.mxu0 %v13177_v38  ;;  %v13220_v38 = vld [vmem:[#allocation7 + $0x288] ss:$16 sps:$4 sm:$0xff]  }
 0x5da   : > { %7026 = vmatpush1.bf16.msra.mxu0 %v13175_v52  ;;  %v13217_v52 = vld [vmem:[#allocation7 + $0x280] ss:$16 sps:$4 sm:$0xff]  }
 0x5db   : > { %7027 = vmatprep.subr.bf16.mxu0 %v13183_v8  ;;  %v13231_v8 = vld [vmem:[#allocation7 + $0x2c4] ss:$16 sps:$4 sm:$0xff]  }
 0x5de   : > { %7028 = vmatpush1.bf16.msra.mxu0 %v13181_v6  ;;  %v13226_v6 = vld [vmem:[#allocation7 + $0x2a8] ss:$16 sps:$4 sm:$0xff]  }
 0x5df   : > { %v4856_v63 = vpop.f32.mrb[26].mxu1  ;;  %7029 = vmatprep.subr.bf16.mxu0 %v13189_v47  ;;  %v13232_v47 = vld [vmem:[#allocation7 + $0x2c8] ss:$16 sps:$4 sm:$0xff]  }
 0x5e0   : > { %4861 = vrot.lane.b32.xlu0 %v4856_v63, %s13924_s16  ;;  %v12630_v41 = vpop.f32.mrb[27].mxu1 }
 0x5e1   : > { %v13190_v41 = vld [vmem:[#allocation7 + $0x1e8] ss:$16 sps:$4 sm:$0xff]  }
 0x5e2   : > { %7030 = vmatpush1.bf16.msra.mxu0 %v13187_v17  ;;  %v13240_v17 = vld [vmem:[#allocation7 + $0x2ec] ss:$16 sps:$4 sm:$0xff]  }
 0x5e3   : > { %v5025_v27 = vpop.f32.mrb[28].mxu1  ;;  %7042 = vmatprep.subr.bf16.mxu0 %v13195_v24  ;;  %v13244_v24 = vld [vmem:[#allocation7 + $0x308] ss:$16 sps:$4 sm:$0xff]  }
 0x5e4   : > { %5029 = vst.msk [vmem:[#allocation2 + $0x20] sm:$0xff] %vm3534_vm1, %v5025_v27  ;;  %4529 = vrot.lane.b32.xlu0 %v4524_v9, %s13924_s16  ;;  %v12640_v13 = vpop.f32.mrb[29].mxu1  ;;  %v13166_v9 = vld [vmem:[#allocation7 + $0x168] ss:$16 sps:$4 sm:$0xff]   ;;  %v13198_v27 = vld [vmem:[#allocation7 + $0x20c] ss:$16 sps:$4 sm:$0xff]  }
 0x5e5   : > { %7108 = vmatpush1.bf16.msra.mxu1 %v13166_v9  ;;  %v13213_v9 = vld [vmem:[#allocation7 + $0x264] ss:$16 sps:$4 sm:$0xff]  }
 0x5e6   : > { %7109 = vmatprep.subr.bf16.mxu1 %v13174_v14  ;;  %v13211_v14 = vld [vmem:[#allocation7 + $0x260] ss:$16 sps:$4 sm:$0xff]  }
 0x5e9   : > { %7110 = vmatpush1.bf16.msra.mxu1 %v13172_v16  ;;  %v13219_v16 = vld [vmem:[#allocation7 + $0x284] ss:$16 sps:$4 sm:$0xff]  }
 0x5ea   : > { %7111 = vmatprep.subr.bf16.mxu1 %v13180_v22  ;;  %v13223_v22 = vld [vmem:[#allocation7 + $0x2a0] ss:$16 sps:$4 sm:$0xff]  }
 0x5ed   : > { %7112 = vmatpush1.bf16.msra.mxu1 %v13178_v21  ;;  %v13228_v21 = vld [vmem:[#allocation7 + $0x2ac] ss:$16 sps:$4 sm:$0xff]  }
 0x5ee   : > { %7113 = vmatprep.subr.bf16.mxu1 %v13186_v43  ;;  %v13229_v43 = vld [vmem:[#allocation7 + $0x2c0] ss:$16 sps:$4 sm:$0xff]  }
 0x5f1   : > { %7114 = vmatpush1.bf16.msra.mxu1 %v13184_v2  ;;  %v13234_v2 = vld [vmem:[#allocation7 + $0x2cc] ss:$16 sps:$4 sm:$0xff]  }
 0x5f2   : > { %7115 = vmatprep.subr.bf16.mxu1 %v13192_v40  ;;  %v13243_v40 = vld [vmem:[#allocation7 + $0x304] ss:$16 sps:$4 sm:$0xff]  }
 0x5f5   : > { %7116 = vmatpush1.bf16.msra.mxu1 %v13190_v41  ;;  %v13238_v41 = vld [vmem:[#allocation7 + $0x2e8] ss:$16 sps:$4 sm:$0xff]  }
 0x5f6   : > { %7128 = vmatprep.subr.bf16.mxu1 %v13198_v27  ;;  %v13249_v27 = vld [vmem:[#allocation7 + $0x324] ss:$16 sps:$4 sm:$0xff]  }
 0x608   : > { %v5192_v61 = vpop.f32.mrb[30].mxu1 }
 0x609   : > { %v12650_v18 = vpop.f32.mrb[31].mxu1 }
 0x60a   : > { %v13225_v18 = vld [vmem:[#allocation7 + $0x2a4] ss:$16 sps:$4 sm:$0xff]  }
 0x610   : > { %v5357_v36 = vpop.f32.mrb[32].mxu1 }
 0x611   : > { %5361 = vst.msk [vmem:[#allocation2 + $0x28] sm:$0xff] %vm3534_vm1, %v5357_v36  ;;  %v12660_v63 = vpop.f32.mrb[33].mxu1  ;;  %v13237_v36 = vld [vmem:[#allocation7 + $0x2e4] ss:$16 sps:$4 sm:$0xff]  }
 0x612   : > { %v13235_v63 = vld [vmem:[#allocation7 + $0x2e0] ss:$16 sps:$4 sm:$0xff]  }
 0x614   : > { %v5524_v54 = vpop.f32.mrb[34].mxu1 }
 0x615   : > { %5529 = vrot.lane.b32.xlu1 %v5524_v54, %s13924_s16  ;;  %v12670_v5 = vpop.f32.mrb[35].mxu1  ;;  %v13246_v54 = vld [vmem:[#allocation7 + $0x30c] ss:$16 sps:$4 sm:$0xff]  }
 0x616   : > { %v13241_v5 = vld [vmem:[#allocation7 + $0x300] ss:$16 sps:$4 sm:$0xff]  }
 0x619   : > { %5197 = vrot.lane.b32.xlu1 %v5192_v61, %s13924_s16  ;;  %v13222_v61 = vld [vmem:[#allocation7 + $0x28c] ss:$16 sps:$4 sm:$0xff]  }
 0x632   : > { %v3865_v13 = vpop.permute.xlu0 %3864 }
 0x633   : > { %3868 = vst.msk [vmem:[#allocation2] sm:$0xff] %vm3867_vm3, %v3865_v13  ;;  %v13252_v13 = vld [vmem:[#allocation7 + $0x32c] ss:$16 sps:$4 sm:$0xff]  }
 0x63a   : > { %v4198_v32 = vpop.permute.xlu1 %4197  ;;  %v6197_v23 = vld [vmem:[#allocation2] sm:$0xff] }
 0x63b   : > { %4200 = vst.msk [vmem:[#allocation2 + $0x8] sm:$0xff] %vm3867_vm3, %v4198_v32  ;;  %v13247_v32 = vld [vmem:[#allocation7 + $0x320] ss:$16 sps:$4 sm:$0xff]  }
 0x642   : > { %v6198_v7 = vld [vmem:[#allocation2 + $0x8] sm:$0xff] }
 0x649   : > { %v5689_v50 = vpop.f32.mrb[36].mxu1 }
 0x64a   : > { %5693 = vst.msk [vmem:[#allocation2 + $0x30] sm:$0xff] %vm3534_vm1, %v5689_v50  ;;  %v12680_v44 = vpop.f32.mrb[37].mxu1  ;;  %v13250_v50 = vld [vmem:[#allocation7 + $0x328] ss:$16 sps:$4 sm:$0xff]  }
 0x64b   : > { %v13255_v44 = vld [vmem:[#allocation7 + $0x344] ss:$16 sps:$4 sm:$0xff]  }
 0x64d   : > { %v5856_v10 = vpop.f32.mrb[38].mxu1 }
 0x64e   : > { %v12690_v58 = vpop.f32.mrb[39].mxu1 }
 0x64f   : > { %v13253_v58 = vld [vmem:[#allocation7 + $0x340] ss:$16 sps:$4 sm:$0xff]  }
 0x651   : > { %v6021_v15 = vpop.f32.mrb[40].mxu1 }
 0x652   : > { %6025 = vst.msk [vmem:[#allocation2 + $0x38] sm:$0xff] %vm3534_vm1, %v6021_v15  ;;  %v4862_v20 = vpop.permute.xlu0 %4861  ;;  %v12700_v46 = vpop.f32.mrb[41].mxu1  ;;  %v13256_v15 = vld [vmem:[#allocation7 + $0x348] ss:$16 sps:$4 sm:$0xff]  }
 0x653   : > { %4864 = vst.msk [vmem:[#allocation2 + $0x18] sm:$0xff] %vm3867_vm3, %v4862_v20  ;;  %v13261_v20 = vld [vmem:[#allocation7 + $0x364] ss:$16 sps:$4 sm:$0xff]   ;;  %v13264_v46 = vld [vmem:[#allocation7 + $0x36c] ss:$16 sps:$4 sm:$0xff]  }
 0x655   : > { %v6188_v4 = vpop.f32.mrb[42].mxu1 }
 0x656   : > { %v4530_v59 = vpop.permute.xlu0 %4529  ;;  %6193 = vrot.lane.b32.xlu1 %v6188_v4, %s13924_s16  ;;  %v12710_v12 = vpop.f32.mrb[43].mxu1  ;;  %v13259_v4 = vld [vmem:[#allocation7 + $0x360] ss:$16 sps:$4 sm:$0xff]  }
 0x657   : > { %4532 = vst.msk [vmem:[#allocation2 + $0x10] sm:$0xff] %vm3867_vm3, %v4530_v59  ;;  %v13262_v59 = vld [vmem:[#allocation7 + $0x368] ss:$16 sps:$4 sm:$0xff]   ;;  %v13267_v12 = vld [vmem:[#allocation7 + $0x384] ss:$16 sps:$4 sm:$0xff]  }
 0x65a   : > { %5861 = vrot.lane.b32.xlu1 %v5856_v10, %s13924_s16  ;;  %v13258_v10 = vld [vmem:[#allocation7 + $0x34c] ss:$16 sps:$4 sm:$0xff]   ;;  %s15080_s16 = sld [smem:[#allocation17_spill]] }
 0x687   : > { %v5530_v53 = vpop.permute.xlu1 %5529 }
 0x688   : > { %5532 = vst.msk [vmem:[#allocation2 + $0x28] sm:$0xff] %vm3867_vm3, %v5530_v53  ;;  %v13270_v53 = vld [vmem:[#allocation7 + $0x38c] ss:$16 sps:$4 sm:$0xff]  }
 0x68b   : > { %v5198_v42 = vpop.permute.xlu1 %5197 }
 0x68c   : > { %5200 = vst.msk [vmem:[#allocation2 + $0x20] sm:$0xff] %vm3867_vm3, %v5198_v42  ;;  %v13265_v42 = vld [vmem:[#allocation7 + $0x380] ss:$16 sps:$4 sm:$0xff]  }
 0x68f   : > { %v6202_v30 = vld [vmem:[#allocation2 + $0x28] sm:$0xff] }
 0x690   : > { %v6206_v49 = vpack.c.bf16 %v6202_v30, %v6198_v7  ;;  %v13268_v7 = vld [vmem:[#allocation7 + $0x388] ss:$16 sps:$4 sm:$0xff]   ;;  %v13273_v30 = vld [vmem:[#allocation7 + $0x3a4] ss:$16 sps:$4 sm:$0xff]  }
 0x692   : > { %7031 = vmatprep.mubr.bf16.mxu0 %v6206_v49  ;;  %7117 = vmatprep.mubr.bf16.mxu1 %v6206_v49  ;;  %v13276_v49 = vld [vmem:[#allocation7 + $0x3ac] ss:$16 sps:$4 sm:$0xff]  }
 0x693   : > { %v6201_v26 = vld [vmem:[#allocation2 + $0x20] sm:$0xff] }
 0x694   : > { %v6205_v33 = vpack.c.bf16 %v6201_v26, %v6197_v23  ;;  %v13274_v23 = vld [vmem:[#allocation7 + $0x3a8] ss:$16 sps:$4 sm:$0xff]  }
 0x696   : > { %7032 = vmatmul.mubr.bf16.vlgmr.msra.gmra.mrb[44].mxu0 %v6205_v33  ;;  %7118 = vmatmul.mubr.bf16.vlgmr.msra.gmra.mrb[44].mxu1 %v6205_v33  ;;  %v13282_v33 = vld [vmem:[#allocation7 + $0x3cc] ss:$16 sps:$4 sm:$0xff]  }
 0x697   : > { %7043 = vmatpush1.bf16.msra.mxu0 %v13193_v25  ;;  %7129 = vmatpush1.bf16.msra.mxu1 %v13196_v62  ;;  %v13271_v25 = vld [vmem:[#allocation7 + $0x3a0] ss:$16 sps:$4 sm:$0xff]   ;;  %v13279_v62 = vld [vmem:[#allocation7 + $0x3c4] ss:$16 sps:$4 sm:$0xff]  }
 0x698   : > { %7044 = vmatprep.subr.bf16.mxu0 %v13201_v45  ;;  %7130 = vmatprep.subr.bf16.mxu1 %v13204_v56  ;;  %v13277_v45 = vld [vmem:[#allocation7 + $0x3c0] ss:$16 sps:$4 sm:$0xff]   ;;  %v13280_v56 = vld [vmem:[#allocation7 + $0x3c8] ss:$16 sps:$4 sm:$0xff]  }
 0x69b   : > { %7045 = vmatpush1.bf16.msra.mxu0 %v13199_v1  ;;  %7131 = vmatpush1.bf16.msra.mxu1 %v13202_v55  ;;  %v13285_v55 = vld [vmem:[#allocation7 + $0x3e4] ss:$16 sps:$4 sm:$0xff]  }
 0x69c   : > { %7046 = vmatprep.subr.bf16.mxu0 %v13207_v57  ;;  %7132 = vmatprep.subr.bf16.mxu1 %v13210_v3  ;;  %v13288_v57 = vld [vmem:[#allocation7 + $0x3ec] ss:$16 sps:$4 sm:$0xff]   ;;  %v13283_v3 = vld [vmem:[#allocation7 + $0x3e0] ss:$16 sps:$4 sm:$0xff]  }
 0x69f   : > { %7047 = vmatpush1.bf16.msra.mxu0 %v13205_v19  ;;  %7133 = vmatpush1.bf16.msra.mxu1 %v13208_v11  ;;  %v6200_v19 = vld [vmem:[#allocation2 + $0x18] sm:$0xff] }
 0x6a0   : > { %7048 = vmatprep.subr.bf16.mxu0 %v13213_v9  ;;  %7134 = vmatprep.subr.bf16.mxu1 %v13216_v34  ;;  %v13286_v9 = vld [vmem:[#allocation7 + $0x3e8] ss:$16 sps:$4 sm:$0xff]  }
 0x6a3   : > { %7049 = vmatpush1.bf16.msra.mxu0 %v13211_v14  ;;  %7135 = vmatpush1.bf16.msra.mxu1 %v13214_v51  ;;  %v6199_v14 = vld [vmem:[#allocation2 + $0x10] sm:$0xff] }
 0x6a4   : > { %7050 = vmatprep.subr.bf16.mxu0 %v13219_v16  ;;  %7136 = vmatprep.subr.bf16.mxu1 %v13222_v61  ;;  %v6337_v61 = vld [vmem:[%s15050_s7] sm:$0xf] }
 0x6a7   : > { %7051 = vmatpush1.bf16.msra.mxu0 %v13217_v52  ;;  %7137 = vmatpush1.bf16.msra.mxu1 %v13220_v38  ;;  %v6342_v52 = vrot.slane %v6337_v61, %v14259_v37  ;;  %v6350_v38 = vrot.slane %v6337_v61, %v14280_v48 }
 0x6a8   : > { %7052 = vmatprep.subr.bf16.mxu0 %v13225_v18  ;;  %7138 = vmatprep.subr.bf16.mxu1 %v13228_v21  ;;  %v6346_v18 = vrot.slane %v6337_v61, %v14265_v39 }
 0x6ab   : > { %7053 = vmatpush1.bf16.msra.mxu0 %v13223_v22  ;;  %7139 = vmatpush1.bf16.msra.mxu1 %v13226_v6  ;;  %v6354_v6 = vrot.slane %v6337_v61, %v14298_v0  ;;  %v7309_v61 = vld [vmem:[#allocation8 + $0x68] sm:$0xff] }
 0x6ac   : > { %7054 = vmatprep.subr.bf16.mxu0 %v13231_v8  ;;  %7140 = vmatprep.subr.bf16.mxu1 %v13234_v2 }
 0x6af   : > { %7055 = vmatpush1.bf16.msra.mxu0 %v13229_v43  ;;  %7141 = vmatpush1.bf16.msra.mxu1 %v13232_v47 }
 0x6b0   : > { %7056 = vmatprep.subr.bf16.mxu0 %v13237_v36  ;;  %7142 = vmatprep.subr.bf16.mxu1 %v13240_v17 }
 0x6b3   : > { %7057 = vmatpush1.bf16.msra.mxu0 %v13235_v63  ;;  %7143 = vmatpush1.bf16.msra.mxu1 %v13238_v41  ;;  %v13745_v41 = vld [vmem:[%s14190_s19] sm:$0xff] }
 0x6b4   : > { %7058 = vmatprep.subr.bf16.mxu0 %v13243_v40  ;;  %7144 = vmatprep.subr.bf16.mxu1 %v13246_v54 }
 0x6b7   : > { %7059 = vmatpush1.bf16.msra.mxu0 %v13241_v5  ;;  %7145 = vmatpush1.bf16.msra.mxu1 %v13244_v24 }
 0x6b8   : > { %7060 = vmatprep.subr.bf16.mxu0 %v13249_v27  ;;  %7146 = vmatprep.subr.bf16.mxu1 %v13252_v13  ;;  %v13746_v27 = vld [vmem:[%s14190_s19 + $0x8] sm:$0xff] }
 0x6bb   : > { %7061 = vmatpush1.bf16.msra.mxu0 %v13247_v32  ;;  %7147 = vmatpush1.bf16.msra.mxu1 %v13250_v50 }
 0x6bc   : > { %7062 = vmatprep.subr.bf16.mxu0 %v13255_v44  ;;  %7148 = vmatprep.subr.bf16.mxu1 %v13258_v10  ;;  %v13747_v10 = vld [vmem:[%s14190_s19 + $0x20] sm:$0xff] }
 0x6bf   : > { %7063 = vmatpush1.bf16.msra.mxu0 %v13253_v58  ;;  %7149 = vmatpush1.bf16.msra.mxu1 %v13256_v15  ;;  %v13748_v15 = vld [vmem:[%s14190_s19 + $0x10] sm:$0xff] }
 0x6c0   : > { %7064 = vmatprep.subr.bf16.mxu0 %v13261_v20  ;;  %7150 = vmatprep.subr.bf16.mxu1 %v13264_v46 }
 0x6c3   : > { %7065 = vmatpush1.bf16.msra.mxu0 %v13259_v4  ;;  %7151 = vmatpush1.bf16.msra.mxu1 %v13262_v59  ;;  %v13749_v4 = vld [vmem:[%s14190_s19 + $0x28] sm:$0xff] }
 0x6c4   : > { %7066 = vmatprep.subr.bf16.mxu0 %v13267_v12  ;;  %7152 = vmatprep.subr.bf16.mxu1 %v13270_v53  ;;  %v13750_v53 = vld [vmem:[%s14190_s19 + $0x18] sm:$0xff] }
 0x6c7   : > { %7067 = vmatpush1.bf16.msra.mxu0 %v13265_v42  ;;  %7153 = vmatpush1.bf16.msra.mxu1 %v13268_v7  ;;  %v13751_v7 = vld [vmem:[%s14190_s19 + $0x30] sm:$0xff] }
 0x6c8   : > { %v6194_v26 = vpop.permute.xlu1 %6193  ;;  %7068 = vmatprep.subr.bf16.mxu0 %v13273_v30  ;;  %7154 = vmatprep.subr.bf16.mxu1 %v13276_v49 }
 0x6c9   : > { %6196 = vst.msk [vmem:[#allocation2 + $0x38] sm:$0xff] %vm3867_vm3, %v6194_v26 }
 0x6cb   : > { %7069 = vmatpush1.bf16.msra.mxu0 %v13271_v25  ;;  %7155 = vmatpush1.bf16.msra.mxu1 %v13274_v23  ;;  %v13752_v23 = vld [vmem:[%s14190_s19 + $0x38] sm:$0xff] }
 0x6cc   : > { %v5862_v1 = vpop.permute.xlu1 %5861  ;;  %7070 = vmatprep.subr.bf16.mxu0 %v13279_v62  ;;  %7156 = vmatprep.subr.bf16.mxu1 %v13282_v33 }
 0x6cd   : > { %5864 = vst.msk [vmem:[#allocation2 + $0x30] sm:$0xff] %vm3867_vm3, %v5862_v1  ;;  %v7300_v1 = vld [vmem:[#allocation8 + $0x20] sm:$0xff] }
 0x6cf   : > { %7071 = vmatpush1.bf16.msra.mxu0 %v13277_v45  ;;  %7157 = vmatpush1.bf16.msra.mxu1 %v13280_v56  ;;  %v7296_v56 = vld [vmem:[#allocation8] sm:$0xff] }
 0x6d0   : > { %7072 = vmatprep.subr.bf16.mxu0 %v13285_v55  ;;  %v6204_v11 = vld [vmem:[#allocation2 + $0x38] sm:$0xff]  ;;  %7158 = vmatprep.subr.bf16.mxu1 %v13288_v57  ;;  %v7297_v55 = vld [vmem:[#allocation8 + $0x8] sm:$0xff]  ;;  %v11970_v57 = vcombine.low %v7296_v56, %v7300_v1 }
 0x6d1   : > { %v6208_v34 = vpack.c.bf16 %v6204_v11, %v6200_v19  ;;  %v7301_v19 = vld [vmem:[#allocation8 + $0x28] sm:$0xff]  ;;  %v7304_v11 = vld [vmem:[#allocation8 + $0x40] sm:$0xff] }
 0x6d3   : > { %7074 = vmatprep.mubr.bf16.mxu0 %v6208_v34  ;;  %7160 = vmatprep.mubr.bf16.mxu1 %v6208_v34  ;;  %v11972_v34 = vcombine.low %v7297_v55, %v7301_v19 }
 0x6d4   : > { %7073 = vmatpush1.bf16.msra.mxu0 %v13283_v3  ;;  %7159 = vmatpush1.bf16.msra.mxu1 %v13286_v9  ;;  %v6203_v51 = vld [vmem:[#allocation2 + $0x30] sm:$0xff]  ;;  %v11971_v3 = vcombine.high %v7296_v56, %v7300_v1  ;;  %v7308_v9 = vld [vmem:[#allocation8 + $0x60] sm:$0xff]  ;;  %v7345_v1 = vld [vmem:[#allocation8 + $0x188] sm:$0xff] }
 0x6d5   : > { %v6207_v16 = vpack.c.bf16 %v6203_v51, %v6199_v14  ;;  %v11973_v14 = vcombine.high %v7297_v55, %v7301_v19  ;;  %v11979_v51 = vcombine.high %v7304_v11, %v7308_v9  ;;  %v7348_v56 = vld [vmem:[#allocation8 + $0x1a0] sm:$0xff]  ;;  %v7349_v55 = vld [vmem:[#allocation8 + $0x1a8] sm:$0xff] }
 0x6d6   : > { %8874 = vmatprep.subr.bf16.mxu0 %v11971_v3 }
 0x6d7   : > { %7075 = vmatmul.mubr.bf16.vlgmr.msra.gmra.mrb[44].mxu0 %v6207_v16  ;;  %7161 = vmatmul.mubr.bf16.vlgmr.msra.gmra.mrb[44].mxu1 %v6207_v16  ;;  %v7305_v16 = vld [vmem:[#allocation8 + $0x48] sm:$0xff] }
 0x6d8   : > { %8960 = vmatprep.subr.bf16.mxu1 %v11973_v14  ;;  %8875 = vmatpush1.bf16.msra.mxu0 %v11970_v57  ;;  %v7353_v14 = vld [vmem:[#allocation8 + $0x1c8] sm:$0xff] }
 0x6d9   : > { %8961 = vmatpush1.bf16.msra.mxu1 %v11972_v34  ;;  %8876 = vmatprep.subr.bf16.mxu0 %v11979_v51  ;;  %v7356_v34 = vld [vmem:[#allocation8 + $0x1e0] sm:$0xff]  ;;  %v7357_v51 = vld [vmem:[#allocation8 + $0x1e8] sm:$0xff] }
 0x7aa   : > { %v7076_v21 = vpop.f32.mrb[44].mxu0  ;;  %v7162_v22 = vpop.f32.mrb[44].mxu1 }
 0x7ab   : > { %v12735_v8 = vadd.f32 %v7076_v21, %v6342_v52  ;;  %v7078_v2 = vpop.f32.mrb[45].mxu0  ;;  %v7164_v43 = vpop.f32.mrb[45].mxu1  ;;  %v12739_v47 = vadd.f32 %v7162_v22, %v6350_v38  ;;  %v7313_v21 = vld [vmem:[#allocation8 + $0x88] sm:$0xff] }
 0x7ac   : > { %v12736_v36 = vadd.f32 %v7078_v2, %v6346_v18  ;;  %v7080_v17 = vpop.f32.mrb[46].mxu0  ;;  %v7166_v63 = vpop.f32.mrb[46].mxu1  ;;  %v12740_v32 = vadd.f32 %v7164_v43, %v6354_v6  ;;  %v7317_v22 = vld [vmem:[#allocation8 + $0xa8] sm:$0xff] }
 0x7ad   : > { %v14810_v40 = vadd.f32 %v13745_v41, %v12735_v8  ;;  %v12737_v54 = vadd.f32 %v7080_v17, %v6342_v52  ;;  %v7082_v5 = vpop.f32.mrb[47].mxu0  ;;  %v7168_v24 = vpop.f32.mrb[47].mxu1  ;;  %v12741_v50 = vadd.f32 %v7166_v63, %v6350_v38  ;;  %v14819_v20 = vadd.f32 %v13748_v15, %v12739_v47  ;;  %v7312_v52 = vld [vmem:[#allocation8 + $0x80] sm:$0xff]  ;;  %v7321_v17 = vld [vmem:[#allocation8 + $0xc8] sm:$0xff] }
 0x7ae   : > { %v14813_v13 = vadd.f32 %v13746_v27, %v12736_v36  ;;  %v12738_v44 = vadd.f32 %v7082_v5, %v6346_v18  ;;  %v12742_v12 = vadd.f32 %v7168_v24, %v6354_v6  ;;  %v14827_v42 = vadd.f32 %v13750_v53, %v12740_v32  ;;  %v7316_v18 = vld [vmem:[#allocation8 + $0xa0] sm:$0xff]  ;;  %v7325_v63 = vld [vmem:[#allocation8 + $0xe8] sm:$0xff] }
 0x7af   : > { %v14816_v58 = vadd.f32 %v13747_v10, %v12737_v54  ;;  %v14830_v30 = vadd.f32 %v13751_v7, %v12741_v50  ;;  %v11981_v38 = vcombine.high %v7305_v16, %v7309_v61  ;;  %v11978_v6 = vcombine.low %v7304_v11, %v7308_v9  ;;  %v7320_v47 = vld [vmem:[#allocation8 + $0xc0] sm:$0xff]  ;;  %v7329_v50 = vld [vmem:[#allocation8 + $0x108] sm:$0xff] }
 0x7b0   : > { %v7181_v46 = vadd.f32 %v14813_v13, %v14810_v40  ;;  %v14824_v59 = vadd.f32 %v13749_v4, %v12738_v44  ;;  %v14836_v26 = vadd.f32 %v13752_v23, %v12742_v12  ;;  %v11980_v8 = vcombine.low %v7305_v16, %v7309_v61  ;;  %v7324_v36 = vld [vmem:[#allocation8 + $0xe0] sm:$0xff]  ;;  %v7333_v44 = vld [vmem:[#allocation8 + $0x128] sm:$0xff] }
 0x7b1   : > { %v11987_v2 = vcombine.high %v7312_v52, %v7316_v18  ;;  %8962 = vmatprep.subr.bf16.mxu1 %v11981_v38  ;;  %v11989_v43 = vcombine.high %v7313_v21, %v7317_v22  ;;  %8877 = vmatpush1.bf16.msra.mxu0 %v11978_v6  ;;  %v11986_v41 = vcombine.low %v7312_v52, %v7316_v18  ;;  %v7328_v27 = vld [vmem:[#allocation8 + $0x100] sm:$0xff]  ;;  %v7337_v7 = vld [vmem:[#allocation8 + $0x148] sm:$0xff] }
 0x7b2   : > { %v7186_v49 = vadd.f32 %v14824_v59, %v14816_v58  ;;  %v7182_v25 = vadd.f32 %v7181_v46, %v14819_v20  ;;  %8963 = vmatpush1.bf16.msra.mxu1 %v11980_v8  ;;  %v11988_v54 = vcombine.low %v7313_v21, %v7317_v22  ;;  %v11995_v5 = vcombine.high %v7320_v47, %v7324_v36  ;;  %v7332_v32 = vld [vmem:[#allocation8 + $0x120] sm:$0xff]  ;;  %v7361_v22 = vld [vmem:[#allocation8 + $0x208] sm:$0xff] }
 0x7b3   : > { %8878 = vmatprep.subr.bf16.mxu0 %v11987_v2  ;;  %8964 = vmatprep.subr.bf16.mxu1 %v11989_v43  ;;  %v11997_v24 = vcombine.high %v7321_v17, %v7325_v63  ;;  %v11994_v10 = vcombine.low %v7320_v47, %v7324_v36  ;;  %v11996_v15 = vcombine.low %v7321_v17, %v7325_v63  ;;  %v7336_v12 = vld [vmem:[#allocation8 + $0x140] sm:$0xff]  ;;  %v7365_v6 = vld [vmem:[#allocation8 + $0x228] sm:$0xff] }
 0x7b4   : > { %v7183_v62 = vadd.f32 %v7182_v25, %v14827_v42  ;;  %v7187_v33 = vadd.f32 %v7186_v49, %v14830_v30  ;;  %v12003_v46 = vcombine.high %v7328_v27, %v7332_v32  ;;  %v12005_v4 = vcombine.high %v7329_v50, %v7333_v44  ;;  %v7340_v53 = vld [vmem:[#allocation8 + $0x160] sm:$0xff]  ;;  %v7341_v49 = vld [vmem:[#allocation8 + $0x168] sm:$0xff] }
 0x7b5   : > { %8879 = vmatpush1.bf16.msra.mxu0 %v11986_v41  ;;  %v12002_v25 = vcombine.low %v7328_v27, %v7332_v32  ;;  %v12004_v23 = vcombine.low %v7329_v50, %v7333_v44  ;;  %v12010_v57 = vcombine.low %v7336_v12, %v7340_v53  ;;  %v12012_v3 = vcombine.low %v7337_v7, %v7341_v49  ;;  %v7352_v9 = vld [vmem:[#allocation8 + $0x1c0] sm:$0xff]  ;;  %v7369_v63 = vld [vmem:[#allocation8 + $0x248] sm:$0xff] }
 0x7b6   : > { %7184 = vadd.xlane.f32.xlu0 %v7183_v62  ;;  %v7188_v45 = vadd.f32 %v7187_v33, %v14836_v26  ;;  %8965 = vmatpush1.bf16.msra.mxu1 %v11988_v54  ;;  %v12011_v62 = vcombine.high %v7336_v12, %v7340_v53  ;;  %v12013_v33 = vcombine.high %v7337_v7, %v7341_v49  ;;  %v7360_v18 = vld [vmem:[#allocation8 + $0x200] sm:$0xff]  ;;  %v7373_v41 = vld [vmem:[#allocation8 + $0x268] sm:$0xff] }
 0x7b7   : > { %8880 = vmatprep.subr.bf16.mxu0 %v11995_v5  ;;  %8966 = vmatprep.subr.bf16.mxu1 %v11997_v24  ;;  %v12021_v11 = vcombine.high %v7345_v1, %v7349_v55  ;;  %v12020_v61 = vcombine.low %v7345_v1, %v7349_v55  ;;  %v12027_v52 = vcombine.high %v7352_v9, %v7356_v34  ;;  %v7364_v21 = vld [vmem:[#allocation8 + $0x220] sm:$0xff] }
 0x7b8   : > { %7189 = vadd.xlane.f32.xlu1 %v7188_v45  ;;  %v7344_v45 = vld [vmem:[#allocation8 + $0x180] sm:$0xff]  ;;  %v12029_v38 = vcombine.high %v7353_v14, %v7357_v51  ;;  %v12026_v8 = vcombine.low %v7352_v9, %v7356_v34  ;;  %v12028_v2 = vcombine.low %v7353_v14, %v7357_v51  ;;  %v12035_v43 = vcombine.high %v7360_v18, %v7364_v21  ;;  %v7377_v9 = vld [vmem:[#allocation8 + $0x288] sm:$0xff] }
 0x7b9   : > { %8881 = vmatpush1.bf16.msra.mxu0 %v11994_v10  ;;  %v12019_v19 = vcombine.high %v7344_v45, %v7348_v56  ;;  %v12018_v16 = vcombine.low %v7344_v45, %v7348_v56  ;;  %v12037_v47 = vcombine.high %v7361_v22, %v7365_v6  ;;  %v7368_v36 = vld [vmem:[#allocation8 + $0x240] sm:$0xff]  ;;  %v12034_v54 = vcombine.low %v7360_v18, %v7364_v21  ;;  %v7381_v14 = vld [vmem:[#allocation8 + $0x2a8] sm:$0xff] }
 0x7ba   : > { %8967 = vmatpush1.bf16.msra.mxu1 %v11996_v15  ;;  %8882 = vmatprep.subr.bf16.mxu0 %v12003_v46  ;;  %v7372_v17 = vld [vmem:[#allocation8 + $0x260] sm:$0xff]  ;;  %v12036_v5 = vcombine.low %v7361_v22, %v7365_v6  ;;  %v12045_v27 = vcombine.high %v7369_v63, %v7373_v41  ;;  %v12044_v50 = vcombine.low %v7369_v63, %v7373_v41  ;;  %v7389_v21 = vld [vmem:[#allocation8 + $0x2e8] sm:$0xff] }
 0x7bb   : > { %8968 = vmatprep.subr.bf16.mxu1 %v12005_v4  ;;  %v12043_v24 = vcombine.high %v7368_v36, %v7372_v17  ;;  %v12042_v32 = vcombine.low %v7368_v36, %v7372_v17  ;;  %v7397_v17 = vld [vmem:[#allocation8 + $0x328] sm:$0xff]  ;;  %v7400_v63 = vld [vmem:[#allocation8 + $0x340] sm:$0xff] }
 0x7bc   : > { %v7404_v41 = vld [vmem:[#allocation8 + $0x360] sm:$0xff] }
 0x7bd   : > { %8883 = vmatpush1.bf16.msra.mxu0 %v12002_v25 }
 0x7be   : > { %8969 = vmatpush1.bf16.msra.mxu1 %v12004_v23  ;;  %8884 = vmatprep.subr.bf16.mxu0 %v12011_v62 }
 0x7bf   : > { %8970 = vmatprep.subr.bf16.mxu1 %v12013_v33 }
 0x7c1   : > { %8885 = vmatpush1.bf16.msra.mxu0 %v12010_v57 }
 0x7c2   : > { %8971 = vmatpush1.bf16.msra.mxu1 %v12012_v3  ;;  %8886 = vmatprep.subr.bf16.mxu0 %v12019_v19  ;;  %v7376_v19 = vld [vmem:[#allocation8 + $0x280] sm:$0xff] }
 0x7c3   : > { %8972 = vmatprep.subr.bf16.mxu1 %v12021_v11  ;;  %v7380_v11 = vld [vmem:[#allocation8 + $0x2a0] sm:$0xff] }
 0x7c4   : > { %v12051_v34 = vcombine.high %v7376_v19, %v7380_v11  ;;  %v12050_v51 = vcombine.low %v7376_v19, %v7380_v11  ;;  %v14881_v11 = vld [vmem:[#allocation8 + $0x400] sm:$0xff] }
 0x7c5   : > { %8887 = vmatpush1.bf16.msra.mxu0 %v12018_v16  ;;  %v12053_v16 = vcombine.high %v7377_v9, %v7381_v14 }
 0x7c6   : > { %8973 = vmatpush1.bf16.msra.mxu1 %v12020_v61  ;;  %8888 = vmatprep.subr.bf16.mxu0 %v12027_v52  ;;  %v7384_v61 = vld [vmem:[#allocation8 + $0x2c0] sm:$0xff] }
 0x7c7   : > { %8974 = vmatprep.subr.bf16.mxu1 %v12029_v38  ;;  %v7388_v52 = vld [vmem:[#allocation8 + $0x2e0] sm:$0xff]  ;;  %v7385_v38 = vld [vmem:[#allocation8 + $0x2c8] sm:$0xff] }
 0x7c8   : > { %v12059_v18 = vcombine.high %v7384_v61, %v7388_v52  ;;  %v12058_v22 = vcombine.low %v7384_v61, %v7388_v52  ;;  %v12060_v6 = vcombine.low %v7385_v38, %v7389_v21 }
 0x7c9   : > { %8889 = vmatpush1.bf16.msra.mxu0 %v12026_v8  ;;  %v12061_v8 = vcombine.high %v7385_v38, %v7389_v21 }
 0x7ca   : > { %8975 = vmatpush1.bf16.msra.mxu1 %v12028_v2  ;;  %8890 = vmatprep.subr.bf16.mxu0 %v12035_v43  ;;  %v7392_v2 = vld [vmem:[#allocation8 + $0x300] sm:$0xff] }
 0x7cb   : > { %8976 = vmatprep.subr.bf16.mxu1 %v12037_v47  ;;  %v7396_v43 = vld [vmem:[#allocation8 + $0x320] sm:$0xff]  ;;  %v7393_v47 = vld [vmem:[#allocation8 + $0x308] sm:$0xff] }
 0x7cc   : > { %v12067_v36 = vcombine.high %v7392_v2, %v7396_v43 }
 0x7cd   : > { %8891 = vmatpush1.bf16.msra.mxu0 %v12034_v54  ;;  %v12066_v54 = vcombine.low %v7392_v2, %v7396_v43  ;;  %v7180_v2 = vld [vmem:[%s15052_s9] sm:$0xf] }
 0x7ce   : > { %8977 = vmatpush1.bf16.msra.mxu1 %v12036_v5  ;;  %8892 = vmatprep.subr.bf16.mxu0 %v12043_v24  ;;  %v12069_v5 = vcombine.high %v7393_v47, %v7397_v17  ;;  %v7401_v24 = vld [vmem:[#allocation8 + $0x348] sm:$0xff] }
 0x7cf   : > { %8978 = vmatprep.subr.bf16.mxu1 %v12045_v27  ;;  %v7405_v27 = vld [vmem:[#allocation8 + $0x368] sm:$0xff] }
 0x7d1   : > { %8893 = vmatpush1.bf16.msra.mxu0 %v12042_v32  ;;  %v12068_v32 = vcombine.low %v7393_v47, %v7397_v17 }
 0x7d2   : > { %8979 = vmatpush1.bf16.msra.mxu1 %v12044_v50  ;;  %8894 = vmatprep.subr.bf16.mxu0 %v12051_v34  ;;  %v12075_v50 = vcombine.high %v7400_v63, %v7404_v41  ;;  %v14885_v34 = vld [vmem:[#allocation8 + $0x408] sm:$0xff] }
 0x7d3   : > { %8980 = vmatprep.subr.bf16.mxu1 %v12053_v16 }
 0x7d5   : > { %8895 = vmatpush1.bf16.msra.mxu0 %v12050_v51 }
 0x7d6   : > { %8896 = vmatprep.subr.bf16.mxu0 %v12059_v18 }
 0x7d9   : > { %8897 = vmatpush1.bf16.msra.mxu0 %v12058_v22 }
 0x7da   : > { %8898 = vmatprep.subr.bf16.mxu0 %v12067_v36 }
 0x7dd   : > { %8899 = vmatpush1.bf16.msra.mxu0 %v12066_v54 }
 0x7de   : > { %8900 = vmatprep.subr.bf16.mxu0 %v12075_v50  ;;  %v7267_v50 = vrot.slane %v7180_v2, %v14259_v37 }
 0x843   : > { %v7185_v44 = vpop.xlane.xlu0 %7184 }
 0x844   : > { %v7192_v10 = vmul.f32 0.001953125, %v7185_v44  ;;  %v12077_v44 = vcombine.high %v7401_v24, %v7405_v27 }
 0x845   : > { %v7190_v15 = vpop.xlane.xlu1 %7189 }
 0x846   : > { %v14842_v46 = vsub.f32 %v14810_v40, %v7192_v10  ;;  %v14845_v4 = vsub.f32 %v14813_v13, %v7192_v10  ;;  %v7193_v12 = vmul.f32 0.001953125, %v7190_v15  ;;  %v14848_v53 = vsub.f32 %v14819_v20, %v7192_v10  ;;  %v7412_v15 = vld [vmem:[#allocation8 + $0x3a0] sm:$0xff] }
 0x847   : > { %v14851_v7 = vsub.f32 %v14827_v42, %v7192_v10  ;;  %v7408_v10 = vld [vmem:[#allocation8 + $0x380] sm:$0xff] }
 0x848   : > { %v14854_v49 = vsub.f32 %v14816_v58, %v7193_v12  ;;  %v14857_v25 = vsub.f32 %v14824_v59, %v7193_v12  ;;  %v7202_v40 = vmul.f32 %v14842_v46, %v14842_v46  ;;  %v7203_v13 = vmul.f32 %v14845_v4, %v14845_v4 }
 0x849   : > { %v14864_v23 = vsub.f32 %v14830_v30, %v7193_v12  ;;  %v7204_v20 = vmul.f32 %v14848_v53, %v14848_v53  ;;  %v7205_v62 = vmul.f32 %v14851_v7, %v14851_v7  ;;  %v14875_v45 = vsub.f32 %v14836_v26, %v7193_v12  ;;  %v7409_v12 = vld [vmem:[#allocation8 + $0x388] sm:$0xff] }
 0x84a   : > { %v7210_v42 = vadd.f32 %v7203_v13, %v7202_v40  ;;  %v7206_v58 = vmul.f32 %v14854_v49, %v14854_v49  ;;  %v7207_v59 = vmul.f32 %v14857_v25, %v14857_v25  ;;  %v12052_v26 = vcombine.low %v7377_v9, %v7381_v14  ;;  %v7413_v40 = vld [vmem:[#allocation8 + $0x3a8] sm:$0xff]  ;;  %v14883_v9 = vld [vmem:[#allocation8 + $0x420] sm:$0xff] }
 0x84b   : > { %v7208_v30 = vmul.f32 %v14864_v23, %v14864_v23  ;;  %v7209_v57 = vmul.f32 %v14875_v45, %v14875_v45  ;;  %v12074_v13 = vcombine.low %v7400_v63, %v7404_v41  ;;  %v12098_v14 = vcombine.low %v14881_v11, %v14883_v9 }
 0x84c   : > { %v7211_v33 = vadd.f32 %v7210_v42, %v7204_v20  ;;  %v7215_v56 = vadd.f32 %v7207_v59, %v7206_v58  ;;  %8981 = vmatpush1.bf16.msra.mxu1 %v12052_v26  ;;  %v12076_v20 = vcombine.low %v7401_v24, %v7405_v27  ;;  %v12083_v42 = vcombine.high %v7408_v10, %v7412_v15  ;;  %v7416_v59 = vld [vmem:[#allocation8 + $0x3c0] sm:$0xff]  ;;  %v14891_v26 = vld [vmem:[#allocation8 + $0x428] sm:$0xff] }
 0x84d   : > { %8982 = vmatprep.subr.bf16.mxu1 %v12061_v8  ;;  %v12085_v58 = vcombine.high %v7409_v12, %v7413_v40  ;;  %8901 = vmatpush1.bf16.msra.mxu0 %v12074_v13  ;;  %v12099_v51 = vcombine.high %v14881_v11, %v14883_v9  ;;  %v12100_v16 = vcombine.low %v14885_v34, %v14891_v26  ;;  %v7179_v8 = vld [vmem:[%s15051_s8] sm:$0xf] }
 0x84e   : > { %v7212_v1 = vadd.f32 %v7211_v33, %v7205_v62  ;;  %v7216_v55 = vadd.f32 %v7215_v56, %v7208_v30  ;;  %v7420_v62 = vld [vmem:[#allocation8 + $0x3e0] sm:$0xff]  ;;  %v7417_v33 = vld [vmem:[#allocation8 + $0x3c8] sm:$0xff]  ;;  %v12082_v56 = vcombine.low %v7408_v10, %v7412_v15  ;;  %8902 = vmatprep.subr.bf16.mxu0 %v12083_v42  ;;  %v12101_v61 = vcombine.high %v14885_v34, %v14891_v26 }
 0x84f   : > { %v7421_v30 = vld [vmem:[#allocation8 + $0x3e8] sm:$0xff]  ;;  %v7246_v43 = vrot.slane %v7179_v8, %v14280_v48  ;;  %v7242_v36 = vrot.slane %v7179_v8, %v14265_v39  ;;  %v7238_v41 = vrot.slane %v7179_v8, %v14259_v37  ;;  %v7250_v10 = vrot.slane %v7179_v8, %v14298_v0  ;;  %v7456_v26 = vld [vmem:[#allocation8 + $0x500] sm:$0xff] }
 0x850   : > { %7213 = vadd.xlane.f32.xlu0 %v7212_v1  ;;  %v7217_v3 = vadd.f32 %v7216_v55, %v7209_v57  ;;  %8983 = vmatpush1.bf16.msra.mxu1 %v12060_v6  ;;  %v12084_v1 = vcombine.low %v7409_v12, %v7413_v40  ;;  %v12091_v55 = vcombine.high %v7416_v59, %v7420_v62 }
 0x851   : > { %8984 = vmatprep.subr.bf16.mxu1 %v12069_v5  ;;  %v12093_v57 = vcombine.high %v7417_v33, %v7421_v30  ;;  %8903 = vmatpush1.bf16.msra.mxu0 %v12082_v56  ;;  %v12092_v19 = vcombine.low %v7417_v33, %v7421_v30  ;;  %v7275_v5 = vrot.slane %v7180_v2, %v14280_v48 }
 0x852   : > { %8904 = vmatprep.subr.bf16.mxu0 %v12091_v55  ;;  %v7437_v55 = vld [vmem:[#allocation8 + $0x468] sm:$0xff] }
 0x854   : > { %7218 = vadd.xlane.f32.xlu0 %v7217_v3  ;;  %8985 = vmatpush1.bf16.msra.mxu1 %v12068_v32  ;;  %v12090_v3 = vcombine.low %v7416_v59, %v7420_v62  ;;  %v7271_v32 = vrot.slane %v7180_v2, %v14265_v39 }
 0x855   : > { %8986 = vmatprep.subr.bf16.mxu1 %v12077_v44 }
 0x856   : > { %8905 = vmatpush1.bf16.msra.mxu0 %v12090_v3 }
 0x857   : > { %8917 = vmatprep.subr.bf16.mxu0 %v12099_v51 }
 0x858   : > { %8987 = vmatpush1.bf16.msra.mxu1 %v12076_v20 }
 0x859   : > { %8988 = vmatprep.subr.bf16.mxu1 %v12085_v58 }
 0x85c   : > { %8989 = vmatpush1.bf16.msra.mxu1 %v12084_v1  ;;  %v7433_v1 = vld [vmem:[#allocation8 + $0x448] sm:$0xff] }
 0x85d   : > { %8990 = vmatprep.subr.bf16.mxu1 %v12093_v57 }
 0x860   : > { %8991 = vmatpush1.bf16.msra.mxu1 %v12092_v19 }
 0x861   : > { %9003 = vmatprep.subr.bf16.mxu1 %v12101_v61  ;;  %v7440_v61 = vld [vmem:[#allocation8 + $0x480] sm:$0xff] }
 0x8dd   : > { %v7214_v52 = vpop.xlane.xlu0 %7213 }
 0x8de   : > { %v7220_v38 = vmul.f32 0.001953125, %v7214_v52 }
 0x8e0   : > { %v7222_v18 = vadd.f32 1e-05, %v7220_v38  ;;  %v12109_v38 = vcombine.high %v7433_v1, %v7437_v55 }
 0x8e1   : > { %v7219_v21 = vpop.xlane.xlu0 %7218 }
 0x8e2   : > { %13737 = vrsqrt.f32 %v7222_v18  ;;  %v7221_v22 = vmul.f32 0.001953125, %v7219_v21  ;;  %v7444_v18 = vld [vmem:[#allocation8 + $0x4a0] sm:$0xff]  ;;  %v7441_v21 = vld [vmem:[#allocation8 + $0x488] sm:$0xff] }
 0x8e3   : > { %v12114_v11 = vcombine.low %v7440_v61, %v7444_v18 }
 0x8e4   : > { %v7223_v6 = vadd.f32 1e-05, %v7221_v22  ;;  %v7445_v22 = vld [vmem:[#allocation8 + $0x4a8] sm:$0xff] }
 0x8e5   : > { %v12116_v9 = vcombine.low %v7441_v21, %v7445_v22 }
 0x8e6   : > { %13739 = vrsqrt.f32 %v7223_v6 }
 0x8ec   : > { %v13738_v47 = vpop.eup %13737 }
 0x8ed   : > { %v7227_v17 = vmul.f32 %v13738_v47, %v14845_v4  ;;  %v7226_v63 = vmul.f32 %v13738_v47, %v14842_v46  ;;  %v7228_v54 = vmul.f32 %v13738_v47, %v14848_v53  ;;  %v7229_v44 = vmul.f32 %v13738_v47, %v14851_v7 }
 0x8ee   : > { %v7279_v7 = vrot.slane %v7180_v2, %v14298_v0  ;;  %v12108_v2 = vcombine.low %v7433_v1, %v7437_v55  ;;  %v12117_v47 = vcombine.high %v7441_v21, %v7445_v22  ;;  %v7480_v1 = vld [vmem:[#allocation8 + $0x5c0] sm:$0xff] }
 0x8ef   : > { %v7257_v24 = vmul.f32 %v7246_v43, %v7228_v54  ;;  %v7256_v15 = vmul.f32 %v7242_v36, %v7227_v17  ;;  %v7255_v12 = vmul.f32 %v7238_v41, %v7226_v63  ;;  %v7258_v58 = vmul.f32 %v7250_v10, %v7229_v44  ;;  %v7452_v17 = vld [vmem:[#allocation8 + $0x4e0] sm:$0xff]  ;;  %v7449_v63 = vld [vmem:[#allocation8 + $0x4c8] sm:$0xff] }
 0x8f0   : > { %v13740_v27 = vpop.eup %13739  ;;  %v7457_v54 = vld [vmem:[#allocation8 + $0x508] sm:$0xff]  ;;  %v7464_v44 = vld [vmem:[#allocation8 + $0x540] sm:$0xff] }
 0x8f1   : > { %v7231_v4 = vmul.f32 %v13740_v27, %v14857_v25  ;;  %v7230_v46 = vmul.f32 %v13740_v27, %v14854_v49  ;;  %v7233_v53 = vmul.f32 %v13740_v27, %v14875_v45  ;;  %v7232_v40 = vmul.f32 %v13740_v27, %v14864_v23  ;;  %v7432_v45 = vld [vmem:[#allocation8 + $0x440] sm:$0xff] }
 0x8f2   : > { %v14918_v13 = vadd.f32 %v7275_v5, %v7257_v24  ;;  %v14921_v33 = vadd.f32 %v7271_v32, %v7256_v15  ;;  %v14925_v30 = vadd.f32 %v7267_v50, %v7255_v12  ;;  %v7436_v23 = vld [vmem:[#allocation8 + $0x460] sm:$0xff]  ;;  %v14941_v51 = vadd.f32 %v7279_v7, %v7258_v58  ;;  %v7469_v15 = vld [vmem:[#allocation8 + $0x568] sm:$0xff] }
 0x8f3   : > { %v7260_v20 = vmul.f32 %v7242_v36, %v7231_v4  ;;  %v7259_v42 = vmul.f32 %v7238_v41, %v7230_v46  ;;  %v7262_v59 = vmul.f32 %v7250_v10, %v7233_v53  ;;  %v7261_v62 = vmul.f32 %v7246_v43, %v7232_v40  ;;  %v7448_v36 = vld [vmem:[#allocation8 + $0x4c0] sm:$0xff]  ;;  %v7453_v41 = vld [vmem:[#allocation8 + $0x4e8] sm:$0xff] }
 0x8f4   : > { %v12107_v52 = vcombine.high %v7432_v45, %v7436_v23  ;;  %v12106_v8 = vcombine.low %v7432_v45, %v7436_v23  ;;  %v12115_v43 = vcombine.high %v7440_v61, %v7444_v18  ;;  %v12123_v34 = vcombine.high %v7448_v36, %v7452_v17  ;;  %v7468_v10 = vld [vmem:[#allocation8 + $0x560] sm:$0xff]  ;;  %v7465_v4 = vld [vmem:[#allocation8 + $0x548] sm:$0xff] }
 0x8f5   : > { %v14923_v25 = vadd.f32 %v7271_v32, %v7260_v20  ;;  %v14927_v49 = vadd.f32 %v7267_v50, %v7259_v42  ;;  %v14929_v56 = vadd.f32 %v7279_v7, %v7262_v59  ;;  %v14931_v57 = vadd.f32 %v7275_v5, %v7261_v62  ;;  %v7461_v5 = vld [vmem:[#allocation8 + $0x528] sm:$0xff]  ;;  %v7472_v20 = vld [vmem:[#allocation8 + $0x580] sm:$0xff] }
 0x8f6   : > { %v12122_v24 = vcombine.low %v7448_v36, %v7452_v17  ;;  %v12124_v27 = vcombine.low %v7449_v63, %v7453_v41  ;;  %v12133_v50 = vcombine.high %v7457_v54, %v7461_v5  ;;  %v12132_v12 = vcombine.low %v7457_v54, %v7461_v5  ;;  %v7476_v42 = vld [vmem:[#allocation8 + $0x5a0] sm:$0xff]  ;;  %v7473_v58 = vld [vmem:[#allocation8 + $0x588] sm:$0xff] }
 0x8f7   : > { %v14935_v3 = vpack.c.bf16 %v14923_v25, %v14921_v33  ;;  %v14939_v19 = vpack.c.bf16 %v14927_v49, %v14925_v30  ;;  %v14949_v6 = vpack.c.bf16 %v14929_v56, %v14941_v51  ;;  %v12139_v53 = vcombine.high %v7464_v44, %v7468_v10  ;;  %v7477_v59 = vld [vmem:[#allocation8 + $0x5a8] sm:$0xff]  ;;  %v7484_v55 = vld [vmem:[#allocation8 + $0x5e0] sm:$0xff] }
 0x8f8   : > { %v12141_v40 = vcombine.high %v7465_v4, %v7469_v15  ;;  %v12138_v7 = vcombine.low %v7464_v44, %v7468_v10  ;;  %v12140_v62 = vcombine.low %v7465_v4, %v7469_v15  ;;  %v12147_v45 = vcombine.high %v7472_v20, %v7476_v42  ;;  %v7481_v61 = vld [vmem:[#allocation8 + $0x5c8] sm:$0xff] }
 0x8f9   : > { %8906 = vmatprep.mubr.bf16.mxu0 %v14935_v3  ;;  %8992 = vmatprep.mubr.bf16.mxu1 %v14935_v3  ;;  %v12149_v23 = vcombine.high %v7473_v58, %v7477_v59  ;;  %v12148_v18 = vcombine.low %v7473_v58, %v7477_v59  ;;  %v12155_v21 = vcombine.high %v7480_v1, %v7484_v55 }
 0x8fa   : > { %8907 = vmatmul.mubr.bf16.vlgmr.msra.gmra.mrb[48].mxu0 %v14939_v19  ;;  %8993 = vmatmul.mubr.bf16.vlgmr.msra.gmra.mrb[48].mxu1 %v14939_v19  ;;  %v12154_v36 = vcombine.low %v7480_v1, %v7484_v55 }
 0x8fb   : > { %8918 = vmatpush1.bf16.msra.mxu0 %v12098_v14  ;;  %9004 = vmatpush1.bf16.msra.mxu1 %v12100_v16  ;;  %v12125_v14 = vcombine.high %v7449_v63, %v7453_v41  ;;  %v7460_v16 = vld [vmem:[#allocation8 + $0x520] sm:$0xff] }
 0x8fc   : > { %8949 = vmatprep.mubr.bf16.mxu0 %v14949_v6  ;;  %9035 = vmatprep.mubr.bf16.mxu1 %v14949_v6  ;;  %v12131_v32 = vcombine.high %v7456_v26, %v7460_v16  ;;  %v12130_v46 = vcombine.low %v7456_v26, %v7460_v16 }
 0x8fd   : > { %8919 = vmatprep.subr.bf16.mxu0 %v12107_v52  ;;  %9005 = vmatprep.subr.bf16.mxu1 %v12109_v38  ;;  %v7485_v52 = vld [vmem:[#allocation8 + $0x5e8] sm:$0xff]  ;;  %v12146_v38 = vcombine.low %v7472_v20, %v7476_v42 }
 0x8fe   : > { %v12157_v22 = vcombine.high %v7481_v61, %v7485_v52  ;;  %v12156_v17 = vcombine.low %v7481_v61, %v7485_v52 }
 0x8ff   : > { %8920 = vmatpush1.bf16.msra.mxu0 %v12106_v8  ;;  %9006 = vmatpush1.bf16.msra.mxu1 %v12108_v2  ;;  %v7488_v8 = vld [vmem:[#allocation8 + $0x600] sm:$0xff] }
 0x900   : > { %8921 = vmatprep.subr.bf16.mxu0 %v12115_v43  ;;  %9007 = vmatprep.subr.bf16.mxu1 %v12117_v47  ;;  %v7492_v2 = vld [vmem:[#allocation8 + $0x620] sm:$0xff]  ;;  %v7489_v43 = vld [vmem:[#allocation8 + $0x608] sm:$0xff] }
 0x901   : > { %v7493_v47 = vld [vmem:[#allocation8 + $0x628] sm:$0xff]  ;;  %v12163_v63 = vcombine.high %v7488_v8, %v7492_v2  ;;  %v12162_v26 = vcombine.low %v7488_v8, %v7492_v2 }
 0x902   : > { %v12165_v41 = vcombine.high %v7489_v43, %v7493_v47  ;;  %v12164_v16 = vcombine.low %v7489_v43, %v7493_v47 }
 0x903   : > { %8922 = vmatpush1.bf16.msra.mxu0 %v12114_v11  ;;  %9008 = vmatpush1.bf16.msra.mxu1 %v12116_v9  ;;  %v7496_v11 = vld [vmem:[#allocation8 + $0x640] sm:$0xff] }
 0x904   : > { %8923 = vmatprep.subr.bf16.mxu0 %v12123_v34  ;;  %9009 = vmatprep.subr.bf16.mxu1 %v12125_v14  ;;  %v7500_v9 = vld [vmem:[#allocation8 + $0x660] sm:$0xff]  ;;  %v7497_v34 = vld [vmem:[#allocation8 + $0x648] sm:$0xff] }
 0x905   : > { %v7501_v14 = vld [vmem:[#allocation8 + $0x668] sm:$0xff]  ;;  %v12171_v54 = vcombine.high %v7496_v11, %v7500_v9  ;;  %v12170_v44 = vcombine.low %v7496_v11, %v7500_v9 }
 0x906   : > { %v12173_v5 = vcombine.high %v7497_v34, %v7501_v14  ;;  %v12172_v10 = vcombine.low %v7497_v34, %v7501_v14 }
 0x907   : > { %8924 = vmatpush1.bf16.msra.mxu0 %v12122_v24  ;;  %9010 = vmatpush1.bf16.msra.mxu1 %v12124_v27  ;;  %v7504_v24 = vld [vmem:[#allocation8 + $0x680] sm:$0xff] }
 0x908   : > { %8925 = vmatprep.subr.bf16.mxu0 %v12131_v32  ;;  %9011 = vmatprep.subr.bf16.mxu1 %v12133_v50  ;;  %v7508_v27 = vld [vmem:[#allocation8 + $0x6a0] sm:$0xff]  ;;  %v7505_v32 = vld [vmem:[#allocation8 + $0x688] sm:$0xff] }
 0x909   : > { %v7509_v50 = vld [vmem:[#allocation8 + $0x6a8] sm:$0xff]  ;;  %v12179_v4 = vcombine.high %v7504_v24, %v7508_v27  ;;  %v12178_v20 = vcombine.low %v7504_v24, %v7508_v27 }
 0x90a   : > { %v12181_v15 = vcombine.high %v7505_v32, %v7509_v50  ;;  %v12180_v42 = vcombine.low %v7505_v32, %v7509_v50 }
 0x90b   : > { %8926 = vmatpush1.bf16.msra.mxu0 %v12130_v46  ;;  %9012 = vmatpush1.bf16.msra.mxu1 %v12132_v12  ;;  %v7512_v46 = vld [vmem:[#allocation8 + $0x6c0] sm:$0xff] }
 0x90c   : > { %8927 = vmatprep.subr.bf16.mxu0 %v12139_v53  ;;  %9013 = vmatprep.subr.bf16.mxu1 %v12141_v40  ;;  %v7516_v12 = vld [vmem:[#allocation8 + $0x6e0] sm:$0xff]  ;;  %v7513_v53 = vld [vmem:[#allocation8 + $0x6c8] sm:$0xff] }
 0x90d   : > { %v7517_v40 = vld [vmem:[#allocation8 + $0x6e8] sm:$0xff]  ;;  %v12187_v58 = vcombine.high %v7512_v46, %v7516_v12  ;;  %v12186_v1 = vcombine.low %v7512_v46, %v7516_v12 }
 0x90e   : > { %v12189_v59 = vcombine.high %v7513_v53, %v7517_v40  ;;  %v12188_v55 = vcombine.low %v7513_v53, %v7517_v40 }
 0x90f   : > { %8928 = vmatpush1.bf16.msra.mxu0 %v12138_v7  ;;  %9014 = vmatpush1.bf16.msra.mxu1 %v12140_v62  ;;  %v7520_v7 = vld [vmem:[#allocation8 + $0x700] sm:$0xff] }
 0x910   : > { %8929 = vmatprep.subr.bf16.mxu0 %v12147_v45  ;;  %9015 = vmatprep.subr.bf16.mxu1 %v12149_v23  ;;  %v7524_v62 = vld [vmem:[#allocation8 + $0x720] sm:$0xff]  ;;  %v7521_v45 = vld [vmem:[#allocation8 + $0x708] sm:$0xff] }
 0x911   : > { %v7525_v23 = vld [vmem:[#allocation8 + $0x728] sm:$0xff]  ;;  %v12195_v61 = vcombine.high %v7520_v7, %v7524_v62  ;;  %v12194_v8 = vcombine.low %v7520_v7, %v7524_v62  ;;  %v14961_v62 = vpack.c.bf16 %v14931_v57, %v14918_v13 }
 0x912   : > { %v12197_v52 = vcombine.high %v7521_v45, %v7525_v23  ;;  %v12196_v2 = vcombine.low %v7521_v45, %v7525_v23 }
 0x913   : > { %8930 = vmatpush1.bf16.msra.mxu0 %v12146_v38  ;;  %9016 = vmatpush1.bf16.msra.mxu1 %v12148_v18  ;;  %v7528_v38 = vld [vmem:[#allocation8 + $0x740] sm:$0xff] }
 0x914   : > { %8931 = vmatprep.subr.bf16.mxu0 %v12155_v21  ;;  %9017 = vmatprep.subr.bf16.mxu1 %v12157_v22  ;;  %v7532_v18 = vld [vmem:[#allocation8 + $0x760] sm:$0xff]  ;;  %v7529_v21 = vld [vmem:[#allocation8 + $0x748] sm:$0xff] }
 0x915   : > { %v7533_v22 = vld [vmem:[#allocation8 + $0x768] sm:$0xff]  ;;  %v12203_v43 = vcombine.high %v7528_v38, %v7532_v18  ;;  %v12202_v11 = vcombine.low %v7528_v38, %v7532_v18  ;;  %v7319_v38 = vld [vmem:[#allocation8 + $0xb8] sm:$0xff] }
 0x916   : > { %v12205_v47 = vcombine.high %v7529_v21, %v7533_v22  ;;  %v12204_v9 = vcombine.low %v7529_v21, %v7533_v22 }
 0x917   : > { %8932 = vmatpush1.bf16.msra.mxu0 %v12154_v36  ;;  %9018 = vmatpush1.bf16.msra.mxu1 %v12156_v17  ;;  %v7536_v36 = vld [vmem:[#allocation8 + $0x780] sm:$0xff] }
 0x918   : > { %8933 = vmatprep.subr.bf16.mxu0 %v12163_v63  ;;  %9019 = vmatprep.subr.bf16.mxu1 %v12165_v41  ;;  %v7540_v17 = vld [vmem:[#allocation8 + $0x7a0] sm:$0xff]  ;;  %v7537_v63 = vld [vmem:[#allocation8 + $0x788] sm:$0xff] }
 0x919   : > { %v7541_v41 = vld [vmem:[#allocation8 + $0x7a8] sm:$0xff]  ;;  %v12211_v34 = vcombine.high %v7536_v36, %v7540_v17  ;;  %v12210_v24 = vcombine.low %v7536_v36, %v7540_v17  ;;  %v7327_v36 = vld [vmem:[#allocation8 + $0xf8] sm:$0xff] }
 0x91a   : > { %v12213_v14 = vcombine.high %v7537_v63, %v7541_v41  ;;  %v12212_v27 = vcombine.low %v7537_v63, %v7541_v41 }
 0x91b   : > { %8934 = vmatpush1.bf16.msra.mxu0 %v12162_v26  ;;  %9020 = vmatpush1.bf16.msra.mxu1 %v12164_v16  ;;  %v7544_v26 = vld [vmem:[#allocation8 + $0x7c0] sm:$0xff] }
 0x91c   : > { %8935 = vmatprep.subr.bf16.mxu0 %v12171_v54  ;;  %9021 = vmatprep.subr.bf16.mxu1 %v12173_v5  ;;  %v7548_v16 = vld [vmem:[#allocation8 + $0x7e0] sm:$0xff]  ;;  %v7545_v54 = vld [vmem:[#allocation8 + $0x7c8] sm:$0xff] }
 0x91d   : > { %v7549_v5 = vld [vmem:[#allocation8 + $0x7e8] sm:$0xff]  ;;  %v12219_v32 = vcombine.high %v7544_v26, %v7548_v16  ;;  %v12218_v46 = vcombine.low %v7544_v26, %v7548_v16 }
 0x91e   : > { %v12221_v50 = vcombine.high %v7545_v54, %v7549_v5  ;;  %v12220_v12 = vcombine.low %v7545_v54, %v7549_v5 }
 0x91f   : > { %8936 = vmatpush1.bf16.msra.mxu0 %v12170_v44  ;;  %9022 = vmatpush1.bf16.msra.mxu1 %v12172_v10  ;;  %v7298_v44 = vld [vmem:[#allocation8 + $0x10] sm:$0xff] }
 0x920   : > { %8937 = vmatprep.subr.bf16.mxu0 %v12179_v4  ;;  %9023 = vmatprep.subr.bf16.mxu1 %v12181_v15  ;;  %v7302_v10 = vld [vmem:[#allocation8 + $0x30] sm:$0xff]  ;;  %v7299_v4 = vld [vmem:[#allocation8 + $0x18] sm:$0xff] }
 0x921   : > { %v7303_v15 = vld [vmem:[#allocation8 + $0x38] sm:$0xff]  ;;  %v11975_v53 = vcombine.high %v7298_v44, %v7302_v10  ;;  %v11974_v7 = vcombine.low %v7298_v44, %v7302_v10 }
 0x922   : > { %v11977_v40 = vcombine.high %v7299_v4, %v7303_v15  ;;  %v11976_v45 = vcombine.low %v7299_v4, %v7303_v15 }
 0x923   : > { %8938 = vmatpush1.bf16.msra.mxu0 %v12178_v20  ;;  %9024 = vmatpush1.bf16.msra.mxu1 %v12180_v42  ;;  %v7306_v20 = vld [vmem:[#allocation8 + $0x50] sm:$0xff] }
 0x924   : > { %8939 = vmatprep.subr.bf16.mxu0 %v12187_v58  ;;  %9025 = vmatprep.subr.bf16.mxu1 %v12189_v59  ;;  %v7310_v42 = vld [vmem:[#allocation8 + $0x70] sm:$0xff]  ;;  %v7307_v58 = vld [vmem:[#allocation8 + $0x58] sm:$0xff] }
 0x925   : > { %v7311_v59 = vld [vmem:[#allocation8 + $0x78] sm:$0xff]  ;;  %v11983_v23 = vcombine.high %v7306_v20, %v7310_v42  ;;  %v11982_v18 = vcombine.low %v7306_v20, %v7310_v42 }
 0x926   : > { %v11984_v21 = vcombine.low %v7307_v58, %v7311_v59 }
 0x927   : > { %8940 = vmatpush1.bf16.msra.mxu0 %v12186_v1  ;;  %9026 = vmatpush1.bf16.msra.mxu1 %v12188_v55  ;;  %v11985_v1 = vcombine.high %v7307_v58, %v7311_v59  ;;  %v7314_v55 = vld [vmem:[#allocation8 + $0x90] sm:$0xff] }
 0x928   : > { %8941 = vmatprep.subr.bf16.mxu0 %v12195_v61  ;;  %9027 = vmatprep.subr.bf16.mxu1 %v12197_v52  ;;  %v7318_v61 = vld [vmem:[#allocation8 + $0xb0] sm:$0xff]  ;;  %v7315_v52 = vld [vmem:[#allocation8 + $0x98] sm:$0xff] }
 0x929   : > { %v11991_v22 = vcombine.high %v7314_v55, %v7318_v61  ;;  %v11990_v17 = vcombine.low %v7314_v55, %v7318_v61  ;;  %v11992_v63 = vcombine.low %v7315_v52, %v7319_v38 }
 0x92b   : > { %8942 = vmatpush1.bf16.msra.mxu0 %v12194_v8  ;;  %9028 = vmatpush1.bf16.msra.mxu1 %v12196_v2  ;;  %v11993_v8 = vcombine.high %v7315_v52, %v7319_v38  ;;  %v7322_v2 = vld [vmem:[#allocation8 + $0xd0] sm:$0xff] }
 0x92c   : > { %8943 = vmatprep.subr.bf16.mxu0 %v12203_v43  ;;  %9029 = vmatprep.subr.bf16.mxu1 %v12205_v47  ;;  %v7326_v43 = vld [vmem:[#allocation8 + $0xf0] sm:$0xff]  ;;  %v7323_v47 = vld [vmem:[#allocation8 + $0xd8] sm:$0xff] }
 0x92d   : > { %v11999_v41 = vcombine.high %v7322_v2, %v7326_v43  ;;  %v11998_v26 = vcombine.low %v7322_v2, %v7326_v43  ;;  %v12000_v16 = vcombine.low %v7323_v47, %v7327_v36 }
 0x92f   : > { %8944 = vmatpush1.bf16.msra.mxu0 %v12202_v11  ;;  %9030 = vmatpush1.bf16.msra.mxu1 %v12204_v9  ;;  %v12001_v11 = vcombine.high %v7323_v47, %v7327_v36  ;;  %v7330_v9 = vld [vmem:[#allocation8 + $0x110] sm:$0xff] }
 0x930   : > { %8945 = vmatprep.subr.bf16.mxu0 %v12211_v34  ;;  %9031 = vmatprep.subr.bf16.mxu1 %v12213_v14  ;;  %v7334_v34 = vld [vmem:[#allocation8 + $0x130] sm:$0xff]  ;;  %v7335_v14 = vld [vmem:[#allocation8 + $0x138] sm:$0xff] }
 0x931   : > { %v12007_v54 = vcombine.high %v7330_v9, %v7334_v34  ;;  %v12006_v44 = vcombine.low %v7330_v9, %v7334_v34 }
 0x933   : > { %8946 = vmatpush1.bf16.msra.mxu0 %v12210_v24  ;;  %9032 = vmatpush1.bf16.msra.mxu1 %v12212_v27  ;;  %v7338_v24 = vld [vmem:[#allocation8 + $0x150] sm:$0xff] }
 0x934   : > { %8947 = vmatprep.subr.bf16.mxu0 %v12219_v32  ;;  %9033 = vmatprep.subr.bf16.mxu1 %v12221_v50  ;;  %v7342_v27 = vld [vmem:[#allocation8 + $0x170] sm:$0xff]  ;;  %v7339_v32 = vld [vmem:[#allocation8 + $0x158] sm:$0xff] }
 0x935   : > { %v7343_v50 = vld [vmem:[#allocation8 + $0x178] sm:$0xff]  ;;  %v12015_v4 = vcombine.high %v7338_v24, %v7342_v27  ;;  %v12014_v20 = vcombine.low %v7338_v24, %v7342_v27 }
 0x936   : > { %v12017_v15 = vcombine.high %v7339_v32, %v7343_v50  ;;  %v12016_v42 = vcombine.low %v7339_v32, %v7343_v50 }
 0x937   : > { %8948 = vmatpush1.bf16.msra.mxu0 %v12218_v46  ;;  %9034 = vmatpush1.bf16.msra.mxu1 %v12220_v12  ;;  %v7346_v46 = vld [vmem:[#allocation8 + $0x190] sm:$0xff] }
 0x938   : > { %9046 = vmatprep.subr.bf16.mxu0 %v11975_v53  ;;  %9132 = vmatprep.subr.bf16.mxu1 %v11977_v40  ;;  %v7350_v12 = vld [vmem:[#allocation8 + $0x1b0] sm:$0xff]  ;;  %v7347_v53 = vld [vmem:[#allocation8 + $0x198] sm:$0xff] }
 0x939   : > { %v7351_v40 = vld [vmem:[#allocation8 + $0x1b8] sm:$0xff]  ;;  %v12023_v58 = vcombine.high %v7346_v46, %v7350_v12  ;;  %v12022_v55 = vcombine.low %v7346_v46, %v7350_v12 }
 0x93a   : > { %8950 = vmatmul.mubr.bf16.vlgmr.msra.gmra.mrb[48].mxu0 %v14961_v62  ;;  %9036 = vmatmul.mubr.bf16.vlgmr.msra.gmra.mrb[48].mxu1 %v14961_v62  ;;  %v12025_v59 = vcombine.high %v7347_v53, %v7351_v40  ;;  %v12024_v61 = vcombine.low %v7347_v53, %v7351_v40 }
 0x93b   : > { %9047 = vmatpush1.bf16.msra.mxu0 %v11974_v7  ;;  %9078 = vmatprep.mubr.bf16.mxu0 %v14935_v3  ;;  %v7354_v7 = vld [vmem:[#allocation8 + $0x1d0] sm:$0xff] }
 0x93c   : > { %9133 = vmatpush1.bf16.msra.mxu1 %v11976_v45  ;;  %9164 = vmatprep.mubr.bf16.mxu1 %v14935_v3  ;;  %v7331_v3 = vld [vmem:[#allocation8 + $0x118] sm:$0xff]  ;;  %v7358_v45 = vld [vmem:[#allocation8 + $0x1f0] sm:$0xff] }
 0x93d   : > { %9048 = vmatprep.subr.bf16.mxu0 %v11983_v23  ;;  %9134 = vmatprep.subr.bf16.mxu1 %v11985_v1  ;;  %v12009_v5 = vcombine.high %v7331_v3, %v7335_v14  ;;  %v12008_v10 = vcombine.low %v7331_v3, %v7335_v14  ;;  %v7355_v23 = vld [vmem:[#allocation8 + $0x1d8] sm:$0xff]  ;;  %v12031_v52 = vcombine.high %v7354_v7, %v7358_v45 }
 0x93e   : > { %v7359_v1 = vld [vmem:[#allocation8 + $0x1f8] sm:$0xff]  ;;  %v12030_v2 = vcombine.low %v7354_v7, %v7358_v45 }
 0x93f   : > { %9049 = vmatpush1.bf16.msra.mxu0 %v11982_v18  ;;  %v12033_v38 = vcombine.high %v7355_v23, %v7359_v1  ;;  %v7362_v18 = vld [vmem:[#allocation8 + $0x210] sm:$0xff]  ;;  %v12032_v43 = vcombine.low %v7355_v23, %v7359_v1 }
 0x940   : > { %9135 = vmatpush1.bf16.msra.mxu1 %v11984_v21  ;;  %9050 = vmatprep.subr.bf16.mxu0 %v11991_v22  ;;  %v7366_v21 = vld [vmem:[#allocation8 + $0x230] sm:$0xff]  ;;  %v7363_v22 = vld [vmem:[#allocation8 + $0x218] sm:$0xff] }
 0x941   : > { %9136 = vmatprep.subr.bf16.mxu1 %v11993_v8  ;;  %v7367_v8 = vld [vmem:[#allocation8 + $0x238] sm:$0xff]  ;;  %v12039_v47 = vcombine.high %v7362_v18, %v7366_v21  ;;  %v12038_v9 = vcombine.low %v7362_v18, %v7366_v21 }
 0x942   : > { %v12041_v36 = vcombine.high %v7363_v22, %v7367_v8  ;;  %v12040_v34 = vcombine.low %v7363_v22, %v7367_v8 }
 0x943   : > { %9051 = vmatpush1.bf16.msra.mxu0 %v11990_v17  ;;  %v7370_v17 = vld [vmem:[#allocation8 + $0x250] sm:$0xff] }
 0x944   : > { %9137 = vmatpush1.bf16.msra.mxu1 %v11992_v63  ;;  %9052 = vmatprep.subr.bf16.mxu0 %v11999_v41  ;;  %v7374_v63 = vld [vmem:[#allocation8 + $0x270] sm:$0xff]  ;;  %v7371_v41 = vld [vmem:[#allocation8 + $0x258] sm:$0xff] }
 0x945   : > { %9138 = vmatprep.subr.bf16.mxu1 %v12001_v11  ;;  %v7375_v11 = vld [vmem:[#allocation8 + $0x278] sm:$0xff]  ;;  %v12047_v3 = vcombine.high %v7370_v17, %v7374_v63  ;;  %v12046_v24 = vcombine.low %v7370_v17, %v7374_v63 }
 0x946   : > { %v12049_v14 = vcombine.high %v7371_v41, %v7375_v11  ;;  %v12048_v27 = vcombine.low %v7371_v41, %v7375_v11 }
 0x947   : > { %9053 = vmatpush1.bf16.msra.mxu0 %v11998_v26  ;;  %v7378_v26 = vld [vmem:[#allocation8 + $0x290] sm:$0xff] }
 0x948   : > { %9139 = vmatpush1.bf16.msra.mxu1 %v12000_v16  ;;  %9054 = vmatprep.subr.bf16.mxu0 %v12007_v54  ;;  %v7382_v16 = vld [vmem:[#allocation8 + $0x2b0] sm:$0xff]  ;;  %v7379_v54 = vld [vmem:[#allocation8 + $0x298] sm:$0xff] }
 0x949   : > { %9140 = vmatprep.subr.bf16.mxu1 %v12009_v5  ;;  %v7383_v5 = vld [vmem:[#allocation8 + $0x2b8] sm:$0xff]  ;;  %v12055_v32 = vcombine.high %v7378_v26, %v7382_v16  ;;  %v12054_v46 = vcombine.low %v7378_v26, %v7382_v16 }
 0x94a   : > { %v12057_v50 = vcombine.high %v7379_v54, %v7383_v5  ;;  %v12056_v12 = vcombine.low %v7379_v54, %v7383_v5 }
 0x94b   : > { %9055 = vmatpush1.bf16.msra.mxu0 %v12006_v44  ;;  %v7386_v44 = vld [vmem:[#allocation8 + $0x2d0] sm:$0xff] }
 0x94c   : > { %9141 = vmatpush1.bf16.msra.mxu1 %v12008_v10  ;;  %9056 = vmatprep.subr.bf16.mxu0 %v12015_v4  ;;  %v7390_v10 = vld [vmem:[#allocation8 + $0x2f0] sm:$0xff]  ;;  %v7387_v4 = vld [vmem:[#allocation8 + $0x2d8] sm:$0xff] }
 0x94d   : > { %9142 = vmatprep.subr.bf16.mxu1 %v12017_v15  ;;  %v7391_v15 = vld [vmem:[#allocation8 + $0x2f8] sm:$0xff]  ;;  %v12063_v53 = vcombine.high %v7386_v44, %v7390_v10  ;;  %v12062_v7 = vcombine.low %v7386_v44, %v7390_v10 }
 0x94e   : > { %v12065_v40 = vcombine.high %v7387_v4, %v7391_v15  ;;  %v12064_v45 = vcombine.low %v7387_v4, %v7391_v15 }
 0x94f   : > { %9057 = vmatpush1.bf16.msra.mxu0 %v12014_v20  ;;  %v7394_v20 = vld [vmem:[#allocation8 + $0x310] sm:$0xff] }
 0x950   : > { %9143 = vmatpush1.bf16.msra.mxu1 %v12016_v42  ;;  %9058 = vmatprep.subr.bf16.mxu0 %v12023_v58  ;;  %v7398_v42 = vld [vmem:[#allocation8 + $0x330] sm:$0xff]  ;;  %v7395_v58 = vld [vmem:[#allocation8 + $0x318] sm:$0xff] }
 0x951   : > { %9144 = vmatprep.subr.bf16.mxu1 %v12025_v59  ;;  %v7399_v59 = vld [vmem:[#allocation8 + $0x338] sm:$0xff]  ;;  %v12071_v23 = vcombine.high %v7394_v20, %v7398_v42  ;;  %v12070_v18 = vcombine.low %v7394_v20, %v7398_v42 }
 0x952   : > { %v12073_v1 = vcombine.high %v7395_v58, %v7399_v59  ;;  %v12072_v21 = vcombine.low %v7395_v58, %v7399_v59  ;;  %v7439_v20 = vld [vmem:[#allocation8 + $0x478] sm:$0xff]  ;;  %v7442_v59 = vld [vmem:[#allocation8 + $0x490] sm:$0xff] }
 0x953   : > { %9059 = vmatpush1.bf16.msra.mxu0 %v12022_v55  ;;  %v7402_v55 = vld [vmem:[#allocation8 + $0x350] sm:$0xff] }
 0x954   : > { %9145 = vmatpush1.bf16.msra.mxu1 %v12024_v61  ;;  %9060 = vmatprep.subr.bf16.mxu0 %v12031_v52  ;;  %v7406_v61 = vld [vmem:[#allocation8 + $0x370] sm:$0xff]  ;;  %v7403_v52 = vld [vmem:[#allocation8 + $0x358] sm:$0xff] }
 0x955   : > { %9146 = vmatprep.subr.bf16.mxu1 %v12033_v38  ;;  %v7407_v38 = vld [vmem:[#allocation8 + $0x378] sm:$0xff]  ;;  %v12079_v22 = vcombine.high %v7402_v55, %v7406_v61  ;;  %v12078_v17 = vcombine.low %v7402_v55, %v7406_v61 }
 0x956   : > { %v12081_v8 = vcombine.high %v7403_v52, %v7407_v38  ;;  %v12080_v63 = vcombine.low %v7403_v52, %v7407_v38 }
 0x957   : > { %9061 = vmatpush1.bf16.msra.mxu0 %v12030_v2  ;;  %v7410_v2 = vld [vmem:[#allocation8 + $0x390] sm:$0xff] }
 0x958   : > { %9147 = vmatpush1.bf16.msra.mxu1 %v12032_v43  ;;  %9062 = vmatprep.subr.bf16.mxu0 %v12039_v47  ;;  %v7414_v43 = vld [vmem:[#allocation8 + $0x3b0] sm:$0xff]  ;;  %v7411_v47 = vld [vmem:[#allocation8 + $0x398] sm:$0xff] }
 0x959   : > { %9148 = vmatprep.subr.bf16.mxu1 %v12041_v36  ;;  %v7415_v36 = vld [vmem:[#allocation8 + $0x3b8] sm:$0xff]  ;;  %v12087_v41 = vcombine.high %v7410_v2, %v7414_v43  ;;  %v12086_v26 = vcombine.low %v7410_v2, %v7414_v43 }
 0x95a   : > { %v12089_v11 = vcombine.high %v7411_v47, %v7415_v36  ;;  %v12088_v16 = vcombine.low %v7411_v47, %v7415_v36  ;;  %v7458_v36 = vld [vmem:[#allocation8 + $0x510] sm:$0xff] }
 0x95b   : > { %9063 = vmatpush1.bf16.msra.mxu0 %v12038_v9  ;;  %v7418_v9 = vld [vmem:[#allocation8 + $0x3d0] sm:$0xff] }
 0x95c   : > { %9149 = vmatpush1.bf16.msra.mxu1 %v12040_v34  ;;  %9064 = vmatprep.subr.bf16.mxu0 %v12047_v3  ;;  %v7422_v34 = vld [vmem:[#allocation8 + $0x3f0] sm:$0xff]  ;;  %v7419_v3 = vld [vmem:[#allocation8 + $0x3d8] sm:$0xff] }
 0x95d   : > { %9150 = vmatprep.subr.bf16.mxu1 %v12049_v14  ;;  %v7423_v14 = vld [vmem:[#allocation8 + $0x3f8] sm:$0xff]  ;;  %v12095_v54 = vcombine.high %v7418_v9, %v7422_v34  ;;  %v12094_v44 = vcombine.low %v7418_v9, %v7422_v34 }
 0x95e   : > { %v12097_v5 = vcombine.high %v7419_v3, %v7423_v14  ;;  %v12096_v10 = vcombine.low %v7419_v3, %v7423_v14  ;;  %v7466_v3 = vld [vmem:[#allocation8 + $0x550] sm:$0xff] }
 0x95f   : > { %9065 = vmatpush1.bf16.msra.mxu0 %v12046_v24  ;;  %v7426_v24 = vld [vmem:[#allocation8 + $0x410] sm:$0xff] }
 0x960   : > { %9151 = vmatpush1.bf16.msra.mxu1 %v12048_v27  ;;  %9066 = vmatprep.subr.bf16.mxu0 %v12055_v32  ;;  %v7430_v27 = vld [vmem:[#allocation8 + $0x430] sm:$0xff]  ;;  %v7427_v32 = vld [vmem:[#allocation8 + $0x418] sm:$0xff] }
 0x961   : > { %9152 = vmatprep.subr.bf16.mxu1 %v12057_v50  ;;  %v7431_v50 = vld [vmem:[#allocation8 + $0x438] sm:$0xff]  ;;  %v12103_v4 = vcombine.high %v7426_v24, %v7430_v27  ;;  %v7470_v14 = vld [vmem:[#allocation8 + $0x570] sm:$0xff] }
 0x962   : > { %v12105_v15 = vcombine.high %v7427_v32, %v7431_v50  ;;  %v12104_v42 = vcombine.low %v7427_v32, %v7431_v50  ;;  %v7474_v32 = vld [vmem:[#allocation8 + $0x590] sm:$0xff] }
 0x963   : > { %9067 = vmatpush1.bf16.msra.mxu0 %v12054_v46  ;;  %v7434_v46 = vld [vmem:[#allocation8 + $0x450] sm:$0xff] }
 0x964   : > { %9153 = vmatpush1.bf16.msra.mxu1 %v12056_v12  ;;  %9068 = vmatprep.subr.bf16.mxu0 %v12063_v53  ;;  %v7438_v12 = vld [vmem:[#allocation8 + $0x470] sm:$0xff]  ;;  %v12102_v53 = vcombine.low %v7426_v24, %v7430_v27  ;;  %v12143_v24 = vcombine.high %v7466_v3, %v7470_v14 }
 0x965   : > { %9154 = vmatprep.subr.bf16.mxu1 %v12065_v40  ;;  %v7435_v40 = vld [vmem:[#allocation8 + $0x458] sm:$0xff]  ;;  %v12111_v58 = vcombine.high %v7434_v46, %v7438_v12  ;;  %v12110_v55 = vcombine.low %v7434_v46, %v7438_v12  ;;  %v7478_v50 = vld [vmem:[#allocation8 + $0x5b0] sm:$0xff] }
 0x966   : > { %v12112_v61 = vcombine.low %v7435_v40, %v7439_v20  ;;  %v12151_v46 = vcombine.high %v7474_v32, %v7478_v50 }
 0x967   : > { %9069 = vmatpush1.bf16.msra.mxu0 %v12062_v7  ;;  %v7446_v7 = vld [vmem:[#allocation8 + $0x4b0] sm:$0xff] }
 0x968   : > { %9155 = vmatpush1.bf16.msra.mxu1 %v12064_v45  ;;  %9070 = vmatprep.subr.bf16.mxu0 %v12071_v23  ;;  %v12113_v45 = vcombine.high %v7435_v40, %v7439_v20  ;;  %v7443_v23 = vld [vmem:[#allocation8 + $0x498] sm:$0xff]  ;;  %v12119_v52 = vcombine.high %v7442_v59, %v7446_v7  ;;  %v12118_v2 = vcombine.low %v7442_v59, %v7446_v7  ;;  %v7486_v40 = vld [vmem:[#allocation8 + $0x5f0] sm:$0xff] }
 0x969   : > { %9156 = vmatprep.subr.bf16.mxu1 %v12073_v1  ;;  %v7447_v1 = vld [vmem:[#allocation8 + $0x4b8] sm:$0xff] }
 0x96a   : > { %v12121_v38 = vcombine.high %v7443_v23, %v7447_v1  ;;  %v7483_v20 = vld [vmem:[#allocation8 + $0x5d8] sm:$0xff] }
 0x96b   : > { %9071 = vmatpush1.bf16.msra.mxu0 %v12070_v18  ;;  %v7450_v18 = vld [vmem:[#allocation8 + $0x4d0] sm:$0xff] }
 0x96c   : > { %9157 = vmatpush1.bf16.msra.mxu1 %v12072_v21  ;;  %9072 = vmatprep.subr.bf16.mxu0 %v12079_v22  ;;  %v7454_v21 = vld [vmem:[#allocation8 + $0x4f0] sm:$0xff]  ;;  %v7451_v22 = vld [vmem:[#allocation8 + $0x4d8] sm:$0xff] }
 0x96d   : > { %9158 = vmatprep.subr.bf16.mxu1 %v12081_v8  ;;  %v7455_v8 = vld [vmem:[#allocation8 + $0x4f8] sm:$0xff]  ;;  %v12127_v43 = vcombine.high %v7450_v18, %v7454_v21 }
 0x96e   : > { %v12129_v47 = vcombine.high %v7451_v22, %v7455_v8 }
 0x96f   : > { %9073 = vmatpush1.bf16.msra.mxu0 %v12078_v17  ;;  %v7462_v17 = vld [vmem:[#allocation8 + $0x530] sm:$0xff] }
 0x970   : > { %9159 = vmatpush1.bf16.msra.mxu1 %v12080_v63  ;;  %9074 = vmatprep.subr.bf16.mxu0 %v12087_v41  ;;  %v7459_v63 = vld [vmem:[#allocation8 + $0x518] sm:$0xff]  ;;  %v12135_v9 = vcombine.high %v7458_v36, %v7462_v17 }
 0x971   : > { %9160 = vmatprep.subr.bf16.mxu1 %v12089_v11  ;;  %v7463_v41 = vld [vmem:[#allocation8 + $0x538] sm:$0xff]  ;;  %v12128_v11 = vcombine.low %v7451_v22, %v7455_v8  ;;  %v7498_v22 = vld [vmem:[#allocation8 + $0x650] sm:$0xff] }
 0x972   : > { %v12137_v34 = vcombine.high %v7459_v63, %v7463_v41  ;;  %v7502_v8 = vld [vmem:[#allocation8 + $0x670] sm:$0xff] }
 0x973   : > { %9075 = vmatpush1.bf16.msra.mxu0 %v12086_v26  ;;  %v7467_v26 = vld [vmem:[#allocation8 + $0x558] sm:$0xff] }
 0x974   : > { %9161 = vmatpush1.bf16.msra.mxu1 %v12088_v16  ;;  %9076 = vmatprep.subr.bf16.mxu0 %v12095_v54  ;;  %v7471_v16 = vld [vmem:[#allocation8 + $0x578] sm:$0xff]  ;;  %v12134_v54 = vcombine.low %v7458_v36, %v7462_v17  ;;  %v12175_v36 = vcombine.high %v7498_v22, %v7502_v8 }
 0x975   : > { %9162 = vmatprep.subr.bf16.mxu1 %v12097_v5  ;;  %v12136_v5 = vcombine.low %v7459_v63, %v7463_v41  ;;  %v12145_v27 = vcombine.high %v7467_v26, %v7471_v16  ;;  %v7506_v63 = vld [vmem:[#allocation8 + $0x690] sm:$0xff] }
 0x976   : > { %v7510_v41 = vld [vmem:[#allocation8 + $0x6b0] sm:$0xff] }
 0x977   : > { %9077 = vmatpush1.bf16.msra.mxu0 %v12094_v44  ;;  %v7475_v44 = vld [vmem:[#allocation8 + $0x598] sm:$0xff] }
 0x978   : > { %9163 = vmatpush1.bf16.msra.mxu1 %v12096_v10  ;;  %9089 = vmatprep.subr.bf16.mxu0 %v12103_v4  ;;  %v7479_v10 = vld [vmem:[#allocation8 + $0x5b8] sm:$0xff]  ;;  %v12142_v4 = vcombine.low %v7466_v3, %v7470_v14  ;;  %v12183_v3 = vcombine.high %v7506_v63, %v7510_v41 }
 0x979   : > { %9175 = vmatprep.subr.bf16.mxu1 %v12105_v15  ;;  %v12144_v15 = vcombine.low %v7467_v26, %v7471_v16  ;;  %v12153_v12 = vcombine.high %v7475_v44, %v7479_v10  ;;  %v12152_v59 = vcombine.low %v7475_v44, %v7479_v10  ;;  %v7514_v26 = vld [vmem:[#allocation8 + $0x6d0] sm:$0xff] }
 0x97a   : > { %9079 = vmatmul.mubr.bf16.vlgmr.msra.gmra.mrb[52].mxu0 %v14939_v19  ;;  %v7518_v16 = vld [vmem:[#allocation8 + $0x6f0] sm:$0xff] }
 0x97b   : > { %9165 = vmatmul.mubr.bf16.vlgmr.msra.gmra.mrb[52].mxu1 %v14939_v19  ;;  %9090 = vmatpush1.bf16.msra.mxu0 %v12102_v53  ;;  %v12120_v19 = vcombine.low %v7443_v23, %v7447_v1  ;;  %v7482_v53 = vld [vmem:[#allocation8 + $0x5d0] sm:$0xff] }
 0x97c   : > { %9121 = vmatprep.mubr.bf16.mxu0 %v14949_v6  ;;  %9176 = vmatpush1.bf16.msra.mxu1 %v12104_v42  ;;  %v7487_v42 = vld [vmem:[#allocation8 + $0x5f8] sm:$0xff]  ;;  %v12159_v7 = vcombine.high %v7482_v53, %v7486_v40  ;;  %v7490_v23 = vld [vmem:[#allocation8 + $0x610] sm:$0xff] }
 0x97d   : > { %9207 = vmatprep.mubr.bf16.mxu1 %v14949_v6  ;;  %9091 = vmatprep.subr.bf16.mxu0 %v12111_v58  ;;  %v12126_v6 = vcombine.low %v7450_v18, %v7454_v21  ;;  %v12150_v58 = vcombine.low %v7474_v32, %v7478_v50  ;;  %v7494_v1 = vld [vmem:[#allocation8 + $0x630] sm:$0xff]  ;;  %v12191_v32 = vcombine.high %v7514_v26, %v7518_v16 }
 0x97e   : > { %9177 = vmatprep.subr.bf16.mxu1 %v12113_v45  ;;  %v12161_v45 = vcombine.high %v7483_v20, %v7487_v42  ;;  %v12167_v18 = vcombine.high %v7490_v23, %v7494_v1  ;;  %v7522_v44 = vld [vmem:[#allocation8 + $0x710] sm:$0xff] }
 0x97f   : > { %9092 = vmatpush1.bf16.msra.mxu0 %v12110_v55  ;;  %v7491_v55 = vld [vmem:[#allocation8 + $0x618] sm:$0xff]  ;;  %v7526_v10 = vld [vmem:[#allocation8 + $0x730] sm:$0xff] }
 0x980   : > { %9178 = vmatpush1.bf16.msra.mxu1 %v12112_v61  ;;  %9093 = vmatprep.subr.bf16.mxu0 %v12119_v52  ;;  %v7495_v61 = vld [vmem:[#allocation8 + $0x638] sm:$0xff]  ;;  %v12158_v52 = vcombine.low %v7482_v53, %v7486_v40  ;;  %v12199_v53 = vcombine.high %v7522_v44, %v7526_v10 }
 0x981   : > { %9179 = vmatprep.subr.bf16.mxu1 %v12121_v38  ;;  %v12160_v38 = vcombine.low %v7483_v20, %v7487_v42  ;;  %v12169_v21 = vcombine.high %v7491_v55, %v7495_v61  ;;  %v7530_v20 = vld [vmem:[#allocation8 + $0x750] sm:$0xff] }
 0x982   : > { %v7534_v42 = vld [vmem:[#allocation8 + $0x770] sm:$0xff] }
 0x983   : > { %9094 = vmatpush1.bf16.msra.mxu0 %v12118_v2  ;;  %v7499_v2 = vld [vmem:[#allocation8 + $0x658] sm:$0xff] }
 0x984   : > { %9180 = vmatpush1.bf16.msra.mxu1 %v12120_v19  ;;  %9095 = vmatprep.subr.bf16.mxu0 %v12127_v43  ;;  %v7503_v19 = vld [vmem:[#allocation8 + $0x678] sm:$0xff]  ;;  %v12166_v43 = vcombine.low %v7490_v23, %v7494_v1  ;;  %v12207_v23 = vcombine.high %v7530_v20, %v7534_v42 }
 0x985   : > { %9181 = vmatprep.subr.bf16.mxu1 %v12129_v47  ;;  %v12168_v47 = vcombine.low %v7491_v55, %v7495_v61  ;;  %v12177_v17 = vcombine.high %v7499_v2, %v7503_v19  ;;  %v7538_v55 = vld [vmem:[#allocation8 + $0x790] sm:$0xff] }
 0x986   : > { %v7542_v61 = vld [vmem:[#allocation8 + $0x7b0] sm:$0xff] }
 0x987   : > { %9096 = vmatpush1.bf16.msra.mxu0 %v12126_v6  ;;  %v7507_v6 = vld [vmem:[#allocation8 + $0x698] sm:$0xff] }
 0x988   : > { %9182 = vmatpush1.bf16.msra.mxu1 %v12128_v11  ;;  %9097 = vmatprep.subr.bf16.mxu0 %v12135_v9  ;;  %v7511_v11 = vld [vmem:[#allocation8 + $0x6b8] sm:$0xff]  ;;  %v12174_v9 = vcombine.low %v7498_v22, %v7502_v8  ;;  %v12215_v22 = vcombine.high %v7538_v55, %v7542_v61 }
 0x989   : > { %9183 = vmatprep.subr.bf16.mxu1 %v12137_v34  ;;  %v12176_v34 = vcombine.low %v7499_v2, %v7503_v19  ;;  %v12185_v14 = vcombine.high %v7507_v6, %v7511_v11  ;;  %v7546_v2 = vld [vmem:[#allocation8 + $0x7d0] sm:$0xff] }
 0x98a   : > { %v7550_v19 = vld [vmem:[#allocation8 + $0x7f0] sm:$0xff] }
 0x98b   : > { %9098 = vmatpush1.bf16.msra.mxu0 %v12134_v54  ;;  %v7515_v54 = vld [vmem:[#allocation8 + $0x6d8] sm:$0xff] }
 0x98c   : > { %9184 = vmatpush1.bf16.msra.mxu1 %v12136_v5  ;;  %9099 = vmatprep.subr.bf16.mxu0 %v12143_v24  ;;  %v7519_v5 = vld [vmem:[#allocation8 + $0x6f8] sm:$0xff]  ;;  %v12182_v24 = vcombine.low %v7506_v63, %v7510_v41  ;;  %v12223_v63 = vcombine.high %v7546_v2, %v7550_v19 }
 0x98d   : > { %9185 = vmatprep.subr.bf16.mxu1 %v12145_v27  ;;  %v12184_v27 = vcombine.low %v7507_v6, %v7511_v11  ;;  %v12193_v50 = vcombine.high %v7515_v54, %v7519_v5  ;;  %v12222_v6 = vcombine.low %v7546_v2, %v7550_v19  ;;  %v13348_v2 = vld [vmem:[#allocation10 + $0x12c] ss:$16 sps:$4 sm:$0xff]   ;;  %v13343_v19 = vld [vmem:[#allocation10 + $0x120] ss:$16 sps:$4 sm:$0xff]  }
 0x98f   : > { %9100 = vmatpush1.bf16.msra.mxu0 %v12142_v4  ;;  %v7523_v4 = vld [vmem:[#allocation8 + $0x718] sm:$0xff] }
 0x990   : > { %9186 = vmatpush1.bf16.msra.mxu1 %v12144_v15  ;;  %9101 = vmatprep.subr.bf16.mxu0 %v12151_v46  ;;  %v7527_v15 = vld [vmem:[#allocation8 + $0x738] sm:$0xff]  ;;  %v12190_v46 = vcombine.low %v7514_v26, %v7518_v16  ;;  %v13297_v26 = vld [vmem:[#allocation10 + $0x24] ss:$16 sps:$4 sm:$0xff]  }
 0x991   : > { %9187 = vmatprep.subr.bf16.mxu1 %v12153_v12  ;;  %v12192_v12 = vcombine.low %v7515_v54, %v7519_v5  ;;  %v12201_v40 = vcombine.high %v7523_v4, %v7527_v15  ;;  %v13300_v16 = vld [vmem:[#allocation10 + $0x2c] ss:$16 sps:$4 sm:$0xff]   ;;  %v13295_v54 = vld [vmem:[#allocation10 + $0x20] ss:$16 sps:$4 sm:$0xff]   ;;  %v13298_v5 = vld [vmem:[#allocation10 + $0x28] ss:$16 sps:$4 sm:$0xff]  }
 0x993   : > { %9102 = vmatpush1.bf16.msra.mxu0 %v12150_v58  ;;  %v7531_v58 = vld [vmem:[#allocation8 + $0x758] sm:$0xff] }
 0x994   : > { %9188 = vmatpush1.bf16.msra.mxu1 %v12152_v59  ;;  %9103 = vmatprep.subr.bf16.mxu0 %v12159_v7  ;;  %v7535_v59 = vld [vmem:[#allocation8 + $0x778] sm:$0xff]  ;;  %v12198_v7 = vcombine.low %v7522_v44, %v7526_v10  ;;  %v13309_v44 = vld [vmem:[#allocation10 + $0x64] ss:$16 sps:$4 sm:$0xff]  }
 0x995   : > { %9189 = vmatprep.subr.bf16.mxu1 %v12161_v45  ;;  %v12200_v45 = vcombine.low %v7523_v4, %v7527_v15  ;;  %v12209_v1 = vcombine.high %v7531_v58, %v7535_v59  ;;  %v13312_v10 = vld [vmem:[#allocation10 + $0x6c] ss:$16 sps:$4 sm:$0xff]   ;;  %v13307_v4 = vld [vmem:[#allocation10 + $0x60] ss:$16 sps:$4 sm:$0xff]   ;;  %v13315_v15 = vld [vmem:[#allocation10 + $0x84] ss:$16 sps:$4 sm:$0xff]  }
 0x997   : > { %9104 = vmatpush1.bf16.msra.mxu0 %v12158_v52  ;;  %v7539_v52 = vld [vmem:[#allocation8 + $0x798] sm:$0xff] }
 0x998   : > { %9190 = vmatpush1.bf16.msra.mxu1 %v12160_v38  ;;  %9105 = vmatprep.subr.bf16.mxu0 %v12167_v18  ;;  %v7543_v38 = vld [vmem:[#allocation8 + $0x7b8] sm:$0xff]  ;;  %v12206_v18 = vcombine.low %v7530_v20, %v7534_v42  ;;  %v13319_v42 = vld [vmem:[#allocation10 + $0xa0] ss:$16 sps:$4 sm:$0xff]  }
 0x999   : > { %9191 = vmatprep.subr.bf16.mxu1 %v12169_v21  ;;  %v12208_v21 = vcombine.low %v7531_v58, %v7535_v59  ;;  %v12217_v8 = vcombine.high %v7539_v52, %v7543_v38  ;;  %v13324_v20 = vld [vmem:[#allocation10 + $0xac] ss:$16 sps:$4 sm:$0xff]   ;;  %v13322_v58 = vld [vmem:[#allocation10 + $0xa8] ss:$16 sps:$4 sm:$0xff]   ;;  %v13327_v59 = vld [vmem:[#allocation10 + $0xc4] ss:$16 sps:$4 sm:$0xff]  }
 0x99b   : > { %9106 = vmatpush1.bf16.msra.mxu0 %v12166_v43  ;;  %v7547_v43 = vld [vmem:[#allocation8 + $0x7d8] sm:$0xff] }
 0x99c   : > { %9192 = vmatpush1.bf16.msra.mxu1 %v12168_v47  ;;  %9107 = vmatprep.subr.bf16.mxu0 %v12175_v36  ;;  %v7551_v47 = vld [vmem:[#allocation8 + $0x7f8] sm:$0xff]  ;;  %v12214_v36 = vcombine.low %v7538_v55, %v7542_v61  ;;  %v13331_v61 = vld [vmem:[#allocation10 + $0xe0] ss:$16 sps:$4 sm:$0xff]  }
 0x99d   : > { %9193 = vmatprep.subr.bf16.mxu1 %v12177_v17  ;;  %v12216_v17 = vcombine.low %v7539_v52, %v7543_v38  ;;  %v12225_v41 = vcombine.high %v7547_v43, %v7551_v47  ;;  %v12224_v11 = vcombine.low %v7547_v43, %v7551_v47  ;;  %v13336_v55 = vld [vmem:[#allocation10 + $0xec] ss:$16 sps:$4 sm:$0xff]   ;;  %v13334_v52 = vld [vmem:[#allocation10 + $0xe8] ss:$16 sps:$4 sm:$0xff]   ;;  %v13339_v38 = vld [vmem:[#allocation10 + $0x104] ss:$16 sps:$4 sm:$0xff]  }
 0x99e   : > { %v13346_v43 = vld [vmem:[#allocation10 + $0x128] ss:$16 sps:$4 sm:$0xff]   ;;  %v13351_v47 = vld [vmem:[#allocation10 + $0x144] ss:$16 sps:$4 sm:$0xff]  }
 0x99f   : > { %9108 = vmatpush1.bf16.msra.mxu0 %v12174_v9  ;;  %v13291_v9 = vld [vmem:[#allocation10 + $0x4] ss:$16 sps:$4 sm:$0xff]  }
 0x9a0   : > { %9194 = vmatpush1.bf16.msra.mxu1 %v12176_v34  ;;  %9109 = vmatprep.subr.bf16.mxu0 %v12183_v3  ;;  %v13294_v34 = vld [vmem:[#allocation10 + $0xc] ss:$16 sps:$4 sm:$0xff]   ;;  %v13289_v3 = vld [vmem:[#allocation10] ss:$16 sps:$4 sm:$0xff]  }
 0x9a1   : > { %9195 = vmatprep.subr.bf16.mxu1 %v12185_v14  ;;  %v13292_v14 = vld [vmem:[#allocation10 + $0x8] ss:$16 sps:$4 sm:$0xff]  }
 0x9a3   : > { %9110 = vmatpush1.bf16.msra.mxu0 %v12182_v24  ;;  %v13303_v24 = vld [vmem:[#allocation10 + $0x44] ss:$16 sps:$4 sm:$0xff]  }
 0x9a4   : > { %9196 = vmatpush1.bf16.msra.mxu1 %v12184_v27  ;;  %9111 = vmatprep.subr.bf16.mxu0 %v12191_v32  ;;  %v13306_v27 = vld [vmem:[#allocation10 + $0x4c] ss:$16 sps:$4 sm:$0xff]   ;;  %v13301_v32 = vld [vmem:[#allocation10 + $0x40] ss:$16 sps:$4 sm:$0xff]  }
 0x9a5   : > { %9197 = vmatprep.subr.bf16.mxu1 %v12193_v50  ;;  %v13304_v50 = vld [vmem:[#allocation10 + $0x48] ss:$16 sps:$4 sm:$0xff]  }
 0x9a7   : > { %9112 = vmatpush1.bf16.msra.mxu0 %v12190_v46  ;;  %v13318_v46 = vld [vmem:[#allocation10 + $0x8c] ss:$16 sps:$4 sm:$0xff]  }
 0x9a8   : > { %9198 = vmatpush1.bf16.msra.mxu1 %v12192_v12  ;;  %9113 = vmatprep.subr.bf16.mxu0 %v12199_v53  ;;  %v13313_v12 = vld [vmem:[#allocation10 + $0x80] ss:$16 sps:$4 sm:$0xff]   ;;  %v13316_v53 = vld [vmem:[#allocation10 + $0x88] ss:$16 sps:$4 sm:$0xff]  }
 0x9a9   : > { %9199 = vmatprep.subr.bf16.mxu1 %v12201_v40  ;;  %v13321_v40 = vld [vmem:[#allocation10 + $0xa4] ss:$16 sps:$4 sm:$0xff]  }
 0x9ab   : > { %9114 = vmatpush1.bf16.msra.mxu0 %v12198_v7  ;;  %v13330_v7 = vld [vmem:[#allocation10 + $0xcc] ss:$16 sps:$4 sm:$0xff]  }
 0x9ac   : > { %9200 = vmatpush1.bf16.msra.mxu1 %v12200_v45  ;;  %9115 = vmatprep.subr.bf16.mxu0 %v12207_v23  ;;  %v13325_v45 = vld [vmem:[#allocation10 + $0xc0] ss:$16 sps:$4 sm:$0xff]   ;;  %v13328_v23 = vld [vmem:[#allocation10 + $0xc8] ss:$16 sps:$4 sm:$0xff]  }
 0x9ad   : > { %9201 = vmatprep.subr.bf16.mxu1 %v12209_v1  ;;  %v13333_v1 = vld [vmem:[#allocation10 + $0xe4] ss:$16 sps:$4 sm:$0xff]  }
 0x9af   : > { %9116 = vmatpush1.bf16.msra.mxu0 %v12206_v18  ;;  %v13342_v18 = vld [vmem:[#allocation10 + $0x10c] ss:$16 sps:$4 sm:$0xff]  }
 0x9b0   : > { %9202 = vmatpush1.bf16.msra.mxu1 %v12208_v21  ;;  %9117 = vmatprep.subr.bf16.mxu0 %v12215_v22  ;;  %v13337_v21 = vld [vmem:[#allocation10 + $0x100] ss:$16 sps:$4 sm:$0xff]   ;;  %v13340_v22 = vld [vmem:[#allocation10 + $0x108] ss:$16 sps:$4 sm:$0xff]  }
 0x9b1   : > { %9203 = vmatprep.subr.bf16.mxu1 %v12217_v8  ;;  %v13345_v8 = vld [vmem:[#allocation10 + $0x124] ss:$16 sps:$4 sm:$0xff]  }
 0x9b3   : > { %9118 = vmatpush1.bf16.msra.mxu0 %v12214_v36  ;;  %v13354_v36 = vld [vmem:[#allocation10 + $0x14c] ss:$16 sps:$4 sm:$0xff]  }
 0x9b4   : > { %9204 = vmatpush1.bf16.msra.mxu1 %v12216_v17  ;;  %9119 = vmatprep.subr.bf16.mxu0 %v12223_v63  ;;  %v13349_v17 = vld [vmem:[#allocation10 + $0x140] ss:$16 sps:$4 sm:$0xff]   ;;  %v13352_v63 = vld [vmem:[#allocation10 + $0x148] ss:$16 sps:$4 sm:$0xff]  }
 0x9b5   : > { %9205 = vmatprep.subr.bf16.mxu1 %v12225_v41  ;;  %v13357_v41 = vld [vmem:[#allocation10 + $0x164] ss:$16 sps:$4 sm:$0xff]  }
 0x9b7   : > { %9120 = vmatpush1.bf16.msra.mxu0 %v12222_v6  ;;  %v13360_v6 = vld [vmem:[#allocation10 + $0x16c] ss:$16 sps:$4 sm:$0xff]  }
 0x9b8   : > { %9206 = vmatpush1.bf16.msra.mxu1 %v12224_v11  ;;  %10800 = vmatprep.subr.bf16.mxu0 %v13291_v9  ;;  %v13355_v11 = vld [vmem:[#allocation10 + $0x160] ss:$16 sps:$4 sm:$0xff]   ;;  %v13358_v9 = vld [vmem:[#allocation10 + $0x168] ss:$16 sps:$4 sm:$0xff]  }
 0x9b9   : > { %10972 = vmatprep.subr.bf16.mxu1 %v13294_v34  ;;  %v13363_v34 = vld [vmem:[#allocation10 + $0x184] ss:$16 sps:$4 sm:$0xff]  }
 0x9ba   : > { %9122 = vmatmul.mubr.bf16.vlgmr.msra.gmra.mrb[52].mxu0 %v14961_v62 }
 0x9bb   : > { %9208 = vmatmul.mubr.bf16.vlgmr.msra.gmra.mrb[52].mxu1 %v14961_v62  ;;  %10801 = vmatpush1.bf16.msra.mxu0 %v13289_v3  ;;  %v13310_v62 = vld [vmem:[#allocation10 + $0x68] ss:$16 sps:$4 sm:$0xff]   ;;  %v13366_v3 = vld [vmem:[#allocation10 + $0x18c] ss:$16 sps:$4 sm:$0xff]  }
 0x9bc   : > { %10973 = vmatpush1.bf16.msra.mxu1 %v13292_v14  ;;  %10802 = vmatprep.subr.bf16.mxu0 %v13297_v26  ;;  %v13361_v14 = vld [vmem:[#allocation10 + $0x180] ss:$16 sps:$4 sm:$0xff]   ;;  %v13364_v26 = vld [vmem:[#allocation10 + $0x188] ss:$16 sps:$4 sm:$0xff]  }
 0x9bd   : > { %10974 = vmatprep.subr.bf16.mxu1 %v13300_v16  ;;  %v13369_v16 = vld [vmem:[#allocation10 + $0x1a4] ss:$16 sps:$4 sm:$0xff]  }
 0x9bf   : > { %10803 = vmatpush1.bf16.msra.mxu0 %v13295_v54  ;;  %v13372_v54 = vld [vmem:[#allocation10 + $0x1ac] ss:$16 sps:$4 sm:$0xff]  }
 0x9c0   : > { %10975 = vmatpush1.bf16.msra.mxu1 %v13298_v5  ;;  %10804 = vmatprep.subr.bf16.mxu0 %v13303_v24  ;;  %v13367_v5 = vld [vmem:[#allocation10 + $0x1a0] ss:$16 sps:$4 sm:$0xff]   ;;  %v13370_v24 = vld [vmem:[#allocation10 + $0x1a8] ss:$16 sps:$4 sm:$0xff]  }
 0x9c1   : > { %10976 = vmatprep.subr.bf16.mxu1 %v13306_v27  ;;  %v13375_v27 = vld [vmem:[#allocation10 + $0x1c4] ss:$16 sps:$4 sm:$0xff]  }
 0x9c3   : > { %10805 = vmatpush1.bf16.msra.mxu0 %v13301_v32  ;;  %v13378_v32 = vld [vmem:[#allocation10 + $0x1cc] ss:$16 sps:$4 sm:$0xff]  }
 0x9c4   : > { %10977 = vmatpush1.bf16.msra.mxu1 %v13304_v50  ;;  %10806 = vmatprep.subr.bf16.mxu0 %v13309_v44  ;;  %v13373_v50 = vld [vmem:[#allocation10 + $0x1c0] ss:$16 sps:$4 sm:$0xff]   ;;  %v13376_v44 = vld [vmem:[#allocation10 + $0x1c8] ss:$16 sps:$4 sm:$0xff]  }
 0x9c5   : > { %10978 = vmatprep.subr.bf16.mxu1 %v13312_v10  ;;  %v13381_v10 = vld [vmem:[#allocation10 + $0x1e4] ss:$16 sps:$4 sm:$0xff]  }
 0x9c7   : > { %10807 = vmatpush1.bf16.msra.mxu0 %v13307_v4  ;;  %v13384_v4 = vld [vmem:[#allocation10 + $0x1ec] ss:$16 sps:$4 sm:$0xff]  }
 0x9c8   : > { %10979 = vmatpush1.bf16.msra.mxu1 %v13310_v62  ;;  %10808 = vmatprep.subr.bf16.mxu0 %v13315_v15  ;;  %v13379_v62 = vld [vmem:[#allocation10 + $0x1e0] ss:$16 sps:$4 sm:$0xff]   ;;  %v13382_v15 = vld [vmem:[#allocation10 + $0x1e8] ss:$16 sps:$4 sm:$0xff]  }
 0x9c9   : > { %10980 = vmatprep.subr.bf16.mxu1 %v13318_v46  ;;  %v13387_v46 = vld [vmem:[#allocation10 + $0x204] ss:$16 sps:$4 sm:$0xff]  }
 0x9cb   : > { %10809 = vmatpush1.bf16.msra.mxu0 %v13313_v12  ;;  %v13390_v12 = vld [vmem:[#allocation10 + $0x20c] ss:$16 sps:$4 sm:$0xff]  }
 0x9cc   : > { %10981 = vmatpush1.bf16.msra.mxu1 %v13316_v53  ;;  %10810 = vmatprep.subr.bf16.mxu0 %v13321_v40  ;;  %v14976_v53 = vld [vmem:[%s15054_s11] sm:$0xff] }
 0x9cd   : > { %10982 = vmatprep.subr.bf16.mxu1 %v13324_v20  ;;  %v7557_v40 = vrot.slane %v14976_v53, %v14259_v37  ;;  %v7565_v20 = vrot.slane %v14976_v53, %v14280_v48 }
 0x9cf   : > { %10811 = vmatpush1.bf16.msra.mxu0 %v13319_v42  ;;  %v7561_v42 = vrot.slane %v14976_v53, %v14265_v39 }
 0x9d0   : > { %10983 = vmatpush1.bf16.msra.mxu1 %v13322_v58  ;;  %10812 = vmatprep.subr.bf16.mxu0 %v13327_v59  ;;  %v7569_v58 = vrot.slane %v14976_v53, %v14298_v0 }
 0x9d1   : > { %10984 = vmatprep.subr.bf16.mxu1 %v13330_v7 }
 0x9d3   : > { %10813 = vmatpush1.bf16.msra.mxu0 %v13325_v45 }
 0x9d4   : > { %10985 = vmatpush1.bf16.msra.mxu1 %v13328_v23  ;;  %10814 = vmatprep.subr.bf16.mxu0 %v13333_v1 }
 0x9d5   : > { %10986 = vmatprep.subr.bf16.mxu1 %v13336_v55 }
 0x9d7   : > { %10815 = vmatpush1.bf16.msra.mxu0 %v13331_v61 }
 0x9d8   : > { %10987 = vmatpush1.bf16.msra.mxu1 %v13334_v52  ;;  %10816 = vmatprep.subr.bf16.mxu0 %v13339_v38 }
 0x9d9   : > { %10988 = vmatprep.subr.bf16.mxu1 %v13342_v18 }
 0x9db   : > { %10817 = vmatpush1.bf16.msra.mxu0 %v13337_v21 }
 0x9dc   : > { %10989 = vmatpush1.bf16.msra.mxu1 %v13340_v22  ;;  %10818 = vmatprep.subr.bf16.mxu0 %v13345_v8 }
 0x9dd   : > { %10990 = vmatprep.subr.bf16.mxu1 %v13348_v2 }
 0x9df   : > { %10819 = vmatpush1.bf16.msra.mxu0 %v13343_v19 }
 0x9e0   : > { %10991 = vmatpush1.bf16.msra.mxu1 %v13346_v43  ;;  %10820 = vmatprep.subr.bf16.mxu0 %v13351_v47 }
 0x9e1   : > { %10992 = vmatprep.subr.bf16.mxu1 %v13354_v36 }
 0x9e3   : > { %10821 = vmatpush1.bf16.msra.mxu0 %v13349_v17 }
 0x9e4   : > { %10993 = vmatpush1.bf16.msra.mxu1 %v13352_v63  ;;  %10822 = vmatprep.subr.bf16.mxu0 %v13357_v41 }
 0x9e5   : > { %10994 = vmatprep.subr.bf16.mxu1 %v13360_v6 }
 0x9e7   : > { %10823 = vmatpush1.bf16.msra.mxu0 %v13355_v11 }
 0x9e8   : > { %10995 = vmatpush1.bf16.msra.mxu1 %v13358_v9  ;;  %10824 = vmatprep.subr.bf16.mxu0 %v13363_v34 }
 0x9e9   : > { %10996 = vmatprep.subr.bf16.mxu1 %v13366_v3 }
 0x9eb   : > { %10825 = vmatpush1.bf16.msra.mxu0 %v13361_v14 }
 0x9ec   : > { %10997 = vmatpush1.bf16.msra.mxu1 %v13364_v26  ;;  %10826 = vmatprep.subr.bf16.mxu0 %v13369_v16  ;;  %v13385_v16 = vld [vmem:[#allocation10 + $0x200] ss:$16 sps:$4 sm:$0xff]  }
 0x9ed   : > { %10998 = vmatprep.subr.bf16.mxu1 %v13372_v54  ;;  %v13388_v54 = vld [vmem:[#allocation10 + $0x208] ss:$16 sps:$4 sm:$0xff]  }
 0x9ef   : > { %10827 = vmatpush1.bf16.msra.mxu0 %v13367_v5  ;;  %v13393_v5 = vld [vmem:[#allocation10 + $0x224] ss:$16 sps:$4 sm:$0xff]  }
 0x9f0   : > { %10999 = vmatpush1.bf16.msra.mxu1 %v13370_v24  ;;  %10828 = vmatprep.subr.bf16.mxu0 %v13375_v27  ;;  %v13396_v24 = vld [vmem:[#allocation10 + $0x22c] ss:$16 sps:$4 sm:$0xff]   ;;  %v13391_v27 = vld [vmem:[#allocation10 + $0x220] ss:$16 sps:$4 sm:$0xff]  }
 0x9f1   : > { %11000 = vmatprep.subr.bf16.mxu1 %v13378_v32  ;;  %v13394_v32 = vld [vmem:[#allocation10 + $0x228] ss:$16 sps:$4 sm:$0xff]  }
 0x9f3   : > { %10829 = vmatpush1.bf16.msra.mxu0 %v13373_v50  ;;  %v13399_v50 = vld [vmem:[#allocation10 + $0x244] ss:$16 sps:$4 sm:$0xff]  }
 0x9f4   : > { %11001 = vmatpush1.bf16.msra.mxu1 %v13376_v44  ;;  %10830 = vmatprep.subr.bf16.mxu0 %v13381_v10  ;;  %v13402_v44 = vld [vmem:[#allocation10 + $0x24c] ss:$16 sps:$4 sm:$0xff]   ;;  %v13397_v10 = vld [vmem:[#allocation10 + $0x240] ss:$16 sps:$4 sm:$0xff]  }
 0x9f5   : > { %11002 = vmatprep.subr.bf16.mxu1 %v13384_v4  ;;  %v13400_v4 = vld [vmem:[#allocation10 + $0x248] ss:$16 sps:$4 sm:$0xff]  }
 0x9f7   : > { %10831 = vmatpush1.bf16.msra.mxu0 %v13379_v62  ;;  %v13405_v62 = vld [vmem:[#allocation10 + $0x264] ss:$16 sps:$4 sm:$0xff]  }
 0x9f8   : > { %11003 = vmatpush1.bf16.msra.mxu1 %v13382_v15  ;;  %10843 = vmatprep.subr.bf16.mxu0 %v13387_v46  ;;  %v13408_v15 = vld [vmem:[#allocation10 + $0x26c] ss:$16 sps:$4 sm:$0xff]   ;;  %v13403_v46 = vld [vmem:[#allocation10 + $0x260] ss:$16 sps:$4 sm:$0xff]  }
 0x9f9   : > { %11015 = vmatprep.subr.bf16.mxu1 %v13390_v12  ;;  %v13406_v12 = vld [vmem:[#allocation10 + $0x268] ss:$16 sps:$4 sm:$0xff]  }
 0xa0d   : > { %v8951_v59 = vpop.f32.mrb[48].mxu0  ;;  %v9037_v7 = vpop.f32.mrb[48].mxu1 }
 0xa0e   : > { %v12743_v45 = vadd.f32 %v8951_v59, %v7557_v40  ;;  %v12747_v23 = vadd.f32 %v9037_v7, %v7565_v20  ;;  %v8953_v1 = vpop.f32.mrb[49].mxu0  ;;  %v9039_v55 = vpop.f32.mrb[49].mxu1  ;;  %v13417_v59 = vld [vmem:[#allocation10 + $0x2a4] ss:$16 sps:$4 sm:$0xff]   ;;  %v13420_v7 = vld [vmem:[#allocation10 + $0x2ac] ss:$16 sps:$4 sm:$0xff]  }
 0xa0f   : > { %v12744_v61 = vadd.f32 %v8953_v1, %v7561_v42  ;;  %v12748_v52 = vadd.f32 %v9039_v55, %v7569_v58  ;;  %v8955_v38 = vpop.f32.mrb[50].mxu0  ;;  %v9041_v18 = vpop.f32.mrb[50].mxu1  ;;  %v13423_v1 = vld [vmem:[#allocation10 + $0x2c4] ss:$16 sps:$4 sm:$0xff]   ;;  %v13426_v55 = vld [vmem:[#allocation10 + $0x2cc] ss:$16 sps:$4 sm:$0xff]  }
 0xa10   : > { %v12745_v21 = vadd.f32 %v8955_v38, %v7557_v40  ;;  %v12749_v22 = vadd.f32 %v9041_v18, %v7565_v20  ;;  %v8957_v8 = vpop.f32.mrb[51].mxu0  ;;  %v9043_v2 = vpop.f32.mrb[51].mxu1  ;;  %v9218_v47 = vmax.f32 %v12743_v45, 0.0  ;;  %v9220_v36 = vmax.f32 %v12747_v23, 0.0  ;;  %v13411_v40 = vld [vmem:[#allocation10 + $0x284] ss:$16 sps:$4 sm:$0xff]  }
 0xa11   : > { %v12746_v19 = vadd.f32 %v8957_v8, %v7561_v42  ;;  %v12750_v43 = vadd.f32 %v9043_v2, %v7569_v58  ;;  %v9219_v41 = vmax.f32 %v12744_v61, 0.0  ;;  %v9221_v6 = vmax.f32 %v12748_v52, 0.0  ;;  %v13414_v20 = vld [vmem:[#allocation10 + $0x28c] ss:$16 sps:$4 sm:$0xff]   ;;  %v13409_v42 = vld [vmem:[#allocation10 + $0x280] ss:$16 sps:$4 sm:$0xff]  }
 0xa12   : > { %v9226_v17 = vmax.f32 %v12745_v21, 0.0  ;;  %v9228_v63 = vmax.f32 %v12749_v22, 0.0  ;;  %v13412_v58 = vld [vmem:[#allocation10 + $0x288] ss:$16 sps:$4 sm:$0xff]   ;;  %v13415_v45 = vld [vmem:[#allocation10 + $0x2a0] ss:$16 sps:$4 sm:$0xff]  }
 0xa13   : > { %v9227_v11 = vmax.f32 %v12746_v19, 0.0  ;;  %v9229_v9 = vmax.f32 %v12750_v43, 0.0  ;;  %v13418_v23 = vld [vmem:[#allocation10 + $0x2a8] ss:$16 sps:$4 sm:$0xff]   ;;  %v13421_v61 = vld [vmem:[#allocation10 + $0x2c0] ss:$16 sps:$4 sm:$0xff]  }
 0xa14   : > { %v9234_v34 = vpack.c.bf16 %v9226_v17, %v9218_v47  ;;  %v14986_v3 = vpack.c.bf16 %v9228_v63, %v9220_v36  ;;  %v13424_v52 = vld [vmem:[#allocation10 + $0x2c8] ss:$16 sps:$4 sm:$0xff]   ;;  %v13429_v38 = vld [vmem:[#allocation10 + $0x2e4] ss:$16 sps:$4 sm:$0xff]   ;;  %v13432_v18 = vld [vmem:[#allocation10 + $0x2ec] ss:$16 sps:$4 sm:$0xff]  }
 0xa15   : > { %v9235_v14 = vpack.c.bf16 %v9227_v11, %v9219_v41  ;;  %v9237_v26 = vpack.c.bf16 %v9229_v9, %v9221_v6  ;;  %v13427_v21 = vld [vmem:[#allocation10 + $0x2e0] ss:$16 sps:$4 sm:$0xff]   ;;  %v13430_v22 = vld [vmem:[#allocation10 + $0x2e8] ss:$16 sps:$4 sm:$0xff]   ;;  %v13435_v8 = vld [vmem:[#allocation10 + $0x304] ss:$16 sps:$4 sm:$0xff]  }
 0xa16   : > { %v13438_v2 = vld [vmem:[#allocation10 + $0x30c] ss:$16 sps:$4 sm:$0xff]   ;;  %v13433_v19 = vld [vmem:[#allocation10 + $0x300] ss:$16 sps:$4 sm:$0xff]   ;;  %v13436_v43 = vld [vmem:[#allocation10 + $0x308] ss:$16 sps:$4 sm:$0xff]  }
 0xa17   : > { %10832 = vmatprep.mubr.bf16.mxu0 %v9235_v14  ;;  %11004 = vmatprep.mubr.bf16.mxu1 %v9235_v14  ;;  %v13441_v47 = vld [vmem:[#allocation10 + $0x324] ss:$16 sps:$4 sm:$0xff]   ;;  %v13444_v36 = vld [vmem:[#allocation10 + $0x32c] ss:$16 sps:$4 sm:$0xff]   ;;  %v13439_v17 = vld [vmem:[#allocation10 + $0x320] ss:$16 sps:$4 sm:$0xff]  }
 0xa18   : > { %10833 = vmatmul.mubr.bf16.vlgmr.msra.gmra.mrb[56].mxu0 %v9234_v34  ;;  %11005 = vmatmul.mubr.bf16.vlgmr.msra.gmra.mrb[56].mxu1 %v9234_v34  ;;  %v13442_v63 = vld [vmem:[#allocation10 + $0x328] ss:$16 sps:$4 sm:$0xff]   ;;  %v13447_v41 = vld [vmem:[#allocation10 + $0x344] ss:$16 sps:$4 sm:$0xff]   ;;  %v13450_v6 = vld [vmem:[#allocation10 + $0x34c] ss:$16 sps:$4 sm:$0xff]  }
 0xa19   : > { %10844 = vmatpush1.bf16.msra.mxu0 %v13385_v16  ;;  %11016 = vmatpush1.bf16.msra.mxu1 %v13388_v54  ;;  %v13445_v11 = vld [vmem:[#allocation10 + $0x340] ss:$16 sps:$4 sm:$0xff]   ;;  %v13448_v9 = vld [vmem:[#allocation10 + $0x348] ss:$16 sps:$4 sm:$0xff]   ;;  %v13453_v34 = vld [vmem:[#allocation10 + $0x364] ss:$16 sps:$4 sm:$0xff]  }
 0xa1a   : > { %10875 = vmatprep.mubr.bf16.mxu0 %v9237_v26  ;;  %11047 = vmatprep.mubr.bf16.mxu1 %v9237_v26  ;;  %v13456_v14 = vld [vmem:[#allocation10 + $0x36c] ss:$16 sps:$4 sm:$0xff]   ;;  %v13451_v26 = vld [vmem:[#allocation10 + $0x360] ss:$16 sps:$4 sm:$0xff]   ;;  %v13454_v16 = vld [vmem:[#allocation10 + $0x368] ss:$16 sps:$4 sm:$0xff]  }
 0xa1b   : > { %10845 = vmatprep.subr.bf16.mxu0 %v13393_v5  ;;  %11017 = vmatprep.subr.bf16.mxu1 %v13396_v24  ;;  %v13459_v54 = vld [vmem:[#allocation10 + $0x384] ss:$16 sps:$4 sm:$0xff]   ;;  %v13462_v5 = vld [vmem:[#allocation10 + $0x38c] ss:$16 sps:$4 sm:$0xff]   ;;  %v13457_v24 = vld [vmem:[#allocation10 + $0x380] ss:$16 sps:$4 sm:$0xff]  }
 0xa1d   : > { %10846 = vmatpush1.bf16.msra.mxu0 %v13391_v27  ;;  %11018 = vmatpush1.bf16.msra.mxu1 %v13394_v32  ;;  %v13460_v27 = vld [vmem:[#allocation10 + $0x388] ss:$16 sps:$4 sm:$0xff]   ;;  %v13465_v32 = vld [vmem:[#allocation10 + $0x3a4] ss:$16 sps:$4 sm:$0xff]  }
 0xa1e   : > { %10847 = vmatprep.subr.bf16.mxu0 %v13399_v50  ;;  %11019 = vmatprep.subr.bf16.mxu1 %v13402_v44  ;;  %v13468_v50 = vld [vmem:[#allocation10 + $0x3ac] ss:$16 sps:$4 sm:$0xff]   ;;  %v13463_v44 = vld [vmem:[#allocation10 + $0x3a0] ss:$16 sps:$4 sm:$0xff]  }
 0xa21   : > { %10848 = vmatpush1.bf16.msra.mxu0 %v13397_v10  ;;  %11020 = vmatpush1.bf16.msra.mxu1 %v13400_v4  ;;  %v13466_v10 = vld [vmem:[#allocation10 + $0x3a8] ss:$16 sps:$4 sm:$0xff]   ;;  %v13471_v4 = vld [vmem:[#allocation10 + $0x3c4] ss:$16 sps:$4 sm:$0xff]  }
 0xa22   : > { %10849 = vmatprep.subr.bf16.mxu0 %v13405_v62  ;;  %11021 = vmatprep.subr.bf16.mxu1 %v13408_v15  ;;  %v13474_v62 = vld [vmem:[#allocation10 + $0x3cc] ss:$16 sps:$4 sm:$0xff]   ;;  %v13469_v15 = vld [vmem:[#allocation10 + $0x3c0] ss:$16 sps:$4 sm:$0xff]  }
 0xa25   : > { %10850 = vmatpush1.bf16.msra.mxu0 %v13403_v46  ;;  %11022 = vmatpush1.bf16.msra.mxu1 %v13406_v12  ;;  %v13472_v46 = vld [vmem:[#allocation10 + $0x3c8] ss:$16 sps:$4 sm:$0xff]   ;;  %v13477_v12 = vld [vmem:[#allocation10 + $0x3e4] ss:$16 sps:$4 sm:$0xff]  }
 0xa26   : > { %10851 = vmatprep.subr.bf16.mxu0 %v13411_v40  ;;  %11023 = vmatprep.subr.bf16.mxu1 %v13414_v20  ;;  %v13480_v40 = vld [vmem:[#allocation10 + $0x3ec] ss:$16 sps:$4 sm:$0xff]   ;;  %v13475_v20 = vld [vmem:[#allocation10 + $0x3e0] ss:$16 sps:$4 sm:$0xff]  }
 0xa29   : > { %10852 = vmatpush1.bf16.msra.mxu0 %v13409_v42  ;;  %11024 = vmatpush1.bf16.msra.mxu1 %v13412_v58  ;;  %v13478_v42 = vld [vmem:[#allocation10 + $0x3e8] ss:$16 sps:$4 sm:$0xff]   ;;  %v13483_v58 = vld [vmem:[#allocation10 + $0x404] ss:$16 sps:$4 sm:$0xff]  }
 0xa2a   : > { %10853 = vmatprep.subr.bf16.mxu0 %v13417_v59  ;;  %11025 = vmatprep.subr.bf16.mxu1 %v13420_v7  ;;  %v13486_v59 = vld [vmem:[#allocation10 + $0x40c] ss:$16 sps:$4 sm:$0xff]   ;;  %v13481_v7 = vld [vmem:[#allocation10 + $0x400] ss:$16 sps:$4 sm:$0xff]  }
 0xa2d   : > { %10854 = vmatpush1.bf16.msra.mxu0 %v13415_v45  ;;  %11026 = vmatpush1.bf16.msra.mxu1 %v13418_v23  ;;  %v13484_v45 = vld [vmem:[#allocation10 + $0x408] ss:$16 sps:$4 sm:$0xff]   ;;  %v13489_v23 = vld [vmem:[#allocation10 + $0x424] ss:$16 sps:$4 sm:$0xff]  }
 0xa2e   : > { %10855 = vmatprep.subr.bf16.mxu0 %v13423_v1  ;;  %11027 = vmatprep.subr.bf16.mxu1 %v13426_v55  ;;  %v13492_v1 = vld [vmem:[#allocation10 + $0x42c] ss:$16 sps:$4 sm:$0xff]   ;;  %v13487_v55 = vld [vmem:[#allocation10 + $0x420] ss:$16 sps:$4 sm:$0xff]  }
 0xa31   : > { %10856 = vmatpush1.bf16.msra.mxu0 %v13421_v61  ;;  %11028 = vmatpush1.bf16.msra.mxu1 %v13424_v52  ;;  %v13490_v61 = vld [vmem:[#allocation10 + $0x428] ss:$16 sps:$4 sm:$0xff]   ;;  %v13495_v52 = vld [vmem:[#allocation10 + $0x444] ss:$16 sps:$4 sm:$0xff]  }
 0xa32   : > { %10857 = vmatprep.subr.bf16.mxu0 %v13429_v38  ;;  %11029 = vmatprep.subr.bf16.mxu1 %v13432_v18  ;;  %v13498_v38 = vld [vmem:[#allocation10 + $0x44c] ss:$16 sps:$4 sm:$0xff]   ;;  %v13493_v18 = vld [vmem:[#allocation10 + $0x440] ss:$16 sps:$4 sm:$0xff]  }
 0xa35   : > { %10858 = vmatpush1.bf16.msra.mxu0 %v13427_v21  ;;  %11030 = vmatpush1.bf16.msra.mxu1 %v13430_v22  ;;  %v13496_v21 = vld [vmem:[#allocation10 + $0x448] ss:$16 sps:$4 sm:$0xff]   ;;  %v13501_v22 = vld [vmem:[#allocation10 + $0x464] ss:$16 sps:$4 sm:$0xff]  }
 0xa36   : > { %10859 = vmatprep.subr.bf16.mxu0 %v13435_v8  ;;  %11031 = vmatprep.subr.bf16.mxu1 %v13438_v2  ;;  %v13504_v8 = vld [vmem:[#allocation10 + $0x46c] ss:$16 sps:$4 sm:$0xff]   ;;  %v13499_v2 = vld [vmem:[#allocation10 + $0x460] ss:$16 sps:$4 sm:$0xff]  }
 0xa39   : > { %10860 = vmatpush1.bf16.msra.mxu0 %v13433_v19  ;;  %11032 = vmatpush1.bf16.msra.mxu1 %v13436_v43  ;;  %v13507_v19 = vld [vmem:[#allocation10 + $0x484] ss:$16 sps:$4 sm:$0xff]   ;;  %v13510_v43 = vld [vmem:[#allocation10 + $0x48c] ss:$16 sps:$4 sm:$0xff]  }
 0xa3a   : > { %10861 = vmatprep.subr.bf16.mxu0 %v13441_v47  ;;  %11033 = vmatprep.subr.bf16.mxu1 %v13444_v36  ;;  %v13505_v47 = vld [vmem:[#allocation10 + $0x480] ss:$16 sps:$4 sm:$0xff]   ;;  %v13508_v36 = vld [vmem:[#allocation10 + $0x488] ss:$16 sps:$4 sm:$0xff]  }
 0xa3d   : > { %10862 = vmatpush1.bf16.msra.mxu0 %v13439_v17  ;;  %11034 = vmatpush1.bf16.msra.mxu1 %v13442_v63  ;;  %v13513_v17 = vld [vmem:[#allocation10 + $0x4a4] ss:$16 sps:$4 sm:$0xff]   ;;  %v13516_v63 = vld [vmem:[#allocation10 + $0x4ac] ss:$16 sps:$4 sm:$0xff]  }
 0xa3e   : > { %10863 = vmatprep.subr.bf16.mxu0 %v13447_v41  ;;  %11035 = vmatprep.subr.bf16.mxu1 %v13450_v6  ;;  %v13511_v41 = vld [vmem:[#allocation10 + $0x4a0] ss:$16 sps:$4 sm:$0xff]   ;;  %v13514_v6 = vld [vmem:[#allocation10 + $0x4a8] ss:$16 sps:$4 sm:$0xff]  }
 0xa41   : > { %10864 = vmatpush1.bf16.msra.mxu0 %v13445_v11  ;;  %11036 = vmatpush1.bf16.msra.mxu1 %v13448_v9  ;;  %v13519_v11 = vld [vmem:[#allocation10 + $0x4c4] ss:$16 sps:$4 sm:$0xff]   ;;  %v13522_v9 = vld [vmem:[#allocation10 + $0x4cc] ss:$16 sps:$4 sm:$0xff]  }
 0xa42   : > { %10865 = vmatprep.subr.bf16.mxu0 %v13453_v34  ;;  %11037 = vmatprep.subr.bf16.mxu1 %v13456_v14  ;;  %v13517_v34 = vld [vmem:[#allocation10 + $0x4c0] ss:$16 sps:$4 sm:$0xff]   ;;  %v13520_v14 = vld [vmem:[#allocation10 + $0x4c8] ss:$16 sps:$4 sm:$0xff]  }
 0xa45   : > { %10866 = vmatpush1.bf16.msra.mxu0 %v13451_v26  ;;  %11038 = vmatpush1.bf16.msra.mxu1 %v13454_v16  ;;  %v13525_v26 = vld [vmem:[#allocation10 + $0x4e4] ss:$16 sps:$4 sm:$0xff]   ;;  %v13528_v16 = vld [vmem:[#allocation10 + $0x4ec] ss:$16 sps:$4 sm:$0xff]  }
 0xa46   : > { %10867 = vmatprep.subr.bf16.mxu0 %v13459_v54  ;;  %11039 = vmatprep.subr.bf16.mxu1 %v13462_v5  ;;  %v13523_v54 = vld [vmem:[#allocation10 + $0x4e0] ss:$16 sps:$4 sm:$0xff]   ;;  %v13526_v5 = vld [vmem:[#allocation10 + $0x4e8] ss:$16 sps:$4 sm:$0xff]  }
 0xa49   : > { %10868 = vmatpush1.bf16.msra.mxu0 %v13457_v24  ;;  %11040 = vmatpush1.bf16.msra.mxu1 %v13460_v27  ;;  %v13531_v24 = vld [vmem:[#allocation10 + $0x504] ss:$16 sps:$4 sm:$0xff]   ;;  %v13534_v27 = vld [vmem:[#allocation10 + $0x50c] ss:$16 sps:$4 sm:$0xff]  }
 0xa4a   : > { %10869 = vmatprep.subr.bf16.mxu0 %v13465_v32  ;;  %11041 = vmatprep.subr.bf16.mxu1 %v13468_v50  ;;  %v13529_v32 = vld [vmem:[#allocation10 + $0x500] ss:$16 sps:$4 sm:$0xff]   ;;  %v13532_v50 = vld [vmem:[#allocation10 + $0x508] ss:$16 sps:$4 sm:$0xff]  }
 0xa4d   : > { %10870 = vmatpush1.bf16.msra.mxu0 %v13463_v44  ;;  %11042 = vmatpush1.bf16.msra.mxu1 %v13466_v10  ;;  %v13537_v44 = vld [vmem:[#allocation10 + $0x524] ss:$16 sps:$4 sm:$0xff]   ;;  %v13540_v10 = vld [vmem:[#allocation10 + $0x52c] ss:$16 sps:$4 sm:$0xff]  }
 0xa4e   : > { %10871 = vmatprep.subr.bf16.mxu0 %v13471_v4  ;;  %11043 = vmatprep.subr.bf16.mxu1 %v13474_v62  ;;  %v13535_v4 = vld [vmem:[#allocation10 + $0x520] ss:$16 sps:$4 sm:$0xff]   ;;  %v13538_v62 = vld [vmem:[#allocation10 + $0x528] ss:$16 sps:$4 sm:$0xff]  }
 0xa51   : > { %10872 = vmatpush1.bf16.msra.mxu0 %v13469_v15  ;;  %11044 = vmatpush1.bf16.msra.mxu1 %v13472_v46  ;;  %v13543_v15 = vld [vmem:[#allocation10 + $0x544] ss:$16 sps:$4 sm:$0xff]   ;;  %v13546_v46 = vld [vmem:[#allocation10 + $0x54c] ss:$16 sps:$4 sm:$0xff]  }
 0xa52   : > { %10873 = vmatprep.subr.bf16.mxu0 %v13477_v12  ;;  %11045 = vmatprep.subr.bf16.mxu1 %v13480_v40  ;;  %v13541_v12 = vld [vmem:[#allocation10 + $0x540] ss:$16 sps:$4 sm:$0xff]   ;;  %v13544_v40 = vld [vmem:[#allocation10 + $0x548] ss:$16 sps:$4 sm:$0xff]  }
 0xa55   : > { %10874 = vmatpush1.bf16.msra.mxu0 %v13475_v20  ;;  %11046 = vmatpush1.bf16.msra.mxu1 %v13478_v42  ;;  %v13549_v20 = vld [vmem:[#allocation10 + $0x564] ss:$16 sps:$4 sm:$0xff]   ;;  %v13552_v42 = vld [vmem:[#allocation10 + $0x56c] ss:$16 sps:$4 sm:$0xff]  }
 0xa56   : > { %10886 = vmatprep.subr.bf16.mxu0 %v13483_v58  ;;  %11058 = vmatprep.subr.bf16.mxu1 %v13486_v59  ;;  %v13547_v58 = vld [vmem:[#allocation10 + $0x560] ss:$16 sps:$4 sm:$0xff]   ;;  %v13550_v59 = vld [vmem:[#allocation10 + $0x568] ss:$16 sps:$4 sm:$0xff]  }
 0xa58   : > { %10876 = vmatmul.mubr.bf16.vlgmr.msra.gmra.mrb[56].mxu0 %v14986_v3  ;;  %11048 = vmatmul.mubr.bf16.vlgmr.msra.gmra.mrb[56].mxu1 %v14986_v3  ;;  %v13502_v3 = vld [vmem:[#allocation10 + $0x468] ss:$16 sps:$4 sm:$0xff]  }
 0xa59   : > { %10887 = vmatpush1.bf16.msra.mxu0 %v13481_v7  ;;  %11059 = vmatpush1.bf16.msra.mxu1 %v13484_v45  ;;  %v13555_v7 = vld [vmem:[#allocation10 + $0x584] ss:$16 sps:$4 sm:$0xff]   ;;  %v13558_v45 = vld [vmem:[#allocation10 + $0x58c] ss:$16 sps:$4 sm:$0xff]  }
 0xa5a   : > { %10888 = vmatprep.subr.bf16.mxu0 %v13489_v23  ;;  %11060 = vmatprep.subr.bf16.mxu1 %v13492_v1  ;;  %v13553_v23 = vld [vmem:[#allocation10 + $0x580] ss:$16 sps:$4 sm:$0xff]   ;;  %v13556_v1 = vld [vmem:[#allocation10 + $0x588] ss:$16 sps:$4 sm:$0xff]  }
 0xa5d   : > { %10889 = vmatpush1.bf16.msra.mxu0 %v13487_v55  ;;  %11061 = vmatpush1.bf16.msra.mxu1 %v13490_v61  ;;  %v13561_v55 = vld [vmem:[#allocation10 + $0x5a4] ss:$16 sps:$4 sm:$0xff]   ;;  %v13564_v61 = vld [vmem:[#allocation10 + $0x5ac] ss:$16 sps:$4 sm:$0xff]  }
 0xa5e   : > { %10890 = vmatprep.subr.bf16.mxu0 %v13495_v52  ;;  %11062 = vmatprep.subr.bf16.mxu1 %v13498_v38  ;;  %v13559_v52 = vld [vmem:[#allocation10 + $0x5a0] ss:$16 sps:$4 sm:$0xff]   ;;  %v13562_v38 = vld [vmem:[#allocation10 + $0x5a8] ss:$16 sps:$4 sm:$0xff]  }
 0xa61   : > { %10891 = vmatpush1.bf16.msra.mxu0 %v13493_v18  ;;  %11063 = vmatpush1.bf16.msra.mxu1 %v13496_v21  ;;  %v7573_v18 = vrot.slane %v14976_v53, %v1884_v60  ;;  %v13567_v21 = vld [vmem:[#allocation10 + $0x5c4] ss:$16 sps:$4 sm:$0xff]  }
 0xa62   : > { %10892 = vmatprep.subr.bf16.mxu0 %v13501_v22  ;;  %11064 = vmatprep.subr.bf16.mxu1 %v13504_v8  ;;  %v13570_v22 = vld [vmem:[#allocation10 + $0x5cc] ss:$16 sps:$4 sm:$0xff]   ;;  %v7581_v8 = vrot.slane %v14976_v53, %v1892_v28 }
 0xa63   : > { %v13576_v28 = vld [vmem:[#allocation10 + $0x5ec] ss:$16 sps:$4 sm:$0xff]  }
 0xa65   : > { %10893 = vmatpush1.bf16.msra.mxu0 %v13499_v2  ;;  %11065 = vmatpush1.bf16.msra.mxu1 %v13502_v3  ;;  %v7577_v2 = vrot.slane %v14976_v53, %v1888_v35  ;;  %v7585_v3 = vrot.slane %v14976_v53, %v1896_v31 }
 0xa66   : > { %10894 = vmatprep.subr.bf16.mxu0 %v13507_v19  ;;  %11066 = vmatprep.subr.bf16.mxu1 %v13510_v43  ;;  %v13565_v43 = vld [vmem:[#allocation10 + $0x5c0] ss:$16 sps:$4 sm:$0xff]  }
 0xa69   : > { %10895 = vmatpush1.bf16.msra.mxu0 %v13505_v47  ;;  %11067 = vmatpush1.bf16.msra.mxu1 %v13508_v36  ;;  %v13568_v47 = vld [vmem:[#allocation10 + $0x5c8] ss:$16 sps:$4 sm:$0xff]  }
 0xa6a   : > { %10896 = vmatprep.subr.bf16.mxu0 %v13513_v17  ;;  %11068 = vmatprep.subr.bf16.mxu1 %v13516_v63  ;;  %v13573_v63 = vld [vmem:[#allocation10 + $0x5e4] ss:$16 sps:$4 sm:$0xff]  }
 0xa6d   : > { %10897 = vmatpush1.bf16.msra.mxu0 %v13511_v41  ;;  %11069 = vmatpush1.bf16.msra.mxu1 %v13514_v6 }
 0xa6e   : > { %10898 = vmatprep.subr.bf16.mxu0 %v13519_v11  ;;  %11070 = vmatprep.subr.bf16.mxu1 %v13522_v9 }
 0xa71   : > { %10899 = vmatpush1.bf16.msra.mxu0 %v13517_v34  ;;  %11071 = vmatpush1.bf16.msra.mxu1 %v13520_v14 }
 0xa72   : > { %10900 = vmatprep.subr.bf16.mxu0 %v13525_v26  ;;  %11072 = vmatprep.subr.bf16.mxu1 %v13528_v16  ;;  %v13571_v16 = vld [vmem:[#allocation10 + $0x5e0] ss:$16 sps:$4 sm:$0xff]  }
 0xa75   : > { %10901 = vmatpush1.bf16.msra.mxu0 %v13523_v54  ;;  %11073 = vmatpush1.bf16.msra.mxu1 %v13526_v5  ;;  %v13574_v54 = vld [vmem:[#allocation10 + $0x5e8] ss:$16 sps:$4 sm:$0xff]  }
 0xa76   : > { %10902 = vmatprep.subr.bf16.mxu0 %v13531_v24  ;;  %11074 = vmatprep.subr.bf16.mxu1 %v13534_v27 }
 0xa79   : > { %10903 = vmatpush1.bf16.msra.mxu0 %v13529_v32  ;;  %11075 = vmatpush1.bf16.msra.mxu1 %v13532_v50  ;;  %v13579_v32 = vld [vmem:[#allocation10 + $0x604] ss:$16 sps:$4 sm:$0xff]   ;;  %v13582_v50 = vld [vmem:[#allocation10 + $0x60c] ss:$16 sps:$4 sm:$0xff]  }
 0xa7a   : > { %10904 = vmatprep.subr.bf16.mxu0 %v13537_v44  ;;  %11076 = vmatprep.subr.bf16.mxu1 %v13540_v10 }
 0xa7d   : > { %10905 = vmatpush1.bf16.msra.mxu0 %v13535_v4  ;;  %11077 = vmatpush1.bf16.msra.mxu1 %v13538_v62 }
 0xa7e   : > { %10906 = vmatprep.subr.bf16.mxu0 %v13543_v15  ;;  %11078 = vmatprep.subr.bf16.mxu1 %v13546_v46 }
 0xa81   : > { %10907 = vmatpush1.bf16.msra.mxu0 %v13541_v12  ;;  %11079 = vmatpush1.bf16.msra.mxu1 %v13544_v40 }
 0xa82   : > { %10908 = vmatprep.subr.bf16.mxu0 %v13549_v20  ;;  %11080 = vmatprep.subr.bf16.mxu1 %v13552_v42  ;;  %v13577_v42 = vld [vmem:[#allocation10 + $0x600] ss:$16 sps:$4 sm:$0xff]  }
 0xa85   : > { %10909 = vmatpush1.bf16.msra.mxu0 %v13547_v58  ;;  %11081 = vmatpush1.bf16.msra.mxu1 %v13550_v59  ;;  %v13580_v58 = vld [vmem:[#allocation10 + $0x608] ss:$16 sps:$4 sm:$0xff]  }
 0xa86   : > { %10910 = vmatprep.subr.bf16.mxu0 %v13555_v7  ;;  %11082 = vmatprep.subr.bf16.mxu1 %v13558_v45  ;;  %v13585_v7 = vld [vmem:[#allocation10 + $0x624] ss:$16 sps:$4 sm:$0xff]   ;;  %v13588_v45 = vld [vmem:[#allocation10 + $0x62c] ss:$16 sps:$4 sm:$0xff]  }
 0xa89   : > { %10911 = vmatpush1.bf16.msra.mxu0 %v13553_v23  ;;  %11083 = vmatpush1.bf16.msra.mxu1 %v13556_v1  ;;  %v13583_v23 = vld [vmem:[#allocation10 + $0x620] ss:$16 sps:$4 sm:$0xff]   ;;  %v13586_v1 = vld [vmem:[#allocation10 + $0x628] ss:$16 sps:$4 sm:$0xff]  }
 0xa8a   : > { %10912 = vmatprep.subr.bf16.mxu0 %v13561_v55  ;;  %11084 = vmatprep.subr.bf16.mxu1 %v13564_v61  ;;  %v13591_v55 = vld [vmem:[#allocation10 + $0x644] ss:$16 sps:$4 sm:$0xff]   ;;  %v13594_v61 = vld [vmem:[#allocation10 + $0x64c] ss:$16 sps:$4 sm:$0xff]  }
 0xa8d   : > { %10913 = vmatpush1.bf16.msra.mxu0 %v13559_v52  ;;  %11085 = vmatpush1.bf16.msra.mxu1 %v13562_v38  ;;  %v9123_v19 = vpop.f32.mrb[52].mxu0  ;;  %v13589_v52 = vld [vmem:[#allocation10 + $0x640] ss:$16 sps:$4 sm:$0xff]   ;;  %v13592_v38 = vld [vmem:[#allocation10 + $0x648] ss:$16 sps:$4 sm:$0xff]  }
 0xa8e   : > { %v12751_v60 = vadd.f32 %v9123_v19, %v7573_v18  ;;  %v9209_v36 = vpop.f32.mrb[52].mxu1  ;;  %v9125_v17 = vpop.f32.mrb[53].mxu0  ;;  %10914 = vmatprep.subr.bf16.mxu0 %v13567_v21  ;;  %11086 = vmatprep.subr.bf16.mxu1 %v13570_v22  ;;  %v13600_v21 = vld [vmem:[#allocation10 + $0x66c] ss:$16 sps:$4 sm:$0xff]   ;;  %v13595_v22 = vld [vmem:[#allocation10 + $0x660] ss:$16 sps:$4 sm:$0xff]  }
 0xa8f   : > { %v12755_v41 = vadd.f32 %v9209_v36, %v7581_v8  ;;  %v12752_v6 = vadd.f32 %v9125_v17, %v7577_v2  ;;  %v9211_v11 = vpop.f32.mrb[53].mxu1  ;;  %v9127_v35 = vpop.f32.mrb[54].mxu0  ;;  %v13601_v19 = vld [vmem:[#allocation10 + $0x680] ss:$16 sps:$4 sm:$0xff]   ;;  %v13610_v17 = vld [vmem:[#allocation10 + $0x6a8] ss:$16 sps:$4 sm:$0xff]  }
 0xa90   : > { %v12756_v9 = vadd.f32 %v9211_v11, %v7585_v3  ;;  %v12753_v29 = vadd.f32 %v9127_v35, %v7573_v18  ;;  %v9213_v34 = vpop.f32.mrb[54].mxu1  ;;  %v9129_v31 = vpop.f32.mrb[55].mxu0  ;;  %v9222_v5 = vmax.f32 %v12751_v60, 0.0  ;;  %v13597_v18 = vld [vmem:[#allocation10 + $0x664] ss:$16 sps:$4 sm:$0xff]  }
 0xa91   : > { %v12757_v53 = vadd.f32 %v9213_v34, %v7581_v8  ;;  %v12754_v14 = vadd.f32 %v9129_v31, %v7577_v2  ;;  %v9215_v26 = vpop.f32.mrb[55].mxu1  ;;  %10915 = vmatpush1.bf16.msra.mxu0 %v13565_v43  ;;  %11087 = vmatpush1.bf16.msra.mxu1 %v13568_v47  ;;  %v9224_v44 = vmax.f32 %v12755_v41, 0.0  ;;  %v9223_v10 = vmax.f32 %v12752_v6, 0.0  ;;  %v13598_v8 = vld [vmem:[#allocation10 + $0x668] ss:$16 sps:$4 sm:$0xff]  }
 0xa92   : > { %v9230_v24 = vmax.f32 %v12753_v29, 0.0  ;;  %v12758_v27 = vadd.f32 %v9215_v26, %v7585_v3  ;;  %10916 = vmatprep.subr.bf16.mxu0 %v13573_v63  ;;  %11088 = vmatprep.subr.bf16.mxu1 %v13576_v28  ;;  %v9225_v15 = vmax.f32 %v12756_v9, 0.0  ;;  %v13603_v2 = vld [vmem:[#allocation10 + $0x684] ss:$16 sps:$4 sm:$0xff]   ;;  %v13606_v3 = vld [vmem:[#allocation10 + $0x68c] ss:$16 sps:$4 sm:$0xff]  }
 0xa93   : > { %v9232_v4 = vmax.f32 %v12757_v53, 0.0  ;;  %v9231_v62 = vmax.f32 %v12754_v14, 0.0  ;;  %v13604_v43 = vld [vmem:[#allocation10 + $0x688] ss:$16 sps:$4 sm:$0xff]   ;;  %v13609_v47 = vld [vmem:[#allocation10 + $0x6a4] ss:$16 sps:$4 sm:$0xff]  }
 0xa94   : > { %v9238_v46 = vpack.c.bf16 %v9230_v24, %v9222_v5  ;;  %v9233_v12 = vmax.f32 %v12758_v27, 0.0  ;;  %v13612_v60 = vld [vmem:[#allocation10 + $0x6ac] ss:$16 sps:$4 sm:$0xff]   ;;  %v13607_v36 = vld [vmem:[#allocation10 + $0x6a0] ss:$16 sps:$4 sm:$0xff]  }
 0xa95   : > { %v15002_v40 = vpack.c.bf16 %v9232_v4, %v9224_v44  ;;  %v9239_v20 = vpack.c.bf16 %v9231_v62, %v9223_v10  ;;  %10917 = vmatpush1.bf16.msra.mxu0 %v13571_v16  ;;  %11089 = vmatpush1.bf16.msra.mxu1 %v13574_v54  ;;  %v13615_v63 = vld [vmem:[#allocation10 + $0x6c4] ss:$16 sps:$4 sm:$0xff]   ;;  %v13618_v28 = vld [vmem:[#allocation10 + $0x6cc] ss:$16 sps:$4 sm:$0xff]   ;;  %v13613_v41 = vld [vmem:[#allocation10 + $0x6c0] ss:$16 sps:$4 sm:$0xff]  }
 0xa96   : > { %v9241_v59 = vpack.c.bf16 %v9233_v12, %v9225_v15  ;;  %10929 = vmatprep.subr.bf16.mxu0 %v13579_v32  ;;  %11101 = vmatprep.subr.bf16.mxu1 %v13582_v50  ;;  %v13616_v6 = vld [vmem:[#allocation10 + $0x6c8] ss:$16 sps:$4 sm:$0xff]   ;;  %v13621_v11 = vld [vmem:[#allocation10 + $0x6e4] ss:$16 sps:$4 sm:$0xff]   ;;  %v13624_v35 = vld [vmem:[#allocation10 + $0x6ec] ss:$16 sps:$4 sm:$0xff]  }
 0xa97   : > { %10918 = vmatprep.mubr.bf16.mxu0 %v9239_v20  ;;  %11090 = vmatprep.mubr.bf16.mxu1 %v9239_v20  ;;  %v13619_v9 = vld [vmem:[#allocation10 + $0x6e0] ss:$16 sps:$4 sm:$0xff]   ;;  %v13622_v29 = vld [vmem:[#allocation10 + $0x6e8] ss:$16 sps:$4 sm:$0xff]   ;;  %v13627_v34 = vld [vmem:[#allocation10 + $0x704] ss:$16 sps:$4 sm:$0xff]  }
 0xa98   : > { %10919 = vmatmul.mubr.bf16.vlgmr.msra.gmra.mrb[56].mxu0 %v9238_v46  ;;  %11091 = vmatmul.mubr.bf16.vlgmr.msra.gmra.mrb[56].mxu1 %v9238_v46  ;;  %v13630_v31 = vld [vmem:[#allocation10 + $0x70c] ss:$16 sps:$4 sm:$0xff]   ;;  %v13625_v53 = vld [vmem:[#allocation10 + $0x700] ss:$16 sps:$4 sm:$0xff]   ;;  %v13628_v14 = vld [vmem:[#allocation10 + $0x708] ss:$16 sps:$4 sm:$0xff]  }
 0xa99   : > { %10930 = vmatpush1.bf16.msra.mxu0 %v13577_v42  ;;  %11102 = vmatpush1.bf16.msra.mxu1 %v13580_v58  ;;  %v13633_v26 = vld [vmem:[#allocation10 + $0x724] ss:$16 sps:$4 sm:$0xff]   ;;  %v13636_v16 = vld [vmem:[#allocation10 + $0x72c] ss:$16 sps:$4 sm:$0xff]   ;;  %v13631_v54 = vld [vmem:[#allocation10 + $0x720] ss:$16 sps:$4 sm:$0xff]  }
 0xa9a   : > { %10961 = vmatprep.mubr.bf16.mxu0 %v9241_v59  ;;  %11133 = vmatprep.mubr.bf16.mxu1 %v9241_v59  ;;  %v13634_v5 = vld [vmem:[#allocation10 + $0x728] ss:$16 sps:$4 sm:$0xff]   ;;  %v13639_v24 = vld [vmem:[#allocation10 + $0x744] ss:$16 sps:$4 sm:$0xff]   ;;  %v13642_v27 = vld [vmem:[#allocation10 + $0x74c] ss:$16 sps:$4 sm:$0xff]  }
 0xa9b   : > { %10931 = vmatprep.subr.bf16.mxu0 %v13585_v7  ;;  %11103 = vmatprep.subr.bf16.mxu1 %v13588_v45  ;;  %v13637_v32 = vld [vmem:[#allocation10 + $0x740] ss:$16 sps:$4 sm:$0xff]   ;;  %v13640_v50 = vld [vmem:[#allocation10 + $0x748] ss:$16 sps:$4 sm:$0xff]   ;;  %v13645_v44 = vld [vmem:[#allocation10 + $0x764] ss:$16 sps:$4 sm:$0xff]  }
 0xa9c   : > { %v13648_v10 = vld [vmem:[#allocation10 + $0x76c] ss:$16 sps:$4 sm:$0xff]   ;;  %v13643_v4 = vld [vmem:[#allocation10 + $0x760] ss:$16 sps:$4 sm:$0xff]   ;;  %v13646_v62 = vld [vmem:[#allocation10 + $0x768] ss:$16 sps:$4 sm:$0xff]  }
 0xa9d   : > { %10932 = vmatpush1.bf16.msra.mxu0 %v13583_v23  ;;  %11104 = vmatpush1.bf16.msra.mxu1 %v13586_v1  ;;  %v13651_v15 = vld [vmem:[#allocation10 + $0x784] ss:$16 sps:$4 sm:$0xff]   ;;  %v13654_v46 = vld [vmem:[#allocation10 + $0x78c] ss:$16 sps:$4 sm:$0xff]   ;;  %v13649_v12 = vld [vmem:[#allocation10 + $0x780] ss:$16 sps:$4 sm:$0xff]  }
 0xa9e   : > { %10933 = vmatprep.subr.bf16.mxu0 %v13591_v55  ;;  %11105 = vmatprep.subr.bf16.mxu1 %v13594_v61  ;;  %v13652_v20 = vld [vmem:[#allocation10 + $0x788] ss:$16 sps:$4 sm:$0xff]   ;;  %v13657_v42 = vld [vmem:[#allocation10 + $0x7a4] ss:$16 sps:$4 sm:$0xff]   ;;  %v13660_v58 = vld [vmem:[#allocation10 + $0x7ac] ss:$16 sps:$4 sm:$0xff]  }
 0xa9f   : > { %v13655_v59 = vld [vmem:[#allocation10 + $0x7a0] ss:$16 sps:$4 sm:$0xff]   ;;  %v13658_v7 = vld [vmem:[#allocation10 + $0x7a8] ss:$16 sps:$4 sm:$0xff]   ;;  %v13663_v45 = vld [vmem:[#allocation10 + $0x7c4] ss:$16 sps:$4 sm:$0xff]  }
 0xaa0   : > { %v13666_v23 = vld [vmem:[#allocation10 + $0x7cc] ss:$16 sps:$4 sm:$0xff]   ;;  %v13661_v1 = vld [vmem:[#allocation10 + $0x7c0] ss:$16 sps:$4 sm:$0xff]   ;;  %v13664_v55 = vld [vmem:[#allocation10 + $0x7c8] ss:$16 sps:$4 sm:$0xff]  }
 0xaa1   : > { %10934 = vmatpush1.bf16.msra.mxu0 %v13589_v52  ;;  %11106 = vmatpush1.bf16.msra.mxu1 %v13592_v38  ;;  %v13669_v61 = vld [vmem:[#allocation10 + $0x7e4] ss:$16 sps:$4 sm:$0xff]   ;;  %v13672_v52 = vld [vmem:[#allocation10 + $0x7ec] ss:$16 sps:$4 sm:$0xff]   ;;  %v13667_v38 = vld [vmem:[#allocation10 + $0x7e0] ss:$16 sps:$4 sm:$0xff]  }
 0xaa2   : > { %10935 = vmatprep.subr.bf16.mxu0 %v13597_v18  ;;  %11107 = vmatprep.subr.bf16.mxu1 %v13600_v21  ;;  %v13670_v18 = vld [vmem:[#allocation10 + $0x7e8] ss:$16 sps:$4 sm:$0xff]   ;;  %v9498_v21 = vld [vmem:[%s15056_s13] sm:$0xf] }
 0xaa5   : > { %10936 = vmatpush1.bf16.msra.mxu0 %v13595_v22  ;;  %11108 = vmatpush1.bf16.msra.mxu1 %v13598_v8  ;;  %v9503_v22 = vrot.slane %v9498_v21, %v14259_v37  ;;  %v9511_v8 = vrot.slane %v9498_v21, %v14280_v48 }
 0xaa6   : > { %10937 = vmatprep.subr.bf16.mxu0 %v13603_v2  ;;  %11109 = vmatprep.subr.bf16.mxu1 %v13606_v3  ;;  %v9507_v2 = vrot.slane %v9498_v21, %v14265_v39 }
 0xaa9   : > { %10938 = vmatpush1.bf16.msra.mxu0 %v13601_v19  ;;  %11110 = vmatpush1.bf16.msra.mxu1 %v13604_v43  ;;  %v9515_v43 = vrot.slane %v9498_v21, %v14298_v0 }
 0xaaa   : > { %10939 = vmatprep.subr.bf16.mxu0 %v13609_v47  ;;  %11111 = vmatprep.subr.bf16.mxu1 %v13612_v60 }
 0xaad   : > { %10940 = vmatpush1.bf16.msra.mxu0 %v13607_v36  ;;  %11112 = vmatpush1.bf16.msra.mxu1 %v13610_v17 }
 0xaae   : > { %10941 = vmatprep.subr.bf16.mxu0 %v13615_v63  ;;  %11113 = vmatprep.subr.bf16.mxu1 %v13618_v28 }
 0xab1   : > { %10942 = vmatpush1.bf16.msra.mxu0 %v13613_v41  ;;  %11114 = vmatpush1.bf16.msra.mxu1 %v13616_v6 }
 0xab2   : > { %10943 = vmatprep.subr.bf16.mxu0 %v13621_v11  ;;  %11115 = vmatprep.subr.bf16.mxu1 %v13624_v35 }
 0xab5   : > { %10944 = vmatpush1.bf16.msra.mxu0 %v13619_v9  ;;  %11116 = vmatpush1.bf16.msra.mxu1 %v13622_v29 }
 0xab6   : > { %10945 = vmatprep.subr.bf16.mxu0 %v13627_v34  ;;  %11117 = vmatprep.subr.bf16.mxu1 %v13630_v31 }
 0xab9   : > { %10946 = vmatpush1.bf16.msra.mxu0 %v13625_v53  ;;  %11118 = vmatpush1.bf16.msra.mxu1 %v13628_v14 }
 0xaba   : > { %10947 = vmatprep.subr.bf16.mxu0 %v13633_v26  ;;  %11119 = vmatprep.subr.bf16.mxu1 %v13636_v16 }
 0xabd   : > { %10948 = vmatpush1.bf16.msra.mxu0 %v13631_v54  ;;  %11120 = vmatpush1.bf16.msra.mxu1 %v13634_v5 }
 0xabe   : > { %10949 = vmatprep.subr.bf16.mxu0 %v13639_v24  ;;  %11121 = vmatprep.subr.bf16.mxu1 %v13642_v27 }
 0xac1   : > { %10950 = vmatpush1.bf16.msra.mxu0 %v13637_v32  ;;  %11122 = vmatpush1.bf16.msra.mxu1 %v13640_v50 }
 0xac2   : > { %10951 = vmatprep.subr.bf16.mxu0 %v13645_v44  ;;  %11123 = vmatprep.subr.bf16.mxu1 %v13648_v10 }
 0xac5   : > { %10952 = vmatpush1.bf16.msra.mxu0 %v13643_v4  ;;  %11124 = vmatpush1.bf16.msra.mxu1 %v13646_v62 }
 0xac6   : > { %10953 = vmatprep.subr.bf16.mxu0 %v13651_v15  ;;  %11125 = vmatprep.subr.bf16.mxu1 %v13654_v46 }
 0xac9   : > { %10954 = vmatpush1.bf16.msra.mxu0 %v13649_v12  ;;  %11126 = vmatpush1.bf16.msra.mxu1 %v13652_v20 }
 0xaca   : > { %10955 = vmatprep.subr.bf16.mxu0 %v13657_v42  ;;  %11127 = vmatprep.subr.bf16.mxu1 %v13660_v58 }
 0xacd   : > { %10956 = vmatpush1.bf16.msra.mxu0 %v13655_v59  ;;  %11128 = vmatpush1.bf16.msra.mxu1 %v13658_v7 }
 0xace   : > { %10957 = vmatprep.subr.bf16.mxu0 %v13663_v45  ;;  %11129 = vmatprep.subr.bf16.mxu1 %v13666_v23 }
 0xad1   : > { %10958 = vmatpush1.bf16.msra.mxu0 %v13661_v1  ;;  %11130 = vmatpush1.bf16.msra.mxu1 %v13664_v55 }
 0xad2   : > { %10959 = vmatprep.subr.bf16.mxu0 %v13669_v61  ;;  %11131 = vmatprep.subr.bf16.mxu1 %v13672_v52 }
 0xad5   : > { %10960 = vmatpush1.bf16.msra.mxu0 %v13667_v38  ;;  %11132 = vmatpush1.bf16.msra.mxu1 %v13670_v18 }
 0xad8   : > { %10962 = vmatmul.mubr.bf16.vlgmr.msra.gmra.mrb[56].mxu0 %v15002_v40  ;;  %11134 = vmatmul.mubr.bf16.vlgmr.msra.gmra.mrb[56].mxu1 %v15002_v40 }
 0xbab   : > { %v10963_v3 = vpop.f32.mrb[56].mxu0  ;;  %v11135_v19 = vpop.f32.mrb[56].mxu1 }
 0xbac   : > { %v12759_v47 = vadd.f32 %v10963_v3, %v9503_v22  ;;  %v10965_v60 = vpop.f32.mrb[57].mxu0  ;;  %v11137_v36 = vpop.f32.mrb[57].mxu1  ;;  %v12763_v17 = vadd.f32 %v11135_v19, %v9511_v8 }
 0xbad   : > { %v12760_v63 = vadd.f32 %v10965_v60, %v9507_v2  ;;  %v10967_v40 = vpop.f32.mrb[58].mxu0  ;;  %v11139_v28 = vpop.f32.mrb[58].mxu1  ;;  %v12764_v29 = vadd.f32 %v11137_v36, %v9515_v43  ;;  %v11153_v60 = vld [vmem:[%s15080_s16] sm:$0xf] }
 0xbae   : > { %v11144_v41 = vadd.f32 %v12759_v47, %v14925_v30  ;;  %v12761_v6 = vadd.f32 %v10967_v40, %v9503_v22  ;;  %v10969_v11 = vpop.f32.mrb[59].mxu0  ;;  %v11141_v35 = vpop.f32.mrb[59].mxu1  ;;  %v12765_v34 = vadd.f32 %v11139_v28, %v9511_v8  ;;  %v11146_v14 = vadd.f32 %v12763_v17, %v14918_v13  ;;  %v11152_v47 = vld [vmem:[%s15079_s27] sm:$0xf] }
 0xbaf   : > { %v11145_v9 = vadd.f32 %v12760_v63, %v14921_v33  ;;  %v12762_v31 = vadd.f32 %v10969_v11, %v9507_v2  ;;  %v12766_v54 = vadd.f32 %v11141_v35, %v9515_v43  ;;  %v11147_v5 = vadd.f32 %v12764_v29, %v14941_v51 }
 0xbb0   : > { %v11148_v53 = vadd.f32 %v12761_v6, %v14927_v49  ;;  %v11150_v30 = vadd.f32 %v12765_v34, %v14931_v57  ;;  %v11210_v36 = vrot.slane %v11152_v47, %v14259_v37  ;;  %v11214_v17 = vrot.slane %v11152_v47, %v14265_v39 }
 0xbb1   : > { %v11154_v26 = vadd.f32 %v11145_v9, %v11144_v41  ;;  %v11149_v16 = vadd.f32 %v12762_v31, %v14923_v25  ;;  %v11151_v32 = vadd.f32 %v12766_v54, %v14929_v56  ;;  %v11218_v63 = vrot.slane %v11152_v47, %v14280_v48 }
 0xbb2   : > { %v11222_v40 = vrot.slane %v11152_v47, %v14298_v0  ;;  %v11243_v6 = vrot.slane %v11153_v60, %v14265_v39  ;;  %v11247_v11 = vrot.slane %v11153_v60, %v14280_v48  ;;  %v11251_v35 = vrot.slane %v11153_v60, %v14298_v0 }
 0xbb3   : > { %v11159_v24 = vadd.f32 %v11149_v16, %v11148_v53  ;;  %v11155_v27 = vadd.f32 %v11154_v26, %v11146_v14 }
 0xbb5   : > { %v11156_v33 = vadd.f32 %v11155_v27, %v11147_v5  ;;  %v11160_v50 = vadd.f32 %v11159_v24, %v11150_v30 }
 0xbb7   : > { %11157 = vadd.xlane.f32.xlu1 %v11156_v33  ;;  %v11161_v44 = vadd.f32 %v11160_v50, %v11151_v32 }
 0xbb9   : > { %11162 = vadd.xlane.f32.xlu0 %v11161_v44 }
 0xc44   : > { %v11158_v49 = vpop.xlane.xlu1 %11157 }
 0xc45   : > { %v11164_v10 = vmul.f32 0.001953125, %v11158_v49 }
 0xc46   : > { %v11163_v13 = vpop.xlane.xlu0 %11162 }
 0xc47   : > { %v11166_v4 = vsub.f32 %v11144_v41, %v11164_v10  ;;  %v11167_v62 = vsub.f32 %v11145_v9, %v11164_v10  ;;  %v11165_v25 = vmul.f32 0.001953125, %v11163_v13  ;;  %v11168_v15 = vsub.f32 %v11146_v14, %v11164_v10 }
 0xc48   : > { %v11169_v46 = vsub.f32 %v11147_v5, %v11164_v10  ;;  %v11239_v41 = vrot.slane %v11153_v60, %v14259_v37 }
 0xc49   : > { %v11170_v51 = vsub.f32 %v11148_v53, %v11165_v25  ;;  %v11171_v12 = vsub.f32 %v11149_v16, %v11165_v25  ;;  %v11174_v57 = vmul.f32 %v11166_v4, %v11166_v4  ;;  %v11175_v20 = vmul.f32 %v11167_v62, %v11167_v62 }
 0xc4a   : > { %v11176_v42 = vmul.f32 %v11168_v15, %v11168_v15  ;;  %v11172_v58 = vsub.f32 %v11150_v30, %v11165_v25  ;;  %v11173_v59 = vsub.f32 %v11151_v32, %v11165_v25  ;;  %v11177_v23 = vmul.f32 %v11169_v46, %v11169_v46 }
 0xc4b   : > { %v11182_v56 = vadd.f32 %v11175_v20, %v11174_v57  ;;  %v11178_v7 = vmul.f32 %v11170_v51, %v11170_v51  ;;  %v11179_v45 = vmul.f32 %v11171_v12, %v11171_v12 }
 0xc4c   : > { %v11180_v55 = vmul.f32 %v11172_v58, %v11172_v58  ;;  %v11181_v38 = vmul.f32 %v11173_v59, %v11173_v59 }
 0xc4d   : > { %v11183_v1 = vadd.f32 %v11182_v56, %v11176_v42  ;;  %v11187_v61 = vadd.f32 %v11179_v45, %v11178_v7 }
 0xc4f   : > { %v11184_v52 = vadd.f32 %v11183_v1, %v11177_v23  ;;  %v11188_v18 = vadd.f32 %v11187_v61, %v11180_v55 }
 0xc51   : > { %11185 = vadd.xlane.f32.xlu1 %v11184_v52  ;;  %v11189_v21 = vadd.f32 %v11188_v18, %v11181_v38 }
 0xc53   : > { %11190 = vadd.xlane.f32.xlu0 %v11189_v21 }
 0xcde   : > { %v11186_v22 = vpop.xlane.xlu1 %11185 }
 0xcdf   : > { %v11192_v8 = vmul.f32 0.001953125, %v11186_v22 }
 0xce0   : > { %v11191_v2 = vpop.xlane.xlu0 %11190 }
 0xce1   : > { %v11194_v3 = vadd.f32 1e-05, %v11192_v8  ;;  %v11193_v19 = vmul.f32 0.001953125, %v11191_v2 }
 0xce3   : > { %13741 = vrsqrt.f32 %v11194_v3  ;;  %v11195_v43 = vadd.f32 1e-05, %v11193_v19 }
 0xce5   : > { %13743 = vrsqrt.f32 %v11195_v43 }
 0xced   : > { %v13742_v28 = vpop.eup %13741 }
 0xcee   : > { %v11198_v9 = vmul.f32 %v13742_v28, %v11166_v4  ;;  %v11199_v29 = vmul.f32 %v13742_v28, %v11167_v62  ;;  %v11200_v34 = vmul.f32 %v13742_v28, %v11168_v15  ;;  %v11201_v31 = vmul.f32 %v13742_v28, %v11169_v46 }
 0xcef   : > { %v13744_v53 = vpop.eup %13743 }
 0xcf0   : > { %v11227_v14 = vmul.f32 %v11210_v36, %v11198_v9  ;;  %v11228_v26 = vmul.f32 %v11214_v17, %v11199_v29  ;;  %v11229_v16 = vmul.f32 %v11218_v63, %v11200_v34  ;;  %v11230_v54 = vmul.f32 %v11222_v40, %v11201_v31 }
 0xcf1   : > { %v11202_v37 = vmul.f32 %v13744_v53, %v11170_v51  ;;  %v11203_v39 = vmul.f32 %v13744_v53, %v11171_v12  ;;  %v11204_v5 = vmul.f32 %v13744_v53, %v11172_v58  ;;  %v11205_v48 = vmul.f32 %v13744_v53, %v11173_v59 }
 0xcf2   : > { %v11256_v30 = vadd.f32 %v11239_v41, %v11227_v14  ;;  %v11257_v0 = vadd.f32 %v11243_v6, %v11228_v26  ;;  %v11258_v24 = vadd.f32 %v11247_v11, %v11229_v16  ;;  %v11259_v27 = vadd.f32 %v11251_v35, %v11230_v54 }
 0xcf3   : > { %v11231_v32 = vmul.f32 %v11210_v36, %v11202_v37  ;;  %v11232_v33 = vmul.f32 %v11214_v17, %v11203_v39  ;;  %v11233_v50 = vmul.f32 %v11218_v63, %v11204_v5  ;;  %v11234_v44 = vmul.f32 %v11222_v40, %v11205_v48 }
 0xcf4   : > { %11264 = vst [vmem:[%s621_s17] sm:$0xff] %v11256_v30  ;;  %11265 = vst [vmem:[%s621_s17 + $0x8] sm:$0xff] %v11257_v0 }
 0xcf5   : > { %11266 = vst [vmem:[%s621_s17 + $0x10] sm:$0xff] %v11258_v24  ;;  %11267 = vst [vmem:[%s621_s17 + $0x18] sm:$0xff] %v11259_v27  ;;  %v11260_v49 = vadd.f32 %v11239_v41, %v11231_v32  ;;  %v11261_v10 = vadd.f32 %v11243_v6, %v11232_v33  ;;  %v11262_v13 = vadd.f32 %v11247_v11, %v11233_v50 }
 0xcf6   : > { %v11263_v4 = vadd.f32 %v11251_v35, %v11234_v44 }
 0xcf7   : > { %11268 = vst [vmem:[%s621_s17 + $0x20] sm:$0xff] %v11260_v49  ;;  %11269 = vst [vmem:[%s621_s17 + $0x28] sm:$0xff] %v11261_v10 }
 0xcf8   : > { %11270 = vst [vmem:[%s621_s17 + $0x30] sm:$0xff] %v11262_v13  ;;  %11271 = vst [vmem:[%s621_s17 + $0x38] sm:$0xff] %v11263_v4 }
 0xcf9 PF: > { %s15082_s25 = sld [smem:[#allocation14_spill]] }
 0xcff   : > { %s29_s21 = sadd.s32 1, %s15082_s25  }
 0xd00   : > { %p26_p8 = scmp.ge.s32.totalorder %s29_s21, 4  }
 0xd02   :  { %28 = sbr.rel (!%p26_p8) target bundleno = 8 (0x8), region = 138 }
 0xd09   :  { %11293 = vsyncpa [#allocation4], 1 }
 0xd0a   :  { %11295 = vsyncpa [#allocation4 + $0x1], 1 }
 0xd0b   :  { %11296 = vsyncpa [#allocation6], 1 }
 0xd0c   :  { %11297 = vsyncpa [#allocation9], 1 }

</bundles_post_ra>
